<compile_context>
chip_gen: v7x
topology: tpu7x:2x2x1
jax: 0.10.0
libtpu: 0.0.40
codegen_flags: <defaults>
</compile_context>

<pallas_src>
import functools

import numpy as np
import jax
import jax.numpy as jnp
from jax.experimental import pallas as pl
from jax.experimental.pallas import tpu as pltpu

_EPS = 1e-5                      # PyTorch BatchNorm default eps
_CDTYPE = jnp.bfloat16           # MXU input dtype (f32 accumulation)
_ADTYPE = jnp.bfloat16           # inter-layer activation dtype
_VMEM_LIMIT = 48 * 1024 * 1024   # explicit scoped-VMEM cap (safe on v5e/v6e/v7x)
_LANE_TILE_TARGET = 2048         # target lane-tile when the lane axis is huge

_DILATIONS = (1, 3, 4)
_KT = 3                          # temporal kernel size
_PMAX = max(_DILATIONS)          # max temporal padding among branches


# ----------------------------------------------------------------------------
# Pallas kernels
# ----------------------------------------------------------------------------

def _mm_kernel(x_ref, w_ref, *rest, has_scale, has_bias, relu_mode):
    """o[0] = epilogue(W @ x[0]); epilogue = [*scale] [+bias] [relu|masked relu]."""
    o_ref = rest[-1]
    extras = rest[:-1]
    y = jnp.dot(w_ref[...], x_ref[0], preferred_element_type=jnp.float32)
    i = 0
    if has_scale:
        y = y * extras[i][...]
        i += 1
    if has_bias:
        y = y + extras[i][...]
        i += 1
    if relu_mode == "all":
        y = jnp.maximum(y, 0.0)
    elif relu_mode == "mask":
        y = jnp.where(extras[i][...] > 0, jnp.maximum(y, 0.0), y)
    o_ref[0] = y.astype(o_ref.dtype)


def _tcn_stage2_kernel(hp_ref, h1_ref, res_ref, wt_ref, bt_ref, o_ref,
                       *, bc, taps, TV):
    """Temporal taps + branch concat + residual add + ReLU, fused.

    hp_ref : (1, 4*bc, Tp*V)  time-padded, relu'd branch activations (bf16)
    h1_ref : (1, bc,  T*V)    1x1 branch (already BN'd, no relu)
    res_ref: (1, cout, T*V)   residual
    wt_ref : (4, K, bc, bc)   per-branch, per-tap effective weights (BN folded)
    bt_ref : (cout, 1)        per-channel bias (zeros for the 1x1 slice)
    """
    parts = []
    for j, offs in enumerate(taps):                 # 3 dilation branches + pool
        acc = jnp.zeros((bc, TV), jnp.float32)
        for k, off in enumerate(offs):
            xk = hp_ref[0, j * bc:(j + 1) * bc, off:off + TV]
            acc = acc + jnp.dot(wt_ref[j, k], xk,
                                preferred_element_type=jnp.float32)
        parts.append(acc)
    parts.append(h1_ref[0].astype(jnp.float32))     # plain 1x1 branch
    y = jnp.concatenate(parts, axis=0)              # (cout, TV)
    y = y + bt_ref[...] + res_ref[0].astype(jnp.float32)
    o_ref[0] = jnp.maximum(y, 0.0).astype(o_ref.dtype)


# ----------------------------------------------------------------------------
# pallas_call wrappers
# ----------------------------------------------------------------------------

def _pick_lane_tile(L):
    """Largest 128-multiple divisor of L <= target; otherwise full extent."""
    if L % 128 == 0 and L > _LANE_TILE_TARGET:
        for cand in range(_LANE_TILE_TARGET, 127, -128):
            if L % cand == 0:
                return cand
    return L


def _pallas_mm(x, w, scale=None, bias=None, relu_mask=None, relu=False,
               out_dtype=_ADTYPE):
    """Per-sample fused matmul: out[n] = epilogue(W @ x[n])."""
    N, Cin, L = x.shape
    Cout = w.shape[0]
    tile = _pick_lane_tile(L)
    grid = (N, L // tile)

    operands = [x, w]
    in_specs = [
        pl.BlockSpec((1, Cin, tile), lambda n, m: (n, 0, m)),
        pl.BlockSpec((Cout, Cin), lambda n, m: (0, 0)),
    ]
    for extra in (scale, bias, relu_mask):
        if extra is not None:
            operands.append(extra)
            in_specs.append(pl.BlockSpec((Cout, 1), lambda n, m: (0, 0)))

    relu_mode = "mask" if relu_mask is not None else ("all" if relu else "none")
    kernel = functools.partial(_mm_kernel,
                               has_scale=scale is not None,
                               has_bias=bias is not None,
                               relu_mode=relu_mode)
    return pl.pallas_call(
        kernel,
        grid=grid,
        in_specs=in_specs,
        out_specs=pl.BlockSpec((1, Cout, tile), lambda n, m: (n, 0, m)),
        out_shape=jax.ShapeDtypeStruct((N, Cout, L), out_dtype),
        compiler_params=pltpu.CompilerParams(
            dimension_semantics=("parallel", "parallel"),
            vmem_limit_bytes=_VMEM_LIMIT),
    )(*operands)


def _pallas_tcn_stage2(hp, h1, res, wt, bt, *, bc, taps, TV, out_dtype=_ADTYPE):
    N = hp.shape[0]
    TpV = hp.shape[2]
    cout = 5 * bc
    kernel = functools.partial(_tcn_stage2_kernel, bc=bc, taps=taps, TV=TV)
    return pl.pallas_call(
        kernel,
        grid=(N,),
        in_specs=[
            pl.BlockSpec((1, 4 * bc, TpV), lambda n: (n, 0, 0)),
            pl.BlockSpec((1, bc, TV), lambda n: (n, 0, 0)),
            pl.BlockSpec((1, cout, TV), lambda n: (n, 0, 0)),
            pl.BlockSpec((4, _KT, bc, bc), lambda n: (0, 0, 0, 0)),
            pl.BlockSpec((cout, 1), lambda n: (0, 0)),
        ],
        out_specs=pl.BlockSpec((1, cout, TV), lambda n: (n, 0, 0)),
        out_shape=jax.ShapeDtypeStruct((N, cout, TV), out_dtype),
        compiler_params=pltpu.CompilerParams(
            dimension_semantics=("parallel",),
            vmem_limit_bytes=_VMEM_LIMIT),
    )(hp, h1, res, wt, bt)


# ----------------------------------------------------------------------------
# Graph construction (numpy, identical to the reference code)
# ----------------------------------------------------------------------------

def k_adjacency(A, k, with_self=False, self_factor=1):
    I = np.eye(len(A), dtype=A.dtype)
    if k == 0:
        return I
    Ak = np.minimum(np.linalg.matrix_power(A + I, k), 1) \
        - np.minimum(np.linalg.matrix_power(A + I, k - 1), 1)
    if with_self:
        Ak += self_factor * I
    return Ak


def normalize_adjacency_matrix(A):
    node_degrees = A.sum(-1)
    degs_inv_sqrt = np.power(node_degrees, -0.5)
    norm_degs_matrix = np.eye(len(node_degrees)) * degs_inv_sqrt
    return (norm_degs_matrix @ A @ norm_degs_matrix).astype(np.float32)


# ----------------------------------------------------------------------------
# BN folding and module forwards
# ----------------------------------------------------------------------------

def _bn_fold(bn):
    s = bn["gamma"] / jnp.sqrt(bn["var"] + _EPS)
    b = bn["beta"] - bn["mean"] * s
    return s, b


def ms_gcn_forward(p, x, num_scales, data_bn=None):
    """MS_GCN: adjacency einsum + permute + 1x1 MLP folded into one matmul."""
    N, C, T, V = x.shape
    A = (p["A_powers"] + p["A_res"]).reshape(num_scales, V, V)     # A[s, v, u]
    W = p["mlp_w"]                                                 # (Cout, S*C)
    Cout = W.shape[0]
    Wm = W.reshape(Cout, num_scales, C)
    # Wfold[(co,v),(c,u)] = sum_s Wm[co,s,c] * A[s,v,u]
    Wfold = jnp.einsum("osc,svu->ovcu", Wm, A).reshape(Cout * V, C * V)

    g, be = _bn_fold(p["mlp_bn"])                                  # (Cout,)
    scale = jnp.repeat(g, V)[:, None]                              # per (co,v) row
    bias = jnp.repeat(be, V)[:, None]

    if data_bn is not None:
        # data_bn channel index is v*C + c -> reorder to (c,u) order c*V+u.
        s_db, b_db = _bn_fold(data_bn)
        sdb = s_db.reshape(V, C).T.reshape(C * V)
        bdb = b_db.reshape(V, C).T.reshape(C * V)
        bias = bias + scale * (Wfold @ bdb)[:, None]
        Wfold = Wfold * sdb[None, :]

    # x (N,C,T,V) -> (N, C*V, T) with row index c*V+u
    x2 = jnp.transpose(x, (0, 1, 3, 2)).reshape(N, C * V, T)
    y = _pallas_mm(x2.astype(_CDTYPE), Wfold.astype(_CDTYPE),
                   scale, bias, relu=True, out_dtype=_ADTYPE)
    # rows of y are (co*V + v)
    return jnp.transpose(y.reshape(N, Cout, V, T), (0, 1, 3, 2))   # (N,Cout,T,V)


def ms_tcn_forward(p, x):
    """MS_TCN (dilations 1,3,4): 2 fused Pallas calls (entry 1x1s; temporal)."""
    N, cin, T, V = x.shape
    bc = p["branches"][0]["w1"].shape[0]
    cout = 5 * bc
    TV = T * V
    bp = p["branch_pool"]
    b1 = p["branch_1x1"]

    # ---- stage 1: fused 1x1 convs (+ optional residual conv), BN folded ----
    w_rows, s_rows, b_rows, m_rows = [], [], [], []
    for br in p["branches"]:                       # 3 dilation branches
        s, b = _bn_fold(br["bn1"])
        w_rows.append(br["w1"]); s_rows.append(s); b_rows.append(b)
        m_rows.append(jnp.ones((bc,), jnp.float32))
    s, b = _bn_fold(bp["bn1"])                     # pool branch entry
    w_rows.append(bp["w1"]); s_rows.append(s); b_rows.append(b)
    m_rows.append(jnp.ones((bc,), jnp.float32))
    s, b = _bn_fold(b1["bn1"])                     # plain 1x1 branch (no relu)
    w_rows.append(b1["w1"]); s_rows.append(s); b_rows.append(b)
    m_rows.append(jnp.zeros((bc,), jnp.float32))
    has_res_conv = p["residual"] is not None
    if has_res_conv:                               # residual 1x1 + BN (no relu)
        r = p["residual"]
        s, b = _bn_fold(r["bn"])
        w_rows.append(r["w"]); s_rows.append(s); b_rows.append(b)
        m_rows.append(jnp.zeros((cout,), jnp.float32))

    Wc = jnp.concatenate(w_rows, axis=0)
    sc = jnp.concatenate(s_rows)[:, None]
    bcv = jnp.concatenate(b_rows)[:, None]
    mk = jnp.concatenate(m_rows)[:, None]

    x3 = x.reshape(N, cin, TV)
    h = _pallas_mm(x3, Wc.astype(_CDTYPE), sc, bcv, relu_mask=mk,
                   out_dtype=_ADTYPE)              # (N, R, TV)

    h4 = h[:, :4 * bc, :].reshape(N, 4 * bc, T, V)
    h4p = jnp.pad(h4, ((0, 0), (0, 0), (_PMAX, _PMAX), (0, 0)))
    h4p = h4p.reshape(N, 4 * bc, (T + 2 * _PMAX) * V)
    h1 = h[:, 4 * bc:5 * bc, :]
    res = h[:, 5 * bc:, :] if has_res_conv else x3

    # ---- stage 2: per-tap effective weights (BN2 folded), fused epilogue ----
    wt_list, bt_list = [], []
    for br in p["branches"]:
        s, b = _bn_fold(br["bn2"])
        wt_list.append(br["tw"].transpose(2, 0, 1) * s[None, :, None])  # (K,bc,bc)
        bt_list.append(b)
    s, b = _bn_fold(bp["bn2"])                     # avgpool (/3) + BN2 as taps
    eye = jnp.eye(bc, dtype=jnp.float32)
    wt_list.append(jnp.stack([eye * (s / 3.0)[:, None]] * _KT))
    bt_list.append(b)
    wt = jnp.stack(wt_list)                                            # (4,K,bc,bc)
    bt = jnp.concatenate(bt_list + [jnp.zeros((bc,), jnp.float32)])[:, None]

    dils = _DILATIONS + (1,)                       # pool acts like dilation 1
    pads = _DILATIONS + (1,)                       # pad = dilation for K=3
    taps = tuple(tuple((_PMAX - pd + k * d) * V for k in range(_KT))
                 for d, pd in zip(dils, pads))

    out = _pallas_tcn_stage2(h4p, h1, res.astype(_ADTYPE),
                             wt.astype(_CDTYPE), bt,
                             bc=bc, taps=taps, TV=TV, out_dtype=_ADTYPE)
    return out.reshape(N, cout, T, V)


@functools.partial(jax.jit, static_argnames=("num_keypoints", "channels",
                                             "num_scales"))
def msg3d_forward(params, x, *, num_keypoints, channels, num_scales):
    # x: (N, T_seq, num_keypoints * channels_per_keypoint)
    N, Tseq, _ = x.shape
    V = num_keypoints
    C = channels
    x = x.reshape(N, Tseq, V, C).transpose(0, 3, 1, 2)        # (N, C, T, V)
    x = x.astype(_ADTYPE)

    for bi, (blk_name, tcn_name) in enumerate((("sgcn1", "tcn1"),
                                               ("sgcn2", "tcn2"),
                                               ("sgcn3", "tcn3"))):
        blk = params[blk_name]
        # data_bn (BatchNorm1d) is folded into the first GCN's weight/bias.
        x = ms_gcn_forward(blk["gcn"], x, num_scales,
                           data_bn=params["data_bn"] if bi == 0 else None)
        x = ms_tcn_forward(blk["tcn_a"], x)
        x = ms_tcn_forward(blk["tcn_b"], x)   # Identity act + outer F.relu fused
        x = ms_tcn_forward(params[tcn_name], x)

    # head: out.permute(0,2,1,3).view(B,T,C*V) @ fc.w^T + fc.b  (per-sample MM)
    N, C3, T, V = x.shape
    xf = jnp.transpose(x, (0, 1, 3, 2)).reshape(N, C3 * V, T)   # rows = c*V + v
    w = params["fc"]["w"]
    b = params["fc"]["b"][:, None]
    y = _pallas_mm(xf, w.astype(_CDTYPE), None, b, relu=False,
                   out_dtype=jnp.float32)                       # (N, H, T)
    return jnp.transpose(y, (0, 2, 1))                          # (N, T, H)


# ----------------------------------------------------------------------------
# Deterministic parameter initialization (shapes match the PyTorch module)
# ----------------------------------------------------------------------------

def init_msg3d_params(key, num_keypoints, channels, num_scales, num_hid):
    c1, c2, c3 = 30, 60, 120
    V = num_keypoints
    A_binary = np.ones((V, V), dtype=np.float32)

    kit = iter(jax.random.split(key, 1024))
    nk = lambda: next(kit)

    def conv_w(cout, cin):
        return jax.random.normal(nk(), (cout, cin), jnp.float32) / np.sqrt(cin)

    def tconv_w(cout, cin, K=3):
        return jax.random.normal(nk(), (cout, cin, K), jnp.float32) / np.sqrt(cin * K)

    def bn(c):
        return dict(
            gamma=1.0 + 0.05 * jax.random.normal(nk(), (c,), jnp.float32),
            beta=0.05 * jax.random.normal(nk(), (c,), jnp.float32),
            mean=jnp.zeros((c,), jnp.float32),
            var=jnp.ones((c,), jnp.float32),
        )

    def ms_gcn(cin, cout):
        A_powers = np.concatenate(
            [normalize_adjacency_matrix(k_adjacency(A_binary, k, with_self=True))
             for k in range(num_scales)])
        return dict(
            A_powers=jnp.asarray(A_powers, jnp.float32),
            A_res=jax.random.uniform(nk(), A_powers.shape, jnp.float32, -1e-6, 1e-6),
            mlp_w=conv_w(cout, cin * num_scales),
            mlp_bn=bn(cout),
        )

    def ms_tcn(cin, cout, dilations=_DILATIONS):
        bc = cout // (len(dilations) + 2)
        branches = [dict(w1=conv_w(bc, cin), bn1=bn(bc),
                         tw=tconv_w(bc, bc, _KT), bn2=bn(bc)) for _ in dilations]
        pool = dict(w1=conv_w(bc, cin), bn1=bn(bc), bn2=bn(bc))
        b1x1 = dict(w1=conv_w(bc, cin), bn1=bn(bc))
        residual = None if cin == cout else dict(w=conv_w(cout, cin), bn=bn(cout))
        return dict(branches=branches, branch_pool=pool,
                    branch_1x1=b1x1, residual=residual)

    def sgcn(cin, cgcn, cout):
        return dict(gcn=ms_gcn(cin, cgcn),
                    tcn_a=ms_tcn(cgcn, cout),
                    tcn_b=ms_tcn(cout, cout))

    return dict(
        data_bn=bn(channels * V),
        sgcn1=sgcn(channels, c1, c1),
        tcn1=ms_tcn(c1, c1),
        sgcn2=sgcn(c1, c1, c2),
        tcn2=ms_tcn(c2, c2),
        sgcn3=sgcn(c2, c2, c3),
        tcn3=ms_tcn(c3, c3),
        fc=dict(
            w=jax.random.normal(nk(), (num_hid, c3 * V), jnp.float32) / np.sqrt(c3 * V),
            b=0.01 * jax.random.normal(nk(), (num_hid,), jnp.float32),
        ),
    )


# ----------------------------------------------------------------------------

if __name__ == "__main__":
    num_keypoints = 5
    channels_per_keypoint = 3
    num_gcn_scales = 3
    num_hid = 32
    N, Tseq = 2, 8

    key = jax.random.PRNGKey(0)
    pkey, xkey = jax.random.split(key)
    params = init_msg3d_params(pkey, num_keypoints, channels_per_keypoint,
                               num_gcn_scales, num_hid)
    x = jax.random.normal(
        xkey, (N, Tseq, num_keypoints * channels_per_keypoint), jnp.float32)

    out = msg3d_forward(params, x,
                        num_keypoints=num_keypoints,
                        channels=channels_per_keypoint,
                        num_scales=num_gcn_scales)
    out = jax.block_until_ready(out)

    assert out.shape == (N, Tseq, num_hid), out.shape
    assert bool(jnp.all(jnp.isfinite(out)))
    print("KERNEL_OK")
</pallas_src>

<mosaic_0001>
module attributes {stable_mosaic.version = 11 : i64} {
  func.func @_mm_kernel(%arg0: i32, %arg1: i32, %arg2: memref<1x15x8xbf16, #tpu.memory_space<vmem>>, %arg3: memref<150x15xbf16, #tpu.memory_space<vmem>>, %arg4: memref<150x1xf32, #tpu.memory_space<vmem>>, %arg5: memref<150x1xf32, #tpu.memory_space<vmem>>, %arg6: memref<1x150x8xbf16, #tpu.memory_space<vmem>>) attributes {dimension_semantics = [#tpu.dimension_semantics<parallel>, #tpu.dimension_semantics<parallel>], iteration_bounds = array<i64: 2, 1>, scalar_prefetch = 0 : i64, scratch_operands = 0 : i64, tpu.core_type = #tpu.core_type<tc>, window_params = [{transform_indices = @transform_0, window_bounds = array<i64: 1, 15, 8>}, {pipeline_mode = #tpu.pipeline_mode<synchronous>, transform_indices = @transform_1, window_bounds = array<i64: 150, 15>}, {pipeline_mode = #tpu.pipeline_mode<synchronous>, transform_indices = @transform_2, window_bounds = array<i64: 150, 1>}, {pipeline_mode = #tpu.pipeline_mode<synchronous>, transform_indices = @transform_3, window_bounds = array<i64: 150, 1>}, {transform_indices = @transform_4, window_bounds = array<i64: 1, 150, 8>}]} {
    %c0 = arith.constant 0 : index
    %c0_0 = arith.constant 0 : index
    %0 = vector.load %arg3[%c0, %c0_0] : memref<150x15xbf16, #tpu.memory_space<vmem>>, vector<150x15xbf16>
    %c0_1 = arith.constant 0 : index
    %c0_2 = arith.constant 0 : index
    %c0_3 = arith.constant 0 : index
    %1 = vector.load %arg2[%c0_1, %c0_2, %c0_3] : memref<1x15x8xbf16, #tpu.memory_space<vmem>>, vector<1x15x8xbf16>
    %2 = vector.shape_cast %1 : vector<1x15x8xbf16> to vector<15x8xbf16>
    %cst = arith.constant dense<0.000000e+00> : vector<150x8xf32>
    %3 = tpu.matmul %0, %2, %cst {dimension_numbers = #tpu.dot_dimension_numbers<[1], [0], [0], [1], [0, 0, 1, 1], [], []>} : vector<150x15xbf16>, vector<15x8xbf16>, vector<150x8xf32> -> vector<150x8xf32>
    %c0_4 = arith.constant 0 : index
    %c0_5 = arith.constant 0 : index
    %4 = vector.load %arg4[%c0_4, %c0_5] : memref<150x1xf32, #tpu.memory_space<vmem>>, vector<150x1xf32>
    %5 = vector.broadcast %4 : vector<150x1xf32> to vector<150x8xf32>
    %6 = arith.mulf %3, %5 : vector<150x8xf32>
    %c0_6 = arith.constant 0 : index
    %c0_7 = arith.constant 0 : index
    %7 = vector.load %arg5[%c0_6, %c0_7] : memref<150x1xf32, #tpu.memory_space<vmem>>, vector<150x1xf32>
    %8 = vector.broadcast %7 : vector<150x1xf32> to vector<150x8xf32>
    %9 = arith.addf %6, %8 : vector<150x8xf32>
    %cst_8 = arith.constant 0.000000e+00 : f32
    %10 = vector.broadcast %cst_8 : f32 to vector<150x8xf32>
    %11 = arith.maximumf %9, %10 : vector<150x8xf32>
    %12 = arith.truncf %11 : vector<150x8xf32> to vector<150x8xbf16>
    %c0_9 = arith.constant 0 : index
    %c0_10 = arith.constant 0 : index
    %c0_11 = arith.constant 0 : index
    %13 = vector.load %arg6[%c0_9, %c0_10, %c0_11] : memref<1x150x8xbf16, #tpu.memory_space<vmem>>, vector<1x150x8xbf16>
    %14 = vector.shape_cast %13 : vector<1x150x8xbf16> to vector<150x8xbf16>
    %15 = vector.shape_cast %12 : vector<150x8xbf16> to vector<1x150x8xbf16>
    tpu.vector_store %arg6[%c0_9, %c0_10, %c0_11], %15 {strides = array<i32>} : memref<1x150x8xbf16, #tpu.memory_space<vmem>>, vector<1x150x8xbf16>,
    return
  }
  func.func @transform_0(%arg0: i32, %arg1: i32) -> (i32, i32, i32) {
    %c0_i32 = arith.constant 0 : i32
    %c0_i32_0 = arith.constant 0 : i32
    return %arg0, %c0_i32, %arg1 : i32, i32, i32
  }
  func.func @transform_1(%arg0: i32, %arg1: i32) -> (i32, i32) {
    %c0_i32 = arith.constant 0 : i32
    %c0_i32_0 = arith.constant 0 : i32
    %c0_i32_1 = arith.constant 0 : i32
    return %c0_i32, %c0_i32_0 : i32, i32
  }
  func.func @transform_2(%arg0: i32, %arg1: i32) -> (i32, i32) {
    %c0_i32 = arith.constant 0 : i32
    %c0_i32_0 = arith.constant 0 : i32
    %c0_i32_1 = arith.constant 0 : i32
    return %c0_i32, %c0_i32_0 : i32, i32
  }
  func.func @transform_3(%arg0: i32, %arg1: i32) -> (i32, i32) {
    %c0_i32 = arith.constant 0 : i32
    %c0_i32_0 = arith.constant 0 : i32
    %c0_i32_1 = arith.constant 0 : i32
    return %c0_i32, %c0_i32_0 : i32, i32
  }
  func.func @transform_4(%arg0: i32, %arg1: i32) -> (i32, i32, i32) {
    %c0_i32 = arith.constant 0 : i32
    %c0_i32_0 = arith.constant 0 : i32
    return %arg0, %c0_i32, %arg1 : i32, i32, i32
  }
}

module attributes {stable_mosaic.version = 11 : i64} {
  func.func @_mm_kernel(%arg0: i32, %arg1: i32, %arg2: memref<1x30x40xbf16, #tpu.memory_space<vmem>>, %arg3: memref<30x30xbf16, #tpu.memory_space<vmem>>, %arg4: memref<30x1xf32, #tpu.memory_space<vmem>>, %arg5: memref<30x1xf32, #tpu.memory_space<vmem>>, %arg6: memref<30x1xf32, #tpu.memory_space<vmem>>, %arg7: memref<1x30x40xbf16, #tpu.memory_space<vmem>>) attributes {dimension_semantics = [#tpu.dimension_semantics<parallel>, #tpu.dimension_semantics<parallel>], iteration_bounds = array<i64: 2, 1>, scalar_prefetch = 0 : i64, scratch_operands = 0 : i64, tpu.core_type = #tpu.core_type<tc>, window_params = [{transform_indices = @transform_0, window_bounds = array<i64: 1, 30, 40>}, {pipeline_mode = #tpu.pipeline_mode<synchronous>, transform_indices = @transform_1, window_bounds = array<i64: 30, 30>}, {pipeline_mode = #tpu.pipeline_mode<synchronous>, transform_indices = @transform_2, window_bounds = array<i64: 30, 1>}, {pipeline_mode = #tpu.pipeline_mode<synchronous>, transform_indices = @transform_3, window_bounds = array<i64: 30, 1>}, {pipeline_mode = #tpu.pipeline_mode<synchronous>, transform_indices = @transform_4, window_bounds = array<i64: 30, 1>}, {transform_indices = @transform_5, window_bounds = array<i64: 1, 30, 40>}]} {
    %c0 = arith.constant 0 : index
    %c0_0 = arith.constant 0 : index
    %0 = vector.load %arg3[%c0, %c0_0] : memref<30x30xbf16, #tpu.memory_space<vmem>>, vector<30x30xbf16>
    %c0_1 = arith.constant 0 : index
    %c0_2 = arith.constant 0 : index
    %c0_3 = arith.constant 0 : index
    %1 = vector.load %arg2[%c0_1, %c0_2, %c0_3] : memref<1x30x40xbf16, #tpu.memory_space<vmem>>, vector<1x30x40xbf16>
    %2 = vector.shape_cast %1 : vector<1x30x40xbf16> to vector<30x40xbf16>
    %cst = arith.constant dense<0.000000e+00> : vector<30x40xf32>
    %3 = tpu.matmul %0, %2, %cst {dimension_numbers = #tpu.dot_dimension_numbers<[1], [0], [0], [1], [0, 0, 1, 1], [], []>} : vector<30x30xbf16>, vector<30x40xbf16>, vector<30x40xf32> -> vector<30x40xf32>
    %c0_4 = arith.constant 0 : index
    %c0_5 = arith.constant 0 : index
    %4 = vector.load %arg4[%c0_4, %c0_5] : memref<30x1xf32, #tpu.memory_space<vmem>>, vector<30x1xf32>
    %5 = vector.broadcast %4 : vector<30x1xf32> to vector<30x40xf32>
    %6 = arith.mulf %3, %5 : vector<30x40xf32>
    %c0_6 = arith.constant 0 : index
    %c0_7 = arith.constant 0 : index
    %7 = vector.load %arg5[%c0_6, %c0_7] : memref<30x1xf32, #tpu.memory_space<vmem>>, vector<30x1xf32>
    %8 = vector.broadcast %7 : vector<30x1xf32> to vector<30x40xf32>
    %9 = arith.addf %6, %8 : vector<30x40xf32>
    %c0_8 = arith.constant 0 : index
    %c0_9 = arith.constant 0 : index
    %10 = vector.load %arg6[%c0_8, %c0_9] : memref<30x1xf32, #tpu.memory_space<vmem>>, vector<30x1xf32>
    %cst_10 = arith.constant 0.000000e+00 : f32
    %11 = vector.broadcast %cst_10 : f32 to vector<30x1xf32>
    %12 = arith.cmpf ogt, %10, %11 : vector<30x1xf32>
    %cst_11 = arith.constant 0.000000e+00 : f32
    %13 = vector.broadcast %cst_11 : f32 to vector<30x40xf32>
    %14 = arith.maximumf %9, %13 : vector<30x40xf32>
    %15 = vector.shape_cast %12 : vector<30x1xi1> to vector<30x1xi1>
    %16 = vector.broadcast %15 : vector<30x1xi1> to vector<30x40xi1>
    %17 = arith.select %16, %14, %9 : vector<30x40xi1>, vector<30x40xf32>
    %18 = arith.truncf %17 : vector<30x40xf32> to vector<30x40xbf16>
    %c0_12 = arith.constant 0 : index
    %c0_13 = arith.constant 0 : index
    %c0_14 = arith.constant 0 : index
    %19 = vector.load %arg7[%c0_12, %c0_13, %c0_14] : memref<1x30x40xbf16, #tpu.memory_space<vmem>>, vector<1x30x40xbf16>
    %20 = vector.shape_cast %19 : vector<1x30x40xbf16> to vector<30x40xbf16>
    %21 = vector.shape_cast %18 : vector<30x40xbf16> to vector<1x30x40xbf16>
    tpu.vector_store %arg7[%c0_12, %c0_13, %c0_14], %21 {strides = array<i32>} : memref<1x30x40xbf16, #tpu.memory_space<vmem>>, vector<1x30x40xbf16>,
    return
  }
  func.func @transform_0(%arg0: i32, %arg1: i32) -> (i32, i32, i32) {
    %c0_i32 = arith.constant 0 : i32
    %c0_i32_0 = arith.constant 0 : i32
    return %arg0, %c0_i32, %arg1 : i32, i32, i32
  }
  func.func @transform_1(%arg0: i32, %arg1: i32) -> (i32, i32) {
    %c0_i32 = arith.constant 0 : i32
    %c0_i32_0 = arith.constant 0 : i32
    %c0_i32_1 = arith.constant 0 : i32
    return %c0_i32, %c0_i32_0 : i32, i32
  }
  func.func @transform_2(%arg0: i32, %arg1: i32) -> (i32, i32) {
    %c0_i32 = arith.constant 0 : i32
    %c0_i32_0 = arith.constant 0 : i32
    %c0_i32_1 = arith.constant 0 : i32
    return %c0_i32, %c0_i32_0 : i32, i32
  }
  func.func @transform_3(%arg0: i32, %arg1: i32) -> (i32, i32) {
    %c0_i32 = arith.constant 0 : i32
    %c0_i32_0 = arith.constant 0 : i32
    %c0_i32_1 = arith.constant 0 : i32
    return %c0_i32, %c0_i32_0 : i32, i32
  }
  func.func @transform_4(%arg0: i32, %arg1: i32) -> (i32, i32) {
    %c0_i32 = arith.constant 0 : i32
    %c0_i32_0 = arith.constant 0 : i32
    %c0_i32_1 = arith.constant 0 : i32
    return %c0_i32, %c0_i32_0 : i32, i32
  }
  func.func @transform_5(%arg0: i32, %arg1: i32) -> (i32, i32, i32) {
    %c0_i32 = arith.constant 0 : i32
    %c0_i32_0 = arith.constant 0 : i32
    return %arg0, %c0_i32, %arg1 : i32, i32, i32
  }
}

module attributes {stable_mosaic.version = 11 : i64} {
  func.func @_tcn_stage2_kernel(%arg0: i32, %arg1: memref<1x24x80xbf16, #tpu.memory_space<vmem>>, %arg2: memref<1x6x40xbf16, #tpu.memory_space<vmem>>, %arg3: memref<1x30x40xbf16, #tpu.memory_space<vmem>>, %arg4: memref<4x3x6x6xbf16, #tpu.memory_space<vmem>>, %arg5: memref<30x1xf32, #tpu.memory_space<vmem>>, %arg6: memref<1x30x40xbf16, #tpu.memory_space<vmem>>) attributes {dimension_semantics = [#tpu.dimension_semantics<parallel>], iteration_bounds = array<i64: 2>, scalar_prefetch = 0 : i64, scratch_operands = 0 : i64, tpu.core_type = #tpu.core_type<tc>, window_params = [{transform_indices = @transform_0, window_bounds = array<i64: 1, 24, 80>}, {transform_indices = @transform_1, window_bounds = array<i64: 1, 6, 40>}, {transform_indices = @transform_2, window_bounds = array<i64: 1, 30, 40>}, {pipeline_mode = #tpu.pipeline_mode<synchronous>, transform_indices = @transform_3, window_bounds = array<i64: 4, 3, 6, 6>}, {pipeline_mode = #tpu.pipeline_mode<synchronous>, transform_indices = @transform_4, window_bounds = array<i64: 30, 1>}, {transform_indices = @transform_5, window_bounds = array<i64: 1, 30, 40>}]} {
    %cst = arith.constant 0.000000e+00 : f32
    %0 = vector.broadcast %cst : f32 to vector<6x40xf32>
    %c0 = arith.constant 0 : index
    %c0_0 = arith.constant 0 : index
    %c15 = arith.constant 15 : index
    %1 = vector.load %arg1[%c0, %c0_0, %c15] : memref<1x24x80xbf16, #tpu.memory_space<vmem>>, vector<1x6x40xbf16>
    %2 = vector.shape_cast %1 : vector<1x6x40xbf16> to vector<6x40xbf16>
    %c0_1 = arith.constant 0 : index
    %c0_2 = arith.constant 0 : index
    %c0_3 = arith.constant 0 : index
    %c0_4 = arith.constant 0 : index
    %3 = vector.load %arg4[%c0_1, %c0_2, %c0_3, %c0_4] : memref<4x3x6x6xbf16, #tpu.memory_space<vmem>>, vector<1x1x6x6xbf16>
    %4 = vector.shape_cast %3 : vector<1x1x6x6xbf16> to vector<6x6xbf16>
    %cst_5 = arith.constant dense<0.000000e+00> : vector<6x40xf32>
    %5 = tpu.matmul %4, %2, %cst_5 {dimension_numbers = #tpu.dot_dimension_numbers<[1], [0], [0], [1], [0, 0, 1, 1], [], []>} : vector<6x6xbf16>, vector<6x40xbf16>, vector<6x40xf32> -> vector<6x40xf32>
    %6 = arith.addf %0, %5 : vector<6x40xf32>
    %c0_6 = arith.constant 0 : index
    %c0_7 = arith.constant 0 : index
    %c20 = arith.constant 20 : index
    %7 = vector.load %arg1[%c0_6, %c0_7, %c20] : memref<1x24x80xbf16, #tpu.memory_space<vmem>>, vector<1x6x40xbf16>
    %8 = vector.shape_cast %7 : vector<1x6x40xbf16> to vector<6x40xbf16>
    %c0_8 = arith.constant 0 : index
    %c1 = arith.constant 1 : index
    %c0_9 = arith.constant 0 : index
    %c0_10 = arith.constant 0 : index
    %9 = vector.load %arg4[%c0_8, %c1, %c0_9, %c0_10] : memref<4x3x6x6xbf16, #tpu.memory_space<vmem>>, vector<1x1x6x6xbf16>
    %10 = vector.shape_cast %9 : vector<1x1x6x6xbf16> to vector<6x6xbf16>
    %cst_11 = arith.constant dense<0.000000e+00> : vector<6x40xf32>
    %11 = tpu.matmul %10, %8, %cst_11 {dimension_numbers = #tpu.dot_dimension_numbers<[1], [0], [0], [1], [0, 0, 1, 1], [], []>} : vector<6x6xbf16>, vector<6x40xbf16>, vector<6x40xf32> -> vector<6x40xf32>
    %12 = arith.addf %6, %11 : vector<6x40xf32>
    %c0_12 = arith.constant 0 : index
    %c0_13 = arith.constant 0 : index
    %c25 = arith.constant 25 : index
    %13 = vector.load %arg1[%c0_12, %c0_13, %c25] : memref<1x24x80xbf16, #tpu.memory_space<vmem>>, vector<1x6x40xbf16>
    %14 = vector.shape_cast %13 : vector<1x6x40xbf16> to vector<6x40xbf16>
    %c0_14 = arith.constant 0 : index
    %c2 = arith.constant 2 : index
    %c0_15 = arith.constant 0 : index
    %c0_16 = arith.constant 0 : index
    %15 = vector.load %arg4[%c0_14, %c2, %c0_15, %c0_16] : memref<4x3x6x6xbf16, #tpu.memory_space<vmem>>, vector<1x1x6x6xbf16>
    %16 = vector.shape_cast %15 : vector<1x1x6x6xbf16> to vector<6x6xbf16>
    %cst_17 = arith.constant dense<0.000000e+00> : vector<6x40xf32>
    %17 = tpu.matmul %16, %14, %cst_17 {dimension_numbers = #tpu.dot_dimension_numbers<[1], [0], [0], [1], [0, 0, 1, 1], [], []>} : vector<6x6xbf16>, vector<6x40xbf16>, vector<6x40xf32> -> vector<6x40xf32>
    %18 = arith.addf %12, %17 : vector<6x40xf32>
    %cst_18 = arith.constant 0.000000e+00 : f32
    %19 = vector.broadcast %cst_18 : f32 to vector<6x40xf32>
    %c0_19 = arith.constant 0 : index
    %c6 = arith.constant 6 : index
    %c5 = arith.constant 5 : index
    %20 = vector.load %arg1[%c0_19, %c6, %c5] : memref<1x24x80xbf16, #tpu.memory_space<vmem>>, vector<1x6x40xbf16>
    %21 = vector.shape_cast %20 : vector<1x6x40xbf16> to vector<6x40xbf16>
    %c1_20 = arith.constant 1 : index
    %c0_21 = arith.constant 0 : index
    %c0_22 = arith.constant 0 : index
    %c0_23 = arith.constant 0 : index
    %22 = vector.load %arg4[%c1_20, %c0_21, %c0_22, %c0_23] : memref<4x3x6x6xbf16, #tpu.memory_space<vmem>>, vector<1x1x6x6xbf16>
    %23 = vector.shape_cast %22 : vector<1x1x6x6xbf16> to vector<6x6xbf16>
    %cst_24 = arith.constant dense<0.000000e+00> : vector<6x40xf32>
    %24 = tpu.matmul %23, %21, %cst_24 {dimension_numbers = #tpu.dot_dimension_numbers<[1], [0], [0], [1], [0, 0, 1, 1], [], []>} : vector<6x6xbf16>, vector<6x40xbf16>, vector<6x40xf32> -> vector<6x40xf32>
    %25 = arith.addf %19, %24 : vector<6x40xf32>
    %c0_25 = arith.constant 0 : index
    %c6_26 = arith.constant 6 : index
    %c20_27 = arith.constant 20 : index
    %26 = vector.load %arg1[%c0_25, %c6_26, %c20_27] : memref<1x24x80xbf16, #tpu.memory_space<vmem>>, vector<1x6x40xbf16>
    %27 = vector.shape_cast %26 : vector<1x6x40xbf16> to vector<6x40xbf16>
    %c1_28 = arith.constant 1 : index
    %c1_29 = arith.constant 1 : index
    %c0_30 = arith.constant 0 : index
    %c0_31 = arith.constant 0 : index
    %28 = vector.load %arg4[%c1_28, %c1_29, %c0_30, %c0_31] : memref<4x3x6x6xbf16, #tpu.memory_space<vmem>>, vector<1x1x6x6xbf16>
    %29 = vector.shape_cast %28 : vector<1x1x6x6xbf16> to vector<6x6xbf16>
    %cst_32 = arith.constant dense<0.000000e+00> : vector<6x40xf32>
    %30 = tpu.matmul %29, %27, %cst_32 {dimension_numbers = #tpu.dot_dimension_numbers<[1], [0], [0], [1], [0, 0, 1, 1], [], []>} : vector<6x6xbf16>, vector<6x40xbf16>, vector<6x40xf32> -> vector<6x40xf32>
    %31 = arith.addf %25, %30 : vector<6x40xf32>
    %c0_33 = arith.constant 0 : index
    %c6_34 = arith.constant 6 : index
    %c35 = arith.constant 35 : index
    %32 = vector.load %arg1[%c0_33, %c6_34, %c35] : memref<1x24x80xbf16, #tpu.memory_space<vmem>>, vector<1x6x40xbf16>
    %33 = vector.shape_cast %32 : vector<1x6x40xbf16> to vector<6x40xbf16>
    %c1_35 = arith.constant 1 : index
    %c2_36 = arith.constant 2 : index
    %c0_37 = arith.constant 0 : index
    %c0_38 = arith.constant 0 : index
    %34 = vector.load %arg4[%c1_35, %c2_36, %c0_37, %c0_38] : memref<4x3x6x6xbf16, #tpu.memory_space<vmem>>, vector<1x1x6x6xbf16>
    %35 = vector.shape_cast %34 : vector<1x1x6x6xbf16> to vector<6x6xbf16>
    %cst_39 = arith.constant dense<0.000000e+00> : vector<6x40xf32>
    %36 = tpu.matmul %35, %33, %cst_39 {dimension_numbers = #tpu.dot_dimension_numbers<[1], [0], [0], [1], [0, 0, 1, 1], [], []>} : vector<6x6xbf16>, vector<6x40xbf16>, vector<6x40xf32> -> vector<6x40xf32>
    %37 = arith.addf %31, %36 : vector<6x40xf32>
    %cst_40 = arith.constant 0.000000e+00 : f32
    %38 = vector.broadcast %cst_40 : f32 to vector<6x40xf32>
    %c0_41 = arith.constant 0 : index
    %c12 = arith.constant 12 : index
    %c0_42 = arith.constant 0 : index
    %39 = vector.load %arg1[%c0_41, %c12, %c0_42] : memref<1x24x80xbf16, #tpu.memory_space<vmem>>, vector<1x6x40xbf16>
    %40 = vector.shape_cast %39 : vector<1x6x40xbf16> to vector<6x40xbf16>
    %c2_43 = arith.constant 2 : index
    %c0_44 = arith.constant 0 : index
    %c0_45 = arith.constant 0 : index
    %c0_46 = arith.constant 0 : index
    %41 = vector.load %arg4[%c2_43, %c0_44, %c0_45, %c0_46] : memref<4x3x6x6xbf16, #tpu.memory_space<vmem>>, vector<1x1x6x6xbf16>
    %42 = vector.shape_cast %41 : vector<1x1x6x6xbf16> to vector<6x6xbf16>
    %cst_47 = arith.constant dense<0.000000e+00> : vector<6x40xf32>
    %43 = tpu.matmul %42, %40, %cst_47 {dimension_numbers = #tpu.dot_dimension_numbers<[1], [0], [0], [1], [0, 0, 1, 1], [], []>} : vector<6x6xbf16>, vector<6x40xbf16>, vector<6x40xf32> -> vector<6x40xf32>
    %44 = arith.addf %38, %43 : vector<6x40xf32>
    %c0_48 = arith.constant 0 : index
    %c12_49 = arith.constant 12 : index
    %c20_50 = arith.constant 20 : index
    %45 = vector.load %arg1[%c0_48, %c12_49, %c20_50] : memref<1x24x80xbf16, #tpu.memory_space<vmem>>, vector<1x6x40xbf16>
    %46 = vector.shape_cast %45 : vector<1x6x40xbf16> to vector<6x40xbf16>
    %c2_51 = arith.constant 2 : index
    %c1_52 = arith.constant 1 : index
    %c0_53 = arith.constant 0 : index
    %c0_54 = arith.constant 0 : index
    %47 = vector.load %arg4[%c2_51, %c1_52, %c0_53, %c0_54] : memref<4x3x6x6xbf16, #tpu.memory_space<vmem>>, vector<1x1x6x6xbf16>
    %48 = vector.shape_cast %47 : vector<1x1x6x6xbf16> to vector<6x6xbf16>
    %cst_55 = arith.constant dense<0.000000e+00> : vector<6x40xf32>
    %49 = tpu.matmul %48, %46, %cst_55 {dimension_numbers = #tpu.dot_dimension_numbers<[1], [0], [0], [1], [0, 0, 1, 1], [], []>} : vector<6x6xbf16>, vector<6x40xbf16>, vector<6x40xf32> -> vector<6x40xf32>
    %50 = arith.addf %44, %49 : vector<6x40xf32>
    %c0_56 = arith.constant 0 : index
    %c12_57 = arith.constant 12 : index
    %c40 = arith.constant 40 : index
    %51 = vector.load %arg1[%c0_56, %c12_57, %c40] : memref<1x24x80xbf16, #tpu.memory_space<vmem>>, vector<1x6x40xbf16>
    %52 = vector.shape_cast %51 : vector<1x6x40xbf16> to vector<6x40xbf16>
    %c2_58 = arith.constant 2 : index
    %c2_59 = arith.constant 2 : index
    %c0_60 = arith.constant 0 : index
    %c0_61 = arith.constant 0 : index
    %53 = vector.load %arg4[%c2_58, %c2_59, %c0_60, %c0_61] : memref<4x3x6x6xbf16, #tpu.memory_space<vmem>>, vector<1x1x6x6xbf16>
    %54 = vector.shape_cast %53 : vector<1x1x6x6xbf16> to vector<6x6xbf16>
    %cst_62 = arith.constant dense<0.000000e+00> : vector<6x40xf32>
    %55 = tpu.matmul %54, %52, %cst_62 {dimension_numbers = #tpu.dot_dimension_numbers<[1], [0], [0], [1], [0, 0, 1, 1], [], []>} : vector<6x6xbf16>, vector<6x40xbf16>, vector<6x40xf32> -> vector<6x40xf32>
    %56 = arith.addf %50, %55 : vector<6x40xf32>
    %cst_63 = arith.constant 0.000000e+00 : f32
    %57 = vector.broadcast %cst_63 : f32 to vector<6x40xf32>
    %c0_64 = arith.constant 0 : index
    %c18 = arith.constant 18 : index
    %c15_65 = arith.constant 15 : index
    %58 = vector.load %arg1[%c0_64, %c18, %c15_65] : memref<1x24x80xbf16, #tpu.memory_space<vmem>>, vector<1x6x40xbf16>
    %59 = vector.shape_cast %58 : vector<1x6x40xbf16> to vector<6x40xbf16>
    %c3 = arith.constant 3 : index
    %c0_66 = arith.constant 0 : index
    %c0_67 = arith.constant 0 : index
    %c0_68 = arith.constant 0 : index
    %60 = vector.load %arg4[%c3, %c0_66, %c0_67, %c0_68] : memref<4x3x6x6xbf16, #tpu.memory_space<vmem>>, vector<1x1x6x6xbf16>
    %61 = vector.shape_cast %60 : vector<1x1x6x6xbf16> to vector<6x6xbf16>
    %cst_69 = arith.constant dense<0.000000e+00> : vector<6x40xf32>
    %62 = tpu.matmul %61, %59, %cst_69 {dimension_numbers = #tpu.dot_dimension_numbers<[1], [0], [0], [1], [0, 0, 1, 1], [], []>} : vector<6x6xbf16>, vector<6x40xbf16>, vector<6x40xf32> -> vector<6x40xf32>
    %63 = arith.addf %57, %62 : vector<6x40xf32>
    %c0_70 = arith.constant 0 : index
    %c18_71 = arith.constant 18 : index
    %c20_72 = arith.constant 20 : index
    %64 = vector.load %arg1[%c0_70, %c18_71, %c20_72] : memref<1x24x80xbf16, #tpu.memory_space<vmem>>, vector<1x6x40xbf16>
    %65 = vector.shape_cast %64 : vector<1x6x40xbf16> to vector<6x40xbf16>
    %c3_73 = arith.constant 3 : index
    %c1_74 = arith.constant 1 : index
    %c0_75 = arith.constant 0 : index
    %c0_76 = arith.constant 0 : index
    %66 = vector.load %arg4[%c3_73, %c1_74, %c0_75, %c0_76] : memref<4x3x6x6xbf16, #tpu.memory_space<vmem>>, vector<1x1x6x6xbf16>
    %67 = vector.shape_cast %66 : vector<1x1x6x6xbf16> to vector<6x6xbf16>
    %cst_77 = arith.constant dense<0.000000e+00> : vector<6x40xf32>
    %68 = tpu.matmul %67, %65, %cst_77 {dimension_numbers = #tpu.dot_dimension_numbers<[1], [0], [0], [1], [0, 0, 1, 1], [], []>} : vector<6x6xbf16>, vector<6x40xbf16>, vector<6x40xf32> -> vector<6x40xf32>
    %69 = arith.addf %63, %68 : vector<6x40xf32>
    %c0_78 = arith.constant 0 : index
    %c18_79 = arith.constant 18 : index
    %c25_80 = arith.constant 25 : index
    %70 = vector.load %arg1[%c0_78, %c18_79, %c25_80] : memref<1x24x80xbf16, #tpu.memory_space<vmem>>, vector<1x6x40xbf16>
    %71 = vector.shape_cast %70 : vector<1x6x40xbf16> to vector<6x40xbf16>
    %c3_81 = arith.constant 3 : index
    %c2_82 = arith.constant 2 : index
    %c0_83 = arith.constant 0 : index
    %c0_84 = arith.constant 0 : index
    %72 = vector.load %arg4[%c3_81, %c2_82, %c0_83, %c0_84] : memref<4x3x6x6xbf16, #tpu.memory_space<vmem>>, vector<1x1x6x6xbf16>
    %73 = vector.shape_cast %72 : vector<1x1x6x6xbf16> to vector<6x6xbf16>
    %cst_85 = arith.constant dense<0.000000e+00> : vector<6x40xf32>
    %74 = tpu.matmul %73, %71, %cst_85 {dimension_numbers = #tpu.dot_dimension_numbers<[1], [0], [0], [1], [0, 0, 1, 1], [], []>} : vector<6x6xbf16>, vector<6x40xbf16>, vector<6x40xf32> -> vector<6x40xf32>
    %75 = arith.addf %69, %74 : vector<6x40xf32>
    %c0_86 = arith.constant 0 : index
    %c0_87 = arith.constant 0 : index
    %c0_88 = arith.constant 0 : index
    %76 = vector.load %arg2[%c0_86, %c0_87, %c0_88] : memref<1x6x40xbf16, #tpu.memory_space<vmem>>, vector<1x6x40xbf16>
    %77 = vector.shape_cast %76 : vector<1x6x40xbf16> to vector<6x40xbf16>
    %78 = arith.extf %77 : vector<6x40xbf16> to vector<6x40xf32>
    %79 = tpu.concatenate %18, %37, %56, %75, %78 in 0 : vector<6x40xf32>, vector<6x40xf32>, vector<6x40xf32>, vector<6x40xf32>, vector<6x40xf32> -> vector<30x40xf32>
    %c0_89 = arith.constant 0 : index
    %c0_90 = arith.constant 0 : index
    %80 = vector.load %arg5[%c0_89, %c0_90] : memref<30x1xf32, #tpu.memory_space<vmem>>, vector<30x1xf32>
    %81 = vector.broadcast %80 : vector<30x1xf32> to vector<30x40xf32>
    %82 = arith.addf %79, %81 : vector<30x40xf32>
    %c0_91 = arith.constant 0 : index
    %c0_92 = arith.constant 0 : index
    %c0_93 = arith.constant 0 : index
    %83 = vector.load %arg3[%c0_91, %c0_92, %c0_93] : memref<1x30x40xbf16, #tpu.memory_space<vmem>>, vector<1x30x40xbf16>
    %84 = vector.shape_cast %83 : vector<1x30x40xbf16> to vector<30x40xbf16>
    %85 = arith.extf %84 : vector<30x40xbf16> to vector<30x40xf32>
    %86 = arith.addf %82, %85 : vector<30x40xf32>
    %cst_94 = arith.constant 0.000000e+00 : f32
    %87 = vector.broadcast %cst_94 : f32 to vector<30x40xf32>
    %88 = arith.maximumf %86, %87 : vector<30x40xf32>
    %89 = arith.truncf %88 : vector<30x40xf32> to vector<30x40xbf16>
    %c0_95 = arith.constant 0 : index
    %c0_96 = arith.constant 0 : index
    %c0_97 = arith.constant 0 : index
    %90 = vector.load %arg6[%c0_95, %c0_96, %c0_97] : memref<1x30x40xbf16, #tpu.memory_space<vmem>>, vector<1x30x40xbf16>
    %91 = vector.shape_cast %90 : vector<1x30x40xbf16> to vector<30x40xbf16>
    %92 = vector.shape_cast %89 : vector<30x40xbf16> to vector<1x30x40xbf16>
    tpu.vector_store %arg6[%c0_95, %c0_96, %c0_97], %92 {strides = array<i32>} : memref<1x30x40xbf16, #tpu.memory_space<vmem>>, vector<1x30x40xbf16>,
    return
  }
  func.func @transform_0(%arg0: i32) -> (i32, i32, i32) {
    %c0_i32 = arith.constant 0 : i32
    %c0_i32_0 = arith.constant 0 : i32
    %c0_i32_1 = arith.constant 0 : i32
    return %arg0, %c0_i32, %c0_i32_0 : i32, i32, i32
  }
  func.func @transform_1(%arg0: i32) -> (i32, i32, i32) {
    %c0_i32 = arith.constant 0 : i32
    %c0_i32_0 = arith.constant 0 : i32
    %c0_i32_1 = arith.constant 0 : i32
    return %arg0, %c0_i32, %c0_i32_0 : i32, i32, i32
  }
  func.func @transform_2(%arg0: i32) -> (i32, i32, i32) {
    %c0_i32 = arith.constant 0 : i32
    %c0_i32_0 = arith.constant 0 : i32
    %c0_i32_1 = arith.constant 0 : i32
    return %arg0, %c0_i32, %c0_i32_0 : i32, i32, i32
  }
  func.func @transform_3(%arg0: i32) -> (i32, i32, i32, i32) {
    %c0_i32 = arith.constant 0 : i32
    %c0_i32_0 = arith.constant 0 : i32
    %c0_i32_1 = arith.constant 0 : i32
    %c0_i32_2 = arith.constant 0 : i32
    %c0_i32_3 = arith.constant 0 : i32
    return %c0_i32, %c0_i32_0, %c0_i32_1, %c0_i32_2 : i32, i32, i32, i32
  }
  func.func @transform_4(%arg0: i32) -> (i32, i32) {
    %c0_i32 = arith.constant 0 : i32
    %c0_i32_0 = arith.constant 0 : i32
    %c0_i32_1 = arith.constant 0 : i32
    return %c0_i32, %c0_i32_0 : i32, i32
  }
  func.func @transform_5(%arg0: i32) -> (i32, i32, i32) {
    %c0_i32 = arith.constant 0 : i32
    %c0_i32_0 = arith.constant 0 : i32
    %c0_i32_1 = arith.constant 0 : i32
    return %arg0, %c0_i32, %c0_i32_0 : i32, i32, i32
  }
}

module attributes {stable_mosaic.version = 11 : i64} {
  func.func @_mm_kernel(%arg0: i32, %arg1: i32, %arg2: memref<1x150x8xbf16, #tpu.memory_space<vmem>>, %arg3: memref<150x150xbf16, #tpu.memory_space<vmem>>, %arg4: memref<150x1xf32, #tpu.memory_space<vmem>>, %arg5: memref<150x1xf32, #tpu.memory_space<vmem>>, %arg6: memref<1x150x8xbf16, #tpu.memory_space<vmem>>) attributes {dimension_semantics = [#tpu.dimension_semantics<parallel>, #tpu.dimension_semantics<parallel>], iteration_bounds = array<i64: 2, 1>, scalar_prefetch = 0 : i64, scratch_operands = 0 : i64, tpu.core_type = #tpu.core_type<tc>, window_params = [{transform_indices = @transform_0, window_bounds = array<i64: 1, 150, 8>}, {pipeline_mode = #tpu.pipeline_mode<synchronous>, transform_indices = @transform_1, window_bounds = array<i64: 150, 150>}, {pipeline_mode = #tpu.pipeline_mode<synchronous>, transform_indices = @transform_2, window_bounds = array<i64: 150, 1>}, {pipeline_mode = #tpu.pipeline_mode<synchronous>, transform_indices = @transform_3, window_bounds = array<i64: 150, 1>}, {transform_indices = @transform_4, window_bounds = array<i64: 1, 150, 8>}]} {
    %c0 = arith.constant 0 : index
    %c0_0 = arith.constant 0 : index
    %0 = vector.load %arg3[%c0, %c0_0] : memref<150x150xbf16, #tpu.memory_space<vmem>>, vector<150x150xbf16>
    %c0_1 = arith.constant 0 : index
    %c0_2 = arith.constant 0 : index
    %c0_3 = arith.constant 0 : index
    %1 = vector.load %arg2[%c0_1, %c0_2, %c0_3] : memref<1x150x8xbf16, #tpu.memory_space<vmem>>, vector<1x150x8xbf16>
    %2 = vector.shape_cast %1 : vector<1x150x8xbf16> to vector<150x8xbf16>
    %cst = arith.constant dense<0.000000e+00> : vector<150x8xf32>
    %3 = tpu.matmul %0, %2, %cst {dimension_numbers = #tpu.dot_dimension_numbers<[1], [0], [0], [1], [0, 0, 1, 1], [], []>} : vector<150x150xbf16>, vector<150x8xbf16>, vector<150x8xf32> -> vector<150x8xf32>
    %c0_4 = arith.constant 0 : index
    %c0_5 = arith.constant 0 : index
    %4 = vector.load %arg4[%c0_4, %c0_5] : memref<150x1xf32, #tpu.memory_space<vmem>>, vector<150x1xf32>
    %5 = vector.broadcast %4 : vector<150x1xf32> to vector<150x8xf32>
    %6 = arith.mulf %3, %5 : vector<150x8xf32>
    %c0_6 = arith.constant 0 : index
    %c0_7 = arith.constant 0 : index
    %7 = vector.load %arg5[%c0_6, %c0_7] : memref<150x1xf32, #tpu.memory_space<vmem>>, vector<150x1xf32>
    %8 = vector.broadcast %7 : vector<150x1xf32> to vector<150x8xf32>
    %9 = arith.addf %6, %8 : vector<150x8xf32>
    %cst_8 = arith.constant 0.000000e+00 : f32
    %10 = vector.broadcast %cst_8 : f32 to vector<150x8xf32>
    %11 = arith.maximumf %9, %10 : vector<150x8xf32>
    %12 = arith.truncf %11 : vector<150x8xf32> to vector<150x8xbf16>
    %c0_9 = arith.constant 0 : index
    %c0_10 = arith.constant 0 : index
    %c0_11 = arith.constant 0 : index
    %13 = vector.load %arg6[%c0_9, %c0_10, %c0_11] : memref<1x150x8xbf16, #tpu.memory_space<vmem>>, vector<1x150x8xbf16>
    %14 = vector.shape_cast %13 : vector<1x150x8xbf16> to vector<150x8xbf16>
    %15 = vector.shape_cast %12 : vector<150x8xbf16> to vector<1x150x8xbf16>
    tpu.vector_store %arg6[%c0_9, %c0_10, %c0_11], %15 {strides = array<i32>} : memref<1x150x8xbf16, #tpu.memory_space<vmem>>, vector<1x150x8xbf16>,
    return
  }
  func.func @transform_0(%arg0: i32, %arg1: i32) -> (i32, i32, i32) {
    %c0_i32 = arith.constant 0 : i32
    %c0_i32_0 = arith.constant 0 : i32
    return %arg0, %c0_i32, %arg1 : i32, i32, i32
  }
  func.func @transform_1(%arg0: i32, %arg1: i32) -> (i32, i32) {
    %c0_i32 = arith.constant 0 : i32
    %c0_i32_0 = arith.constant 0 : i32
    %c0_i32_1 = arith.constant 0 : i32
    return %c0_i32, %c0_i32_0 : i32, i32
  }
  func.func @transform_2(%arg0: i32, %arg1: i32) -> (i32, i32) {
    %c0_i32 = arith.constant 0 : i32
    %c0_i32_0 = arith.constant 0 : i32
    %c0_i32_1 = arith.constant 0 : i32
    return %c0_i32, %c0_i32_0 : i32, i32
  }
  func.func @transform_3(%arg0: i32, %arg1: i32) -> (i32, i32) {
    %c0_i32 = arith.constant 0 : i32
    %c0_i32_0 = arith.constant 0 : i32
    %c0_i32_1 = arith.constant 0 : i32
    return %c0_i32, %c0_i32_0 : i32, i32
  }
  func.func @transform_4(%arg0: i32, %arg1: i32) -> (i32, i32, i32) {
    %c0_i32 = arith.constant 0 : i32
    %c0_i32_0 = arith.constant 0 : i32
    return %arg0, %c0_i32, %arg1 : i32, i32, i32
  }
}

module attributes {stable_mosaic.version = 11 : i64} {
  func.func @_mm_kernel(%arg0: i32, %arg1: i32, %arg2: memref<1x30x40xbf16, #tpu.memory_space<vmem>>, %arg3: memref<120x30xbf16, #tpu.memory_space<vmem>>, %arg4: memref<120x1xf32, #tpu.memory_space<vmem>>, %arg5: memref<120x1xf32, #tpu.memory_space<vmem>>, %arg6: memref<120x1xf32, #tpu.memory_space<vmem>>, %arg7: memref<1x120x40xbf16, #tpu.memory_space<vmem>>) attributes {dimension_semantics = [#tpu.dimension_semantics<parallel>, #tpu.dimension_semantics<parallel>], iteration_bounds = array<i64: 2, 1>, scalar_prefetch = 0 : i64, scratch_operands = 0 : i64, tpu.core_type = #tpu.core_type<tc>, window_params = [{transform_indices = @transform_0, window_bounds = array<i64: 1, 30, 40>}, {pipeline_mode = #tpu.pipeline_mode<synchronous>, transform_indices = @transform_1, window_bounds = array<i64: 120, 30>}, {pipeline_mode = #tpu.pipeline_mode<synchronous>, transform_indices = @transform_2, window_bounds = array<i64: 120, 1>}, {pipeline_mode = #tpu.pipeline_mode<synchronous>, transform_indices = @transform_3, window_bounds = array<i64: 120, 1>}, {pipeline_mode = #tpu.pipeline_mode<synchronous>, transform_indices = @transform_4, window_bounds = array<i64: 120, 1>}, {transform_indices = @transform_5, window_bounds = array<i64: 1, 120, 40>}]} {
    %c0 = arith.constant 0 : index
    %c0_0 = arith.constant 0 : index
    %0 = vector.load %arg3[%c0, %c0_0] : memref<120x30xbf16, #tpu.memory_space<vmem>>, vector<120x30xbf16>
    %c0_1 = arith.constant 0 : index
    %c0_2 = arith.constant 0 : index
    %c0_3 = arith.constant 0 : index
    %1 = vector.load %arg2[%c0_1, %c0_2, %c0_3] : memref<1x30x40xbf16, #tpu.memory_space<vmem>>, vector<1x30x40xbf16>
    %2 = vector.shape_cast %1 : vector<1x30x40xbf16> to vector<30x40xbf16>
    %cst = arith.constant dense<0.000000e+00> : vector<120x40xf32>
    %3 = tpu.matmul %0, %2, %cst {dimension_numbers = #tpu.dot_dimension_numbers<[1], [0], [0], [1], [0, 0, 1, 1], [], []>} : vector<120x30xbf16>, vector<30x40xbf16>, vector<120x40xf32> -> vector<120x40xf32>
    %c0_4 = arith.constant 0 : index
    %c0_5 = arith.constant 0 : index
    %4 = vector.load %arg4[%c0_4, %c0_5] : memref<120x1xf32, #tpu.memory_space<vmem>>, vector<120x1xf32>
    %5 = vector.broadcast %4 : vector<120x1xf32> to vector<120x40xf32>
    %6 = arith.mulf %3, %5 : vector<120x40xf32>
    %c0_6 = arith.constant 0 : index
    %c0_7 = arith.constant 0 : index
    %7 = vector.load %arg5[%c0_6, %c0_7] : memref<120x1xf32, #tpu.memory_space<vmem>>, vector<120x1xf32>
    %8 = vector.broadcast %7 : vector<120x1xf32> to vector<120x40xf32>
    %9 = arith.addf %6, %8 : vector<120x40xf32>
    %c0_8 = arith.constant 0 : index
    %c0_9 = arith.constant 0 : index
    %10 = vector.load %arg6[%c0_8, %c0_9] : memref<120x1xf32, #tpu.memory_space<vmem>>, vector<120x1xf32>
    %cst_10 = arith.constant 0.000000e+00 : f32
    %11 = vector.broadcast %cst_10 : f32 to vector<120x1xf32>
    %12 = arith.cmpf ogt, %10, %11 : vector<120x1xf32>
    %cst_11 = arith.constant 0.000000e+00 : f32
    %13 = vector.broadcast %cst_11 : f32 to vector<120x40xf32>
    %14 = arith.maximumf %9, %13 : vector<120x40xf32>
    %15 = vector.shape_cast %12 : vector<120x1xi1> to vector<120x1xi1>
    %16 = vector.broadcast %15 : vector<120x1xi1> to vector<120x40xi1>
    %17 = arith.select %16, %14, %9 : vector<120x40xi1>, vector<120x40xf32>
    %18 = arith.truncf %17 : vector<120x40xf32> to vector<120x40xbf16>
    %c0_12 = arith.constant 0 : index
    %c0_13 = arith.constant 0 : index
    %c0_14 = arith.constant 0 : index
    %19 = vector.load %arg7[%c0_12, %c0_13, %c0_14] : memref<1x120x40xbf16, #tpu.memory_space<vmem>>, vector<1x120x40xbf16>
    %20 = vector.shape_cast %19 : vector<1x120x40xbf16> to vector<120x40xbf16>
    %21 = vector.shape_cast %18 : vector<120x40xbf16> to vector<1x120x40xbf16>
    tpu.vector_store %arg7[%c0_12, %c0_13, %c0_14], %21 {strides = array<i32>} : memref<1x120x40xbf16, #tpu.memory_space<vmem>>, vector<1x120x40xbf16>,
    return
  }
  func.func @transform_0(%arg0: i32, %arg1: i32) -> (i32, i32, i32) {
    %c0_i32 = arith.constant 0 : i32
    %c0_i32_0 = arith.constant 0 : i32
    return %arg0, %c0_i32, %arg1 : i32, i32, i32
  }
  func.func @transform_1(%arg0: i32, %arg1: i32) -> (i32, i32) {
    %c0_i32 = arith.constant 0 : i32
    %c0_i32_0 = arith.constant 0 : i32
    %c0_i32_1 = arith.constant 0 : i32
    return %c0_i32, %c0_i32_0 : i32, i32
  }
  func.func @transform_2(%arg0: i32, %arg1: i32) -> (i32, i32) {
    %c0_i32 = arith.constant 0 : i32
    %c0_i32_0 = arith.constant 0 : i32
    %c0_i32_1 = arith.constant 0 : i32
    return %c0_i32, %c0_i32_0 : i32, i32
  }
  func.func @transform_3(%arg0: i32, %arg1: i32) -> (i32, i32) {
    %c0_i32 = arith.constant 0 : i32
    %c0_i32_0 = arith.constant 0 : i32
    %c0_i32_1 = arith.constant 0 : i32
    return %c0_i32, %c0_i32_0 : i32, i32
  }
  func.func @transform_4(%arg0: i32, %arg1: i32) -> (i32, i32) {
    %c0_i32 = arith.constant 0 : i32
    %c0_i32_0 = arith.constant 0 : i32
    %c0_i32_1 = arith.constant 0 : i32
    return %c0_i32, %c0_i32_0 : i32, i32
  }
  func.func @transform_5(%arg0: i32, %arg1: i32) -> (i32, i32, i32) {
    %c0_i32 = arith.constant 0 : i32
    %c0_i32_0 = arith.constant 0 : i32
    return %arg0, %c0_i32, %arg1 : i32, i32, i32
  }
}

module attributes {stable_mosaic.version = 11 : i64} {
  func.func @_tcn_stage2_kernel(%arg0: i32, %arg1: memref<1x48x80xbf16, #tpu.memory_space<vmem>>, %arg2: memref<1x12x40xbf16, #tpu.memory_space<vmem>>, %arg3: memref<1x60x40xbf16, #tpu.memory_space<vmem>>, %arg4: memref<4x3x12x12xbf16, #tpu.memory_space<vmem>>, %arg5: memref<60x1xf32, #tpu.memory_space<vmem>>, %arg6: memref<1x60x40xbf16, #tpu.memory_space<vmem>>) attributes {dimension_semantics = [#tpu.dimension_semantics<parallel>], iteration_bounds = array<i64: 2>, scalar_prefetch = 0 : i64, scratch_operands = 0 : i64, tpu.core_type = #tpu.core_type<tc>, window_params = [{transform_indices = @transform_0, window_bounds = array<i64: 1, 48, 80>}, {transform_indices = @transform_1, window_bounds = array<i64: 1, 12, 40>}, {transform_indices = @transform_2, window_bounds = array<i64: 1, 60, 40>}, {pipeline_mode = #tpu.pipeline_mode<synchronous>, transform_indices = @transform_3, window_bounds = array<i64: 4, 3, 12, 12>}, {pipeline_mode = #tpu.pipeline_mode<synchronous>, transform_indices = @transform_4, window_bounds = array<i64: 60, 1>}, {transform_indices = @transform_5, window_bounds = array<i64: 1, 60, 40>}]} {
    %cst = arith.constant 0.000000e+00 : f32
    %0 = vector.broadcast %cst : f32 to vector<12x40xf32>
    %c0 = arith.constant 0 : index
    %c0_0 = arith.constant 0 : index
    %c15 = arith.constant 15 : index
    %1 = vector.load %arg1[%c0, %c0_0, %c15] : memref<1x48x80xbf16, #tpu.memory_space<vmem>>, vector<1x12x40xbf16>
    %2 = vector.shape_cast %1 : vector<1x12x40xbf16> to vector<12x40xbf16>
    %c0_1 = arith.constant 0 : index
    %c0_2 = arith.constant 0 : index
    %c0_3 = arith.constant 0 : index
    %c0_4 = arith.constant 0 : index
    %3 = vector.load %arg4[%c0_1, %c0_2, %c0_3, %c0_4] : memref<4x3x12x12xbf16, #tpu.memory_space<vmem>>, vector<1x1x12x12xbf16>
    %4 = vector.shape_cast %3 : vector<1x1x12x12xbf16> to vector<12x12xbf16>
    %cst_5 = arith.constant dense<0.000000e+00> : vector<12x40xf32>
    %5 = tpu.matmul %4, %2, %cst_5 {dimension_numbers = #tpu.dot_dimension_numbers<[1], [0], [0], [1], [0, 0, 1, 1], [], []>} : vector<12x12xbf16>, vector<12x40xbf16>, vector<12x40xf32> -> vector<12x40xf32>
    %6 = arith.addf %0, %5 : vector<12x40xf32>
    %c0_6 = arith.constant 0 : index
    %c0_7 = arith.constant 0 : index
    %c20 = arith.constant 20 : index
    %7 = vector.load %arg1[%c0_6, %c0_7, %c20] : memref<1x48x80xbf16, #tpu.memory_space<vmem>>, vector<1x12x40xbf16>
    %8 = vector.shape_cast %7 : vector<1x12x40xbf16> to vector<12x40xbf16>
    %c0_8 = arith.constant 0 : index
    %c1 = arith.constant 1 : index
    %c0_9 = arith.constant 0 : index
    %c0_10 = arith.constant 0 : index
    %9 = vector.load %arg4[%c0_8, %c1, %c0_9, %c0_10] : memref<4x3x12x12xbf16, #tpu.memory_space<vmem>>, vector<1x1x12x12xbf16>
    %10 = vector.shape_cast %9 : vector<1x1x12x12xbf16> to vector<12x12xbf16>
    %cst_11 = arith.constant dense<0.000000e+00> : vector<12x40xf32>
    %11 = tpu.matmul %10, %8, %cst_11 {dimension_numbers = #tpu.dot_dimension_numbers<[1], [0], [0], [1], [0, 0, 1, 1], [], []>} : vector<12x12xbf16>, vector<12x40xbf16>, vector<12x40xf32> -> vector<12x40xf32>
    %12 = arith.addf %6, %11 : vector<12x40xf32>
    %c0_12 = arith.constant 0 : index
    %c0_13 = arith.constant 0 : index
    %c25 = arith.constant 25 : index
    %13 = vector.load %arg1[%c0_12, %c0_13, %c25] : memref<1x48x80xbf16, #tpu.memory_space<vmem>>, vector<1x12x40xbf16>
    %14 = vector.shape_cast %13 : vector<1x12x40xbf16> to vector<12x40xbf16>
    %c0_14 = arith.constant 0 : index
    %c2 = arith.constant 2 : index
    %c0_15 = arith.constant 0 : index
    %c0_16 = arith.constant 0 : index
    %15 = vector.load %arg4[%c0_14, %c2, %c0_15, %c0_16] : memref<4x3x12x12xbf16, #tpu.memory_space<vmem>>, vector<1x1x12x12xbf16>
    %16 = vector.shape_cast %15 : vector<1x1x12x12xbf16> to vector<12x12xbf16>
    %cst_17 = arith.constant dense<0.000000e+00> : vector<12x40xf32>
    %17 = tpu.matmul %16, %14, %cst_17 {dimension_numbers = #tpu.dot_dimension_numbers<[1], [0], [0], [1], [0, 0, 1, 1], [], []>} : vector<12x12xbf16>, vector<12x40xbf16>, vector<12x40xf32> -> vector<12x40xf32>
    %18 = arith.addf %12, %17 : vector<12x40xf32>
    %cst_18 = arith.constant 0.000000e+00 : f32
    %19 = vector.broadcast %cst_18 : f32 to vector<12x40xf32>
    %c0_19 = arith.constant 0 : index
    %c12 = arith.constant 12 : index
    %c5 = arith.constant 5 : index
    %20 = vector.load %arg1[%c0_19, %c12, %c5] : memref<1x48x80xbf16, #tpu.memory_space<vmem>>, vector<1x12x40xbf16>
    %21 = vector.shape_cast %20 : vector<1x12x40xbf16> to vector<12x40xbf16>
    %c1_20 = arith.constant 1 : index
    %c0_21 = arith.constant 0 : index
    %c0_22 = arith.constant 0 : index
    %c0_23 = arith.constant 0 : index
    %22 = vector.load %arg4[%c1_20, %c0_21, %c0_22, %c0_23] : memref<4x3x12x12xbf16, #tpu.memory_space<vmem>>, vector<1x1x12x12xbf16>
    %23 = vector.shape_cast %22 : vector<1x1x12x12xbf16> to vector<12x12xbf16>
    %cst_24 = arith.constant dense<0.000000e+00> : vector<12x40xf32>
    %24 = tpu.matmul %23, %21, %cst_24 {dimension_numbers = #tpu.dot_dimension_numbers<[1], [0], [0], [1], [0, 0, 1, 1], [], []>} : vector<12x12xbf16>, vector<12x40xbf16>, vector<12x40xf32> -> vector<12x40xf32>
    %25 = arith.addf %19, %24 : vector<12x40xf32>
    %c0_25 = arith.constant 0 : index
    %c12_26 = arith.constant 12 : index
    %c20_27 = arith.constant 20 : index
    %26 = vector.load %arg1[%c0_25, %c12_26, %c20_27] : memref<1x48x80xbf16, #tpu.memory_space<vmem>>, vector<1x12x40xbf16>
    %27 = vector.shape_cast %26 : vector<1x12x40xbf16> to vector<12x40xbf16>
    %c1_28 = arith.constant 1 : index
    %c1_29 = arith.constant 1 : index
    %c0_30 = arith.constant 0 : index
    %c0_31 = arith.constant 0 : index
    %28 = vector.load %arg4[%c1_28, %c1_29, %c0_30, %c0_31] : memref<4x3x12x12xbf16, #tpu.memory_space<vmem>>, vector<1x1x12x12xbf16>
    %29 = vector.shape_cast %28 : vector<1x1x12x12xbf16> to vector<12x12xbf16>
    %cst_32 = arith.constant dense<0.000000e+00> : vector<12x40xf32>
    %30 = tpu.matmul %29, %27, %cst_32 {dimension_numbers = #tpu.dot_dimension_numbers<[1], [0], [0], [1], [0, 0, 1, 1], [], []>} : vector<12x12xbf16>, vector<12x40xbf16>, vector<12x40xf32> -> vector<12x40xf32>
    %31 = arith.addf %25, %30 : vector<12x40xf32>
    %c0_33 = arith.constant 0 : index
    %c12_34 = arith.constant 12 : index
    %c35 = arith.constant 35 : index
    %32 = vector.load %arg1[%c0_33, %c12_34, %c35] : memref<1x48x80xbf16, #tpu.memory_space<vmem>>, vector<1x12x40xbf16>
    %33 = vector.shape_cast %32 : vector<1x12x40xbf16> to vector<12x40xbf16>
    %c1_35 = arith.constant 1 : index
    %c2_36 = arith.constant 2 : index
    %c0_37 = arith.constant 0 : index
    %c0_38 = arith.constant 0 : index
    %34 = vector.load %arg4[%c1_35, %c2_36, %c0_37, %c0_38] : memref<4x3x12x12xbf16, #tpu.memory_space<vmem>>, vector<1x1x12x12xbf16>
    %35 = vector.shape_cast %34 : vector<1x1x12x12xbf16> to vector<12x12xbf16>
    %cst_39 = arith.constant dense<0.000000e+00> : vector<12x40xf32>
    %36 = tpu.matmul %35, %33, %cst_39 {dimension_numbers = #tpu.dot_dimension_numbers<[1], [0], [0], [1], [0, 0, 1, 1], [], []>} : vector<12x12xbf16>, vector<12x40xbf16>, vector<12x40xf32> -> vector<12x40xf32>
    %37 = arith.addf %31, %36 : vector<12x40xf32>
    %cst_40 = arith.constant 0.000000e+00 : f32
    %38 = vector.broadcast %cst_40 : f32 to vector<12x40xf32>
    %c0_41 = arith.constant 0 : index
    %c24 = arith.constant 24 : index
    %c0_42 = arith.constant 0 : index
    %39 = vector.load %arg1[%c0_41, %c24, %c0_42] : memref<1x48x80xbf16, #tpu.memory_space<vmem>>, vector<1x12x40xbf16>
    %40 = vector.shape_cast %39 : vector<1x12x40xbf16> to vector<12x40xbf16>
    %c2_43 = arith.constant 2 : index
    %c0_44 = arith.constant 0 : index
    %c0_45 = arith.constant 0 : index
    %c0_46 = arith.constant 0 : index
    %41 = vector.load %arg4[%c2_43, %c0_44, %c0_45, %c0_46] : memref<4x3x12x12xbf16, #tpu.memory_space<vmem>>, vector<1x1x12x12xbf16>
    %42 = vector.shape_cast %41 : vector<1x1x12x12xbf16> to vector<12x12xbf16>
    %cst_47 = arith.constant dense<0.000000e+00> : vector<12x40xf32>
    %43 = tpu.matmul %42, %40, %cst_47 {dimension_numbers = #tpu.dot_dimension_numbers<[1], [0], [0], [1], [0, 0, 1, 1], [], []>} : vector<12x12xbf16>, vector<12x40xbf16>, vector<12x40xf32> -> vector<12x40xf32>
    %44 = arith.addf %38, %43 : vector<12x40xf32>
    %c0_48 = arith.constant 0 : index
    %c24_49 = arith.constant 24 : index
    %c20_50 = arith.constant 20 : index
    %45 = vector.load %arg1[%c0_48, %c24_49, %c20_50] : memref<1x48x80xbf16, #tpu.memory_space<vmem>>, vector<1x12x40xbf16>
    %46 = vector.shape_cast %45 : vector<1x12x40xbf16> to vector<12x40xbf16>
    %c2_51 = arith.constant 2 : index
    %c1_52 = arith.constant 1 : index
    %c0_53 = arith.constant 0 : index
    %c0_54 = arith.constant 0 : index
    %47 = vector.load %arg4[%c2_51, %c1_52, %c0_53, %c0_54] : memref<4x3x12x12xbf16, #tpu.memory_space<vmem>>, vector<1x1x12x12xbf16>
    %48 = vector.shape_cast %47 : vector<1x1x12x12xbf16> to vector<12x12xbf16>
    %cst_55 = arith.constant dense<0.000000e+00> : vector<12x40xf32>
    %49 = tpu.matmul %48, %46, %cst_55 {dimension_numbers = #tpu.dot_dimension_numbers<[1], [0], [0], [1], [0, 0, 1, 1], [], []>} : vector<12x12xbf16>, vector<12x40xbf16>, vector<12x40xf32> -> vector<12x40xf32>
    %50 = arith.addf %44, %49 : vector<12x40xf32>
    %c0_56 = arith.constant 0 : index
    %c24_57 = arith.constant 24 : index
    %c40 = arith.constant 40 : index
    %51 = vector.load %arg1[%c0_56, %c24_57, %c40] : memref<1x48x80xbf16, #tpu.memory_space<vmem>>, vector<1x12x40xbf16>
    %52 = vector.shape_cast %51 : vector<1x12x40xbf16> to vector<12x40xbf16>
    %c2_58 = arith.constant 2 : index
    %c2_59 = arith.constant 2 : index
    %c0_60 = arith.constant 0 : index
    %c0_61 = arith.constant 0 : index
    %53 = vector.load %arg4[%c2_58, %c2_59, %c0_60, %c0_61] : memref<4x3x12x12xbf16, #tpu.memory_space<vmem>>, vector<1x1x12x12xbf16>
    %54 = vector.shape_cast %53 : vector<1x1x12x12xbf16> to vector<12x12xbf16>
    %cst_62 = arith.constant dense<0.000000e+00> : vector<12x40xf32>
    %55 = tpu.matmul %54, %52, %cst_62 {dimension_numbers = #tpu.dot_dimension_numbers<[1], [0], [0], [1], [0, 0, 1, 1], [], []>} : vector<12x12xbf16>, vector<12x40xbf16>, vector<12x40xf32> -> vector<12x40xf32>
    %56 = arith.addf %50, %55 : vector<12x40xf32>
    %cst_63 = arith.constant 0.000000e+00 : f32
    %57 = vector.broadcast %cst_63 : f32 to vector<12x40xf32>
    %c0_64 = arith.constant 0 : index
    %c36 = arith.constant 36 : index
    %c15_65 = arith.constant 15 : index
    %58 = vector.load %arg1[%c0_64, %c36, %c15_65] : memref<1x48x80xbf16, #tpu.memory_space<vmem>>, vector<1x12x40xbf16>
    %59 = vector.shape_cast %58 : vector<1x12x40xbf16> to vector<12x40xbf16>
    %c3 = arith.constant 3 : index
    %c0_66 = arith.constant 0 : index
    %c0_67 = arith.constant 0 : index
    %c0_68 = arith.constant 0 : index
    %60 = vector.load %arg4[%c3, %c0_66, %c0_67, %c0_68] : memref<4x3x12x12xbf16, #tpu.memory_space<vmem>>, vector<1x1x12x12xbf16>
    %61 = vector.shape_cast %60 : vector<1x1x12x12xbf16> to vector<12x12xbf16>
    %cst_69 = arith.constant dense<0.000000e+00> : vector<12x40xf32>
    %62 = tpu.matmul %61, %59, %cst_69 {dimension_numbers = #tpu.dot_dimension_numbers<[1], [0], [0], [1], [0, 0, 1, 1], [], []>} : vector<12x12xbf16>, vector<12x40xbf16>, vector<12x40xf32> -> vector<12x40xf32>
    %63 = arith.addf %57, %62 : vector<12x40xf32>
    %c0_70 = arith.constant 0 : index
    %c36_71 = arith.constant 36 : index
    %c20_72 = arith.constant 20 : index
    %64 = vector.load %arg1[%c0_70, %c36_71, %c20_72] : memref<1x48x80xbf16, #tpu.memory_space<vmem>>, vector<1x12x40xbf16>
    %65 = vector.shape_cast %64 : vector<1x12x40xbf16> to vector<12x40xbf16>
    %c3_73 = arith.constant 3 : index
    %c1_74 = arith.constant 1 : index
    %c0_75 = arith.constant 0 : index
    %c0_76 = arith.constant 0 : index
    %66 = vector.load %arg4[%c3_73, %c1_74, %c0_75, %c0_76] : memref<4x3x12x12xbf16, #tpu.memory_space<vmem>>, vector<1x1x12x12xbf16>
    %67 = vector.shape_cast %66 : vector<1x1x12x12xbf16> to vector<12x12xbf16>
    %cst_77 = arith.constant dense<0.000000e+00> : vector<12x40xf32>
    %68 = tpu.matmul %67, %65, %cst_77 {dimension_numbers = #tpu.dot_dimension_numbers<[1], [0], [0], [1], [0, 0, 1, 1], [], []>} : vector<12x12xbf16>, vector<12x40xbf16>, vector<12x40xf32> -> vector<12x40xf32>
    %69 = arith.addf %63, %68 : vector<12x40xf32>
    %c0_78 = arith.constant 0 : index
    %c36_79 = arith.constant 36 : index
    %c25_80 = arith.constant 25 : index
    %70 = vector.load %arg1[%c0_78, %c36_79, %c25_80] : memref<1x48x80xbf16, #tpu.memory_space<vmem>>, vector<1x12x40xbf16>
    %71 = vector.shape_cast %70 : vector<1x12x40xbf16> to vector<12x40xbf16>
    %c3_81 = arith.constant 3 : index
    %c2_82 = arith.constant 2 : index
    %c0_83 = arith.constant 0 : index
    %c0_84 = arith.constant 0 : index
    %72 = vector.load %arg4[%c3_81, %c2_82, %c0_83, %c0_84] : memref<4x3x12x12xbf16, #tpu.memory_space<vmem>>, vector<1x1x12x12xbf16>
    %73 = vector.shape_cast %72 : vector<1x1x12x12xbf16> to vector<12x12xbf16>
    %cst_85 = arith.constant dense<0.000000e+00> : vector<12x40xf32>
    %74 = tpu.matmul %73, %71, %cst_85 {dimension_numbers = #tpu.dot_dimension_numbers<[1], [0], [0], [1], [0, 0, 1, 1], [], []>} : vector<12x12xbf16>, vector<12x40xbf16>, vector<12x40xf32> -> vector<12x40xf32>
    %75 = arith.addf %69, %74 : vector<12x40xf32>
    %c0_86 = arith.constant 0 : index
    %c0_87 = arith.constant 0 : index
    %c0_88 = arith.constant 0 : index
    %76 = vector.load %arg2[%c0_86, %c0_87, %c0_88] : memref<1x12x40xbf16, #tpu.memory_space<vmem>>, vector<1x12x40xbf16>
    %77 = vector.shape_cast %76 : vector<1x12x40xbf16> to vector<12x40xbf16>
    %78 = arith.extf %77 : vector<12x40xbf16> to vector<12x40xf32>
    %79 = tpu.concatenate %18, %37, %56, %75, %78 in 0 : vector<12x40xf32>, vector<12x40xf32>, vector<12x40xf32>, vector<12x40xf32>, vector<12x40xf32> -> vector<60x40xf32>
    %c0_89 = arith.constant 0 : index
    %c0_90 = arith.constant 0 : index
    %80 = vector.load %arg5[%c0_89, %c0_90] : memref<60x1xf32, #tpu.memory_space<vmem>>, vector<60x1xf32>
    %81 = vector.broadcast %80 : vector<60x1xf32> to vector<60x40xf32>
    %82 = arith.addf %79, %81 : vector<60x40xf32>
    %c0_91 = arith.constant 0 : index
    %c0_92 = arith.constant 0 : index
    %c0_93 = arith.constant 0 : index
    %83 = vector.load %arg3[%c0_91, %c0_92, %c0_93] : memref<1x60x40xbf16, #tpu.memory_space<vmem>>, vector<1x60x40xbf16>
    %84 = vector.shape_cast %83 : vector<1x60x40xbf16> to vector<60x40xbf16>
    %85 = arith.extf %84 : vector<60x40xbf16> to vector<60x40xf32>
    %86 = arith.addf %82, %85 : vector<60x40xf32>
    %cst_94 = arith.constant 0.000000e+00 : f32
    %87 = vector.broadcast %cst_94 : f32 to vector<60x40xf32>
    %88 = arith.maximumf %86, %87 : vector<60x40xf32>
    %89 = arith.truncf %88 : vector<60x40xf32> to vector<60x40xbf16>
    %c0_95 = arith.constant 0 : index
    %c0_96 = arith.constant 0 : index
    %c0_97 = arith.constant 0 : index
    %90 = vector.load %arg6[%c0_95, %c0_96, %c0_97] : memref<1x60x40xbf16, #tpu.memory_space<vmem>>, vector<1x60x40xbf16>
    %91 = vector.shape_cast %90 : vector<1x60x40xbf16> to vector<60x40xbf16>
    %92 = vector.shape_cast %89 : vector<60x40xbf16> to vector<1x60x40xbf16>
    tpu.vector_store %arg6[%c0_95, %c0_96, %c0_97], %92 {strides = array<i32>} : memref<1x60x40xbf16, #tpu.memory_space<vmem>>, vector<1x60x40xbf16>,
    return
  }
  func.func @transform_0(%arg0: i32) -> (i32, i32, i32) {
    %c0_i32 = arith.constant 0 : i32
    %c0_i32_0 = arith.constant 0 : i32
    %c0_i32_1 = arith.constant 0 : i32
    return %arg0, %c0_i32, %c0_i32_0 : i32, i32, i32
  }
  func.func @transform_1(%arg0: i32) -> (i32, i32, i32) {
    %c0_i32 = arith.constant 0 : i32
    %c0_i32_0 = arith.constant 0 : i32
    %c0_i32_1 = arith.constant 0 : i32
    return %arg0, %c0_i32, %c0_i32_0 : i32, i32, i32
  }
  func.func @transform_2(%arg0: i32) -> (i32, i32, i32) {
    %c0_i32 = arith.constant 0 : i32
    %c0_i32_0 = arith.constant 0 : i32
    %c0_i32_1 = arith.constant 0 : i32
    return %arg0, %c0_i32, %c0_i32_0 : i32, i32, i32
  }
  func.func @transform_3(%arg0: i32) -> (i32, i32, i32, i32) {
    %c0_i32 = arith.constant 0 : i32
    %c0_i32_0 = arith.constant 0 : i32
    %c0_i32_1 = arith.constant 0 : i32
    %c0_i32_2 = arith.constant 0 : i32
    %c0_i32_3 = arith.constant 0 : i32
    return %c0_i32, %c0_i32_0, %c0_i32_1, %c0_i32_2 : i32, i32, i32, i32
  }
  func.func @transform_4(%arg0: i32) -> (i32, i32) {
    %c0_i32 = arith.constant 0 : i32
    %c0_i32_0 = arith.constant 0 : i32
    %c0_i32_1 = arith.constant 0 : i32
    return %c0_i32, %c0_i32_0 : i32, i32
  }
  func.func @transform_5(%arg0: i32) -> (i32, i32, i32) {
    %c0_i32 = arith.constant 0 : i32
    %c0_i32_0 = arith.constant 0 : i32
    %c0_i32_1 = arith.constant 0 : i32
    return %arg0, %c0_i32, %c0_i32_0 : i32, i32, i32
  }
}

module attributes {stable_mosaic.version = 11 : i64} {
  func.func @_mm_kernel(%arg0: i32, %arg1: i32, %arg2: memref<1x60x40xbf16, #tpu.memory_space<vmem>>, %arg3: memref<60x60xbf16, #tpu.memory_space<vmem>>, %arg4: memref<60x1xf32, #tpu.memory_space<vmem>>, %arg5: memref<60x1xf32, #tpu.memory_space<vmem>>, %arg6: memref<60x1xf32, #tpu.memory_space<vmem>>, %arg7: memref<1x60x40xbf16, #tpu.memory_space<vmem>>) attributes {dimension_semantics = [#tpu.dimension_semantics<parallel>, #tpu.dimension_semantics<parallel>], iteration_bounds = array<i64: 2, 1>, scalar_prefetch = 0 : i64, scratch_operands = 0 : i64, tpu.core_type = #tpu.core_type<tc>, window_params = [{transform_indices = @transform_0, window_bounds = array<i64: 1, 60, 40>}, {pipeline_mode = #tpu.pipeline_mode<synchronous>, transform_indices = @transform_1, window_bounds = array<i64: 60, 60>}, {pipeline_mode = #tpu.pipeline_mode<synchronous>, transform_indices = @transform_2, window_bounds = array<i64: 60, 1>}, {pipeline_mode = #tpu.pipeline_mode<synchronous>, transform_indices = @transform_3, window_bounds = array<i64: 60, 1>}, {pipeline_mode = #tpu.pipeline_mode<synchronous>, transform_indices = @transform_4, window_bounds = array<i64: 60, 1>}, {transform_indices = @transform_5, window_bounds = array<i64: 1, 60, 40>}]} {
    %c0 = arith.constant 0 : index
    %c0_0 = arith.constant 0 : index
    %0 = vector.load %arg3[%c0, %c0_0] : memref<60x60xbf16, #tpu.memory_space<vmem>>, vector<60x60xbf16>
    %c0_1 = arith.constant 0 : index
    %c0_2 = arith.constant 0 : index
    %c0_3 = arith.constant 0 : index
    %1 = vector.load %arg2[%c0_1, %c0_2, %c0_3] : memref<1x60x40xbf16, #tpu.memory_space<vmem>>, vector<1x60x40xbf16>
    %2 = vector.shape_cast %1 : vector<1x60x40xbf16> to vector<60x40xbf16>
    %cst = arith.constant dense<0.000000e+00> : vector<60x40xf32>
    %3 = tpu.matmul %0, %2, %cst {dimension_numbers = #tpu.dot_dimension_numbers<[1], [0], [0], [1], [0, 0, 1, 1], [], []>} : vector<60x60xbf16>, vector<60x40xbf16>, vector<60x40xf32> -> vector<60x40xf32>
    %c0_4 = arith.constant 0 : index
    %c0_5 = arith.constant 0 : index
    %4 = vector.load %arg4[%c0_4, %c0_5] : memref<60x1xf32, #tpu.memory_space<vmem>>, vector<60x1xf32>
    %5 = vector.broadcast %4 : vector<60x1xf32> to vector<60x40xf32>
    %6 = arith.mulf %3, %5 : vector<60x40xf32>
    %c0_6 = arith.constant 0 : index
    %c0_7 = arith.constant 0 : index
    %7 = vector.load %arg5[%c0_6, %c0_7] : memref<60x1xf32, #tpu.memory_space<vmem>>, vector<60x1xf32>
    %8 = vector.broadcast %7 : vector<60x1xf32> to vector<60x40xf32>
    %9 = arith.addf %6, %8 : vector<60x40xf32>
    %c0_8 = arith.constant 0 : index
    %c0_9 = arith.constant 0 : index
    %10 = vector.load %arg6[%c0_8, %c0_9] : memref<60x1xf32, #tpu.memory_space<vmem>>, vector<60x1xf32>
    %cst_10 = arith.constant 0.000000e+00 : f32
    %11 = vector.broadcast %cst_10 : f32 to vector<60x1xf32>
    %12 = arith.cmpf ogt, %10, %11 : vector<60x1xf32>
    %cst_11 = arith.constant 0.000000e+00 : f32
    %13 = vector.broadcast %cst_11 : f32 to vector<60x40xf32>
    %14 = arith.maximumf %9, %13 : vector<60x40xf32>
    %15 = vector.shape_cast %12 : vector<60x1xi1> to vector<60x1xi1>
    %16 = vector.broadcast %15 : vector<60x1xi1> to vector<60x40xi1>
    %17 = arith.select %16, %14, %9 : vector<60x40xi1>, vector<60x40xf32>
    %18 = arith.truncf %17 : vector<60x40xf32> to vector<60x40xbf16>
    %c0_12 = arith.constant 0 : index
    %c0_13 = arith.constant 0 : index
    %c0_14 = arith.constant 0 : index
    %19 = vector.load %arg7[%c0_12, %c0_13, %c0_14] : memref<1x60x40xbf16, #tpu.memory_space<vmem>>, vector<1x60x40xbf16>
    %20 = vector.shape_cast %19 : vector<1x60x40xbf16> to vector<60x40xbf16>
    %21 = vector.shape_cast %18 : vector<60x40xbf16> to vector<1x60x40xbf16>
    tpu.vector_store %arg7[%c0_12, %c0_13, %c0_14], %21 {strides = array<i32>} : memref<1x60x40xbf16, #tpu.memory_space<vmem>>, vector<1x60x40xbf16>,
    return
  }
  func.func @transform_0(%arg0: i32, %arg1: i32) -> (i32, i32, i32) {
    %c0_i32 = arith.constant 0 : i32
    %c0_i32_0 = arith.constant 0 : i32
    return %arg0, %c0_i32, %arg1 : i32, i32, i32
  }
  func.func @transform_1(%arg0: i32, %arg1: i32) -> (i32, i32) {
    %c0_i32 = arith.constant 0 : i32
    %c0_i32_0 = arith.constant 0 : i32
    %c0_i32_1 = arith.constant 0 : i32
    return %c0_i32, %c0_i32_0 : i32, i32
  }
  func.func @transform_2(%arg0: i32, %arg1: i32) -> (i32, i32) {
    %c0_i32 = arith.constant 0 : i32
    %c0_i32_0 = arith.constant 0 : i32
    %c0_i32_1 = arith.constant 0 : i32
    return %c0_i32, %c0_i32_0 : i32, i32
  }
  func.func @transform_3(%arg0: i32, %arg1: i32) -> (i32, i32) {
    %c0_i32 = arith.constant 0 : i32
    %c0_i32_0 = arith.constant 0 : i32
    %c0_i32_1 = arith.constant 0 : i32
    return %c0_i32, %c0_i32_0 : i32, i32
  }
  func.func @transform_4(%arg0: i32, %arg1: i32) -> (i32, i32) {
    %c0_i32 = arith.constant 0 : i32
    %c0_i32_0 = arith.constant 0 : i32
    %c0_i32_1 = arith.constant 0 : i32
    return %c0_i32, %c0_i32_0 : i32, i32
  }
  func.func @transform_5(%arg0: i32, %arg1: i32) -> (i32, i32, i32) {
    %c0_i32 = arith.constant 0 : i32
    %c0_i32_0 = arith.constant 0 : i32
    return %arg0, %c0_i32, %arg1 : i32, i32, i32
  }
}

module attributes {stable_mosaic.version = 11 : i64} {
  func.func @_mm_kernel(%arg0: i32, %arg1: i32, %arg2: memref<1x300x8xbf16, #tpu.memory_space<vmem>>, %arg3: memref<300x300xbf16, #tpu.memory_space<vmem>>, %arg4: memref<300x1xf32, #tpu.memory_space<vmem>>, %arg5: memref<300x1xf32, #tpu.memory_space<vmem>>, %arg6: memref<1x300x8xbf16, #tpu.memory_space<vmem>>) attributes {dimension_semantics = [#tpu.dimension_semantics<parallel>, #tpu.dimension_semantics<parallel>], iteration_bounds = array<i64: 2, 1>, scalar_prefetch = 0 : i64, scratch_operands = 0 : i64, tpu.core_type = #tpu.core_type<tc>, window_params = [{transform_indices = @transform_0, window_bounds = array<i64: 1, 300, 8>}, {pipeline_mode = #tpu.pipeline_mode<synchronous>, transform_indices = @transform_1, window_bounds = array<i64: 300, 300>}, {pipeline_mode = #tpu.pipeline_mode<synchronous>, transform_indices = @transform_2, window_bounds = array<i64: 300, 1>}, {pipeline_mode = #tpu.pipeline_mode<synchronous>, transform_indices = @transform_3, window_bounds = array<i64: 300, 1>}, {transform_indices = @transform_4, window_bounds = array<i64: 1, 300, 8>}]} {
    %c0 = arith.constant 0 : index
    %c0_0 = arith.constant 0 : index
    %0 = vector.load %arg3[%c0, %c0_0] : memref<300x300xbf16, #tpu.memory_space<vmem>>, vector<300x300xbf16>
    %c0_1 = arith.constant 0 : index
    %c0_2 = arith.constant 0 : index
    %c0_3 = arith.constant 0 : index
    %1 = vector.load %arg2[%c0_1, %c0_2, %c0_3] : memref<1x300x8xbf16, #tpu.memory_space<vmem>>, vector<1x300x8xbf16>
    %2 = vector.shape_cast %1 : vector<1x300x8xbf16> to vector<300x8xbf16>
    %cst = arith.constant dense<0.000000e+00> : vector<300x8xf32>
    %3 = tpu.matmul %0, %2, %cst {dimension_numbers = #tpu.dot_dimension_numbers<[1], [0], [0], [1], [0, 0, 1, 1], [], []>} : vector<300x300xbf16>, vector<300x8xbf16>, vector<300x8xf32> -> vector<300x8xf32>
    %c0_4 = arith.constant 0 : index
    %c0_5 = arith.constant 0 : index
    %4 = vector.load %arg4[%c0_4, %c0_5] : memref<300x1xf32, #tpu.memory_space<vmem>>, vector<300x1xf32>
    %5 = vector.broadcast %4 : vector<300x1xf32> to vector<300x8xf32>
    %6 = arith.mulf %3, %5 : vector<300x8xf32>
    %c0_6 = arith.constant 0 : index
    %c0_7 = arith.constant 0 : index
    %7 = vector.load %arg5[%c0_6, %c0_7] : memref<300x1xf32, #tpu.memory_space<vmem>>, vector<300x1xf32>
    %8 = vector.broadcast %7 : vector<300x1xf32> to vector<300x8xf32>
    %9 = arith.addf %6, %8 : vector<300x8xf32>
    %cst_8 = arith.constant 0.000000e+00 : f32
    %10 = vector.broadcast %cst_8 : f32 to vector<300x8xf32>
    %11 = arith.maximumf %9, %10 : vector<300x8xf32>
    %12 = arith.truncf %11 : vector<300x8xf32> to vector<300x8xbf16>
    %c0_9 = arith.constant 0 : index
    %c0_10 = arith.constant 0 : index
    %c0_11 = arith.constant 0 : index
    %13 = vector.load %arg6[%c0_9, %c0_10, %c0_11] : memref<1x300x8xbf16, #tpu.memory_space<vmem>>, vector<1x300x8xbf16>
    %14 = vector.shape_cast %13 : vector<1x300x8xbf16> to vector<300x8xbf16>
    %15 = vector.shape_cast %12 : vector<300x8xbf16> to vector<1x300x8xbf16>
    tpu.vector_store %arg6[%c0_9, %c0_10, %c0_11], %15 {strides = array<i32>} : memref<1x300x8xbf16, #tpu.memory_space<vmem>>, vector<1x300x8xbf16>,
    return
  }
  func.func @transform_0(%arg0: i32, %arg1: i32) -> (i32, i32, i32) {
    %c0_i32 = arith.constant 0 : i32
    %c0_i32_0 = arith.constant 0 : i32
    return %arg0, %c0_i32, %arg1 : i32, i32, i32
  }
  func.func @transform_1(%arg0: i32, %arg1: i32) -> (i32, i32) {
    %c0_i32 = arith.constant 0 : i32
    %c0_i32_0 = arith.constant 0 : i32
    %c0_i32_1 = arith.constant 0 : i32
    return %c0_i32, %c0_i32_0 : i32, i32
  }
  func.func @transform_2(%arg0: i32, %arg1: i32) -> (i32, i32) {
    %c0_i32 = arith.constant 0 : i32
    %c0_i32_0 = arith.constant 0 : i32
    %c0_i32_1 = arith.constant 0 : i32
    return %c0_i32, %c0_i32_0 : i32, i32
  }
  func.func @transform_3(%arg0: i32, %arg1: i32) -> (i32, i32) {
    %c0_i32 = arith.constant 0 : i32
    %c0_i32_0 = arith.constant 0 : i32
    %c0_i32_1 = arith.constant 0 : i32
    return %c0_i32, %c0_i32_0 : i32, i32
  }
  func.func @transform_4(%arg0: i32, %arg1: i32) -> (i32, i32, i32) {
    %c0_i32 = arith.constant 0 : i32
    %c0_i32_0 = arith.constant 0 : i32
    return %arg0, %c0_i32, %arg1 : i32, i32, i32
  }
}

module attributes {stable_mosaic.version = 11 : i64} {
  func.func @_mm_kernel(%arg0: i32, %arg1: i32, %arg2: memref<1x60x40xbf16, #tpu.memory_space<vmem>>, %arg3: memref<240x60xbf16, #tpu.memory_space<vmem>>, %arg4: memref<240x1xf32, #tpu.memory_space<vmem>>, %arg5: memref<240x1xf32, #tpu.memory_space<vmem>>, %arg6: memref<240x1xf32, #tpu.memory_space<vmem>>, %arg7: memref<1x240x40xbf16, #tpu.memory_space<vmem>>) attributes {dimension_semantics = [#tpu.dimension_semantics<parallel>, #tpu.dimension_semantics<parallel>], iteration_bounds = array<i64: 2, 1>, scalar_prefetch = 0 : i64, scratch_operands = 0 : i64, tpu.core_type = #tpu.core_type<tc>, window_params = [{transform_indices = @transform_0, window_bounds = array<i64: 1, 60, 40>}, {pipeline_mode = #tpu.pipeline_mode<synchronous>, transform_indices = @transform_1, window_bounds = array<i64: 240, 60>}, {pipeline_mode = #tpu.pipeline_mode<synchronous>, transform_indices = @transform_2, window_bounds = array<i64: 240, 1>}, {pipeline_mode = #tpu.pipeline_mode<synchronous>, transform_indices = @transform_3, window_bounds = array<i64: 240, 1>}, {pipeline_mode = #tpu.pipeline_mode<synchronous>, transform_indices = @transform_4, window_bounds = array<i64: 240, 1>}, {transform_indices = @transform_5, window_bounds = array<i64: 1, 240, 40>}]} {
    %c0 = arith.constant 0 : index
    %c0_0 = arith.constant 0 : index
    %0 = vector.load %arg3[%c0, %c0_0] : memref<240x60xbf16, #tpu.memory_space<vmem>>, vector<240x60xbf16>
    %c0_1 = arith.constant 0 : index
    %c0_2 = arith.constant 0 : index
    %c0_3 = arith.constant 0 : index
    %1 = vector.load %arg2[%c0_1, %c0_2, %c0_3] : memref<1x60x40xbf16, #tpu.memory_space<vmem>>, vector<1x60x40xbf16>
    %2 = vector.shape_cast %1 : vector<1x60x40xbf16> to vector<60x40xbf16>
    %cst = arith.constant dense<0.000000e+00> : vector<240x40xf32>
    %3 = tpu.matmul %0, %2, %cst {dimension_numbers = #tpu.dot_dimension_numbers<[1], [0], [0], [1], [0, 0, 1, 1], [], []>} : vector<240x60xbf16>, vector<60x40xbf16>, vector<240x40xf32> -> vector<240x40xf32>
    %c0_4 = arith.constant 0 : index
    %c0_5 = arith.constant 0 : index
    %4 = vector.load %arg4[%c0_4, %c0_5] : memref<240x1xf32, #tpu.memory_space<vmem>>, vector<240x1xf32>
    %5 = vector.broadcast %4 : vector<240x1xf32> to vector<240x40xf32>
    %6 = arith.mulf %3, %5 : vector<240x40xf32>
    %c0_6 = arith.constant 0 : index
    %c0_7 = arith.constant 0 : index
    %7 = vector.load %arg5[%c0_6, %c0_7] : memref<240x1xf32, #tpu.memory_space<vmem>>, vector<240x1xf32>
    %8 = vector.broadcast %7 : vector<240x1xf32> to vector<240x40xf32>
    %9 = arith.addf %6, %8 : vector<240x40xf32>
    %c0_8 = arith.constant 0 : index
    %c0_9 = arith.constant 0 : index
    %10 = vector.load %arg6[%c0_8, %c0_9] : memref<240x1xf32, #tpu.memory_space<vmem>>, vector<240x1xf32>
    %cst_10 = arith.constant 0.000000e+00 : f32
    %11 = vector.broadcast %cst_10 : f32 to vector<240x1xf32>
    %12 = arith.cmpf ogt, %10, %11 : vector<240x1xf32>
    %cst_11 = arith.constant 0.000000e+00 : f32
    %13 = vector.broadcast %cst_11 : f32 to vector<240x40xf32>
    %14 = arith.maximumf %9, %13 : vector<240x40xf32>
    %15 = vector.shape_cast %12 : vector<240x1xi1> to vector<240x1xi1>
    %16 = vector.broadcast %15 : vector<240x1xi1> to vector<240x40xi1>
    %17 = arith.select %16, %14, %9 : vector<240x40xi1>, vector<240x40xf32>
    %18 = arith.truncf %17 : vector<240x40xf32> to vector<240x40xbf16>
    %c0_12 = arith.constant 0 : index
    %c0_13 = arith.constant 0 : index
    %c0_14 = arith.constant 0 : index
    %19 = vector.load %arg7[%c0_12, %c0_13, %c0_14] : memref<1x240x40xbf16, #tpu.memory_space<vmem>>, vector<1x240x40xbf16>
    %20 = vector.shape_cast %19 : vector<1x240x40xbf16> to vector<240x40xbf16>
    %21 = vector.shape_cast %18 : vector<240x40xbf16> to vector<1x240x40xbf16>
    tpu.vector_store %arg7[%c0_12, %c0_13, %c0_14], %21 {strides = array<i32>} : memref<1x240x40xbf16, #tpu.memory_space<vmem>>, vector<1x240x40xbf16>,
    return
  }
  func.func @transform_0(%arg0: i32, %arg1: i32) -> (i32, i32, i32) {
    %c0_i32 = arith.constant 0 : i32
    %c0_i32_0 = arith.constant 0 : i32
    return %arg0, %c0_i32, %arg1 : i32, i32, i32
  }
  func.func @transform_1(%arg0: i32, %arg1: i32) -> (i32, i32) {
    %c0_i32 = arith.constant 0 : i32
    %c0_i32_0 = arith.constant 0 : i32
    %c0_i32_1 = arith.constant 0 : i32
    return %c0_i32, %c0_i32_0 : i32, i32
  }
  func.func @transform_2(%arg0: i32, %arg1: i32) -> (i32, i32) {
    %c0_i32 = arith.constant 0 : i32
    %c0_i32_0 = arith.constant 0 : i32
    %c0_i32_1 = arith.constant 0 : i32
    return %c0_i32, %c0_i32_0 : i32, i32
  }
  func.func @transform_3(%arg0: i32, %arg1: i32) -> (i32, i32) {
    %c0_i32 = arith.constant 0 : i32
    %c0_i32_0 = arith.constant 0 : i32
    %c0_i32_1 = arith.constant 0 : i32
    return %c0_i32, %c0_i32_0 : i32, i32
  }
  func.func @transform_4(%arg0: i32, %arg1: i32) -> (i32, i32) {
    %c0_i32 = arith.constant 0 : i32
    %c0_i32_0 = arith.constant 0 : i32
    %c0_i32_1 = arith.constant 0 : i32
    return %c0_i32, %c0_i32_0 : i32, i32
  }
  func.func @transform_5(%arg0: i32, %arg1: i32) -> (i32, i32, i32) {
    %c0_i32 = arith.constant 0 : i32
    %c0_i32_0 = arith.constant 0 : i32
    return %arg0, %c0_i32, %arg1 : i32, i32, i32
  }
}

module attributes {stable_mosaic.version = 11 : i64} {
  func.func @_mm_kernel(%arg0: i32, %arg1: i32, %arg2: memref<1x120x40xbf16, #tpu.memory_space<vmem>>, %arg3: memref<120x120xbf16, #tpu.memory_space<vmem>>, %arg4: memref<120x1xf32, #tpu.memory_space<vmem>>, %arg5: memref<120x1xf32, #tpu.memory_space<vmem>>, %arg6: memref<120x1xf32, #tpu.memory_space<vmem>>, %arg7: memref<1x120x40xbf16, #tpu.memory_space<vmem>>) attributes {dimension_semantics = [#tpu.dimension_semantics<parallel>, #tpu.dimension_semantics<parallel>], iteration_bounds = array<i64: 2, 1>, scalar_prefetch = 0 : i64, scratch_operands = 0 : i64, tpu.core_type = #tpu.core_type<tc>, window_params = [{transform_indices = @transform_0, window_bounds = array<i64: 1, 120, 40>}, {pipeline_mode = #tpu.pipeline_mode<synchronous>, transform_indices = @transform_1, window_bounds = array<i64: 120, 120>}, {pipeline_mode = #tpu.pipeline_mode<synchronous>, transform_indices = @transform_2, window_bounds = array<i64: 120, 1>}, {pipeline_mode = #tpu.pipeline_mode<synchronous>, transform_indices = @transform_3, window_bounds = array<i64: 120, 1>}, {pipeline_mode = #tpu.pipeline_mode<synchronous>, transform_indices = @transform_4, window_bounds = array<i64: 120, 1>}, {transform_indices = @transform_5, window_bounds = array<i64: 1, 120, 40>}]} {
    %c0 = arith.constant 0 : index
    %c0_0 = arith.constant 0 : index
    %0 = vector.load %arg3[%c0, %c0_0] : memref<120x120xbf16, #tpu.memory_space<vmem>>, vector<120x120xbf16>
    %c0_1 = arith.constant 0 : index
    %c0_2 = arith.constant 0 : index
    %c0_3 = arith.constant 0 : index
    %1 = vector.load %arg2[%c0_1, %c0_2, %c0_3] : memref<1x120x40xbf16, #tpu.memory_space<vmem>>, vector<1x120x40xbf16>
    %2 = vector.shape_cast %1 : vector<1x120x40xbf16> to vector<120x40xbf16>
    %cst = arith.constant dense<0.000000e+00> : vector<120x40xf32>
    %3 = tpu.matmul %0, %2, %cst {dimension_numbers = #tpu.dot_dimension_numbers<[1], [0], [0], [1], [0, 0, 1, 1], [], []>} : vector<120x120xbf16>, vector<120x40xbf16>, vector<120x40xf32> -> vector<120x40xf32>
    %c0_4 = arith.constant 0 : index
    %c0_5 = arith.constant 0 : index
    %4 = vector.load %arg4[%c0_4, %c0_5] : memref<120x1xf32, #tpu.memory_space<vmem>>, vector<120x1xf32>
    %5 = vector.broadcast %4 : vector<120x1xf32> to vector<120x40xf32>
    %6 = arith.mulf %3, %5 : vector<120x40xf32>
    %c0_6 = arith.constant 0 : index
    %c0_7 = arith.constant 0 : index
    %7 = vector.load %arg5[%c0_6, %c0_7] : memref<120x1xf32, #tpu.memory_space<vmem>>, vector<120x1xf32>
    %8 = vector.broadcast %7 : vector<120x1xf32> to vector<120x40xf32>
    %9 = arith.addf %6, %8 : vector<120x40xf32>
    %c0_8 = arith.constant 0 : index
    %c0_9 = arith.constant 0 : index
    %10 = vector.load %arg6[%c0_8, %c0_9] : memref<120x1xf32, #tpu.memory_space<vmem>>, vector<120x1xf32>
    %cst_10 = arith.constant 0.000000e+00 : f32
    %11 = vector.broadcast %cst_10 : f32 to vector<120x1xf32>
    %12 = arith.cmpf ogt, %10, %11 : vector<120x1xf32>
    %cst_11 = arith.constant 0.000000e+00 : f32
    %13 = vector.broadcast %cst_11 : f32 to vector<120x40xf32>
    %14 = arith.maximumf %9, %13 : vector<120x40xf32>
    %15 = vector.shape_cast %12 : vector<120x1xi1> to vector<120x1xi1>
    %16 = vector.broadcast %15 : vector<120x1xi1> to vector<120x40xi1>
    %17 = arith.select %16, %14, %9 : vector<120x40xi1>, vector<120x40xf32>
    %18 = arith.truncf %17 : vector<120x40xf32> to vector<120x40xbf16>
    %c0_12 = arith.constant 0 : index
    %c0_13 = arith.constant 0 : index
    %c0_14 = arith.constant 0 : index
    %19 = vector.load %arg7[%c0_12, %c0_13, %c0_14] : memref<1x120x40xbf16, #tpu.memory_space<vmem>>, vector<1x120x40xbf16>
    %20 = vector.shape_cast %19 : vector<1x120x40xbf16> to vector<120x40xbf16>
    %21 = vector.shape_cast %18 : vector<120x40xbf16> to vector<1x120x40xbf16>
    tpu.vector_store %arg7[%c0_12, %c0_13, %c0_14], %21 {strides = array<i32>} : memref<1x120x40xbf16, #tpu.memory_space<vmem>>, vector<1x120x40xbf16>,
    return
  }
  func.func @transform_0(%arg0: i32, %arg1: i32) -> (i32, i32, i32) {
    %c0_i32 = arith.constant 0 : i32
    %c0_i32_0 = arith.constant 0 : i32
    return %arg0, %c0_i32, %arg1 : i32, i32, i32
  }
  func.func @transform_1(%arg0: i32, %arg1: i32) -> (i32, i32) {
    %c0_i32 = arith.constant 0 : i32
    %c0_i32_0 = arith.constant 0 : i32
    %c0_i32_1 = arith.constant 0 : i32
    return %c0_i32, %c0_i32_0 : i32, i32
  }
  func.func @transform_2(%arg0: i32, %arg1: i32) -> (i32, i32) {
    %c0_i32 = arith.constant 0 : i32
    %c0_i32_0 = arith.constant 0 : i32
    %c0_i32_1 = arith.constant 0 : i32
    return %c0_i32, %c0_i32_0 : i32, i32
  }
  func.func @transform_3(%arg0: i32, %arg1: i32) -> (i32, i32) {
    %c0_i32 = arith.constant 0 : i32
    %c0_i32_0 = arith.constant 0 : i32
    %c0_i32_1 = arith.constant 0 : i32
    return %c0_i32, %c0_i32_0 : i32, i32
  }
  func.func @transform_4(%arg0: i32, %arg1: i32) -> (i32, i32) {
    %c0_i32 = arith.constant 0 : i32
    %c0_i32_0 = arith.constant 0 : i32
    %c0_i32_1 = arith.constant 0 : i32
    return %c0_i32, %c0_i32_0 : i32, i32
  }
  func.func @transform_5(%arg0: i32, %arg1: i32) -> (i32, i32, i32) {
    %c0_i32 = arith.constant 0 : i32
    %c0_i32_0 = arith.constant 0 : i32
    return %arg0, %c0_i32, %arg1 : i32, i32, i32
  }
}

module attributes {stable_mosaic.version = 11 : i64} {
  func.func @_tcn_stage2_kernel(%arg0: i32, %arg1: memref<1x96x80xbf16, #tpu.memory_space<vmem>>, %arg2: memref<1x24x40xbf16, #tpu.memory_space<vmem>>, %arg3: memref<1x120x40xbf16, #tpu.memory_space<vmem>>, %arg4: memref<4x3x24x24xbf16, #tpu.memory_space<vmem>>, %arg5: memref<120x1xf32, #tpu.memory_space<vmem>>, %arg6: memref<1x120x40xbf16, #tpu.memory_space<vmem>>) attributes {dimension_semantics = [#tpu.dimension_semantics<parallel>], iteration_bounds = array<i64: 2>, scalar_prefetch = 0 : i64, scratch_operands = 0 : i64, tpu.core_type = #tpu.core_type<tc>, window_params = [{transform_indices = @transform_0, window_bounds = array<i64: 1, 96, 80>}, {transform_indices = @transform_1, window_bounds = array<i64: 1, 24, 40>}, {transform_indices = @transform_2, window_bounds = array<i64: 1, 120, 40>}, {pipeline_mode = #tpu.pipeline_mode<synchronous>, transform_indices = @transform_3, window_bounds = array<i64: 4, 3, 24, 24>}, {pipeline_mode = #tpu.pipeline_mode<synchronous>, transform_indices = @transform_4, window_bounds = array<i64: 120, 1>}, {transform_indices = @transform_5, window_bounds = array<i64: 1, 120, 40>}]} {
    %cst = arith.constant 0.000000e+00 : f32
    %0 = vector.broadcast %cst : f32 to vector<24x40xf32>
    %c0 = arith.constant 0 : index
    %c0_0 = arith.constant 0 : index
    %c15 = arith.constant 15 : index
    %1 = vector.load %arg1[%c0, %c0_0, %c15] : memref<1x96x80xbf16, #tpu.memory_space<vmem>>, vector<1x24x40xbf16>
    %2 = vector.shape_cast %1 : vector<1x24x40xbf16> to vector<24x40xbf16>
    %c0_1 = arith.constant 0 : index
    %c0_2 = arith.constant 0 : index
    %c0_3 = arith.constant 0 : index
    %c0_4 = arith.constant 0 : index
    %3 = vector.load %arg4[%c0_1, %c0_2, %c0_3, %c0_4] : memref<4x3x24x24xbf16, #tpu.memory_space<vmem>>, vector<1x1x24x24xbf16>
    %4 = vector.shape_cast %3 : vector<1x1x24x24xbf16> to vector<24x24xbf16>
    %cst_5 = arith.constant dense<0.000000e+00> : vector<24x40xf32>
    %5 = tpu.matmul %4, %2, %cst_5 {dimension_numbers = #tpu.dot_dimension_numbers<[1], [0], [0], [1], [0, 0, 1, 1], [], []>} : vector<24x24xbf16>, vector<24x40xbf16>, vector<24x40xf32> -> vector<24x40xf32>
    %6 = arith.addf %0, %5 : vector<24x40xf32>
    %c0_6 = arith.constant 0 : index
    %c0_7 = arith.constant 0 : index
    %c20 = arith.constant 20 : index
    %7 = vector.load %arg1[%c0_6, %c0_7, %c20] : memref<1x96x80xbf16, #tpu.memory_space<vmem>>, vector<1x24x40xbf16>
    %8 = vector.shape_cast %7 : vector<1x24x40xbf16> to vector<24x40xbf16>
    %c0_8 = arith.constant 0 : index
    %c1 = arith.constant 1 : index
    %c0_9 = arith.constant 0 : index
    %c0_10 = arith.constant 0 : index
    %9 = vector.load %arg4[%c0_8, %c1, %c0_9, %c0_10] : memref<4x3x24x24xbf16, #tpu.memory_space<vmem>>, vector<1x1x24x24xbf16>
    %10 = vector.shape_cast %9 : vector<1x1x24x24xbf16> to vector<24x24xbf16>
    %cst_11 = arith.constant dense<0.000000e+00> : vector<24x40xf32>
    %11 = tpu.matmul %10, %8, %cst_11 {dimension_numbers = #tpu.dot_dimension_numbers<[1], [0], [0], [1], [0, 0, 1, 1], [], []>} : vector<24x24xbf16>, vector<24x40xbf16>, vector<24x40xf32> -> vector<24x40xf32>
    %12 = arith.addf %6, %11 : vector<24x40xf32>
    %c0_12 = arith.constant 0 : index
    %c0_13 = arith.constant 0 : index
    %c25 = arith.constant 25 : index
    %13 = vector.load %arg1[%c0_12, %c0_13, %c25] : memref<1x96x80xbf16, #tpu.memory_space<vmem>>, vector<1x24x40xbf16>
    %14 = vector.shape_cast %13 : vector<1x24x40xbf16> to vector<24x40xbf16>
    %c0_14 = arith.constant 0 : index
    %c2 = arith.constant 2 : index
    %c0_15 = arith.constant 0 : index
    %c0_16 = arith.constant 0 : index
    %15 = vector.load %arg4[%c0_14, %c2, %c0_15, %c0_16] : memref<4x3x24x24xbf16, #tpu.memory_space<vmem>>, vector<1x1x24x24xbf16>
    %16 = vector.shape_cast %15 : vector<1x1x24x24xbf16> to vector<24x24xbf16>
    %cst_17 = arith.constant dense<0.000000e+00> : vector<24x40xf32>
    %17 = tpu.matmul %16, %14, %cst_17 {dimension_numbers = #tpu.dot_dimension_numbers<[1], [0], [0], [1], [0, 0, 1, 1], [], []>} : vector<24x24xbf16>, vector<24x40xbf16>, vector<24x40xf32> -> vector<24x40xf32>
    %18 = arith.addf %12, %17 : vector<24x40xf32>
    %cst_18 = arith.constant 0.000000e+00 : f32
    %19 = vector.broadcast %cst_18 : f32 to vector<24x40xf32>
    %c0_19 = arith.constant 0 : index
    %c24 = arith.constant 24 : index
    %c5 = arith.constant 5 : index
    %20 = vector.load %arg1[%c0_19, %c24, %c5] : memref<1x96x80xbf16, #tpu.memory_space<vmem>>, vector<1x24x40xbf16>
    %21 = vector.shape_cast %20 : vector<1x24x40xbf16> to vector<24x40xbf16>
    %c1_20 = arith.constant 1 : index
    %c0_21 = arith.constant 0 : index
    %c0_22 = arith.constant 0 : index
    %c0_23 = arith.constant 0 : index
    %22 = vector.load %arg4[%c1_20, %c0_21, %c0_22, %c0_23] : memref<4x3x24x24xbf16, #tpu.memory_space<vmem>>, vector<1x1x24x24xbf16>
    %23 = vector.shape_cast %22 : vector<1x1x24x24xbf16> to vector<24x24xbf16>
    %cst_24 = arith.constant dense<0.000000e+00> : vector<24x40xf32>
    %24 = tpu.matmul %23, %21, %cst_24 {dimension_numbers = #tpu.dot_dimension_numbers<[1], [0], [0], [1], [0, 0, 1, 1], [], []>} : vector<24x24xbf16>, vector<24x40xbf16>, vector<24x40xf32> -> vector<24x40xf32>
    %25 = arith.addf %19, %24 : vector<24x40xf32>
    %c0_25 = arith.constant 0 : index
    %c24_26 = arith.constant 24 : index
    %c20_27 = arith.constant 20 : index
    %26 = vector.load %arg1[%c0_25, %c24_26, %c20_27] : memref<1x96x80xbf16, #tpu.memory_space<vmem>>, vector<1x24x40xbf16>
    %27 = vector.shape_cast %26 : vector<1x24x40xbf16> to vector<24x40xbf16>
    %c1_28 = arith.constant 1 : index
    %c1_29 = arith.constant 1 : index
    %c0_30 = arith.constant 0 : index
    %c0_31 = arith.constant 0 : index
    %28 = vector.load %arg4[%c1_28, %c1_29, %c0_30, %c0_31] : memref<4x3x24x24xbf16, #tpu.memory_space<vmem>>, vector<1x1x24x24xbf16>
    %29 = vector.shape_cast %28 : vector<1x1x24x24xbf16> to vector<24x24xbf16>
    %cst_32 = arith.constant dense<0.000000e+00> : vector<24x40xf32>
    %30 = tpu.matmul %29, %27, %cst_32 {dimension_numbers = #tpu.dot_dimension_numbers<[1], [0], [0], [1], [0, 0, 1, 1], [], []>} : vector<24x24xbf16>, vector<24x40xbf16>, vector<24x40xf32> -> vector<24x40xf32>
    %31 = arith.addf %25, %30 : vector<24x40xf32>
    %c0_33 = arith.constant 0 : index
    %c24_34 = arith.constant 24 : index
    %c35 = arith.constant 35 : index
    %32 = vector.load %arg1[%c0_33, %c24_34, %c35] : memref<1x96x80xbf16, #tpu.memory_space<vmem>>, vector<1x24x40xbf16>
    %33 = vector.shape_cast %32 : vector<1x24x40xbf16> to vector<24x40xbf16>
    %c1_35 = arith.constant 1 : index
    %c2_36 = arith.constant 2 : index
    %c0_37 = arith.constant 0 : index
    %c0_38 = arith.constant 0 : index
    %34 = vector.load %arg4[%c1_35, %c2_36, %c0_37, %c0_38] : memref<4x3x24x24xbf16, #tpu.memory_space<vmem>>, vector<1x1x24x24xbf16>
    %35 = vector.shape_cast %34 : vector<1x1x24x24xbf16> to vector<24x24xbf16>
    %cst_39 = arith.constant dense<0.000000e+00> : vector<24x40xf32>
    %36 = tpu.matmul %35, %33, %cst_39 {dimension_numbers = #tpu.dot_dimension_numbers<[1], [0], [0], [1], [0, 0, 1, 1], [], []>} : vector<24x24xbf16>, vector<24x40xbf16>, vector<24x40xf32> -> vector<24x40xf32>
    %37 = arith.addf %31, %36 : vector<24x40xf32>
    %cst_40 = arith.constant 0.000000e+00 : f32
    %38 = vector.broadcast %cst_40 : f32 to vector<24x40xf32>
    %c0_41 = arith.constant 0 : index
    %c48 = arith.constant 48 : index
    %c0_42 = arith.constant 0 : index
    %39 = vector.load %arg1[%c0_41, %c48, %c0_42] : memref<1x96x80xbf16, #tpu.memory_space<vmem>>, vector<1x24x40xbf16>
    %40 = vector.shape_cast %39 : vector<1x24x40xbf16> to vector<24x40xbf16>
    %c2_43 = arith.constant 2 : index
    %c0_44 = arith.constant 0 : index
    %c0_45 = arith.constant 0 : index
    %c0_46 = arith.constant 0 : index
    %41 = vector.load %arg4[%c2_43, %c0_44, %c0_45, %c0_46] : memref<4x3x24x24xbf16, #tpu.memory_space<vmem>>, vector<1x1x24x24xbf16>
    %42 = vector.shape_cast %41 : vector<1x1x24x24xbf16> to vector<24x24xbf16>
    %cst_47 = arith.constant dense<0.000000e+00> : vector<24x40xf32>
    %43 = tpu.matmul %42, %40, %cst_47 {dimension_numbers = #tpu.dot_dimension_numbers<[1], [0], [0], [1], [0, 0, 1, 1], [], []>} : vector<24x24xbf16>, vector<24x40xbf16>, vector<24x40xf32> -> vector<24x40xf32>
    %44 = arith.addf %38, %43 : vector<24x40xf32>
    %c0_48 = arith.constant 0 : index
    %c48_49 = arith.constant 48 : index
    %c20_50 = arith.constant 20 : index
    %45 = vector.load %arg1[%c0_48, %c48_49, %c20_50] : memref<1x96x80xbf16, #tpu.memory_space<vmem>>, vector<1x24x40xbf16>
    %46 = vector.shape_cast %45 : vector<1x24x40xbf16> to vector<24x40xbf16>
    %c2_51 = arith.constant 2 : index
    %c1_52 = arith.constant 1 : index
    %c0_53 = arith.constant 0 : index
    %c0_54 = arith.constant 0 : index
    %47 = vector.load %arg4[%c2_51, %c1_52, %c0_53, %c0_54] : memref<4x3x24x24xbf16, #tpu.memory_space<vmem>>, vector<1x1x24x24xbf16>
    %48 = vector.shape_cast %47 : vector<1x1x24x24xbf16> to vector<24x24xbf16>
    %cst_55 = arith.constant dense<0.000000e+00> : vector<24x40xf32>
    %49 = tpu.matmul %48, %46, %cst_55 {dimension_numbers = #tpu.dot_dimension_numbers<[1], [0], [0], [1], [0, 0, 1, 1], [], []>} : vector<24x24xbf16>, vector<24x40xbf16>, vector<24x40xf32> -> vector<24x40xf32>
    %50 = arith.addf %44, %49 : vector<24x40xf32>
    %c0_56 = arith.constant 0 : index
    %c48_57 = arith.constant 48 : index
    %c40 = arith.constant 40 : index
    %51 = vector.load %arg1[%c0_56, %c48_57, %c40] : memref<1x96x80xbf16, #tpu.memory_space<vmem>>, vector<1x24x40xbf16>
    %52 = vector.shape_cast %51 : vector<1x24x40xbf16> to vector<24x40xbf16>
    %c2_58 = arith.constant 2 : index
    %c2_59 = arith.constant 2 : index
    %c0_60 = arith.constant 0 : index
    %c0_61 = arith.constant 0 : index
    %53 = vector.load %arg4[%c2_58, %c2_59, %c0_60, %c0_61] : memref<4x3x24x24xbf16, #tpu.memory_space<vmem>>, vector<1x1x24x24xbf16>
    %54 = vector.shape_cast %53 : vector<1x1x24x24xbf16> to vector<24x24xbf16>
    %cst_62 = arith.constant dense<0.000000e+00> : vector<24x40xf32>
    %55 = tpu.matmul %54, %52, %cst_62 {dimension_numbers = #tpu.dot_dimension_numbers<[1], [0], [0], [1], [0, 0, 1, 1], [], []>} : vector<24x24xbf16>, vector<24x40xbf16>, vector<24x40xf32> -> vector<24x40xf32>
    %56 = arith.addf %50, %55 : vector<24x40xf32>
    %cst_63 = arith.constant 0.000000e+00 : f32
    %57 = vector.broadcast %cst_63 : f32 to vector<24x40xf32>
    %c0_64 = arith.constant 0 : index
    %c72 = arith.constant 72 : index
    %c15_65 = arith.constant 15 : index
    %58 = vector.load %arg1[%c0_64, %c72, %c15_65] : memref<1x96x80xbf16, #tpu.memory_space<vmem>>, vector<1x24x40xbf16>
    %59 = vector.shape_cast %58 : vector<1x24x40xbf16> to vector<24x40xbf16>
    %c3 = arith.constant 3 : index
    %c0_66 = arith.constant 0 : index
    %c0_67 = arith.constant 0 : index
    %c0_68 = arith.constant 0 : index
    %60 = vector.load %arg4[%c3, %c0_66, %c0_67, %c0_68] : memref<4x3x24x24xbf16, #tpu.memory_space<vmem>>, vector<1x1x24x24xbf16>
    %61 = vector.shape_cast %60 : vector<1x1x24x24xbf16> to vector<24x24xbf16>
    %cst_69 = arith.constant dense<0.000000e+00> : vector<24x40xf32>
    %62 = tpu.matmul %61, %59, %cst_69 {dimension_numbers = #tpu.dot_dimension_numbers<[1], [0], [0], [1], [0, 0, 1, 1], [], []>} : vector<24x24xbf16>, vector<24x40xbf16>, vector<24x40xf32> -> vector<24x40xf32>
    %63 = arith.addf %57, %62 : vector<24x40xf32>
    %c0_70 = arith.constant 0 : index
    %c72_71 = arith.constant 72 : index
    %c20_72 = arith.constant 20 : index
    %64 = vector.load %arg1[%c0_70, %c72_71, %c20_72] : memref<1x96x80xbf16, #tpu.memory_space<vmem>>, vector<1x24x40xbf16>
    %65 = vector.shape_cast %64 : vector<1x24x40xbf16> to vector<24x40xbf16>
    %c3_73 = arith.constant 3 : index
    %c1_74 = arith.constant 1 : index
    %c0_75 = arith.constant 0 : index
    %c0_76 = arith.constant 0 : index
    %66 = vector.load %arg4[%c3_73, %c1_74, %c0_75, %c0_76] : memref<4x3x24x24xbf16, #tpu.memory_space<vmem>>, vector<1x1x24x24xbf16>
    %67 = vector.shape_cast %66 : vector<1x1x24x24xbf16> to vector<24x24xbf16>
    %cst_77 = arith.constant dense<0.000000e+00> : vector<24x40xf32>
    %68 = tpu.matmul %67, %65, %cst_77 {dimension_numbers = #tpu.dot_dimension_numbers<[1], [0], [0], [1], [0, 0, 1, 1], [], []>} : vector<24x24xbf16>, vector<24x40xbf16>, vector<24x40xf32> -> vector<24x40xf32>
    %69 = arith.addf %63, %68 : vector<24x40xf32>
    %c0_78 = arith.constant 0 : index
    %c72_79 = arith.constant 72 : index
    %c25_80 = arith.constant 25 : index
    %70 = vector.load %arg1[%c0_78, %c72_79, %c25_80] : memref<1x96x80xbf16, #tpu.memory_space<vmem>>, vector<1x24x40xbf16>
    %71 = vector.shape_cast %70 : vector<1x24x40xbf16> to vector<24x40xbf16>
    %c3_81 = arith.constant 3 : index
    %c2_82 = arith.constant 2 : index
    %c0_83 = arith.constant 0 : index
    %c0_84 = arith.constant 0 : index
    %72 = vector.load %arg4[%c3_81, %c2_82, %c0_83, %c0_84] : memref<4x3x24x24xbf16, #tpu.memory_space<vmem>>, vector<1x1x24x24xbf16>
    %73 = vector.shape_cast %72 : vector<1x1x24x24xbf16> to vector<24x24xbf16>
    %cst_85 = arith.constant dense<0.000000e+00> : vector<24x40xf32>
    %74 = tpu.matmul %73, %71, %cst_85 {dimension_numbers = #tpu.dot_dimension_numbers<[1], [0], [0], [1], [0, 0, 1, 1], [], []>} : vector<24x24xbf16>, vector<24x40xbf16>, vector<24x40xf32> -> vector<24x40xf32>
    %75 = arith.addf %69, %74 : vector<24x40xf32>
    %c0_86 = arith.constant 0 : index
    %c0_87 = arith.constant 0 : index
    %c0_88 = arith.constant 0 : index
    %76 = vector.load %arg2[%c0_86, %c0_87, %c0_88] : memref<1x24x40xbf16, #tpu.memory_space<vmem>>, vector<1x24x40xbf16>
    %77 = vector.shape_cast %76 : vector<1x24x40xbf16> to vector<24x40xbf16>
    %78 = arith.extf %77 : vector<24x40xbf16> to vector<24x40xf32>
    %79 = tpu.concatenate %18, %37, %56, %75, %78 in 0 : vector<24x40xf32>, vector<24x40xf32>, vector<24x40xf32>, vector<24x40xf32>, vector<24x40xf32> -> vector<120x40xf32>
    %c0_89 = arith.constant 0 : index
    %c0_90 = arith.constant 0 : index
    %80 = vector.load %arg5[%c0_89, %c0_90] : memref<120x1xf32, #tpu.memory_space<vmem>>, vector<120x1xf32>
    %81 = vector.broadcast %80 : vector<120x1xf32> to vector<120x40xf32>
    %82 = arith.addf %79, %81 : vector<120x40xf32>
    %c0_91 = arith.constant 0 : index
    %c0_92 = arith.constant 0 : index
    %c0_93 = arith.constant 0 : index
    %83 = vector.load %arg3[%c0_91, %c0_92, %c0_93] : memref<1x120x40xbf16, #tpu.memory_space<vmem>>, vector<1x120x40xbf16>
    %84 = vector.shape_cast %83 : vector<1x120x40xbf16> to vector<120x40xbf16>
    %85 = arith.extf %84 : vector<120x40xbf16> to vector<120x40xf32>
    %86 = arith.addf %82, %85 : vector<120x40xf32>
    %cst_94 = arith.constant 0.000000e+00 : f32
    %87 = vector.broadcast %cst_94 : f32 to vector<120x40xf32>
    %88 = arith.maximumf %86, %87 : vector<120x40xf32>
    %89 = arith.truncf %88 : vector<120x40xf32> to vector<120x40xbf16>
    %c0_95 = arith.constant 0 : index
    %c0_96 = arith.constant 0 : index
    %c0_97 = arith.constant 0 : index
    %90 = vector.load %arg6[%c0_95, %c0_96, %c0_97] : memref<1x120x40xbf16, #tpu.memory_space<vmem>>, vector<1x120x40xbf16>
    %91 = vector.shape_cast %90 : vector<1x120x40xbf16> to vector<120x40xbf16>
    %92 = vector.shape_cast %89 : vector<120x40xbf16> to vector<1x120x40xbf16>
    tpu.vector_store %arg6[%c0_95, %c0_96, %c0_97], %92 {strides = array<i32>} : memref<1x120x40xbf16, #tpu.memory_space<vmem>>, vector<1x120x40xbf16>,
    return
  }
  func.func @transform_0(%arg0: i32) -> (i32, i32, i32) {
    %c0_i32 = arith.constant 0 : i32
    %c0_i32_0 = arith.constant 0 : i32
    %c0_i32_1 = arith.constant 0 : i32
    return %arg0, %c0_i32, %c0_i32_0 : i32, i32, i32
  }
  func.func @transform_1(%arg0: i32) -> (i32, i32, i32) {
    %c0_i32 = arith.constant 0 : i32
    %c0_i32_0 = arith.constant 0 : i32
    %c0_i32_1 = arith.constant 0 : i32
    return %arg0, %c0_i32, %c0_i32_0 : i32, i32, i32
  }
  func.func @transform_2(%arg0: i32) -> (i32, i32, i32) {
    %c0_i32 = arith.constant 0 : i32
    %c0_i32_0 = arith.constant 0 : i32
    %c0_i32_1 = arith.constant 0 : i32
    return %arg0, %c0_i32, %c0_i32_0 : i32, i32, i32
  }
  func.func @transform_3(%arg0: i32) -> (i32, i32, i32, i32) {
    %c0_i32 = arith.constant 0 : i32
    %c0_i32_0 = arith.constant 0 : i32
    %c0_i32_1 = arith.constant 0 : i32
    %c0_i32_2 = arith.constant 0 : i32
    %c0_i32_3 = arith.constant 0 : i32
    return %c0_i32, %c0_i32_0, %c0_i32_1, %c0_i32_2 : i32, i32, i32, i32
  }
  func.func @transform_4(%arg0: i32) -> (i32, i32) {
    %c0_i32 = arith.constant 0 : i32
    %c0_i32_0 = arith.constant 0 : i32
    %c0_i32_1 = arith.constant 0 : i32
    return %c0_i32, %c0_i32_0 : i32, i32
  }
  func.func @transform_5(%arg0: i32) -> (i32, i32, i32) {
    %c0_i32 = arith.constant 0 : i32
    %c0_i32_0 = arith.constant 0 : i32
    %c0_i32_1 = arith.constant 0 : i32
    return %arg0, %c0_i32, %c0_i32_0 : i32, i32, i32
  }
}

module attributes {stable_mosaic.version = 11 : i64} {
  func.func @_mm_kernel(%arg0: i32, %arg1: i32, %arg2: memref<1x600x8xbf16, #tpu.memory_space<vmem>>, %arg3: memref<32x600xbf16, #tpu.memory_space<vmem>>, %arg4: memref<32x1xf32, #tpu.memory_space<vmem>>, %arg5: memref<1x32x8xf32, #tpu.memory_space<vmem>>) attributes {dimension_semantics = [#tpu.dimension_semantics<parallel>, #tpu.dimension_semantics<parallel>], iteration_bounds = array<i64: 2, 1>, scalar_prefetch = 0 : i64, scratch_operands = 0 : i64, tpu.core_type = #tpu.core_type<tc>, window_params = [{transform_indices = @transform_0, window_bounds = array<i64: 1, 600, 8>}, {pipeline_mode = #tpu.pipeline_mode<synchronous>, transform_indices = @transform_1, window_bounds = array<i64: 32, 600>}, {pipeline_mode = #tpu.pipeline_mode<synchronous>, transform_indices = @transform_2, window_bounds = array<i64: 32, 1>}, {transform_indices = @transform_3, window_bounds = array<i64: 1, 32, 8>}]} {
    %c0 = arith.constant 0 : index
    %c0_0 = arith.constant 0 : index
    %0 = vector.load %arg3[%c0, %c0_0] : memref<32x600xbf16, #tpu.memory_space<vmem>>, vector<32x600xbf16>
    %c0_1 = arith.constant 0 : index
    %c0_2 = arith.constant 0 : index
    %c0_3 = arith.constant 0 : index
    %1 = vector.load %arg2[%c0_1, %c0_2, %c0_3] : memref<1x600x8xbf16, #tpu.memory_space<vmem>>, vector<1x600x8xbf16>
    %2 = vector.shape_cast %1 : vector<1x600x8xbf16> to vector<600x8xbf16>
    %cst = arith.constant dense<0.000000e+00> : vector<32x8xf32>
    %3 = tpu.matmul %0, %2, %cst {dimension_numbers = #tpu.dot_dimension_numbers<[1], [0], [0], [1], [0, 0, 1, 1], [], []>} : vector<32x600xbf16>, vector<600x8xbf16>, vector<32x8xf32> -> vector<32x8xf32>
    %c0_4 = arith.constant 0 : index
    %c0_5 = arith.constant 0 : index
    %4 = vector.load %arg4[%c0_4, %c0_5] : memref<32x1xf32, #tpu.memory_space<vmem>>, vector<32x1xf32>
    %5 = vector.broadcast %4 : vector<32x1xf32> to vector<32x8xf32>
    %6 = arith.addf %3, %5 : vector<32x8xf32>
    %c0_6 = arith.constant 0 : index
    %c0_7 = arith.constant 0 : index
    %c0_8 = arith.constant 0 : index
    %7 = vector.load %arg5[%c0_6, %c0_7, %c0_8] : memref<1x32x8xf32, #tpu.memory_space<vmem>>, vector<1x32x8xf32>
    %8 = vector.shape_cast %7 : vector<1x32x8xf32> to vector<32x8xf32>
    %9 = vector.shape_cast %6 : vector<32x8xf32> to vector<1x32x8xf32>
    tpu.vector_store %arg5[%c0_6, %c0_7, %c0_8], %9 {strides = array<i32>} : memref<1x32x8xf32, #tpu.memory_space<vmem>>, vector<1x32x8xf32>,
    return
  }
  func.func @transform_0(%arg0: i32, %arg1: i32) -> (i32, i32, i32) {
    %c0_i32 = arith.constant 0 : i32
    %c0_i32_0 = arith.constant 0 : i32
    return %arg0, %c0_i32, %arg1 : i32, i32, i32
  }
  func.func @transform_1(%arg0: i32, %arg1: i32) -> (i32, i32) {
    %c0_i32 = arith.constant 0 : i32
    %c0_i32_0 = arith.constant 0 : i32
    %c0_i32_1 = arith.constant 0 : i32
    return %c0_i32, %c0_i32_0 : i32, i32
  }
  func.func @transform_2(%arg0: i32, %arg1: i32) -> (i32, i32) {
    %c0_i32 = arith.constant 0 : i32
    %c0_i32_0 = arith.constant 0 : i32
    %c0_i32_1 = arith.constant 0 : i32
    return %c0_i32, %c0_i32_0 : i32, i32
  }
  func.func @transform_3(%arg0: i32, %arg1: i32) -> (i32, i32, i32) {
    %c0_i32 = arith.constant 0 : i32
    %c0_i32_0 = arith.constant 0 : i32
    return %arg0, %c0_i32, %arg1 : i32, i32, i32
  }
}

</mosaic_0001>

<bundles_post_ra>
// kernel: mul.240
= control target key start
LH: loop header
LB: loop body
LE: loop exit
PB: predicated region body
PF: predicated region fallthrough
CT: control target
= control target key end

     0   :  { %vm7_vm0 = vcmask 39936   ;;  %s30_s8 = smov 5   ;;  %vm13_vm1 = vcmask 121936   ;;  %vm19_vm2 = vcmask 80936   ;;  %s47_s0 = inlined_call_operand.vmem [shape: f32[3,5], index: 0, kind: input, shape index: {}]   ;;  %s48_s1 = inlined_call_operand.vmem [shape: f32[15], index: 1, kind: output, shape index: {}]  }
   0x1   :  { %v4_v0 = vld [vmem:[%s47_s0] sm:$0xf]  ;;  %s29_s0 = smov 10  }
   0x2   :  { %5 = vst [vmem:[#allocation1] sm:$0xf] %v4_v0 }
   0x9   :  { %v10_v1 = vld [vmem:[#allocation1 + $0x2] sm:$0x1]   ;;  %v6_v2 = vld [vmem:[#allocation1] sm:$0x1]   ;;  %v16_v3 = vld [vmem:[#allocation1 + $0x1] sm:$0x1]  }
   0xa   :  { %11 = vrot.lane.b32.xlu0 %v10_v1, %s29_s0  ;;  %8 = vst.msk [vmem:[#allocation0] sm:$0x1] %vm7_vm0, %v6_v2  }
   0xe   :  { %17 = vrot.lane.b32.xlu0 %v16_v3, %s30_s8 }
  0x7c   :  { %v12_v4 = vpop.permute.xlu0 %11  }
  0x7d   :  { %14 = vst.msk [vmem:[#allocation0] sm:$0x1] %vm13_vm1, %v12_v4  }
  0x80   :  { %v18_v5 = vpop.permute.xlu0 %17  }
  0x81   :  { %20 = vst.msk [vmem:[#allocation0] sm:$0x1] %vm19_vm2, %v18_v5  }
  0x88   :  { %v24_v6 = vld [vmem:[#allocation0] sm:$0x1] }
  0x89   :  { %26 = vst [vmem:[%s48_s1] sm:$0x1] %v24_v6 }

// kernel: mul.7
= control target key start
LH: loop header
LB: loop body
LE: loop exit
PB: predicated region body
PF: predicated region fallthrough
CT: control target
= control target key end

     0   :  { %s56_s0 = inlined_call_operand.vmem [shape: f32[150,1], index: 0, kind: input, shape index: {}]   ;;  %s57_s1 = inlined_call_operand.vmem [shape: f32[150,1], index: 1, kind: input, shape index: {}]   ;;  %s58_s2 = inlined_call_operand.vmem [shape: f32[150,1], index: 2, kind: output, shape index: {}]  }
   0x1   :  { %v3_v0 = vld [vmem:[%s56_s0] sm:$0x1]  ;;  %v20_v2 = vld [vmem:[%s56_s0 + $0x1] sm:$0x1] }
   0x2   :  { %v4_v1 = vld [vmem:[%s57_s1] sm:$0x1]  ;;  %v21_v4 = vld [vmem:[%s57_s1 + $0x1] sm:$0x1] }
   0x3   :  { %v7_v3 = vmul.f32 %v4_v1, %v3_v0  ;;  %v16_v5 = vmul.f32 %v21_v4, %v20_v2 }
   0x5   :  { %9 = vst [vmem:[%s58_s2] sm:$0x1] %v7_v3  ;;  %22 = vst [vmem:[%s58_s2 + $0x1] sm:$0x1] %v16_v5 }

// kernel: msg3d_forward.22
= control target key start
LH: loop header
LB: loop body
LE: loop exit
PB: predicated region body
PF: predicated region fallthrough
CT: control target
= control target key end

     0   :  { %s1116_s15 = smov 0   ;;  %s1118_s16 = smov 0   ;;  %s1406_s0 = inlined_call_operand.vmem [shape: bf16[2,15,8], index: 0, kind: input, shape index: {}]   ;;  %s1407_s1 = inlined_call_operand.vmem [shape: bf16[150,15], index: 1, kind: input, shape index: {}]   ;;  %s1408_s2 = inlined_call_operand.vmem [shape: f32[150,1], index: 2, kind: input, shape index: {}]   ;;  %s1409_s3 = inlined_call_operand.vmem [shape: f32[150,1], index: 3, kind: input, shape index: {}]   ;;  %s1410_s4 = inlined_call_operand.vmem [shape: bf16[2,150,8], index: 4, kind: output, shape index: {}]  }
   0x1   :  { %s1120_s17 = smov 0  }
   0x2 LB: > { %s26_s18 = sadd.s32 1, %s1083_s16  ;;  %p924_p0 = scmp.ge.s32.totalorder %s1087_s17, 1  ;;  %s1087_s17 = sphi %s1120_s17, %s14_s17   ;;  %s1083_s16 = sphi %s1118_s16, %s1412_s16   ;;  %s1079_s15 = sphi %s1116_s15, %s1411_s15  }
   0x3   : > { %p28_p1 = scmp.ge.s32.totalorder %s26_s18, 2  ;;  %p181_p2 = scmp.lt.s32.totalorder %s1087_s17, 3 }
   0x5   : > { %s1414_s18 = smov (%p28_p1, %s26_s18), 0  ;;  %p182_p3 = pnand %p924_p0, %p181_p2 }
   0x6   : > { %v456_v0 = vld [vmem:[%s1408_s2 + $0x10] sm:$0xff] (!%p182_p3)  ;;  %v454_v1 = vld [vmem:[%s1408_s2] sm:$0xff] (!%p182_p3)  ;;  %p213_p4 = scmp.lt.s32.totalorder (!%p182_p3), %s1079_s15, 1  ;;  %vm335_vm0 = vcmask (!%p182_p3), 1046528   ;;  %v1089_v2 = vmov (!%p182_p3), 0   ;;  %v457_v3 = vld [vmem:[%s1408_s2 + $0x18] sm:$0xff] (!%p182_p3) }
   0x7   : > { %185 = sbr.rel (%p182_p3) target bundleno = 264 (0x108), region = 36  ;;  %1053 = vset.pattern.permute.xlu1 (!%p182_p3), %v1089_v2  ;;  %1052 = vset.pattern.permute.xlu0 (!%p182_p3), %v1089_v2  ;;  %vm336_vm1 = vcmask (!%p182_p3), 1047552   ;;  %v455_v4 = vld [vmem:[%s1408_s2 + $0x8] sm:$0xff] (!%p182_p3)  ;;  %v1090_v5 = vmov (!%p182_p3), 65535   ;;  %vm304_vm2 = vcmask (!%p182_p3), 121856   ;;  %v1055_v7 = vld [vmem:[%s1407_s1] sm:$0xff] (!%p182_p3)  }
   0x8   : > { %485 = vperm.xlu1 (!%p182_p3), %1053, %v456_v0   ;;  %475 = vperm.xlu0 (!%p182_p3), %1052, %v454_v1   ;;  %v337_v6 = vsel (!%p182_p3), %vm335_vm0, 4294967295, %v1090_v5  ;;  %v1056_v9 = vld [vmem:[%s1407_s1 + $0x30] sm:$0xff] (!%p182_p3)   ;;  %v459_v11 = vld [vmem:[%s1408_s2 + $0x28] sm:$0xff] (!%p182_p3)  ;;  %v458_v12 = vld [vmem:[%s1408_s2 + $0x20] sm:$0xff] (!%p182_p3)  ;;  %vm816_vm3 = vcmask (!%p182_p3), 60416   ;;  %vm835_vm4 = vcmask (!%p182_p3), 59392  }
   0x9   : > { %v338_v8 = vsel (!%p182_p3), %vm336_vm1, %v337_v6, 0  ;;  %1003 = vmatprep.mubr.msk.bf16.mxu0 (!%p182_p3), %vm304_vm2, %v1055_v7  ;;  %1015 = vmatprep.mubr.msk.bf16.mxu1 (!%p182_p3), %vm304_vm2, %v1056_v9  ;;  %v461_v14 = vld [vmem:[%s1408_s2 + $0x38] sm:$0xff] (!%p182_p3)  ;;  %v460_v15 = vld [vmem:[%s1408_s2 + $0x30] sm:$0xff] (!%p182_p3)  ;;  %v1057_v16 = vld [vmem:[%s1407_s1 + $0x8] sm:$0xff] (!%p182_p3)  }
   0xa   : > { %v1058_v17 = vld [vmem:[%s1407_s1 + $0x38] sm:$0xff] (!%p182_p3)   ;;  %v1059_v18 = vld [vmem:[%s1407_s1 + $0x10] sm:$0xff] (!%p182_p3)   ;;  %v1060_v19 = vld [vmem:[%s1407_s1 + $0x40] sm:$0xff] (!%p182_p3)  }
   0xb   : > { %v463_v20 = vld [vmem:[%s1408_s2 + $0x48] sm:$0xff] (!%p182_p3)  ;;  %v462_v21 = vld [vmem:[%s1408_s2 + $0x40] sm:$0xff] (!%p182_p3)  ;;  %v465_v22 = vld [vmem:[%s1408_s2 + $0x58] sm:$0xff] (!%p182_p3) }
   0xc   : > { %490 = vperm.xlu1 (!%p182_p3), %1053, %v457_v3   ;;  %480 = vperm.xlu0 (!%p182_p3), %1052, %v455_v4   ;;  %v464_v23 = vld [vmem:[%s1408_s2 + $0x50] sm:$0xff] (!%p182_p3)  ;;  %v1061_v24 = vld [vmem:[%s1407_s1 + $0x18] sm:$0xff] (!%p182_p3)   ;;  %v1062_v25 = vld [vmem:[%s1407_s1 + $0x48] ss:$0 sps:$4 sm:$0x77] (!%p182_p3)  }
   0xd   : > { %v1063_v26 = vld [vmem:[%s1407_s1 + $0x20] sm:$0xff] (!%p182_p3)   ;;  %v467_v27 = vld [vmem:[%s1408_s2 + $0x68] sm:$0xff] (!%p182_p3)  ;;  %v469_v29 = vld [vmem:[%s1408_s2 + $0x78] sm:$0xff] (!%p182_p3) }
   0xe   : > { %s1416_s15 = smov (!%p213_p4, %s1079_s15), 1  ;;  %v466_v28 = vld [vmem:[%s1408_s2 + $0x60] sm:$0xff]  ;;  %v468_v30 = vld [vmem:[%s1408_s2 + $0x70] sm:$0xff]  ;;  %v1064_v31 = vld [vmem:[%s1407_s1 + $0x28] sm:$0xff]  }
   0xf   : > { %s970_s29 = sshll.u32 %s1416_s15, 3  ;;  %v471_v32 = vld [vmem:[%s1408_s2 + $0x88] sm:$0xff]  ;;  %v470_v33 = vld [vmem:[%s1408_s2 + $0x80] sm:$0xff]  ;;  %v472_v35 = vld [vmem:[%s1408_s2 + $0x90] sm:$0x3f]  ;;  %s1025_s5 = smul.u32 76, %s1416_s15 }
  0x10   : > { %s220_s8 = scalar_lea.vmem %s1406_s0, %s970_s29  ;;  %500 = vperm.xlu1 %1053, %v459_v11   ;;  %495 = vperm.xlu0 %1052, %v458_v12   ;;  %v587_v34 = vld [vmem:[%s1409_s3] sm:$0xff]  ;;  %v589_v36 = vld [vmem:[%s1409_s3 + $0x10] sm:$0xff]  ;;  %v588_v37 = vld [vmem:[%s1409_s3 + $0x8] sm:$0xff] }
  0x11   : > { %v1054_v10 = vld [vmem:[%s220_s8] sm:$0xff]   ;;  %v590_v39 = vld [vmem:[%s1409_s3 + $0x18] sm:$0xff]  ;;  %v593_v40 = vld [vmem:[%s1409_s3 + $0x30] sm:$0xff]  ;;  %s1338_s7 = scalar_lea.vmem %s1410_s4, %s1025_s5 }
  0x12   : > { %v340_v13 = vand.u32 %v1054_v10, %v338_v8  ;;  %v591_v38 = vld [vmem:[%s1409_s3 + $0x20] sm:$0xff]  ;;  %v592_v41 = vld [vmem:[%s1409_s3 + $0x28] sm:$0xff]  ;;  %v594_v43 = vld [vmem:[%s1409_s3 + $0x38] sm:$0xff] }
  0x13   : > { %v595_v42 = vld [vmem:[%s1409_s3 + $0x40] sm:$0xff]  ;;  %v597_v44 = vld [vmem:[%s1409_s3 + $0x50] sm:$0xff]  ;;  %v596_v45 = vld [vmem:[%s1409_s3 + $0x48] sm:$0xff] }
  0x14   : > { %1001 = vmatprep.subr.bf16.mxu0 %v340_v13  ;;  %1023 = vmatprep.subr.bf16.mxu1 %v340_v13  ;;  %v599_v46 = vld [vmem:[%s1409_s3 + $0x60] sm:$0xff]  ;;  %v598_v47 = vld [vmem:[%s1409_s3 + $0x58] sm:$0xff]  ;;  %v601_v48 = vld [vmem:[%s1409_s3 + $0x70] sm:$0xff] }
  0x15   : > { %1002 = vmatpush3.bf16.msra.mxu0 %v340_v13  ;;  %1024 = vmatpush3.bf16.msra.mxu1 %v340_v13  ;;  %v600_v49 = vld [vmem:[%s1409_s3 + $0x68] sm:$0xff]  ;;  %v603_v50 = vld [vmem:[%s1409_s3 + $0x80] sm:$0xff]  ;;  %v602_v51 = vld [vmem:[%s1409_s3 + $0x78] sm:$0xff] }
  0x16   : > { %510 = vperm.xlu1 %1053, %v461_v14   ;;  %505 = vperm.xlu0 %1052, %v460_v15   ;;  %v605_v52 = vld [vmem:[%s1409_s3 + $0x90] sm:$0x3f]  ;;  %v604_v53 = vld [vmem:[%s1409_s3 + $0x88] sm:$0xff] }
  0x18   : > { %1004 = vmatmul.mubr.msk.bf16.vlgmr.msra.gmra.mrb[0].mxu0 %vm304_vm2, %v1057_v16  ;;  %1016 = vmatmul.mubr.msk.bf16.vlgmr.msra.gmra.mrb[0].mxu1 %vm304_vm2, %v1058_v17 }
  0x19   : > { %1007 = vmatprep.mubr.msk.bf16.mxu0 %vm304_vm2, %v1059_v18  ;;  %1019 = vmatprep.mubr.msk.bf16.mxu1 %vm304_vm2, %v1060_v19 }
  0x1a   : > { %520 = vperm.xlu1 %1053, %v463_v20   ;;  %515 = vperm.xlu0 %1052, %v462_v21  }
  0x1e   : > { %530 = vperm.xlu1 %1053, %v465_v22   ;;  %525 = vperm.xlu0 %1052, %v464_v23  }
  0x20   : > { %1008 = vmatmul.mubr.msk.bf16.gmra.mrb[4].mxu0 %vm304_vm2, %v1061_v24  ;;  %1020 = vmatmul.mubr.msk.bf16.gmra.mrb[4].mxu1 %vm304_vm2, %v1062_v25 }
  0x21   : > { %1011 = vmatprep.mubr.msk.bf16.mxu0 %vm304_vm2, %v1063_v26 }
  0x22   : > { %540 = vperm.xlu1 %1053, %v467_v27   ;;  %535 = vperm.xlu0 %1052, %v466_v28  }
  0x26   : > { %550 = vperm.xlu1 %1053, %v469_v29   ;;  %545 = vperm.xlu0 %1052, %v468_v30  }
  0x28   : > { %1012 = vmatmul.mubr.msk.bf16.gmra.mrb[8].mxu0 %vm304_vm2, %v1064_v31 }
  0x2a   : > { %560 = vperm.xlu1 %1053, %v471_v32   ;;  %555 = vperm.xlu0 %1052, %v470_v33  }
  0x2e   : > { %608 = vperm.xlu1 %1053, %v587_v34   ;;  %565 = vperm.xlu0 %1052, %v472_v35  }
  0x32   : > { %618 = vperm.xlu1 %1053, %v589_v36   ;;  %613 = vperm.xlu0 %1052, %v588_v37  }
  0x36   : > { %628 = vperm.xlu1 %1053, %v591_v38   ;;  %623 = vperm.xlu0 %1052, %v590_v39  }
  0x3a   : > { %638 = vperm.xlu1 %1053, %v593_v40   ;;  %633 = vperm.xlu0 %1052, %v592_v41  }
  0x3e   : > { %648 = vperm.xlu1 %1053, %v595_v42   ;;  %643 = vperm.xlu0 %1052, %v594_v43  }
  0x42   : > { %658 = vperm.xlu1 %1053, %v597_v44   ;;  %653 = vperm.xlu0 %1052, %v596_v45  }
  0x46   : > { %668 = vperm.xlu1 %1053, %v599_v46   ;;  %663 = vperm.xlu0 %1052, %v598_v47  }
  0x4a   : > { %678 = vperm.xlu1 %1053, %v601_v48   ;;  %673 = vperm.xlu0 %1052, %v600_v49  }
  0x4e   : > { %688 = vperm.xlu1 %1053, %v603_v50   ;;  %683 = vperm.xlu0 %1052, %v602_v51  }
  0x52   : > { %698 = vperm.xlu1 %1053, %v605_v52   ;;  %693 = vperm.xlu0 %1052, %v604_v53  }
  0x87   : > { %v486_v54 = vpop.permute.xlu1 %485  ;;  %v476_v55 = vpop.permute.xlu0 %475 }
  0x8b   : > { %v491_v56 = vpop.permute.xlu1 %490  ;;  %v481_v57 = vpop.permute.xlu0 %480 }
  0x8f   : > { %v1294_v58 = vpop.permute.xlu1 %500  ;;  %v1296_v59 = vpop.permute.xlu0 %495 }
  0x95   : > { %v1298_v60 = vpop.permute.xlu1 %510  ;;  %v1300_v61 = vpop.permute.xlu0 %505 }
  0x99   : > { %v1302_v62 = vpop.permute.xlu1 %520  ;;  %v1304_v63 = vpop.permute.xlu0 %515 }
  0x9d   : > { %v1306_v0 = vpop.permute.xlu1 %530  ;;  %v1308_v1 = vpop.permute.xlu0 %525 }
  0xa1   : > { %v541_v2 = vpop.permute.xlu1 %540  ;;  %v536_v3 = vpop.permute.xlu0 %535 }
  0xa5   : > { %v551_v4 = vpop.permute.xlu1 %550  ;;  %v546_v5 = vpop.permute.xlu0 %545 }
  0xa9   : > { %v1310_v6 = vpop.permute.xlu1 %560  ;;  %v1312_v7 = vpop.permute.xlu0 %555 }
  0xad   : > { %v609_v8 = vpop.permute.xlu1 %608  ;;  %v1314_v9 = vpop.permute.xlu0 %565 }
  0xb1   : > { %v619_v10 = vpop.permute.xlu1 %618  ;;  %v614_v11 = vpop.permute.xlu0 %613 }
  0xb5   : > { %v1316_v12 = vpop.permute.xlu1 %628  ;;  %v624_v13 = vpop.permute.xlu0 %623 }
  0xb9   : > { %v1318_v14 = vpop.permute.xlu1 %638  ;;  %v1320_v15 = vpop.permute.xlu0 %633 }
  0xbd   : > { %v1322_v16 = vpop.permute.xlu1 %648  ;;  %v1324_v17 = vpop.permute.xlu0 %643 }
  0xc1   : > { %v1326_v18 = vpop.permute.xlu1 %658  ;;  %v1328_v19 = vpop.permute.xlu0 %653 }
  0xc5   : > { %v669_v20 = vpop.permute.xlu1 %668  ;;  %v1330_v21 = vpop.permute.xlu0 %663 }
  0xc9   : > { %v679_v22 = vpop.permute.xlu1 %678  ;;  %v674_v23 = vpop.permute.xlu0 %673 }
  0xcd   : > { %v1332_v24 = vpop.permute.xlu1 %688  ;;  %v684_v41 = vpop.permute.xlu0 %683 }
  0xeb   : > { %v1005_v25 = vpop.f32.mrb[0].mxu0  ;;  %v1017_v26 = vpop.f32.mrb[0].mxu1 }
  0xec   : > { %v570_v27 = vmul.f32 %v1005_v25, %v486_v54  ;;  %v582_v28 = vmul.f32 %v1017_v26, %v546_v5  ;;  %v376_v29 = vpop.f32.mrb[1].mxu0  ;;  %v424_v30 = vpop.f32.mrb[1].mxu1 }
  0xed   : > { %v568_v31 = vmul.f32 %v476_v55, %v376_v29  ;;  %v580_v32 = vmul.f32 %v536_v3, %v424_v30  ;;  %v1006_v33 = vpop.f32.mrb[2].mxu0  ;;  %v1018_v34 = vpop.f32.mrb[2].mxu1 }
  0xee   : > { %v703_v35 = vadd.f32 %v619_v10, %v570_v27  ;;  %v715_v36 = vadd.f32 %v679_v22, %v582_v28  ;;  %v571_v37 = vmul.f32 %v1006_v33, %v491_v56  ;;  %v583_v38 = vmul.f32 %v1018_v34, %v551_v4  ;;  %v379_v39 = vpop.f32.mrb[3].mxu0  ;;  %v427_v40 = vpop.f32.mrb[3].mxu1 }
  0xef   : > { %v701_v42 = vadd.f32 %v609_v8, %v568_v31  ;;  %v713_v43 = vadd.f32 %v669_v20, %v580_v32  ;;  %v569_v44 = vmul.f32 %v481_v57, %v379_v39  ;;  %v581_v45 = vmul.f32 %v541_v2, %v427_v40  ;;  %v699_v54 = vpop.permute.xlu1 %698 }
  0xf0   : > { %v722_v46 = vmax.f32 %v703_v35, 0.0  ;;  %v734_v47 = vmax.f32 %v715_v36, 0.0  ;;  %v704_v48 = vadd.f32 %v624_v13, %v571_v37  ;;  %v716_v49 = vadd.f32 %v684_v41, %v583_v38  ;;  %v694_v38 = vpop.permute.xlu0 %693 }
  0xf1   : > { %v720_v50 = vmax.f32 %v701_v42, 0.0  ;;  %v732_v51 = vmax.f32 %v713_v43, 0.0  ;;  %v702_v52 = vadd.f32 %v614_v11, %v569_v44  ;;  %v714_v53 = vadd.f32 %v674_v23, %v581_v45 }
  0xf2   : > { %v973_v55 = vpack.c.bf16 %v722_v46, %v722_v46  ;;  %v985_v56 = vpack.c.bf16 %v734_v47, %v734_v47  ;;  %v723_v57 = vmax.f32 %v704_v48, 0.0  ;;  %v735_v2 = vmax.f32 %v716_v49, 0.0 }
  0xf3   : > { %v971_v3 = vpack.c.bf16 %v720_v50, %v720_v50  ;;  %v983_v4 = vpack.c.bf16 %v732_v51, %v732_v51  ;;  %v721_v5 = vmax.f32 %v702_v52, 0.0  ;;  %v733_v8 = vmax.f32 %v714_v53, 0.0  ;;  %v1009_v10 = vpop.f32.mrb[4].mxu0  ;;  %v1021_v13 = vpop.f32.mrb[4].mxu1 }
  0xf4   : > { %819 = vst.msk [vmem:[%s1338_s7 + $0x8] sm:$0xf] %vm816_vm3, %v973_v55  ;;  %831 = vst.msk [vmem:[%s1338_s7 + $0x38] sm:$0xf] %vm816_vm3, %v985_v56  ;;  %v974_v11 = vpack.c.bf16 %v723_v57, %v723_v57  ;;  %v986_v20 = vpack.c.bf16 %v735_v2, %v735_v2  ;;  %v574_v22 = vmul.f32 %v1009_v10, %v1300_v61  ;;  %v392_v25 = vpop.f32.mrb[5].mxu0  ;;  %v440_v26 = vpop.f32.mrb[5].mxu1 }
  0xf5   : > { %v586_v23 = vmul.f32 %v1021_v13, %v1314_v9  ;;  %817 = vst.msk [vmem:[%s1338_s7] sm:$0xf] %vm816_vm3, %v971_v3  ;;  %829 = vst.msk [vmem:[%s1338_s7 + $0x30] sm:$0xf] %vm816_vm3, %v983_v4  ;;  %v972_v27 = vpack.c.bf16 %v721_v5, %v721_v5  ;;  %v984_v28 = vpack.c.bf16 %v733_v8, %v733_v8  ;;  %v1010_v31 = vpop.f32.mrb[6].mxu0  ;;  %v1022_v32 = vpop.f32.mrb[6].mxu1 }
  0xf6   : > { %v572_v29 = vmul.f32 %v1296_v59, %v392_v25  ;;  %v584_v30 = vmul.f32 %v1312_v7, %v440_v26  ;;  %820 = vst.msk [vmem:[%s1338_s7 + $0xc] sm:$0xf] %vm816_vm3, %v974_v11  ;;  %832 = vst.msk [vmem:[%s1338_s7 + $0x3c] sm:$0xf] %vm816_vm3, %v986_v20  ;;  %v707_v61 = vadd.f32 %v1318_v14, %v574_v22  ;;  %v395_v34 = vpop.f32.mrb[7].mxu0  ;;  %v443_v35 = vpop.f32.mrb[7].mxu1 }
  0xf7   : > { %v719_v9 = vadd.f32 %v699_v54, %v586_v23  ;;  %v575_v33 = vmul.f32 %v1010_v31, %v1298_v60  ;;  %818 = vst.msk [vmem:[%s1338_s7 + $0x4] sm:$0xf] %vm816_vm3, %v972_v27  ;;  %830 = vst.msk [vmem:[%s1338_s7 + $0x34] sm:$0xf] %vm816_vm3, %v984_v28  ;;  %v573_v36 = vmul.f32 %v1294_v58, %v395_v34 }
  0xf8   : > { %v705_v59 = vadd.f32 %v1316_v12, %v572_v29  ;;  %v717_v7 = vadd.f32 %v1332_v24, %v584_v30  ;;  %v585_v37 = vmul.f32 %v1310_v6, %v443_v35  ;;  %v726_v39 = vmax.f32 %v707_v61, 0.0 }
  0xf9   : > { %v738_v14 = vmax.f32 %v719_v9, 0.0  ;;  %v708_v60 = vadd.f32 %v1324_v17, %v575_v33  ;;  %v706_v42 = vadd.f32 %v1320_v15, %v573_v36 }
  0xfa   : > { %v724_v40 = vmax.f32 %v705_v59, 0.0  ;;  %v736_v41 = vmax.f32 %v717_v7, 0.0  ;;  %v718_v12 = vadd.f32 %v694_v38, %v585_v37  ;;  %v977_v24 = vpack.c.bf16 %v726_v39, %v726_v39 }
  0xfb   : > { %v989_v43 = vpack.c.bf16 %v738_v14, %v738_v14  ;;  %v727_v58 = vmax.f32 %v708_v60, 0.0  ;;  %v725_v45 = vmax.f32 %v706_v42, 0.0  ;;  %v1013_v47 = vpop.f32.mrb[8].mxu0 }
  0xfc   : > { %v975_v44 = vpack.c.bf16 %v724_v40, %v724_v40  ;;  %v987_v6 = vpack.c.bf16 %v736_v41, %v736_v41  ;;  %v737_v46 = vmax.f32 %v718_v12, 0.0  ;;  %823 = vst.msk [vmem:[%s1338_s7 + $0x18] sm:$0xf] %vm816_vm3, %v977_v24  ;;  %v578_v48 = vmul.f32 %v1013_v47, %v1308_v1  ;;  %v408_v15 = vpop.f32.mrb[9].mxu0 }
  0xfd   : > { %836 = vst.msk [vmem:[%s1338_s7 + $0x48] sm:$0x7] %vm835_vm4, %v989_v43  ;;  %v978_v17 = vpack.c.bf16 %v727_v58, %v727_v58  ;;  %v976_v49 = vpack.c.bf16 %v725_v45, %v725_v45  ;;  %v576_v51 = vmul.f32 %v1304_v63, %v408_v15  ;;  %v1014_v52 = vpop.f32.mrb[10].mxu0 }
  0xfe   : > { %821 = vst.msk [vmem:[%s1338_s7 + $0x10] sm:$0xf] %vm816_vm3, %v975_v44  ;;  %833 = vst.msk [vmem:[%s1338_s7 + $0x40] sm:$0xf] %vm816_vm3, %v987_v6  ;;  %v988_v50 = vpack.c.bf16 %v737_v46, %v737_v46  ;;  %v711_v53 = vadd.f32 %v1326_v18, %v578_v48  ;;  %v579_v54 = vmul.f32 %v1014_v52, %v1306_v0  ;;  %v411_v55 = vpop.f32.mrb[11].mxu0 }
  0xff   : > { %824 = vst.msk [vmem:[%s1338_s7 + $0x1c] sm:$0xf] %vm816_vm3, %v978_v17  ;;  %822 = vst.msk [vmem:[%s1338_s7 + $0x14] sm:$0xf] %vm816_vm3, %v976_v49  ;;  %v709_v1 = vadd.f32 %v1322_v16, %v576_v51  ;;  %v577_v63 = vmul.f32 %v1302_v62, %v411_v55 }
 0x100   : > { %834 = vst.msk [vmem:[%s1338_s7 + $0x44] sm:$0xf] %vm816_vm3, %v988_v50  ;;  %v730_v56 = vmax.f32 %v711_v53, 0.0  ;;  %v712_v57 = vadd.f32 %v1330_v21, %v579_v54 }
 0x101   : > { %v728_v2 = vmax.f32 %v709_v1, 0.0  ;;  %v710_v18 = vadd.f32 %v1328_v19, %v577_v63 }
 0x102   : > { %v981_v3 = vpack.c.bf16 %v730_v56, %v730_v56  ;;  %v731_v0 = vmax.f32 %v712_v57, 0.0 }
 0x103   : > { %v979_v4 = vpack.c.bf16 %v728_v2, %v728_v2  ;;  %v729_v5 = vmax.f32 %v710_v18, 0.0 }
 0x104   : > { %827 = vst.msk [vmem:[%s1338_s7 + $0x28] sm:$0xf] %vm816_vm3, %v981_v3  ;;  %v982_v8 = vpack.c.bf16 %v731_v0, %v731_v0 }
 0x105   : > { %825 = vst.msk [vmem:[%s1338_s7 + $0x20] sm:$0xf] %vm816_vm3, %v979_v4  ;;  %v980_v10 = vpack.c.bf16 %v729_v5, %v729_v5 }
 0x106   : > { %828 = vst.msk [vmem:[%s1338_s7 + $0x2c] sm:$0xf] %vm816_vm3, %v982_v8 }
 0x107   : > { %826 = vst.msk [vmem:[%s1338_s7 + $0x24] sm:$0xf] %vm816_vm3, %v980_v10 }
 0x108 PF: > { %s14_s17 = sadd.s32 1, %s1087_s17   ;;  %s1411_s15 = smov %s1083_s16 }
 0x109   : > { %p11_p5 = scmp.ge.s32.totalorder %s14_s17, 4   ;;  %s1412_s16 = smov %s1414_s18 }
 0x10b   :  { %13 = sbr.rel (!%p11_p5) target bundleno = 2 (0x2), region = 66 }

// kernel: msg3d_forward.23
= control target key start
LH: loop header
LB: loop body
LE: loop exit
PB: predicated region body
PF: predicated region fallthrough
CT: control target
= control target key end

     0   :  { %10 = vsyncpa [#allocation3], 0  ;;  %s747_s18 = smov 0   ;;  %s749_s19 = smov 0   ;;  %s865_s0 = inlined_call_operand.vmem [shape: bf16[2,30,40], index: 0, kind: input, shape index: {}]   ;;  %s866_s1 = inlined_call_operand.vmem [shape: bf16[30,30], index: 1, kind: input, shape index: {}]   ;;  %s867_s2 = inlined_call_operand.vmem [shape: f32[30,1], index: 2, kind: input, shape index: {}]   ;;  %s868_s3 = inlined_call_operand.vmem [shape: f32[30,1], index: 3, kind: input, shape index: {}]   ;;  %s869_s4 = inlined_call_operand.hbm [shape: f32[30,1], index: 4, kind: input, shape index: {}]   ;;  %s870_s5 = inlined_call_operand.vmem [shape: bf16[2,30,40], index: 5, kind: output, shape index: {}]  }
   0x1   :  { %s751_s20 = smov 0  }
   0x2 LB: > { %s571_s21 = sadd.s32 4294967295, %s711_s20   ;;  %s28_s22 = sadd.s32 1, %s707_s19  ;;  %s711_s20 = sphi %s751_s20, %s16_s20   ;;  %s707_s19 = sphi %s749_s19, %s880_s19   ;;  %s703_s18 = sphi %s747_s18, %s879_s18  }
   0x3   : > { %p30_p0 = scmp.ge.s32.totalorder %s28_s22, 2  ;;  %p573_p1 = scmp.ge.s32.totalorder %s711_s20, 1 }
   0x4   : > { %p173_p2 = scmp.lt.s32.totalorder %s711_s20, 3  ;;  %p772_p4 = scmp.eq.s32.totalorder %s571_s21, 0 }
   0x5   : > { %s882_s22 = smov (%p30_p0, %s28_s22), 0  ;;  %s713_s25 = smov [#allocation2]  }
   0x6   : > { %p768_p3 = pnand %p573_p1, %p173_p2  ;;  %s194_s26 = sshll.u32 %s713_s25, 4  ;;  %s195_s26 = int_to_ptr.vmem [resolvable:$true] %s194_s26 }
   0x7   : > { %s875_s24 = scalar_select %p772_p4, 1, 0 }
   0x8   : > { %s874_s23 = scalar_select %p768_p3, 1, 0 }
   0x9   : > { %p617_p5 = pneg %p768_p3  ;;  %s657_s30 = scalar_lea.hbm %s869_s4, 512 }
   0xa   : > { %p658_p7 = scmp.ne.s32.totalorder %s869_s4, %s657_s30  ;;  %p664_p11 = scmp.lt.u32.totalorder %s657_s30, %s869_s4 }
   0xb   : > { %p780_p6 = pnand %p772_p4, %p617_p5 }
   0xd   : > { %p659_p8 = pneg %p780_p6 }
   0xf   : > { %p660_p9 = pnand %p659_p8, %p658_p7 }
  0x11   : > { %p661_p10 = pneg %p660_p9 }
  0x13   : > { %p666_p12 = pnand %p664_p11, %p661_p10 }
  0x15   : > { %669 = shalt.err (!%p666_p12)
}
  0x16   : > { %s670_s10 = scalar_lea.vmem %s195_s26, 512  ;;  %p678_p2 = scmp.lt.s32.totalorder %s195_s26, %s195_s26 }
  0x17   : > { %p671_p13 = scmp.ne.s32.totalorder %s195_s26, %s670_s10  ;;  %p679_p5 = scmp.lt.s32.totalorder %s670_s10, %s670_s10 }
  0x19   : > { %p673_p0 = pnand %p671_p13, %p659_p8  ;;  %p680_p4 = por %p679_p5, %p678_p2 }
  0x1b   : > { %p674_p1 = pneg %p673_p0 }
  0x1d   : > { %p681_p3 = pnand %p680_p4, %p674_p1 }
  0x1f   : > { %684 = shalt.err (!%p681_p3)
}
  0x20   : > { %s714_s11 = smov 128   ;;  %s715_s12 = smov 8  }
  0x21   : > { %620 = dma.hbm_to_vmem [thread:$0]  (!%p780_p6), %s869_s4, 512, %s195_s26, [#allocation3], %s714_s11, %s714_s11, %s715_s12  }
  0x22   : > { %p877_p7 = scmp.ne.s32.totalorder %s874_s23, 0 }
  0x23   : > { %p878_p9 = scmp.ne.s32.totalorder (!%p877_p7), %s875_s24, 0 }
  0x24   : > { %221 = sbr.rel (%p877_p7) target bundleno = 283 (0x11b), region = 40 }
  0x2b   : > { %698 = dma.done.wait (%p878_p9), [#allocation3], 512  }
  0x2c   : > { %700 = vsyncadd (%p878_p9), [#allocation3], 4294966784  ;;  %p255_p3 = scmp.lt.s32.totalorder %s703_s18, 1  ;;  %v716_v0 = vmov 0   ;;  %vm308_vm0 = vcmask 1046528   ;;  %vm301_vm1 = vcmask 244736  }
  0x2d   : > { %652 = vset.pattern.permute.xlu1 %v716_v0  ;;  %651 = vset.pattern.permute.xlu0 %v716_v0  ;;  %v655_v3 = vld [vmem:[%s866_s1] sm:$0xff]   ;;  %v363_v4 = vld [vmem:[%s867_s2 + $0x10] sm:$0xff]  ;;  %v656_v7 = vld [vmem:[%s866_s1 + $0x8] sm:$0x7f]   ;;  %vm469_vm8 = vcmask 322560   ;;  %vm473_vm11 = vcmask 321536  }
  0x2e   : > { %s884_s18 = smov (!%p255_p3, %s703_s18), 1  ;;  %608 = vmatprep.mubr.msk.bf16.mxu0 %vm301_vm1, %v655_v3  ;;  %v361_v6 = vld [vmem:[%s867_s2] sm:$0xff]  ;;  %377 = vperm.xlu1 %652, %v363_v4   ;;  %v364_v8 = vld [vmem:[%s867_s2 + $0x18] sm:$0x3f]  ;;  %v362_v9 = vld [vmem:[%s867_s2 + $0x8] sm:$0xff] }
  0x2f   : > { %s594_s15 = sshll.u32 %s884_s18, 4  ;;  %367 = vperm.xlu0 %651, %v361_v6   ;;  %v390_v10 = vld [vmem:[%s868_s3 + $0x8] sm:$0xff]  ;;  %v389_v11 = vld [vmem:[%s868_s3] sm:$0xff]  ;;  %v392_v14 = vld [vmem:[%s868_s3 + $0x18] sm:$0x3f] }
  0x30   : > { %s262_s21 = scalar_lea.vmem %s865_s0, %s594_s15  ;;  %v418_v12 = vld [vmem:[#allocation2 + $0x8] sm:$0xff]  ;;  %v417_v13 = vld [vmem:[#allocation2] sm:$0xff]  ;;  %v391_v15 = vld [vmem:[%s868_s3 + $0x10] sm:$0xff]  ;;  %s270_s25 = scalar_lea.vmem %s870_s5, %s594_s15 }
  0x31   : > { %v653_v1 = vld [vmem:[%s262_s21] sm:$0xff]   ;;  %v654_v2 = vld [vmem:[%s262_s21 + $0x8] sm:$0x7f]   ;;  %vm422_vm2 = vcmp.gt.f32.partialorder %v418_v12, 0.0  ;;  %vm421_vm3 = vcmp.gt.f32.partialorder %v417_v13, 0.0  ;;  %v419_v17 = vld [vmem:[#allocation2 + $0x10] sm:$0xff] }
  0x32   : > { %604 = vmatprep.subr.bf16.mxu0 %v653_v1  ;;  %v310_v5 = vsel %vm308_vm0, %v654_v2, 0  ;;  %382 = vperm.xlu1 %652, %v364_v8   ;;  %v420_v16 = vld [vmem:[#allocation2 + $0x18] sm:$0x3f]  ;;  %v430_v18 = vsel %vm422_vm2, 1, %v716_v0  ;;  %v429_v19 = vsel %vm421_vm3, 1, %v716_v0  ;;  %vm423_vm5 = vcmp.gt.f32.partialorder %v419_v17, 0.0 }
  0x33   : > { %605 = vmatpush3.bf16.msra.mxu0 %v653_v1  ;;  %372 = vperm.xlu0 %651, %v362_v9   ;;  %vm424_vm4 = vcmp.gt.f32.partialorder %v420_v16, 0.0  ;;  %v431_v21 = vsel %vm423_vm5, 1, %v716_v0 }
  0x34   : > { %612 = vmatprep.subr.msk.bf16.mxu0 %vm308_vm0, %v654_v2  ;;  %v432_v20 = vsel %vm424_vm4, 1, %v716_v0 }
  0x36   : > { %400 = vperm.xlu1 %652, %v390_v10  }
  0x37   : > { %607 = vmatpush3.bf16.msra.mxu0 %v310_v5  ;;  %395 = vperm.xlu0 %651, %v389_v11  }
  0x3a   : > { %609 = vmatmul.mubr.msk.bf16.vlgmr.msra.gmra.mrb[0].mxu0 %vm301_vm1, %v656_v7  ;;  %410 = vperm.xlu1 %652, %v392_v14  }
  0x3b   : > { %405 = vperm.xlu0 %651, %v391_v15  }
  0x3e   : > { %437 = vperm.xlu1 %652, %v430_v18  }
  0x3f   : > { %434 = vperm.xlu0 %651, %v429_v19  }
  0x42   : > { %443 = vperm.xlu1 %652, %v432_v20  }
  0x43   : > { %440 = vperm.xlu0 %651, %v431_v21  }
  0xad   : > { %v378_v23 = vpop.permute.xlu1 %377 }
  0xae   : > { %v368_v22 = vpop.permute.xlu0 %367 }
  0xb1   : > { %v383_v25 = vpop.permute.xlu1 %382 }
  0xb2   : > { %v373_v24 = vpop.permute.xlu0 %372 }
  0xb5   : > { %v401_v27 = vpop.permute.xlu1 %400 }
  0xb6   : > { %v396_v26 = vpop.permute.xlu0 %395 }
  0xb9   : > { %v411_v29 = vpop.permute.xlu1 %410 }
  0xba   : > { %v406_v28 = vpop.permute.xlu0 %405 }
  0xbd   : > { %v438_v31 = vpop.permute.xlu1 %437 }
  0xbe   : > { %v435_v30 = vpop.permute.xlu0 %434  ;;  %vm446_vm10 = vcmp.eq.s32.totalorder %v438_v31, 1 }
  0xbf   : > { %vm445_vm7 = vcmp.eq.s32.totalorder %v435_v30, 1 }
  0xc1   : > { %v444_v43 = vpop.permute.xlu1 %443 }
  0xc2   : > { %v441_v37 = vpop.permute.xlu0 %440  ;;  %vm448_vm9 = vcmp.eq.s32.totalorder %v444_v43, 1 }
  0xc3   : > { %vm447_vm6 = vcmp.eq.s32.totalorder %v441_v37, 1 }
 0x10d   : > { %v610_v32 = vpop.f32.mrb[0].mxu0 }
 0x10e   : > { %v387_v33 = vmul.f32 %v610_v32, %v378_v23  ;;  %v346_v34 = vpop.f32.mrb[1].mxu0 }
 0x10f   : > { %v385_v35 = vmul.f32 %v368_v22, %v346_v34  ;;  %v611_v36 = vpop.f32.mrb[2].mxu0 }
 0x110   : > { %v415_v38 = vadd.f32 %v406_v28, %v387_v33  ;;  %v388_v39 = vmul.f32 %v611_v36, %v383_v25  ;;  %v349_v40 = vpop.f32.mrb[3].mxu0 }
 0x111   : > { %v413_v41 = vadd.f32 %v396_v26, %v385_v35  ;;  %v386_v42 = vmul.f32 %v373_v24, %v349_v40 }
 0x112   : > { %v427_v44 = vmax.f32 %v415_v38, 0.0  ;;  %v416_v45 = vadd.f32 %v411_v29, %v388_v39 }
 0x113   : > { %v425_v46 = vmax.f32 %v413_v41, 0.0  ;;  %v414_v47 = vadd.f32 %v401_v27, %v386_v42 }
 0x114   : > { %v451_v48 = vsel %vm447_vm6, %v427_v44, %v415_v38  ;;  %v428_v49 = vmax.f32 %v416_v45, 0.0 }
 0x115   : > { %v598_v50 = vpack.c.bf16 %v451_v48, %v451_v48  ;;  %v449_v51 = vsel %vm445_vm7, %v425_v46, %v413_v41  ;;  %v426_v52 = vmax.f32 %v414_v47, 0.0 }
 0x116   : > { %v596_v53 = vpack.c.bf16 %v449_v51, %v449_v51  ;;  %v452_v54 = vsel %vm448_vm9, %v428_v49, %v416_v45 }
 0x117   : > { %472 = vst.msk [vmem:[%s270_s25 + $0x8] sm:$0xf] %vm469_vm8, %v598_v50  ;;  %v599_v55 = vpack.c.bf16 %v452_v54, %v452_v54  ;;  %v450_v56 = vsel %vm446_vm10, %v426_v52, %v414_v47 }
 0x118   : > { %470 = vst.msk [vmem:[%s270_s25] sm:$0xf] %vm469_vm8, %v596_v53  ;;  %v597_v57 = vpack.c.bf16 %v450_v56, %v450_v56 }
 0x119   : > { %474 = vst.msk [vmem:[%s270_s25 + $0xc] sm:$0x7] %vm473_vm11, %v599_v55 }
 0x11a   : > { %471 = vst.msk [vmem:[%s270_s25 + $0x4] sm:$0xf] %vm469_vm8, %v597_v57 }
 0x11b PF: > { %s16_s20 = sadd.s32 1, %s711_s20   ;;  %s879_s18 = smov %s707_s19 }
 0x11c   : > { %p13_p4 = scmp.ge.s32.totalorder %s16_s20, 4   ;;  %s880_s19 = smov %s882_s22 }
 0x11e   :  { %15 = sbr.rel (!%p13_p4) target bundleno = 2 (0x2), region = 75 }
 0x125   :  { %502 = vsyncpa [#allocation3], 1 }
 0x126   :  { %504 = vsyncpa [#allocation3 + $0x1], 1 }

// kernel: msg3d_forward.24
= control target key start
LH: loop header
LB: loop body
LE: loop exit
PB: predicated region body
PF: predicated region fallthrough
CT: control target
= control target key end

     0   :  { %s1306_s18 = smov 0   ;;  %s1461_s0 = inlined_call_operand.vmem [shape: bf16[2,24,80], index: 0, kind: input, shape index: {}]   ;;  %s1462_s1 = inlined_call_operand.vmem [shape: bf16[2,6,40], index: 1, kind: input, shape index: {}]   ;;  %s1463_s2 = inlined_call_operand.vmem [shape: bf16[2,30,40], index: 2, kind: input, shape index: {}]   ;;  %s1464_s3 = inlined_call_operand.vmem [shape: bf16[4,3,6,6], index: 3, kind: input, shape index: {}]   ;;  %s1465_s4 = inlined_call_operand.vmem [shape: f32[30,1], index: 4, kind: input, shape index: {}]   ;;  %s1466_s5 = inlined_call_operand.vmem [shape: bf16[2,30,40], index: 5, kind: output, shape index: {}]  }
   0x1 LB: > { %s1053_s19 = sadd.s32 4294967295, %s1265_s18   ;;  %p1057_p0 = scmp.ge.s32.totalorder %s1265_s18, 1  ;;  %s1265_s18 = sphi %s1306_s18, %s15_s18  }
   0x2   : > { %p206_p1 = scmp.lt.s32.totalorder %s1265_s18, 3 }
   0x4   : > { %p207_p2 = pnand %p1057_p0, %p206_p1 }
   0x5   : > { %p243_p3 = scmp.lt.s32.totalorder (!%p207_p2), %s1053_s19, 1  ;;  %v1267_v0 = vmov (!%p207_p2), 0.0   ;;  %vm1268_vm0 = vmmov (!%p207_p2), 0   ;;  %s1269_s24 = smov (!%p207_p2), 108   ;;  %v908_v8 = vld [vmem:[%s1465_s4] sm:$0xff] (!%p207_p2)  ;;  %v1275_v9 = vmov (!%p207_p2), 0  }
   0x6   : > { %210 = sbr.rel (%p207_p2) target bundleno = 421 (0x1a5), region = 40  ;;  %1131 = vmatprep.subr.bf16.mxu0 (!%p207_p2), %v1267_v0  ;;  %1133 = vmatprep.mubr.msk.bf16.mxu0 (!%p207_p2), %vm1268_vm0, %v1267_v0  ;;  %s1270_s25 = smov (!%p207_p2), 113   ;;  %v909_v10 = vld [vmem:[%s1465_s4 + $0x8] sm:$0xff] (!%p207_p2)  ;;  %v910_v11 = vld [vmem:[%s1465_s4 + $0x10] sm:$0xff] (!%p207_p2)  ;;  %v911_v12 = vld [vmem:[%s1465_s4 + $0x18] sm:$0x3f] (!%p207_p2) }
   0x7   : > { %1149 = vmatprep.subr.bf16.mxu1 (!%p207_p2), %v1267_v0  ;;  %1151 = vmatprep.mubr.msk.bf16.mxu1 (!%p207_p2), %vm1268_vm0, %v1267_v0  ;;  %s1271_s26 = smov (!%p207_p2), 123   ;;  %s1272_s27 = smov (!%p207_p2), 93   ;;  %vm276_vm1 = vcmask (!%p207_p2), 1042432   ;;  %v1064_v16 = vld [vmem:[%s1464_s3 + $0x4] sm:$0x7] (!%p207_p2)  ;;  %vm272_vm2 = vcmask (!%p207_p2), 48128  }
   0x8   : > { %s1273_s28 = smov (!%p207_p2), 103   ;;  %s1274_s29 = smov (!%p207_p2), 88   ;;  %1253 = vset.pattern.permute.xlu1 (!%p207_p2), %v1275_v9  ;;  %1254 = vset.pattern.permute.xlu0 (!%p207_p2), %v1275_v9  ;;  %v1071_v21 = vld [vmem:[%s1464_s3 + $0x10] sm:$0x7] (!%p207_p2)  ;;  %v264_v24 = vld [vmem:[%s1464_s3] sm:$0x7] (!%p207_p2) }
   0x9   : > { %v1070_v27 = vld [vmem:[%s1464_s3 + $0xc] sm:$0x7] (!%p207_p2)  ;;  %v1068_v30 = vld [vmem:[%s1464_s3 + $0x8] sm:$0x7] (!%p207_p2)  ;;  %v1075_v33 = vld [vmem:[%s1464_s3 + $0x14] sm:$0x7] (!%p207_p2) }
   0xa   : > { %v1078_v35 = vld [vmem:[%s1464_s3 + $0x1c] sm:$0x7] (!%p207_p2)  ;;  %v1085_v38 = vld [vmem:[%s1464_s3 + $0x28] sm:$0x7] (!%p207_p2)  ;;  %v1077_v41 = vld [vmem:[%s1464_s3 + $0x18] sm:$0x7] (!%p207_p2) }
   0xb   : > { %v1084_v44 = vld [vmem:[%s1464_s3 + $0x24] sm:$0x7] (!%p207_p2)  ;;  %v1082_v46 = vld [vmem:[%s1464_s3 + $0x20] sm:$0x7] (!%p207_p2)  ;;  %v1089_v47 = vld [vmem:[%s1464_s3 + $0x2c] sm:$0x7] (!%p207_p2) }
   0xc   : > { %vm972_vm3 = vcmask (!%p207_p2), 321536   ;;  %vm902_vm4 = vcmask (!%p207_p2), 1045504   ;;  %vm968_vm5 = vcmask (!%p207_p2), 322560   ;;  %vm904_vm6 = vcmask (!%p207_p2), 1043456  }
   0xd   : > { %s1468_s19 = smov (!%p243_p3, %s1053_s19), 1  ;;  %vm906_vm7 = vcmask 1041408  }
   0xe   : > { %s1235_s20 = smul.u32 12, %s1468_s19  ;;  %s1097_s14 = sshll.u32 %s1468_s19, 4 }
   0xf   : > { %s1437_s17 = scalar_lea.vmem %s1463_s2, %s1097_s14 }
  0x10   : > { %s247_s23 = scalar_lea.vmem %s1461_s0, %s1235_s20  ;;  %s1059_s20 = sshll.u32 %s1468_s19, 2  ;;  %v939_v50 = vld [vmem:[%s1437_s17 + $0xc] sm:$0x7]  ;;  %v1104_v63 = vld [vmem:[%s1437_s17] sm:$0xff]  }
  0x11   : > { %v1255_v1 = vld [vmem:[%s247_s23] ss:$0 sps:$4 sm:$0x77]   ;;  %v1256_v2 = vld [vmem:[%s247_s23] sm:$0x38]   ;;  %v943_v53 = vunpack.c.l.bf16 %v939_v50 }
  0x12   : > { %270 = vrot.lane.b32.xlu0 %v1255_v1, %s1269_s24  ;;  %320 = vrot.lane.b32.xlu1 %v1255_v1, %s1270_s25  ;;  %v430_v3 = vrot.slane %v1256_v2, 3  ;;  %v1257_v4 = vld [vmem:[%s247_s23 + $0x8] ss:$0 sps:$4 sm:$0xee]  }
  0x13   : > { %v1258_v5 = vld [vmem:[%s247_s23 + $0x4] sm:$0x1c]   ;;  %v743_v6 = vrot.slane %v1257_v4, 1  ;;  %s251_s23 = scalar_lea.vmem %s1462_s1, %s1059_s20  ;;  %v1105_v4 = vunpack.c.l.bf16 %v1104_v63 }
  0x14   : > { %v1326_v7 = vrot.slane %v1258_v5, 2  ;;  %v891_v51 = vld [vmem:[%s251_s23] sm:$0x7] }
  0x15   : > { %v892_v52 = vunpack.c.l.bf16 %v891_v51 }
  0x16   : > { %431 = vrot.lane.b32.xlu0 %v430_v3, %s1269_s24  ;;  %479 = vrot.lane.b32.xlu1 %v430_v3, %s1271_s26  ;;  %v642_v36 = vsel %vm276_vm1, %v1326_v7, 0  ;;  %s1447_s26 = scalar_lea.vmem %s1466_s5, %s1097_s14 }
  0x1a   : > { %529 = vrot.lane.b32.xlu1 %v430_v3, %s1272_s27  ;;  %370 = vrot.lane.b32.xlu0 %v1255_v1, %s1273_s28 }
  0x1e   : > { %744 = vrot.lane.b32.xlu1 %v743_v6, %s1269_s24  ;;  %590 = vrot.lane.b32.xlu0 %v1326_v7, %s1269_s24 }
  0x22   : > { %792 = vrot.lane.b32.xlu0 %v743_v6, %s1270_s25  ;;  %686 = vrot.lane.b32.xlu1 %v1326_v7, %s1274_s29 }
  0x26   : > { %842 = vrot.lane.b32.xlu0 %v743_v6, %s1273_s28  ;;  %914 = vperm.xlu1 %1253, %v908_v8  }
  0x2a   : > { %919 = vperm.xlu0 %1254, %v909_v10   ;;  %924 = vperm.xlu1 %1253, %v910_v11  }
  0x2e   : > { %929 = vperm.xlu1 %1253, %v911_v12  }
  0x84   : > { %v271_v13 = vpop.permute.xlu0 %270  ;;  %v321_v14 = vpop.permute.xlu1 %320 }
  0x85   : > { %v278_v15 = vsel %vm276_vm1, %v271_v13, 0  ;;  %v326_v17 = vsel %vm276_vm1, %v321_v14, 0 }
  0x86   : > { %1132 = vmatpush3.bf16.msra.mxu0 %v278_v15 }
  0x87   : > { %1137 = vmatprep.subr.bf16.mxu0 %v1267_v0 }
  0x88   : > { %v432_v18 = vpop.permute.xlu0 %431  ;;  %v480_v19 = vpop.permute.xlu1 %479 }
  0x89   : > { %1134 = vmatmul.mubr.msk.bf16.vlgmr.msra.gmra.mrb[0].mxu0 %vm272_vm2, %v1064_v16  ;;  %v437_v20 = vsel %vm276_vm1, %v432_v18, 0  ;;  %v485_v22 = vsel %vm276_vm1, %v480_v19, 0  ;;  %v1106_v16 = vunpack.c.h.bf16 %v1104_v63 }
  0x8a   : > { %1138 = vmatpush3.bf16.msra.mxu0 %v326_v17  ;;  %1150 = vmatpush3.bf16.msra.mxu1 %v437_v20  ;;  %v938_v17 = vld [vmem:[%s1437_s17 + $0x8] sm:$0xf] }
  0x8b   : > { %1155 = vmatprep.subr.bf16.mxu1 %v1267_v0  ;;  %1139 = vmatprep.mubr.msk.bf16.mxu0 %vm1268_vm0, %v1267_v0 }
  0x8c   : > { %1143 = vmatprep.subr.bf16.mxu0 %v1267_v0  ;;  %v371_v23 = vpop.permute.xlu0 %370  ;;  %v530_v26 = vpop.permute.xlu1 %529 }
  0x8d   : > { %1152 = vmatmul.mubr.msk.bf16.vlgmr.msra.gmra.mrb[0].mxu1 %vm272_vm2, %v1071_v21  ;;  %v376_v25 = vsel %vm276_vm1, %v371_v23, 0  ;;  %v535_v28 = vsel %vm276_vm1, %v530_v26, 0 }
  0x8e   : > { %1156 = vmatpush3.bf16.msra.mxu1 %v485_v22  ;;  %1157 = vmatprep.mubr.msk.bf16.mxu1 %vm1268_vm0, %v1267_v0 }
  0x8f   : > { %1161 = vmatprep.subr.bf16.mxu1 %v1267_v0 }
  0x90   : > { %v591_v29 = vpop.permute.xlu0 %590  ;;  %v745_v32 = vpop.permute.xlu1 %744 }
  0x91   : > { %v596_v31 = vsel %vm276_vm1, %v591_v29, 0  ;;  %v750_v34 = vsel %vm276_vm1, %v745_v32, 0 }
  0x94   : > { %v793_v37 = vpop.permute.xlu0 %792  ;;  %v687_v40 = vpop.permute.xlu1 %686 }
  0x95   : > { %1140 = vmatmul.mubr.msk.bf16.vlgmr.msra.gmra.mrb[0].mxu0 %vm272_vm2, %v264_v24  ;;  %v798_v39 = vsel %vm276_vm1, %v793_v37, 0  ;;  %v692_v42 = vsel %vm276_vm1, %v687_v40, 0 }
  0x96   : > { %1144 = vmatpush3.bf16.msra.mxu0 %v376_v25  ;;  %1145 = vmatprep.mubr.msk.bf16.mxu0 %vm1268_vm0, %v1267_v0  ;;  %v942_v25 = vunpack.c.l.bf16 %v938_v17 }
  0x97   : > { %1167 = vmatprep.subr.bf16.mxu0 %v1267_v0 }
  0x98   : > { %v843_v43 = vpop.permute.xlu0 %842 }
  0x99   : > { %1158 = vmatmul.mubr.msk.bf16.vlgmr.msra.gmra.mrb[0].mxu1 %vm272_vm2, %v1070_v27  ;;  %v848_v45 = vsel %vm276_vm1, %v843_v43, 0 }
  0x9a   : > { %1162 = vmatpush3.bf16.msra.mxu1 %v535_v28  ;;  %1163 = vmatprep.mubr.msk.bf16.mxu1 %vm1268_vm0, %v1267_v0 }
  0x9b   : > { %1185 = vmatprep.subr.bf16.mxu1 %v1267_v0 }
  0xa1   : > { %1146 = vmatmul.mubr.msk.bf16.vlgmr.msra.gmra.mrb[0].mxu0 %vm272_vm2, %v1068_v30 }
  0xa2   : > { %1168 = vmatpush3.bf16.msra.mxu0 %v596_v31  ;;  %1169 = vmatprep.mubr.msk.bf16.mxu0 %vm1268_vm0, %v1267_v0 }
  0xa3   : > { %1173 = vmatprep.subr.bf16.mxu0 %v1267_v0 }
  0xa5   : > { %1164 = vmatmul.mubr.msk.bf16.vlgmr.msra.gmra.mrb[0].mxu1 %vm272_vm2, %v1075_v33  ;;  %v915_v48 = vpop.permute.xlu1 %914 }
  0xa6   : > { %1186 = vmatpush3.bf16.msra.mxu1 %v750_v34  ;;  %1187 = vmatprep.mubr.msk.bf16.mxu1 %vm1268_vm0, %v1267_v0 }
  0xa7   : > { %1191 = vmatprep.subr.bf16.mxu1 %v1267_v0 }
  0xa9   : > { %1170 = vmatmul.mubr.msk.bf16.vlgmr.msra.gmra.mrb[4].mxu0 %vm272_vm2, %v1078_v35  ;;  %v925_v49 = vpop.permute.xlu1 %924  ;;  %v920_v14 = vpop.permute.xlu0 %919 }
  0xaa   : > { %1174 = vmatpush3.bf16.msra.mxu0 %v642_v36  ;;  %1175 = vmatprep.mubr.msk.bf16.mxu0 %vm1268_vm0, %v1267_v0 }
  0xab   : > { %1179 = vmatprep.subr.bf16.mxu0 %v1267_v0 }
  0xad   : > { %1188 = vmatmul.mubr.msk.bf16.vlgmr.msra.gmra.mrb[4].mxu1 %vm272_vm2, %v1085_v38  ;;  %v930_v54 = vpop.permute.xlu1 %929 }
  0xae   : > { %1192 = vmatpush3.bf16.msra.mxu1 %v798_v39  ;;  %1193 = vmatprep.mubr.msk.bf16.mxu1 %vm1268_vm0, %v1267_v0  ;;  %v935_v55 = vadd.f32 %v930_v54, %v892_v52 }
  0xaf   : > { %1197 = vmatprep.subr.bf16.mxu1 %v1267_v0 }
  0xb0   : > { %v947_v56 = vadd.f32 %v943_v53, %v935_v55 }
  0xb2   : > { %v951_v57 = vmax.f32 %v947_v56, 0.0 }
  0xb4   : > { %v1102_v58 = vpack.c.bf16 %v951_v57, %v951_v57 }
  0xb5   : > { %1176 = vmatmul.mubr.msk.bf16.vlgmr.msra.gmra.mrb[4].mxu0 %vm272_vm2, %v1077_v41 }
  0xb6   : > { %1180 = vmatpush3.bf16.msra.mxu0 %v692_v42  ;;  %1181 = vmatprep.mubr.msk.bf16.mxu0 %vm1268_vm0, %v1267_v0  ;;  %973 = vst.msk [vmem:[%s1447_s26 + $0xc] sm:$0x7] %vm972_vm3, %v1102_v58 }
  0xb9   : > { %1194 = vmatmul.mubr.msk.bf16.vlgmr.msra.gmra.mrb[4].mxu1 %vm272_vm2, %v1084_v44 }
  0xba   : > { %1198 = vmatpush3.bf16.msra.mxu1 %v848_v45  ;;  %1199 = vmatprep.mubr.msk.bf16.mxu1 %vm1268_vm0, %v1267_v0 }
  0xc1   : > { %1182 = vmatmul.mubr.msk.bf16.vlgmr.msra.gmra.mrb[4].mxu0 %vm272_vm2, %v1082_v46 }
  0xc5   : > { %1200 = vmatmul.mubr.msk.bf16.vlgmr.msra.gmra.mrb[4].mxu1 %vm272_vm2, %v1089_v47 }
 0x174   : > { %v412_v59 = vpop.f32.mrb[0].mxu0 }
 0x175   : > { %v1147_v60 = vpop.f32.mrb[1].mxu0 }
 0x176   : > { %v415_v61 = vpop.f32.mrb[2].mxu0 }
 0x177   : > { %v1148_v62 = vpop.f32.mrb[3].mxu0 }
 0x178   : > { %v571_v0 = vpop.f32.mrb[0].mxu1 }
 0x179   : > { %v894_v1 = vrot.slane %v571_v0, 2  ;;  %v1165_v2 = vpop.f32.mrb[1].mxu1 }
 0x17a   : > { %v574_v3 = vpop.f32.mrb[2].mxu1 }
 0x17b   : > { %v903_v5 = vsel %vm902_vm4, %v412_v59, %v894_v1  ;;  %v1166_v6 = vpop.f32.mrb[3].mxu1 }
 0x17c   : > { %v932_v7 = vadd.f32 %v915_v48, %v903_v5 }
 0x17e   : > { %v944_v8 = vadd.f32 %v1105_v4, %v932_v7 }
 0x180   : > { %v948_v9 = vmax.f32 %v944_v8, 0.0 }
 0x182   : > { %v1099_v10 = vpack.c.bf16 %v948_v9, %v948_v9 }
 0x184   : > { %969 = vst.msk [vmem:[%s1447_s26] sm:$0xf] %vm968_vm5, %v1099_v10 }
 0x194   : > { %v728_v11 = vpop.f32.mrb[4].mxu0 }
 0x195   : > { %v897_v12 = vrot.slane %v728_v11, 4  ;;  %v1183_v13 = vpop.f32.mrb[5].mxu0 }
 0x196   : > { %v731_v15 = vpop.f32.mrb[6].mxu0 }
 0x197   : > { %v1184_v18 = vpop.f32.mrb[7].mxu0  ;;  %v905_v19 = vsel %vm904_vm6, %v894_v1, %v897_v12 }
 0x198   : > { %v933_v20 = vadd.f32 %v920_v14, %v905_v19  ;;  %v884_v21 = vpop.f32.mrb[4].mxu1 }
 0x199   : > { %v900_v22 = vrot.slane %v884_v21, 6  ;;  %v1201_v23 = vpop.f32.mrb[5].mxu1 }
 0x19a   : > { %v945_v24 = vadd.f32 %v1106_v16, %v933_v20  ;;  %v887_v26 = vpop.f32.mrb[6].mxu1 }
 0x19b   : > { %v907_v27 = vsel %vm906_vm7, %v897_v12, %v900_v22  ;;  %v1202_v28 = vpop.f32.mrb[7].mxu1 }
 0x19c   : > { %v949_v29 = vmax.f32 %v945_v24, 0.0  ;;  %v934_v30 = vadd.f32 %v925_v49, %v907_v27 }
 0x19e   : > { %v1100_v31 = vpack.c.bf16 %v949_v29, %v949_v29  ;;  %v946_v32 = vadd.f32 %v942_v25, %v934_v30 }
 0x1a0   : > { %970 = vst.msk [vmem:[%s1447_s26 + $0x4] sm:$0xf] %vm968_vm5, %v1100_v31  ;;  %v950_v33 = vmax.f32 %v946_v32, 0.0 }
 0x1a2   : > { %v1101_v34 = vpack.c.bf16 %v950_v33, %v950_v33 }
 0x1a4   : > { %971 = vst.msk [vmem:[%s1447_s26 + $0x8] sm:$0xf] %vm968_vm5, %v1101_v34 }
 0x1a5 PF: > { %s15_s18 = sadd.s32 1, %s1265_s18  }
 0x1a6   : > { %p12_p4 = scmp.ge.s32.totalorder %s15_s18, 4  }
 0x1a8   :  { %14 = sbr.rel (!%p12_p4) target bundleno = 1 (0x1), region = 87 }

// kernel: msg3d_forward.29
= control target key start
LH: loop header
LB: loop body
LE: loop exit
PB: predicated region body
PF: predicated region fallthrough
CT: control target
= control target key end

     0   :  { %s1249_s15 = smov 0   ;;  %s1251_s16 = smov 0   ;;  %s1597_s0 = inlined_call_operand.vmem [shape: bf16[2,150,8], index: 0, kind: input, shape index: {}]   ;;  %s1598_s1 = inlined_call_operand.vmem [shape: bf16[150,150], index: 1, kind: input, shape index: {}]   ;;  %s1599_s2 = inlined_call_operand.vmem [shape: f32[150,1], index: 2, kind: input, shape index: {}]   ;;  %s1600_s3 = inlined_call_operand.vmem [shape: f32[150,1], index: 3, kind: input, shape index: {}]   ;;  %s1601_s4 = inlined_call_operand.vmem [shape: bf16[2,150,8], index: 4, kind: output, shape index: {}]  }
   0x1   :  { %s1253_s17 = smov 0  }
   0x2 LB: > { %s26_s18 = sadd.s32 1, %s1217_s16  ;;  %p1029_p0 = scmp.ge.s32.totalorder %s1221_s17, 1  ;;  %s1221_s17 = sphi %s1253_s17, %s14_s17   ;;  %s1217_s16 = sphi %s1251_s16, %s1603_s16   ;;  %s1213_s15 = sphi %s1249_s15, %s1602_s15  }
   0x3   : > { %p28_p1 = scmp.ge.s32.totalorder %s26_s18, 2  ;;  %p181_p2 = scmp.lt.s32.totalorder %s1221_s17, 3 }
   0x5   : > { %s1605_s18 = smov (%p28_p1, %s26_s18), 0  ;;  %p182_p3 = pnand %p1029_p0, %p181_p2 }
   0x6   : > { %p213_p4 = scmp.lt.s32.totalorder (!%p182_p3), %s1213_s15, 1  ;;  %v561_v0 = vld [vmem:[%s1599_s2 + $0x10] sm:$0xff] (!%p182_p3)  ;;  %v559_v1 = vld [vmem:[%s1599_s2] sm:$0xff] (!%p182_p3)  ;;  %v1223_v2 = vmov (!%p182_p3), 0   ;;  %v562_v3 = vld [vmem:[%s1599_s2 + $0x18] sm:$0xff] (!%p182_p3)  ;;  %vm412_vm0 = vcmask (!%p182_p3), 179200  }
   0x7   : > { %185 = sbr.rel (%p182_p3) target bundleno = 313 (0x139), region = 36  ;;  %447 = vmatprep.subr.bf16.mxu0 (!%p182_p3), %v1223_v2  ;;  %1112 = vmatprep.subr.bf16.mxu1 (!%p182_p3), %v1223_v2  ;;  %v560_v4 = vld [vmem:[%s1599_s2 + $0x8] sm:$0xff] (!%p182_p3)  ;;  %v1175_v7 = vld [vmem:[%s1598_s1 + $0x54] ss:$8 sps:$4 sm:$0xff] (!%p182_p3)   ;;  %v563_v9 = vld [vmem:[%s1599_s2 + $0x20] sm:$0xff] (!%p182_p3)  ;;  %vm443_vm1 = vcmask (!%p182_p3), 1042432  }
   0x8   : > { %1159 = vset.pattern.permute.xlu1 (!%p182_p3), %v1223_v2  ;;  %1158 = vset.pattern.permute.xlu0 (!%p182_p3), %v1223_v2  ;;  %v1172_v5 = vld [vmem:[%s1598_s1 + $0x4] ss:$8 sps:$4 sm:$0xff] (!%p182_p3)   ;;  %v566_v11 = vld [vmem:[%s1599_s2 + $0x38] sm:$0xff] (!%p182_p3)  ;;  %v565_v12 = vld [vmem:[%s1599_s2 + $0x30] sm:$0xff] (!%p182_p3)  ;;  %vm921_vm2 = vcmask (!%p182_p3), 60416   ;;  %vm940_vm3 = vcmask (!%p182_p3), 59392  }
   0x9   : > { %590 = vperm.xlu1 (!%p182_p3), %1159, %v561_v0   ;;  %580 = vperm.xlu0 (!%p182_p3), %1158, %v559_v1   ;;  %v564_v6 = vld [vmem:[%s1599_s2 + $0x28] sm:$0xff] (!%p182_p3)  ;;  %v567_v15 = vld [vmem:[%s1599_s2 + $0x40] sm:$0xff] (!%p182_p3)  ;;  %v570_v17 = vld [vmem:[%s1599_s2 + $0x58] sm:$0xff] (!%p182_p3) }
   0xa   : > { %1062 = vmatprep.mubr.msk.bf16.mxu0 (!%p182_p3), %vm412_vm0, %v1172_v5  ;;  %1067 = vmatprep.mubr.msk.bf16.mxu1 (!%p182_p3), %vm412_vm0, %v1175_v7  ;;  %v568_v14 = vld [vmem:[%s1599_s2 + $0x48] sm:$0xff] (!%p182_p3)  ;;  %v569_v18 = vld [vmem:[%s1599_s2 + $0x50] sm:$0xff] (!%p182_p3)  ;;  %v571_v21 = vld [vmem:[%s1599_s2 + $0x60] sm:$0xff] (!%p182_p3) }
   0xb   : > { %v572_v20 = vld [vmem:[%s1599_s2 + $0x68] sm:$0xff] (!%p182_p3)  ;;  %v574_v23 = vld [vmem:[%s1599_s2 + $0x78] sm:$0xff] (!%p182_p3)  ;;  %v573_v24 = vld [vmem:[%s1599_s2 + $0x70] sm:$0xff] (!%p182_p3) }
   0xc   : > { %v576_v26 = vld [vmem:[%s1599_s2 + $0x88] sm:$0xff] (!%p182_p3)  ;;  %v575_v27 = vld [vmem:[%s1599_s2 + $0x80] sm:$0xff] (!%p182_p3)  ;;  %v577_v30 = vld [vmem:[%s1599_s2 + $0x90] sm:$0x3f] (!%p182_p3) }
   0xd   : > { %595 = vperm.xlu1 (!%p182_p3), %1159, %v562_v3   ;;  %585 = vperm.xlu0 (!%p182_p3), %1158, %v560_v4   ;;  %v692_v29 = vld [vmem:[%s1600_s3] sm:$0xff] (!%p182_p3)  ;;  %v694_v33 = vld [vmem:[%s1600_s3 + $0x10] sm:$0xff] (!%p182_p3)  ;;  %v693_v34 = vld [vmem:[%s1600_s3 + $0x8] sm:$0xff] (!%p182_p3) }
   0xe   : > { %s1607_s15 = smov (!%p213_p4, %s1213_s15), 1  ;;  %v1170_v36 = vld [vmem:[%s1598_s1] ss:$8 sps:$4 sm:$0xff]   ;;  %v1173_v37 = vld [vmem:[%s1598_s1 + $0x50] ss:$8 sps:$4 sm:$0xff]  }
   0xf   : > { %s1132_s25 = smul.u32 76, %s1607_s15  ;;  %v696_v38 = vld [vmem:[%s1600_s3 + $0x20] sm:$0xff]  ;;  %v695_v39 = vld [vmem:[%s1600_s3 + $0x18] sm:$0xff]  ;;  %v698_v42 = vld [vmem:[%s1600_s3 + $0x30] sm:$0xff] }
  0x10   : > { %v1176_v40 = vld [vmem:[%s1598_s1 + $0x14] ss:$8 sps:$4 sm:$0xff]   ;;  %v1178_v41 = vld [vmem:[%s1598_s1 + $0x64] ss:$8 sps:$4 sm:$0xff]   ;;  %v1180_v44 = vld [vmem:[%s1598_s1 + $0x10] ss:$8 sps:$4 sm:$0xff]  }
  0x11   : > { %s1294_s6 = scalar_lea.vmem %s1597_s0, %s1132_s25  ;;  %605 = vperm.xlu1 %1159, %v564_v6   ;;  %600 = vperm.xlu0 %1158, %v563_v9   ;;  %v697_v43 = vld [vmem:[%s1600_s3 + $0x28] sm:$0xff]  ;;  %v700_v46 = vld [vmem:[%s1600_s3 + $0x40] sm:$0xff]  ;;  %v699_v47 = vld [vmem:[%s1600_s3 + $0x38] sm:$0xff]  ;;  %s1531_s9 = scalar_lea.vmem %s1601_s4, %s1132_s25 }
  0x12   : > { %v1160_v8 = vld [vmem:[%s1294_s6] sm:$0xff]   ;;  %v1161_v10 = vld [vmem:[%s1294_s6 + $0x8] sm:$0xff]   ;;  %v1162_v13 = vld [vmem:[%s1294_s6 + $0x10] sm:$0xff]  }
  0x13   : > { %448 = vmatpush1.bf16.msra.mxu0 %v1160_v8  ;;  %1122 = vmatpush1.bf16.msra.mxu1 %v1160_v8  ;;  %v1163_v16 = vld [vmem:[%s1294_s6 + $0x18] sm:$0xff]   ;;  %v1164_v19 = vld [vmem:[%s1294_s6 + $0x20] sm:$0xff]   ;;  %v1165_v22 = vld [vmem:[%s1294_s6 + $0x28] sm:$0xff]  }
  0x14   : > { %449 = vmatprep.subr.bf16.mxu0 %v1223_v2  ;;  %1113 = vmatprep.subr.bf16.mxu1 %v1223_v2  ;;  %v1166_v25 = vld [vmem:[%s1294_s6 + $0x30] sm:$0xff]   ;;  %v1167_v28 = vld [vmem:[%s1294_s6 + $0x38] sm:$0xff]   ;;  %v1168_v31 = vld [vmem:[%s1294_s6 + $0x40] sm:$0xff]  }
  0x15   : > { %615 = vperm.xlu1 %1159, %v566_v11   ;;  %610 = vperm.xlu0 %1158, %v565_v12   ;;  %v1169_v32 = vld [vmem:[%s1294_s6 + $0x48] ss:$0 sps:$4 sm:$0x77]   ;;  %v1182_v48 = vld [vmem:[%s1598_s1 + $0x24] ss:$8 sps:$4 sm:$0xff]   ;;  %v702_v50 = vld [vmem:[%s1600_s3 + $0x50] sm:$0xff] }
  0x16   : > { %v445_v35 = vsel %vm443_vm1, %v1169_v32, 0  ;;  %v1181_v45 = vld [vmem:[%s1598_s1 + $0x60] ss:$8 sps:$4 sm:$0xff]   ;;  %v1184_v49 = vld [vmem:[%s1598_s1 + $0x74] ss:$8 sps:$4 sm:$0xff]  }
  0x17   : > { %450 = vmatpush1.bf16.msra.mxu0 %v1161_v10  ;;  %1123 = vmatpush1.bf16.msra.mxu1 %v1161_v10  ;;  %v701_v51 = vld [vmem:[%s1600_s3 + $0x48] sm:$0xff]  ;;  %v1187_v53 = vld [vmem:[%s1598_s1 + $0x70] ss:$8 sps:$4 sm:$0xff]   ;;  %v704_v54 = vld [vmem:[%s1600_s3 + $0x60] sm:$0xff] }
  0x18   : > { %451 = vmatprep.subr.bf16.mxu0 %v1223_v2  ;;  %1114 = vmatprep.subr.bf16.mxu1 %v1223_v2  ;;  %v1186_v52 = vld [vmem:[%s1598_s1 + $0x20] ss:$8 sps:$4 sm:$0xff]   ;;  %v703_v55 = vld [vmem:[%s1600_s3 + $0x58] sm:$0xff]  ;;  %v1190_v57 = vld [vmem:[%s1598_s1 + $0x84] ss:$8 sps:$4 sm:$0xff]  }
  0x19   : > { %625 = vperm.xlu1 %1159, %v568_v14   ;;  %620 = vperm.xlu0 %1158, %v567_v15   ;;  %v1188_v56 = vld [vmem:[%s1598_s1 + $0x34] ss:$8 sps:$4 sm:$0xff]   ;;  %v705_v59 = vld [vmem:[%s1600_s3 + $0x68] sm:$0xff]  ;;  %v1192_v61 = vld [vmem:[%s1598_s1 + $0x30] ss:$8 sps:$4 sm:$0xff]  }
  0x1a   : > { %v706_v58 = vld [vmem:[%s1600_s3 + $0x70] sm:$0xff]  ;;  %v1193_v62 = vld [vmem:[%s1598_s1 + $0x80] ss:$8 sps:$4 sm:$0xff]   ;;  %v707_v0 = vld [vmem:[%s1600_s3 + $0x78] sm:$0xff] }
  0x1b   : > { %452 = vmatpush1.bf16.msra.mxu0 %v1162_v13  ;;  %1124 = vmatpush1.bf16.msra.mxu1 %v1162_v13  ;;  %v248_v60 = vld [vmem:[%s1598_s1 + $0x90] sm:$0x77]  ;;  %v708_v63 = vld [vmem:[%s1600_s3 + $0x80] sm:$0xff]  ;;  %v709_v4 = vld [vmem:[%s1600_s3 + $0x88] sm:$0xff] }
  0x1c   : > { %453 = vmatprep.subr.bf16.mxu0 %v1223_v2  ;;  %1115 = vmatprep.subr.bf16.mxu1 %v1223_v2  ;;  %v1194_v1 = vld [vmem:[%s1598_s1 + $0x44] ss:$8 sps:$4 sm:$0xff]   ;;  %v710_v3 = vld [vmem:[%s1600_s3 + $0x90] sm:$0x3f]  ;;  %v1197_v5 = vld [vmem:[%s1598_s1 + $0x40] ss:$8 sps:$4 sm:$0xff]   ;;  %v1050_v6 = vcombine.low %v248_v60, %v248_v60 }
  0x1d   : > { %635 = vperm.xlu1 %1159, %v570_v17   ;;  %630 = vperm.xlu0 %1158, %v569_v18  }
  0x1f   : > { %454 = vmatpush1.bf16.msra.mxu0 %v1163_v16  ;;  %1125 = vmatpush1.bf16.msra.mxu1 %v1163_v16 }
  0x20   : > { %455 = vmatprep.subr.bf16.mxu0 %v1223_v2  ;;  %1116 = vmatprep.subr.bf16.mxu1 %v1223_v2 }
  0x21   : > { %645 = vperm.xlu1 %1159, %v572_v20   ;;  %640 = vperm.xlu0 %1158, %v571_v21  }
  0x23   : > { %456 = vmatpush1.bf16.msra.mxu0 %v1164_v19  ;;  %1126 = vmatpush1.bf16.msra.mxu1 %v1164_v19 }
  0x24   : > { %457 = vmatprep.subr.bf16.mxu0 %v1223_v2  ;;  %1117 = vmatprep.subr.bf16.mxu1 %v1223_v2 }
  0x25   : > { %655 = vperm.xlu1 %1159, %v574_v23   ;;  %650 = vperm.xlu0 %1158, %v573_v24  }
  0x27   : > { %458 = vmatpush1.bf16.msra.mxu0 %v1165_v22  ;;  %1127 = vmatpush1.bf16.msra.mxu1 %v1165_v22 }
  0x28   : > { %459 = vmatprep.subr.bf16.mxu0 %v1223_v2  ;;  %1118 = vmatprep.subr.bf16.mxu1 %v1223_v2 }
  0x29   : > { %665 = vperm.xlu1 %1159, %v576_v26   ;;  %660 = vperm.xlu0 %1158, %v575_v27  }
  0x2b   : > { %460 = vmatpush1.bf16.msra.mxu0 %v1166_v25  ;;  %1128 = vmatpush1.bf16.msra.mxu1 %v1166_v25 }
  0x2c   : > { %461 = vmatprep.subr.bf16.mxu0 %v1223_v2  ;;  %1119 = vmatprep.subr.bf16.mxu1 %v1223_v2 }
  0x2d   : > { %713 = vperm.xlu1 %1159, %v692_v29   ;;  %670 = vperm.xlu0 %1158, %v577_v30  }
  0x2f   : > { %462 = vmatpush1.bf16.msra.mxu0 %v1167_v28  ;;  %1129 = vmatpush1.bf16.msra.mxu1 %v1167_v28 }
  0x30   : > { %463 = vmatprep.subr.bf16.mxu0 %v1223_v2  ;;  %1120 = vmatprep.subr.bf16.mxu1 %v1223_v2 }
  0x31   : > { %723 = vperm.xlu1 %1159, %v694_v33   ;;  %718 = vperm.xlu0 %1158, %v693_v34  }
  0x33   : > { %464 = vmatpush1.bf16.msra.mxu0 %v1168_v31  ;;  %1130 = vmatpush1.bf16.msra.mxu1 %v1168_v31 }
  0x34   : > { %465 = vmatprep.subr.bf16.mxu0 %v1223_v2  ;;  %1121 = vmatprep.subr.bf16.mxu1 %v1223_v2  ;;  %v1051_v2 = vcombine.high %v248_v60, %v248_v60 }
  0x35   : > { %733 = vperm.xlu1 %1159, %v696_v38   ;;  %728 = vperm.xlu0 %1158, %v695_v39  }
  0x37   : > { %466 = vmatpush1.bf16.msra.mxu0 %v445_v35  ;;  %1131 = vmatpush1.bf16.msra.mxu1 %v445_v35 }
  0x39   : > { %743 = vperm.xlu1 %1159, %v698_v42   ;;  %738 = vperm.xlu0 %1158, %v697_v43  }
  0x3a   : > { %480 = vmatmul.mubr.bf16.vlgmr.msra.gmra.mrb[0].mxu0 %v1170_v36  ;;  %520 = vmatmul.mubr.bf16.vlgmr.msra.gmra.mrb[0].mxu1 %v1173_v37 }
  0x3b   : > { %1063 = vmatprep.mubr.msk.bf16.mxu0 %vm412_vm0, %v1176_v40  ;;  %1068 = vmatprep.mubr.msk.bf16.mxu1 %vm412_vm0, %v1178_v41 }
  0x3d   : > { %753 = vperm.xlu1 %1159, %v700_v46   ;;  %748 = vperm.xlu0 %1158, %v699_v47  }
  0x41   : > { %763 = vperm.xlu1 %1159, %v702_v50   ;;  %758 = vperm.xlu0 %1158, %v701_v51  }
  0x42   : > { %488 = vmatmul.mubr.bf16.gmra.mrb[4].mxu0 %v1180_v44  ;;  %528 = vmatmul.mubr.bf16.gmra.mrb[4].mxu1 %v1181_v45 }
  0x43   : > { %1064 = vmatprep.mubr.msk.bf16.mxu0 %vm412_vm0, %v1182_v48  ;;  %1069 = vmatprep.mubr.msk.bf16.mxu1 %vm412_vm0, %v1184_v49 }
  0x45   : > { %773 = vperm.xlu1 %1159, %v704_v54   ;;  %768 = vperm.xlu0 %1158, %v703_v55  }
  0x49   : > { %783 = vperm.xlu1 %1159, %v706_v58   ;;  %778 = vperm.xlu0 %1158, %v705_v59  }
  0x4a   : > { %496 = vmatmul.mubr.bf16.gmra.mrb[8].mxu0 %v1186_v52  ;;  %536 = vmatmul.mubr.bf16.gmra.mrb[8].mxu1 %v1187_v53 }
  0x4b   : > { %1065 = vmatprep.mubr.msk.bf16.mxu0 %vm412_vm0, %v1188_v56  ;;  %1070 = vmatprep.mubr.msk.bf16.mxu1 %vm412_vm0, %v1190_v57 }
  0x4d   : > { %793 = vperm.xlu1 %1159, %v708_v63   ;;  %788 = vperm.xlu0 %1158, %v707_v0  }
  0x51   : > { %803 = vperm.xlu1 %1159, %v710_v3   ;;  %798 = vperm.xlu0 %1158, %v709_v4  }
  0x52   : > { %504 = vmatmul.mubr.bf16.gmra.mrb[12].mxu0 %v1192_v61  ;;  %544 = vmatmul.mubr.bf16.gmra.mrb[12].mxu1 %v1193_v62 }
  0x53   : > { %1066 = vmatprep.mubr.msk.bf16.mxu0 %vm412_vm0, %v1194_v1  ;;  %1071 = vmatprep.mubr.msk.bf16.mxu1 %vm412_vm0, %v1051_v2 }
  0x5a   : > { %512 = vmatmul.mubr.bf16.gmra.mrb[16].mxu0 %v1197_v5  ;;  %552 = vmatmul.mubr.bf16.gmra.mrb[16].mxu1 %v1050_v6 }
  0x88   : > { %v581_v7 = vpop.permute.xlu0 %580  ;;  %v591_v8 = vpop.permute.xlu1 %590 }
  0x8c   : > { %v586_v9 = vpop.permute.xlu0 %585  ;;  %v1490_v10 = vpop.permute.xlu1 %595 }
  0x90   : > { %v1492_v11 = vpop.permute.xlu0 %600  ;;  %v1494_v12 = vpop.permute.xlu1 %605 }
  0x94   : > { %v1496_v13 = vpop.permute.xlu0 %610  ;;  %v1498_v14 = vpop.permute.xlu1 %615 }
  0x98   : > { %v1500_v15 = vpop.permute.xlu0 %620  ;;  %v1502_v16 = vpop.permute.xlu1 %625 }
  0x9c   : > { %v631_v17 = vpop.permute.xlu0 %630  ;;  %v636_v18 = vpop.permute.xlu1 %635 }
  0xa0   : > { %v641_v19 = vpop.permute.xlu0 %640  ;;  %v646_v20 = vpop.permute.xlu1 %645 }
  0xa4   : > { %v1504_v21 = vpop.permute.xlu0 %650  ;;  %v1506_v22 = vpop.permute.xlu1 %655 }
  0xa8   : > { %v1508_v23 = vpop.permute.xlu0 %660  ;;  %v1510_v24 = vpop.permute.xlu1 %665 }
  0xac   : > { %v1512_v25 = vpop.permute.xlu0 %670  ;;  %v714_v26 = vpop.permute.xlu1 %713 }
  0xb0   : > { %v719_v27 = vpop.permute.xlu0 %718  ;;  %v724_v28 = vpop.permute.xlu1 %723 }
  0xb4   : > { %v729_v29 = vpop.permute.xlu0 %728  ;;  %v1514_v30 = vpop.permute.xlu1 %733 }
  0xb8   : > { %v1516_v31 = vpop.permute.xlu0 %738  ;;  %v1518_v32 = vpop.permute.xlu1 %743 }
  0xbc   : > { %v1520_v33 = vpop.permute.xlu0 %748  ;;  %v1522_v34 = vpop.permute.xlu1 %753 }
  0xc0   : > { %v1524_v35 = vpop.permute.xlu0 %758  ;;  %v764_v36 = vpop.permute.xlu1 %763 }
  0xc4   : > { %v769_v51 = vpop.permute.xlu0 %768  ;;  %v774_v56 = vpop.permute.xlu1 %773 }
 0x10d   : > { %v481_v37 = vpop.f32.mrb[0].mxu0  ;;  %v521_v38 = vpop.f32.mrb[0].mxu1 }
 0x10e   : > { %v673_v39 = vmul.f32 %v581_v7, %v481_v37  ;;  %v683_v40 = vmul.f32 %v631_v17, %v521_v38  ;;  %v483_v41 = vpop.f32.mrb[1].mxu0  ;;  %v523_v42 = vpop.f32.mrb[1].mxu1 }
 0x10f   : > { %v484_v43 = vpop.f32.mrb[2].mxu0  ;;  %v524_v44 = vpop.f32.mrb[2].mxu1 }
 0x110   : > { %v806_v45 = vadd.f32 %v714_v26, %v673_v39  ;;  %v816_v46 = vadd.f32 %v764_v36, %v683_v40  ;;  %v674_v47 = vmul.f32 %v586_v9, %v484_v43  ;;  %v684_v48 = vmul.f32 %v636_v18, %v524_v44  ;;  %v486_v49 = vpop.f32.mrb[3].mxu0  ;;  %v526_v50 = vpop.f32.mrb[3].mxu1 }
 0x111   : > { %v779_v36 = vpop.permute.xlu0 %778  ;;  %v784_v39 = vpop.permute.xlu1 %783 }
 0x112   : > { %v825_v52 = vmax.f32 %v806_v45, 0.0  ;;  %v835_v53 = vmax.f32 %v816_v46, 0.0  ;;  %v807_v54 = vadd.f32 %v719_v27, %v674_v47  ;;  %v817_v55 = vadd.f32 %v769_v51, %v684_v48 }
 0x114   : > { %v1093_v57 = vpack.c.bf16 %v825_v52, %v825_v52  ;;  %v1103_v58 = vpack.c.bf16 %v835_v53, %v835_v53  ;;  %v826_v59 = vmax.f32 %v807_v54, 0.0  ;;  %v836_v60 = vmax.f32 %v817_v55, 0.0 }
 0x115   : > { %v489_v61 = vpop.f32.mrb[4].mxu0  ;;  %v529_v62 = vpop.f32.mrb[4].mxu1 }
 0x116   : > { %922 = vst.msk [vmem:[%s1531_s9] sm:$0xf] %vm921_vm2, %v1093_v57  ;;  %932 = vst.msk [vmem:[%s1531_s9 + $0x28] sm:$0xf] %vm921_vm2, %v1103_v58  ;;  %v1094_v63 = vpack.c.bf16 %v826_v59, %v826_v59  ;;  %v1104_v0 = vpack.c.bf16 %v836_v60, %v836_v60  ;;  %v675_v1 = vmul.f32 %v591_v8, %v489_v61  ;;  %v491_v3 = vpop.f32.mrb[5].mxu0  ;;  %v531_v4 = vpop.f32.mrb[5].mxu1 }
 0x117   : > { %v685_v2 = vmul.f32 %v641_v19, %v529_v62  ;;  %v492_v5 = vpop.f32.mrb[6].mxu0  ;;  %v532_v6 = vpop.f32.mrb[6].mxu1 }
 0x118   : > { %923 = vst.msk [vmem:[%s1531_s9 + $0x4] sm:$0xf] %vm921_vm2, %v1094_v63  ;;  %933 = vst.msk [vmem:[%s1531_s9 + $0x2c] sm:$0xf] %vm921_vm2, %v1104_v0  ;;  %v808_v7 = vadd.f32 %v724_v28, %v675_v1  ;;  %v676_v17 = vmul.f32 %v1490_v10, %v492_v5  ;;  %v686_v18 = vmul.f32 %v646_v20, %v532_v6  ;;  %v494_v26 = vpop.f32.mrb[7].mxu0  ;;  %v534_v27 = vpop.f32.mrb[7].mxu1 }
 0x119   : > { %v818_v9 = vadd.f32 %v774_v56, %v685_v2  ;;  %v794_v59 = vpop.permute.xlu1 %793 }
 0x11a   : > { %v827_v8 = vmax.f32 %v808_v7, 0.0  ;;  %v809_v37 = vadd.f32 %v729_v29, %v676_v17  ;;  %v819_v38 = vadd.f32 %v779_v36, %v686_v18 }
 0x11b   : > { %v837_v19 = vmax.f32 %v818_v9, 0.0 }
 0x11c   : > { %v1095_v40 = vpack.c.bf16 %v827_v8, %v827_v8  ;;  %v828_v42 = vmax.f32 %v809_v37, 0.0  ;;  %v838_v28 = vmax.f32 %v819_v38, 0.0 }
 0x11d   : > { %v1105_v41 = vpack.c.bf16 %v837_v19, %v837_v19  ;;  %v497_v43 = vpop.f32.mrb[8].mxu0  ;;  %v537_v44 = vpop.f32.mrb[8].mxu1 }
 0x11e   : > { %924 = vst.msk [vmem:[%s1531_s9 + $0x8] sm:$0xf] %vm921_vm2, %v1095_v40  ;;  %v1096_v10 = vpack.c.bf16 %v828_v42, %v828_v42  ;;  %v1106_v20 = vpack.c.bf16 %v838_v28, %v838_v28  ;;  %v677_v45 = vmul.f32 %v1492_v11, %v497_v43  ;;  %v687_v29 = vmul.f32 %v1504_v21, %v537_v44  ;;  %v499_v46 = vpop.f32.mrb[9].mxu0  ;;  %v539_v47 = vpop.f32.mrb[9].mxu1 }
 0x11f   : > { %934 = vst.msk [vmem:[%s1531_s9 + $0x30] sm:$0xf] %vm921_vm2, %v1105_v41  ;;  %v500_v48 = vpop.f32.mrb[10].mxu0  ;;  %v540_v49 = vpop.f32.mrb[10].mxu1 }
 0x120   : > { %925 = vst.msk [vmem:[%s1531_s9 + $0xc] sm:$0xf] %vm921_vm2, %v1096_v10  ;;  %935 = vst.msk [vmem:[%s1531_s9 + $0x34] sm:$0xf] %vm921_vm2, %v1106_v20  ;;  %v810_v50 = vadd.f32 %v1514_v30, %v677_v45  ;;  %v820_v51 = vadd.f32 %v784_v39, %v687_v29  ;;  %v678_v52 = vmul.f32 %v1494_v12, %v500_v48  ;;  %v502_v11 = vpop.f32.mrb[11].mxu0  ;;  %v542_v54 = vpop.f32.mrb[11].mxu1 }
 0x121   : > { %v688_v53 = vmul.f32 %v1506_v22, %v540_v49  ;;  %v789_v21 = vpop.permute.xlu0 %788  ;;  %v804_v19 = vpop.permute.xlu1 %803 }
 0x122   : > { %v829_v55 = vmax.f32 %v810_v50, 0.0  ;;  %v839_v56 = vmax.f32 %v820_v51, 0.0  ;;  %v811_v57 = vadd.f32 %v1516_v31, %v678_v52 }
 0x123   : > { %v821_v58 = vadd.f32 %v789_v21, %v688_v53 }
 0x124   : > { %v1097_v60 = vpack.c.bf16 %v829_v55, %v829_v55  ;;  %v1107_v61 = vpack.c.bf16 %v839_v56, %v839_v56  ;;  %v830_v30 = vmax.f32 %v811_v57, 0.0 }
 0x125   : > { %v840_v62 = vmax.f32 %v821_v58, 0.0  ;;  %v505_v12 = vpop.f32.mrb[12].mxu0  ;;  %v545_v63 = vpop.f32.mrb[12].mxu1 }
 0x126   : > { %926 = vst.msk [vmem:[%s1531_s9 + $0x10] sm:$0xf] %vm921_vm2, %v1097_v60  ;;  %936 = vst.msk [vmem:[%s1531_s9 + $0x38] sm:$0xf] %vm921_vm2, %v1107_v61  ;;  %v1098_v22 = vpack.c.bf16 %v830_v30, %v830_v30  ;;  %v679_v1 = vmul.f32 %v1496_v13, %v505_v12  ;;  %v689_v31 = vmul.f32 %v1508_v23, %v545_v63  ;;  %v507_v2 = vpop.f32.mrb[13].mxu0  ;;  %v547_v3 = vpop.f32.mrb[13].mxu1 }
 0x127   : > { %v1108_v0 = vpack.c.bf16 %v840_v62, %v840_v62  ;;  %v508_v4 = vpop.f32.mrb[14].mxu0  ;;  %v548_v5 = vpop.f32.mrb[14].mxu1 }
 0x128   : > { %927 = vst.msk [vmem:[%s1531_s9 + $0x14] sm:$0xf] %vm921_vm2, %v1098_v22  ;;  %v812_v6 = vadd.f32 %v1518_v32, %v679_v1  ;;  %v822_v7 = vadd.f32 %v794_v59, %v689_v31  ;;  %v680_v9 = vmul.f32 %v1498_v14, %v508_v4  ;;  %v690_v17 = vmul.f32 %v1510_v24, %v548_v5  ;;  %v510_v13 = vpop.f32.mrb[15].mxu0  ;;  %v550_v18 = vpop.f32.mrb[15].mxu1 }
 0x129   : > { %937 = vst.msk [vmem:[%s1531_s9 + $0x3c] sm:$0xf] %vm921_vm2, %v1108_v0  ;;  %v799_v23 = vpop.permute.xlu0 %798 }
 0x12a   : > { %v831_v26 = vmax.f32 %v812_v6, 0.0  ;;  %v841_v27 = vmax.f32 %v822_v7, 0.0  ;;  %v813_v36 = vadd.f32 %v1520_v33, %v680_v9  ;;  %v823_v8 = vadd.f32 %v799_v23, %v690_v17 }
 0x12c   : > { %v1099_v37 = vpack.c.bf16 %v831_v26, %v831_v26  ;;  %v1109_v38 = vpack.c.bf16 %v841_v27, %v841_v27  ;;  %v832_v32 = vmax.f32 %v813_v36, 0.0  ;;  %v842_v39 = vmax.f32 %v823_v8, 0.0 }
 0x12d   : > { %v513_v14 = vpop.f32.mrb[16].mxu0  ;;  %v553_v40 = vpop.f32.mrb[16].mxu1 }
 0x12e   : > { %928 = vst.msk [vmem:[%s1531_s9 + $0x18] sm:$0xf] %vm921_vm2, %v1099_v37  ;;  %938 = vst.msk [vmem:[%s1531_s9 + $0x40] sm:$0xf] %vm921_vm2, %v1109_v38  ;;  %v1100_v24 = vpack.c.bf16 %v832_v32, %v832_v32  ;;  %v1110_v41 = vpack.c.bf16 %v842_v39, %v842_v39  ;;  %v681_v42 = vmul.f32 %v1500_v15, %v513_v14  ;;  %v515_v28 = vpop.f32.mrb[17].mxu0  ;;  %v555_v43 = vpop.f32.mrb[17].mxu1 }
 0x12f   : > { %v691_v33 = vmul.f32 %v1512_v25, %v553_v40  ;;  %v516_v44 = vpop.f32.mrb[18].mxu0  ;;  %v556_v10 = vpop.f32.mrb[18].mxu1 }
 0x130   : > { %929 = vst.msk [vmem:[%s1531_s9 + $0x1c] sm:$0xf] %vm921_vm2, %v1100_v24  ;;  %939 = vst.msk [vmem:[%s1531_s9 + $0x44] sm:$0xf] %vm921_vm2, %v1110_v41  ;;  %v814_v20 = vadd.f32 %v1522_v34, %v681_v42  ;;  %v682_v29 = vmul.f32 %v1502_v16, %v516_v44  ;;  %v518_v46 = vpop.f32.mrb[19].mxu0  ;;  %v557_v15 = vpop.f32.mrb[19].mxu1 }
 0x131   : > { %v824_v45 = vadd.f32 %v804_v19, %v691_v33 }
 0x132   : > { %v833_v47 = vmax.f32 %v814_v20, 0.0  ;;  %v815_v48 = vadd.f32 %v1524_v35, %v682_v29 }
 0x133   : > { %v843_v25 = vmax.f32 %v824_v45, 0.0 }
 0x134   : > { %v1101_v49 = vpack.c.bf16 %v833_v47, %v833_v47  ;;  %v834_v51 = vmax.f32 %v815_v48, 0.0 }
 0x135   : > { %v1111_v50 = vpack.c.bf16 %v843_v25, %v843_v25 }
 0x136   : > { %930 = vst.msk [vmem:[%s1531_s9 + $0x20] sm:$0xf] %vm921_vm2, %v1101_v49  ;;  %v1102_v52 = vpack.c.bf16 %v834_v51, %v834_v51 }
 0x137   : > { %941 = vst.msk [vmem:[%s1531_s9 + $0x48] sm:$0x7] %vm940_vm3, %v1111_v50 }
 0x138   : > { %931 = vst.msk [vmem:[%s1531_s9 + $0x24] sm:$0xf] %vm921_vm2, %v1102_v52 }
 0x139 PF: > { %s14_s17 = sadd.s32 1, %s1221_s17   ;;  %s1602_s15 = smov %s1217_s16 }
 0x13a   : > { %p11_p5 = scmp.ge.s32.totalorder %s14_s17, 4   ;;  %s1603_s16 = smov %s1605_s18 }
 0x13c   :  { %13 = sbr.rel (!%p11_p5) target bundleno = 2 (0x2), region = 66 }

// kernel: msg3d_forward.30
= control target key start
LH: loop header
LB: loop body
LE: loop exit
PB: predicated region body
PF: predicated region fallthrough
CT: control target
= control target key end

     0   :  { %s1143_s18 = smov 0   ;;  %s1145_s19 = smov 0   ;;  %s1487_s0 = inlined_call_operand.vmem [shape: bf16[2,30,40], index: 0, kind: input, shape index: {}]   ;;  %s1488_s1 = inlined_call_operand.vmem [shape: bf16[120,30], index: 1, kind: input, shape index: {}]   ;;  %s1489_s2 = inlined_call_operand.vmem [shape: f32[120,1], index: 2, kind: input, shape index: {}]   ;;  %s1490_s3 = inlined_call_operand.vmem [shape: f32[120,1], index: 3, kind: input, shape index: {}]   ;;  %s1491_s4 = inlined_call_operand.vmem [shape: f32[120,1], index: 4, kind: input, shape index: {}]   ;;  %s1492_s5 = inlined_call_operand.vmem [shape: bf16[2,120,40], index: 5, kind: output, shape index: {}]  }
   0x1   :  { %s1147_s20 = smov 0  }
   0x2 LB: > { %s27_s21 = sadd.s32 1, %s1106_s19  ;;  %p959_p0 = scmp.ge.s32.totalorder %s1110_s20, 1  ;;  %s1110_s20 = sphi %s1147_s20, %s15_s20   ;;  %s1106_s19 = sphi %s1145_s19, %s1494_s19   ;;  %s1102_s18 = sphi %s1143_s18, %s1493_s18  }
   0x3   : > { %p29_p1 = scmp.ge.s32.totalorder %s27_s21, 2  ;;  %p206_p2 = scmp.lt.s32.totalorder %s1110_s20, 3 }
   0x5   : > { %s1496_s21 = smov (%p29_p1, %s27_s21), 0  ;;  %p207_p3 = pnand %p959_p0, %p206_p2 }
   0x6   : > { %v452_v0 = vld [vmem:[%s1489_s2 + $0x10] sm:$0xff] (!%p207_p3)  ;;  %v450_v1 = vld [vmem:[%s1489_s2] sm:$0xff] (!%p207_p3)  ;;  %p240_p4 = scmp.lt.s32.totalorder (!%p207_p3), %s1102_s18, 1  ;;  %v1112_v2 = vmov (!%p207_p3), 0   ;;  %v453_v3 = vld [vmem:[%s1489_s2 + $0x18] sm:$0xff] (!%p207_p3)  ;;  %vm325_vm0 = vcmask (!%p207_p3), 244736  }
   0x7   : > { %210 = sbr.rel (%p207_p3) target bundleno = 263 (0x107), region = 40  ;;  %1077 = vset.pattern.permute.xlu1 (!%p207_p3), %v1112_v2  ;;  %1076 = vset.pattern.permute.xlu0 (!%p207_p3), %v1112_v2  ;;  %v451_v4 = vld [vmem:[%s1489_s2 + $0x8] sm:$0xff] (!%p207_p3)  ;;  %v1080_v5 = vld [vmem:[%s1488_s1] sm:$0xff] (!%p207_p3)   ;;  %vm350_vm1 = vcmask (!%p207_p3), 1046528   ;;  %v457_v11 = vld [vmem:[%s1489_s2 + $0x38] sm:$0xff] (!%p207_p3) }
   0x8   : > { %477 = vperm.xlu1 (!%p207_p3), %1077, %v452_v0   ;;  %467 = vperm.xlu0 (!%p207_p3), %1076, %v450_v1   ;;  %v1081_v6 = vld [vmem:[%s1488_s1 + $0x20] sm:$0xff] (!%p207_p3)   ;;  %v455_v7 = vld [vmem:[%s1489_s2 + $0x28] sm:$0xff] (!%p207_p3)  ;;  %v456_v12 = vld [vmem:[%s1489_s2 + $0x30] sm:$0xff] (!%p207_p3) }
   0x9   : > { %v454_v8 = vld [vmem:[%s1489_s2 + $0x20] sm:$0xff] (!%p207_p3)  ;;  %1028 = vmatprep.mubr.msk.bf16.mxu0 (!%p207_p3), %vm325_vm0, %v1080_v5  ;;  %1036 = vmatprep.mubr.msk.bf16.mxu1 (!%p207_p3), %vm325_vm0, %v1081_v6  ;;  %v1082_v14 = vld [vmem:[%s1488_s1 + $0x8] sm:$0xff] (!%p207_p3)   ;;  %v1084_v16 = vld [vmem:[%s1488_s1 + $0x10] sm:$0xff] (!%p207_p3)  }
   0xa   : > { %v1083_v15 = vld [vmem:[%s1488_s1 + $0x28] sm:$0xff] (!%p207_p3)   ;;  %v1085_v17 = vld [vmem:[%s1488_s1 + $0x30] sm:$0xff] (!%p207_p3)   ;;  %v458_v19 = vld [vmem:[%s1489_s2 + $0x40] sm:$0xff] (!%p207_p3) }
   0xb   : > { %v459_v18 = vld [vmem:[%s1489_s2 + $0x48] sm:$0xff] (!%p207_p3)  ;;  %v461_v20 = vld [vmem:[%s1489_s2 + $0x58] sm:$0xff] (!%p207_p3)  ;;  %v460_v21 = vld [vmem:[%s1489_s2 + $0x50] sm:$0xff] (!%p207_p3) }
   0xc   : > { %482 = vperm.xlu1 (!%p207_p3), %1077, %v453_v3   ;;  %472 = vperm.xlu0 (!%p207_p3), %1076, %v451_v4   ;;  %v1086_v22 = vld [vmem:[%s1488_s1 + $0x18] sm:$0xff] (!%p207_p3)   ;;  %v463_v24 = vld [vmem:[%s1489_s2 + $0x68] sm:$0xff] (!%p207_p3)  ;;  %v462_v25 = vld [vmem:[%s1489_s2 + $0x60] sm:$0xff] (!%p207_p3) }
   0xd   : > { %v1087_v23 = vld [vmem:[%s1488_s1 + $0x38] ss:$0 sps:$4 sm:$0xff] (!%p207_p3)   ;;  %v555_v26 = vld [vmem:[%s1490_s3] sm:$0xff] (!%p207_p3)  ;;  %v464_v27 = vld [vmem:[%s1489_s2 + $0x70] sm:$0xff] (!%p207_p3) }
   0xe   : > { %s1498_s18 = smov (!%p240_p4, %s1102_s18), 1  ;;  %v557_v28 = vld [vmem:[%s1490_s3 + $0x10] sm:$0xff]  ;;  %v556_v29 = vld [vmem:[%s1490_s3 + $0x8] sm:$0xff]  ;;  %v559_v30 = vld [vmem:[%s1490_s3 + $0x20] sm:$0xff] }
   0xf   : > { %s998_s7 = sshll.u32 %s1498_s18, 4  ;;  %v558_v31 = vld [vmem:[%s1490_s3 + $0x18] sm:$0xff]  ;;  %v561_v32 = vld [vmem:[%s1490_s3 + $0x30] sm:$0xff]  ;;  %v560_v33 = vld [vmem:[%s1490_s3 + $0x28] sm:$0xff]  ;;  %s1050_s27 = smul.u32 60, %s1498_s18 }
  0x10   : > { %s247_s12 = scalar_lea.vmem %s1487_s0, %s998_s7  ;;  %492 = vperm.xlu1 %1077, %v455_v7   ;;  %487 = vperm.xlu0 %1076, %v454_v8   ;;  %v563_v34 = vld [vmem:[%s1490_s3 + $0x40] sm:$0xff]  ;;  %v562_v35 = vld [vmem:[%s1490_s3 + $0x38] sm:$0xff]  ;;  %v565_v36 = vld [vmem:[%s1490_s3 + $0x50] sm:$0xff] }
  0x11   : > { %v1078_v9 = vld [vmem:[%s247_s12] sm:$0xff]   ;;  %v1079_v10 = vld [vmem:[%s247_s12 + $0x8] sm:$0x7f]   ;;  %v566_v39 = vld [vmem:[%s1490_s3 + $0x58] sm:$0xff]  ;;  %s1408_s29 = scalar_lea.vmem %s1492_s5, %s1050_s27 }
  0x12   : > { %1024 = vmatprep.subr.bf16.mxu0 %v1078_v9  ;;  %1044 = vmatprep.subr.bf16.mxu1 %v1078_v9  ;;  %v352_v13 = vsel %vm350_vm1, %v1079_v10, 0  ;;  %v564_v37 = vld [vmem:[%s1490_s3 + $0x48] sm:$0xff]  ;;  %v567_v38 = vld [vmem:[%s1490_s3 + $0x60] sm:$0xff]  ;;  %v569_v42 = vld [vmem:[%s1490_s3 + $0x70] sm:$0xff] }
  0x13   : > { %1025 = vmatpush3.bf16.msra.mxu0 %v1078_v9  ;;  %1046 = vmatpush3.bf16.msra.mxu1 %v1078_v9  ;;  %v661_v40 = vld [vmem:[%s1491_s4 + $0x8] sm:$0xff]  ;;  %v660_v41 = vld [vmem:[%s1491_s4] sm:$0xff]  ;;  %v663_v44 = vld [vmem:[%s1491_s4 + $0x18] sm:$0xff] }
  0x14   : > { %1048 = vmatprep.subr.msk.bf16.mxu0 %vm350_vm1, %v1079_v10  ;;  %1049 = vmatprep.subr.msk.bf16.mxu1 %vm350_vm1, %v1079_v10  ;;  %v568_v43 = vld [vmem:[%s1490_s3 + $0x68] sm:$0xff]  ;;  %vm676_vm2 = vcmp.gt.f32.partialorder %v661_v40, 0.0  ;;  %vm675_vm3 = vcmp.gt.f32.partialorder %v660_v41, 0.0  ;;  %v662_v45 = vld [vmem:[%s1491_s4 + $0x10] sm:$0xff]  ;;  %vm678_vm4 = vcmp.gt.f32.partialorder %v663_v44, 0.0  ;;  %v664_v49 = vld [vmem:[%s1491_s4 + $0x20] sm:$0xff] }
  0x15   : > { %502 = vperm.xlu1 %1077, %v457_v11   ;;  %497 = vperm.xlu0 %1076, %v456_v12   ;;  %v706_v46 = vsel %vm676_vm2, 1, %v1112_v2  ;;  %v705_v47 = vsel %vm675_vm3, 1, %v1112_v2  ;;  %vm677_vm5 = vcmp.gt.f32.partialorder %v662_v45, 0.0  ;;  %v665_v48 = vld [vmem:[%s1491_s4 + $0x28] sm:$0xff]  ;;  %v708_v50 = vsel %vm678_vm4, 1, %v1112_v2  ;;  %v667_v52 = vld [vmem:[%s1491_s4 + $0x38] sm:$0xff] }
  0x16   : > { %v707_v51 = vsel %vm677_vm5, 1, %v1112_v2  ;;  %vm680_vm6 = vcmp.gt.f32.partialorder %v665_v48, 0.0  ;;  %vm679_vm7 = vcmp.gt.f32.partialorder %v664_v49, 0.0  ;;  %v666_v53 = vld [vmem:[%s1491_s4 + $0x30] sm:$0xff]  ;;  %vm682_vm8 = vcmp.gt.f32.partialorder %v667_v52, 0.0  ;;  %v669_v56 = vld [vmem:[%s1491_s4 + $0x48] sm:$0xff] }
  0x17   : > { %1027 = vmatpush3.bf16.msra.mxu0 %v352_v13  ;;  %1047 = vmatpush3.bf16.msra.mxu1 %v352_v13  ;;  %v710_v54 = vsel %vm680_vm6, 1, %v1112_v2  ;;  %v709_v55 = vsel %vm679_vm7, 1, %v1112_v2  ;;  %vm681_vm9 = vcmp.gt.f32.partialorder %v666_v53, 0.0  ;;  %v668_v57 = vld [vmem:[%s1491_s4 + $0x40] sm:$0xff]  ;;  %v712_v58 = vsel %vm682_vm8, 1, %v1112_v2  ;;  %v671_v60 = vld [vmem:[%s1491_s4 + $0x58] sm:$0xff] }
  0x18   : > { %v711_v59 = vsel %vm681_vm9, 1, %v1112_v2  ;;  %vm684_vm10 = vcmp.gt.f32.partialorder %v669_v56, 0.0  ;;  %vm683_vm11 = vcmp.gt.f32.partialorder %v668_v57, 0.0  ;;  %v670_v61 = vld [vmem:[%s1491_s4 + $0x50] sm:$0xff]  ;;  %vm686_vm12 = vcmp.gt.f32.partialorder %v671_v60, 0.0  ;;  %v673_v0 = vld [vmem:[%s1491_s4 + $0x68] sm:$0xff] }
  0x19   : > { %512 = vperm.xlu1 %1077, %v459_v18   ;;  %507 = vperm.xlu0 %1076, %v458_v19   ;;  %v714_v62 = vsel %vm684_vm10, 1, %v1112_v2  ;;  %v713_v63 = vsel %vm683_vm11, 1, %v1112_v2  ;;  %vm685_vm13 = vcmp.gt.f32.partialorder %v670_v61, 0.0  ;;  %v672_v1 = vld [vmem:[%s1491_s4 + $0x60] sm:$0xff]  ;;  %v716_v3 = vsel %vm686_vm12, 1, %v1112_v2  ;;  %v674_v5 = vld [vmem:[%s1491_s4 + $0x70] sm:$0xff] }
  0x1a   : > { %1029 = vmatmul.mubr.msk.bf16.vlgmr.msra.gmra.mrb[0].mxu0 %vm325_vm0, %v1082_v14  ;;  %1037 = vmatmul.mubr.msk.bf16.vlgmr.msra.gmra.mrb[0].mxu1 %vm325_vm0, %v1083_v15  ;;  %v715_v4 = vsel %vm685_vm13, 1, %v1112_v2  ;;  %vm688_vm14 = vcmp.gt.f32.partialorder %v673_v0, 0.0  ;;  %vm687_vm15 = vcmp.gt.f32.partialorder %v672_v1, 0.0  ;;  %vm856_vm3 = vcmask 322560  }
  0x1b   : > { %1032 = vmatprep.mubr.msk.bf16.mxu0 %vm325_vm0, %v1084_v16  ;;  %1040 = vmatprep.mubr.msk.bf16.mxu1 %vm325_vm0, %v1085_v17  ;;  %v718_v6 = vsel %vm688_vm14, 1, %v1112_v2  ;;  %v717_v7 = vsel %vm687_vm15, 1, %v1112_v2 }
  0x1d   : > { %522 = vperm.xlu1 %1077, %v461_v20   ;;  %517 = vperm.xlu0 %1076, %v460_v21  }
  0x21   : > { %532 = vperm.xlu1 %1077, %v463_v24   ;;  %527 = vperm.xlu0 %1076, %v462_v25  }
  0x22   : > { %1033 = vmatmul.mubr.msk.bf16.gmra.mrb[4].mxu0 %vm325_vm0, %v1086_v22  ;;  %1041 = vmatmul.mubr.msk.bf16.gmra.mrb[4].mxu1 %vm325_vm0, %v1087_v23  ;;  %vm689_vm0 = vcmp.gt.f32.partialorder %v674_v5, 0.0 }
  0x23   : > { %v719_v8 = vsel %vm689_vm0, 1, %v1112_v2 }
  0x25   : > { %572 = vperm.xlu1 %1077, %v555_v26   ;;  %537 = vperm.xlu0 %1076, %v464_v27  }
  0x29   : > { %582 = vperm.xlu1 %1077, %v557_v28   ;;  %577 = vperm.xlu0 %1076, %v556_v29  }
  0x2d   : > { %592 = vperm.xlu1 %1077, %v559_v30   ;;  %587 = vperm.xlu0 %1076, %v558_v31  }
  0x31   : > { %602 = vperm.xlu1 %1077, %v561_v32   ;;  %597 = vperm.xlu0 %1076, %v560_v33  }
  0x35   : > { %612 = vperm.xlu1 %1077, %v563_v34   ;;  %607 = vperm.xlu0 %1076, %v562_v35  }
  0x39   : > { %622 = vperm.xlu1 %1077, %v565_v36   ;;  %617 = vperm.xlu0 %1076, %v564_v37  }
  0x3d   : > { %632 = vperm.xlu1 %1077, %v567_v38   ;;  %627 = vperm.xlu0 %1076, %v566_v39  }
  0x41   : > { %642 = vperm.xlu1 %1077, %v569_v42   ;;  %637 = vperm.xlu0 %1076, %v568_v43  }
  0x45   : > { %724 = vperm.xlu1 %1077, %v706_v46   ;;  %721 = vperm.xlu0 %1076, %v705_v47  }
  0x49   : > { %730 = vperm.xlu1 %1077, %v708_v50   ;;  %727 = vperm.xlu0 %1076, %v707_v51  }
  0x4d   : > { %736 = vperm.xlu1 %1077, %v710_v54   ;;  %733 = vperm.xlu0 %1076, %v709_v55  }
  0x51   : > { %742 = vperm.xlu1 %1077, %v712_v58   ;;  %739 = vperm.xlu0 %1076, %v711_v59  }
  0x55   : > { %748 = vperm.xlu1 %1077, %v714_v62   ;;  %745 = vperm.xlu0 %1076, %v713_v63  }
  0x59   : > { %754 = vperm.xlu1 %1077, %v716_v3   ;;  %751 = vperm.xlu0 %1076, %v715_v4  }
  0x5d   : > { %760 = vperm.xlu1 %1077, %v718_v6   ;;  %757 = vperm.xlu0 %1076, %v717_v7  }
  0x61   : > { %763 = vperm.xlu0 %1076, %v719_v8  }
  0x87   : > { %v478_v9 = vpop.permute.xlu1 %477  ;;  %v468_v10 = vpop.permute.xlu0 %467 }
  0x8b   : > { %v483_v11 = vpop.permute.xlu1 %482  ;;  %v1351_v12 = vpop.permute.xlu0 %472 }
  0x8f   : > { %v1353_v13 = vpop.permute.xlu1 %492  ;;  %v1355_v14 = vpop.permute.xlu0 %487 }
  0x94   : > { %v1357_v15 = vpop.permute.xlu1 %502  ;;  %v1359_v16 = vpop.permute.xlu0 %497 }
  0x98   : > { %v1361_v17 = vpop.permute.xlu1 %512  ;;  %v508_v18 = vpop.permute.xlu0 %507 }
  0x9c   : > { %v523_v19 = vpop.permute.xlu1 %522  ;;  %v518_v20 = vpop.permute.xlu0 %517 }
  0xa0   : > { %v1363_v2 = vpop.permute.xlu1 %532  ;;  %v1365_v21 = vpop.permute.xlu0 %527 }
  0xa4   : > { %v573_v22 = vpop.permute.xlu1 %572  ;;  %v1367_v23 = vpop.permute.xlu0 %537 }
  0xa8   : > { %v583_v24 = vpop.permute.xlu1 %582  ;;  %v578_v25 = vpop.permute.xlu0 %577 }
  0xac   : > { %v1369_v26 = vpop.permute.xlu1 %592  ;;  %v588_v27 = vpop.permute.xlu0 %587 }
  0xb0   : > { %v1371_v28 = vpop.permute.xlu1 %602  ;;  %v1373_v29 = vpop.permute.xlu0 %597 }
  0xb4   : > { %v613_v30 = vpop.permute.xlu1 %612  ;;  %v1375_v31 = vpop.permute.xlu0 %607 }
  0xb8   : > { %v623_v32 = vpop.permute.xlu1 %622  ;;  %v618_v33 = vpop.permute.xlu0 %617 }
  0xbc   : > { %v1377_v34 = vpop.permute.xlu1 %632  ;;  %v628_v35 = vpop.permute.xlu0 %627 }
  0xc0   : > { %v1379_v36 = vpop.permute.xlu1 %642  ;;  %v1381_v37 = vpop.permute.xlu0 %637 }
  0xc4   : > { %v1383_v38 = vpop.permute.xlu1 %724  ;;  %v722_v39 = vpop.permute.xlu0 %721 }
  0xc5   : > { %vm765_vm1 = vcmp.eq.s32.totalorder %v722_v39, 1  ;;  %vm766_vm8 = vcmp.eq.s32.totalorder %v1383_v38, 1 }
  0xc8   : > { %v1385_v40 = vpop.permute.xlu1 %730  ;;  %v728_v41 = vpop.permute.xlu0 %727 }
  0xc9   : > { %vm768_vm2 = vcmp.eq.s32.totalorder %v1385_v40, 1  ;;  %vm767_vm4 = vcmp.eq.s32.totalorder %v728_v41, 1 }
  0xcc   : > { %v1387_v42 = vpop.permute.xlu1 %736  ;;  %v1389_v43 = vpop.permute.xlu0 %733 }
  0xcd   : > { %vm769_vm11 = vcmp.eq.s32.totalorder %v1389_v43, 1  ;;  %vm770_vm12 = vcmp.eq.s32.totalorder %v1387_v42, 1 }
  0xd0   : > { %v1391_v44 = vpop.permute.xlu1 %742  ;;  %v1393_v45 = vpop.permute.xlu0 %739 }
  0xd1   : > { %vm771_vm10 = vcmp.eq.s32.totalorder %v1393_v45, 1  ;;  %vm772_vm13 = vcmp.eq.s32.totalorder %v1391_v44, 1 }
  0xd4   : > { %v1395_v46 = vpop.permute.xlu1 %748  ;;  %v746_v47 = vpop.permute.xlu0 %745 }
  0xd5   : > { %vm773_vm5 = vcmp.eq.s32.totalorder %v746_v47, 1  ;;  %vm774_vm9 = vcmp.eq.s32.totalorder %v1395_v46, 1 }
  0xd8   : > { %v755_v48 = vpop.permute.xlu1 %754  ;;  %v752_v49 = vpop.permute.xlu0 %751 }
  0xd9   : > { %vm776_vm6 = vcmp.eq.s32.totalorder %v755_v48, 1  ;;  %vm775_vm7 = vcmp.eq.s32.totalorder %v752_v49, 1 }
  0xed   : > { %v1030_v50 = vpop.f32.mrb[0].mxu0  ;;  %v1038_v51 = vpop.f32.mrb[0].mxu1 }
  0xee   : > { %v542_v52 = vmul.f32 %v1030_v50, %v478_v9  ;;  %v550_v53 = vmul.f32 %v1038_v51, %v518_v20  ;;  %v388_v54 = vpop.f32.mrb[1].mxu0  ;;  %v420_v55 = vpop.f32.mrb[1].mxu1 }
  0xef   : > { %v540_v56 = vmul.f32 %v468_v10, %v388_v54  ;;  %v548_v57 = vmul.f32 %v508_v18, %v420_v55  ;;  %v1031_v58 = vpop.f32.mrb[2].mxu0  ;;  %v1039_v59 = vpop.f32.mrb[2].mxu1 }
  0xf0   : > { %v647_v60 = vadd.f32 %v583_v24, %v542_v52  ;;  %v655_v61 = vadd.f32 %v623_v32, %v550_v53  ;;  %v543_v62 = vmul.f32 %v1031_v58, %v483_v11  ;;  %v551_v63 = vmul.f32 %v1039_v59, %v523_v19  ;;  %v391_v0 = vpop.f32.mrb[3].mxu0  ;;  %v423_v1 = vpop.f32.mrb[3].mxu1 }
  0xf1   : > { %v645_v3 = vadd.f32 %v573_v22, %v540_v56  ;;  %v653_v4 = vadd.f32 %v613_v30, %v548_v57  ;;  %v541_v5 = vmul.f32 %v1351_v12, %v391_v0  ;;  %v549_v6 = vmul.f32 %v1361_v17, %v423_v1  ;;  %v1403_v18 = vpop.permute.xlu0 %757 }
  0xf2   : > { %v692_v7 = vmax.f32 %v647_v60, 0.0  ;;  %v700_v8 = vmax.f32 %v655_v61, 0.0  ;;  %v648_v9 = vadd.f32 %v588_v27, %v543_v62  ;;  %v656_v10 = vadd.f32 %v628_v35, %v551_v63 }
  0xf3   : > { %v690_v20 = vmax.f32 %v645_v3, 0.0  ;;  %v698_v50 = vmax.f32 %v653_v4, 0.0  ;;  %v646_v24 = vadd.f32 %v578_v25, %v541_v5  ;;  %v654_v32 = vadd.f32 %v618_v33, %v549_v6 }
  0xf4   : > { %v782_v11 = vsel %vm767_vm4, %v692_v7, %v647_v60  ;;  %v790_v12 = vsel %vm775_vm7, %v700_v8, %v655_v61  ;;  %v693_v17 = vmax.f32 %v648_v9, 0.0  ;;  %v701_v19 = vmax.f32 %v656_v10, 0.0 }
  0xf5   : > { %v1001_v22 = vpack.c.bf16 %v782_v11, %v782_v11  ;;  %v1009_v27 = vpack.c.bf16 %v790_v12, %v790_v12  ;;  %v780_v25 = vsel %vm765_vm1, %v690_v20, %v645_v3  ;;  %v788_v30 = vsel %vm773_vm5, %v698_v50, %v653_v4  ;;  %v1034_v33 = vpop.f32.mrb[4].mxu0  ;;  %v1042_v35 = vpop.f32.mrb[4].mxu1 }
  0xf6   : > { %v999_v41 = vpack.c.bf16 %v780_v25, %v780_v25  ;;  %v1007_v49 = vpack.c.bf16 %v788_v30, %v788_v30  ;;  %v783_v51 = vsel %vm768_vm2, %v693_v17, %v648_v9  ;;  %v791_v52 = vsel %vm776_vm6, %v701_v19, %v656_v10  ;;  %v404_v53 = vpop.f32.mrb[5].mxu0  ;;  %v436_v54 = vpop.f32.mrb[5].mxu1 }
  0xf7   : > { %859 = vst.msk [vmem:[%s1408_s29 + $0x8] sm:$0xf] %vm856_vm3, %v1001_v22  ;;  %867 = vst.msk [vmem:[%s1408_s29 + $0x28] sm:$0xf] %vm856_vm3, %v1009_v27  ;;  %v1002_v39 = vpack.c.bf16 %v783_v51, %v783_v51  ;;  %v1010_v47 = vpack.c.bf16 %v791_v52, %v791_v52  ;;  %v691_v55 = vmax.f32 %v646_v24, 0.0  ;;  %v699_v40 = vmax.f32 %v654_v32, 0.0  ;;  %v764_v63 = vpop.permute.xlu0 %763  ;;  %v761_v9 = vpop.permute.xlu1 %760 }
  0xf8   : > { %v1035_v56 = vpop.f32.mrb[6].mxu0  ;;  %v1043_v57 = vpop.f32.mrb[6].mxu1  ;;  %857 = vst.msk [vmem:[%s1408_s29] sm:$0xf] %vm856_vm3, %v999_v41  ;;  %865 = vst.msk [vmem:[%s1408_s29 + $0x20] sm:$0xf] %vm856_vm3, %v1007_v49  ;;  %v546_v48 = vmul.f32 %v1034_v33, %v1359_v16  ;;  %v554_v58 = vmul.f32 %v1042_v35, %v1367_v23  ;;  %v544_v59 = vmul.f32 %v1355_v14, %v404_v53 }
  0xf9   : > { %v552_v60 = vmul.f32 %v1365_v21, %v436_v54  ;;  %v407_v61 = vpop.f32.mrb[7].mxu0  ;;  %v439_v62 = vpop.f32.mrb[7].mxu1  ;;  %860 = vst.msk [vmem:[%s1408_s29 + $0xc] sm:$0xf] %vm856_vm3, %v1002_v39  ;;  %868 = vst.msk [vmem:[%s1408_s29 + $0x2c] sm:$0xf] %vm856_vm3, %v1010_v47  ;;  %v781_v0 = vsel %vm766_vm8, %v691_v55, %v646_v24  ;;  %v789_v16 = vsel %vm774_vm9, %v699_v40, %v654_v32 }
  0xfa   : > { %v547_v23 = vmul.f32 %v1035_v56, %v1357_v15  ;;  %v545_v14 = vmul.f32 %v1353_v13, %v407_v61  ;;  %v1000_v21 = vpack.c.bf16 %v781_v0, %v781_v0  ;;  %v1008_v1 = vpack.c.bf16 %v789_v16, %v789_v16 }
  0xfb   : > { %v651_v3 = vadd.f32 %v1371_v28, %v546_v48  ;;  %v659_v4 = vadd.f32 %v1379_v36, %v554_v58  ;;  %v649_v5 = vadd.f32 %v1369_v26, %v544_v59  ;;  %v657_v6 = vadd.f32 %v1377_v34, %v552_v60 }
  0xfc   : > { %v652_v38 = vadd.f32 %v1375_v31, %v547_v23  ;;  %v650_v7 = vadd.f32 %v1373_v29, %v545_v14  ;;  %vm779_vm14 = vcmp.eq.s32.totalorder %v764_v63, 1  ;;  %858 = vst.msk [vmem:[%s1408_s29 + $0x4] sm:$0xf] %vm856_vm3, %v1000_v21  ;;  %866 = vst.msk [vmem:[%s1408_s29 + $0x24] sm:$0xf] %vm856_vm3, %v1008_v1  ;;  %v553_v46 = vmul.f32 %v1363_v2, %v439_v62 }
  0xfd   : > { %v696_v13 = vmax.f32 %v651_v3, 0.0  ;;  %v704_v15 = vmax.f32 %v659_v4, 0.0  ;;  %v694_v28 = vmax.f32 %v649_v5, 0.0  ;;  %v702_v8 = vmax.f32 %v657_v6, 0.0 }
  0xfe   : > { %v697_v36 = vmax.f32 %v652_v38, 0.0  ;;  %v695_v26 = vmax.f32 %v650_v7, 0.0  ;;  %vm777_vm15 = vcmp.eq.s32.totalorder %v1403_v18, 1  ;;  %v658_v34 = vadd.f32 %v1381_v37, %v553_v46 }
  0xff   : > { %v786_v29 = vsel %vm771_vm10, %v696_v13, %v651_v3  ;;  %v794_v31 = vsel %vm779_vm14, %v704_v15, %v659_v4  ;;  %v784_v20 = vsel %vm769_vm11, %v694_v28, %v649_v5  ;;  %v792_v50 = vsel %vm777_vm15, %v702_v8, %v657_v6 }
 0x100   : > { %v1005_v10 = vpack.c.bf16 %v786_v29, %v786_v29  ;;  %v1013_v2 = vpack.c.bf16 %v794_v31, %v794_v31  ;;  %v1003_v24 = vpack.c.bf16 %v784_v20, %v784_v20  ;;  %v1011_v18 = vpack.c.bf16 %v792_v50, %v792_v50 }
 0x101   : > { %v787_v45 = vsel %vm772_vm13, %v697_v36, %v652_v38  ;;  %v785_v37 = vsel %vm770_vm12, %v695_v26, %v650_v7  ;;  %v703_v12 = vmax.f32 %v658_v34, 0.0  ;;  %vm778_vm0 = vcmp.eq.s32.totalorder %v761_v9, 1 }
 0x102   : > { %863 = vst.msk [vmem:[%s1408_s29 + $0x18] sm:$0xf] %vm856_vm3, %v1005_v10  ;;  %871 = vst.msk [vmem:[%s1408_s29 + $0x38] sm:$0xf] %vm856_vm3, %v1013_v2  ;;  %v1006_v32 = vpack.c.bf16 %v787_v45, %v787_v45  ;;  %v1004_v11 = vpack.c.bf16 %v785_v37, %v785_v37 }
 0x103   : > { %861 = vst.msk [vmem:[%s1408_s29 + $0x10] sm:$0xf] %vm856_vm3, %v1003_v24  ;;  %869 = vst.msk [vmem:[%s1408_s29 + $0x30] sm:$0xf] %vm856_vm3, %v1011_v18  ;;  %v793_v43 = vsel %vm778_vm0, %v703_v12, %v658_v34 }
 0x104   : > { %864 = vst.msk [vmem:[%s1408_s29 + $0x1c] sm:$0xf] %vm856_vm3, %v1006_v32  ;;  %862 = vst.msk [vmem:[%s1408_s29 + $0x14] sm:$0xf] %vm856_vm3, %v1004_v11  ;;  %v1012_v44 = vpack.c.bf16 %v793_v43, %v793_v43 }
 0x106   : > { %870 = vst.msk [vmem:[%s1408_s29 + $0x34] sm:$0xf] %vm856_vm3, %v1012_v44 }
 0x107 PF: > { %s15_s20 = sadd.s32 1, %s1110_s20   ;;  %s1493_s18 = smov %s1106_s19 }
 0x108   : > { %p12_p5 = scmp.ge.s32.totalorder %s15_s20, 4   ;;  %s1494_s19 = smov %s1496_s21 }
 0x10a   :  { %14 = sbr.rel (!%p12_p5) target bundleno = 2 (0x2), region = 70 }

// kernel: msg3d_forward.32
= control target key start
LH: loop header
LB: loop body
LE: loop exit
PB: predicated region body
PF: predicated region fallthrough
CT: control target
= control target key end

     0   :  { %s872_s18 = smov 0   ;;  %s874_s19 = smov 0   ;;  %s1030_s0 = inlined_call_operand.vmem [shape: bf16[2,60,40], index: 0, kind: input, shape index: {}]   ;;  %s1031_s1 = inlined_call_operand.vmem [shape: bf16[60,60], index: 1, kind: input, shape index: {}]   ;;  %s1032_s2 = inlined_call_operand.vmem [shape: f32[60,1], index: 2, kind: input, shape index: {}]   ;;  %s1033_s3 = inlined_call_operand.vmem [shape: f32[60,1], index: 3, kind: input, shape index: {}]   ;;  %s1034_s4 = inlined_call_operand.vmem [shape: f32[60,1], index: 4, kind: input, shape index: {}]   ;;  %s1035_s5 = inlined_call_operand.vmem [shape: bf16[2,60,40], index: 5, kind: output, shape index: {}]  }
   0x1   :  { %s876_s20 = smov 0  }
   0x2 LB: > { %s27_s21 = sadd.s32 1, %s835_s19  ;;  %p711_p0 = scmp.ge.s32.totalorder %s839_s20, 1  ;;  %s839_s20 = sphi %s876_s20, %s15_s20   ;;  %s835_s19 = sphi %s874_s19, %s1037_s19   ;;  %s831_s18 = sphi %s872_s18, %s1036_s18  }
   0x3   : > { %p29_p1 = scmp.ge.s32.totalorder %s27_s21, 2  ;;  %p206_p2 = scmp.lt.s32.totalorder %s839_s20, 3 }
   0x5   : > { %s1039_s21 = smov (%p29_p1, %s27_s21), 0  ;;  %p207_p3 = pnand %p711_p0, %p206_p2 }
   0x6   : > { %p240_p4 = scmp.lt.s32.totalorder (!%p207_p3), %s831_s18, 1  ;;  %v813_v0 = vld [vmem:[%s1031_s1] sm:$0xff] (!%p207_p3)   ;;  %vm316_vm0 = vcmask (!%p207_p3), 490496   ;;  %v814_v1 = vld [vmem:[%s1031_s1 + $0x10] sm:$0xff] (!%p207_p3)   ;;  %v841_v2 = vmov (!%p207_p3), 0   ;;  %v401_v6 = vld [vmem:[%s1032_s2 + $0x18] sm:$0xff] (!%p207_p3) }
   0x7   : > { %210 = sbr.rel (%p207_p3) target bundleno = 261 (0x105), region = 40  ;;  %764 = vmatprep.mubr.msk.bf16.mxu0 (!%p207_p3), %vm316_vm0, %v813_v0  ;;  %768 = vmatprep.mubr.msk.bf16.mxu1 (!%p207_p3), %vm316_vm0, %v814_v1  ;;  %v400_v3 = vld [vmem:[%s1032_s2 + $0x10] sm:$0xff] (!%p207_p3)  ;;  %v398_v4 = vld [vmem:[%s1032_s2] sm:$0xff] (!%p207_p3)  ;;  %v399_v8 = vld [vmem:[%s1032_s2 + $0x8] sm:$0xff] (!%p207_p3)  ;;  %vm329_vm1 = vcmask (!%p207_p3), 1045504   ;;  %vm614_vm12 = vcmask (!%p207_p3), 322560  }
   0x8   : > { %808 = vset.pattern.permute.xlu1 (!%p207_p3), %v841_v2  ;;  %807 = vset.pattern.permute.xlu0 (!%p207_p3), %v841_v2  ;;  %v403_v10 = vld [vmem:[%s1032_s2 + $0x28] sm:$0xff] (!%p207_p3)  ;;  %v402_v11 = vld [vmem:[%s1032_s2 + $0x20] sm:$0xff] (!%p207_p3)  ;;  %v405_v13 = vld [vmem:[%s1032_s2 + $0x38] sm:$0xf] (!%p207_p3)  ;;  %vm622_vm15 = vcmask (!%p207_p3), 320512  }
   0x9   : > { %418 = vperm.xlu1 (!%p207_p3), %808, %v400_v3   ;;  %408 = vperm.xlu0 (!%p207_p3), %807, %v398_v4   ;;  %v404_v14 = vld [vmem:[%s1032_s2 + $0x30] sm:$0xff] (!%p207_p3)  ;;  %v815_v16 = vld [vmem:[%s1031_s1 + $0x8] sm:$0xff] (!%p207_p3)   ;;  %v816_v17 = vld [vmem:[%s1031_s1 + $0x18] sm:$0x3f] (!%p207_p3)  }
   0xa   : > { %v455_v18 = vld [vmem:[%s1033_s3 + $0x8] sm:$0xff] (!%p207_p3)  ;;  %v454_v19 = vld [vmem:[%s1033_s3] sm:$0xff] (!%p207_p3)  ;;  %v457_v20 = vld [vmem:[%s1033_s3 + $0x18] sm:$0xff] (!%p207_p3) }
   0xb   : > { %v456_v21 = vld [vmem:[%s1033_s3 + $0x10] sm:$0xff] (!%p207_p3)  ;;  %v459_v22 = vld [vmem:[%s1033_s3 + $0x28] sm:$0xff] (!%p207_p3)  ;;  %v458_v23 = vld [vmem:[%s1033_s3 + $0x20] sm:$0xff] (!%p207_p3) }
   0xc   : > { %v511_v24 = vld [vmem:[%s1034_s4 + $0x8] sm:$0xff] (!%p207_p3)  ;;  %v510_v25 = vld [vmem:[%s1034_s4] sm:$0xff] (!%p207_p3)  ;;  %v461_v26 = vld [vmem:[%s1033_s3 + $0x38] sm:$0xf] (!%p207_p3) }
   0xd   : > { %423 = vperm.xlu1 (!%p207_p3), %808, %v401_v6   ;;  %413 = vperm.xlu0 (!%p207_p3), %807, %v399_v8   ;;  %v460_v27 = vld [vmem:[%s1033_s3 + $0x30] sm:$0xff] (!%p207_p3)  ;;  %vm519_vm2 = vcmp.gt.f32.partialorder (!%p207_p3), %v511_v24, 0.0  ;;  %vm518_vm3 = vcmp.gt.f32.partialorder (!%p207_p3), %v510_v25, 0.0  ;;  %v513_v28 = vld [vmem:[%s1034_s4 + $0x18] sm:$0xff] (!%p207_p3)  ;;  %v515_v32 = vld [vmem:[%s1034_s4 + $0x28] sm:$0xff] (!%p207_p3) }
   0xe   : > { %s1041_s18 = smov (!%p240_p4, %s831_s18), 1  ;;  %v512_v29 = vld [vmem:[%s1034_s4 + $0x10] sm:$0xff]  ;;  %v535_v30 = vsel %vm519_vm2, 1, %v841_v2  ;;  %v534_v31 = vsel %vm518_vm3, 1, %v841_v2  ;;  %vm521_vm4 = vcmp.gt.f32.partialorder %v513_v28, 0.0  ;;  %v514_v33 = vld [vmem:[%s1034_s4 + $0x20] sm:$0xff] }
   0xf   : > { %s738_s26 = sshll.u32 %s1041_s18, 5  ;;  %vm520_vm5 = vcmp.gt.f32.partialorder %v512_v29, 0.0  ;;  %v537_v34 = vsel %vm521_vm4, 1, %v841_v2  ;;  %vm523_vm6 = vcmp.gt.f32.partialorder %v515_v32, 0.0  ;;  %vm522_vm7 = vcmp.gt.f32.partialorder %v514_v33, 0.0  ;;  %v516_v37 = vld [vmem:[%s1034_s4 + $0x30] sm:$0xff] }
  0x10   : > { %s247_s8 = scalar_lea.vmem %s1030_s0, %s738_s26  ;;  %v536_v35 = vsel %vm520_vm5, 1, %v841_v2  ;;  %v517_v36 = vld [vmem:[%s1034_s4 + $0x38] sm:$0xf]  ;;  %v539_v38 = vsel %vm523_vm6, 1, %v841_v2  ;;  %v538_v39 = vsel %vm522_vm7, 1, %v841_v2  ;;  %vm524_vm9 = vcmp.gt.f32.partialorder %v516_v37, 0.0  ;;  %s255_s23 = scalar_lea.vmem %s1035_s5, %s738_s26 }
  0x11   : > { %v809_v5 = vld [vmem:[%s247_s8] sm:$0xff]   ;;  %v810_v7 = vld [vmem:[%s247_s8 + $0x8] sm:$0xff]   ;;  %v811_v9 = vld [vmem:[%s247_s8 + $0x10] sm:$0xff]   ;;  %433 = vperm.xlu1 %808, %v403_v10   ;;  %428 = vperm.xlu0 %807, %v402_v11   ;;  %vm525_vm8 = vcmp.gt.f32.partialorder %v517_v36, 0.0  ;;  %v540_v41 = vsel %vm524_vm9, 1, %v841_v2 }
  0x12   : > { %756 = vmatprep.subr.bf16.mxu0 %v809_v5  ;;  %772 = vmatprep.subr.bf16.mxu1 %v809_v5  ;;  %v812_v12 = vld [vmem:[%s247_s8 + $0x18] sm:$0x3f]   ;;  %v541_v40 = vsel %vm525_vm8, 1, %v841_v2 }
  0x13   : > { %757 = vmatpush3.bf16.msra.mxu0 %v809_v5  ;;  %776 = vmatpush3.bf16.msra.mxu1 %v809_v5  ;;  %v331_v15 = vsel %vm329_vm1, %v812_v12, 0 }
  0x14   : > { %758 = vmatprep.subr.bf16.mxu0 %v810_v7  ;;  %773 = vmatprep.subr.bf16.mxu1 %v810_v7 }
  0x15   : > { %443 = vperm.xlu1 %808, %v405_v13   ;;  %438 = vperm.xlu0 %807, %v404_v14  }
  0x17   : > { %759 = vmatpush3.bf16.msra.mxu0 %v810_v7  ;;  %777 = vmatpush3.bf16.msra.mxu1 %v810_v7 }
  0x18   : > { %760 = vmatprep.subr.bf16.mxu0 %v811_v9  ;;  %774 = vmatprep.subr.bf16.mxu1 %v811_v9 }
  0x19   : > { %469 = vperm.xlu1 %808, %v455_v18   ;;  %464 = vperm.xlu0 %807, %v454_v19  }
  0x1b   : > { %761 = vmatpush3.bf16.msra.mxu0 %v811_v9  ;;  %778 = vmatpush3.bf16.msra.mxu1 %v811_v9 }
  0x1c   : > { %780 = vmatprep.subr.msk.bf16.mxu0 %vm329_vm1, %v812_v12  ;;  %781 = vmatprep.subr.msk.bf16.mxu1 %vm329_vm1, %v812_v12 }
  0x1d   : > { %479 = vperm.xlu1 %808, %v457_v20   ;;  %474 = vperm.xlu0 %807, %v456_v21  }
  0x1f   : > { %763 = vmatpush3.bf16.msra.mxu0 %v331_v15  ;;  %779 = vmatpush3.bf16.msra.mxu1 %v331_v15 }
  0x21   : > { %489 = vperm.xlu1 %808, %v459_v22   ;;  %484 = vperm.xlu0 %807, %v458_v23  }
  0x22   : > { %765 = vmatmul.mubr.msk.bf16.vlgmr.msra.gmra.mrb[0].mxu0 %vm316_vm0, %v815_v16  ;;  %769 = vmatmul.mubr.msk.bf16.vlgmr.msra.gmra.mrb[0].mxu1 %vm316_vm0, %v816_v17 }
  0x25   : > { %499 = vperm.xlu1 %808, %v461_v26   ;;  %494 = vperm.xlu0 %807, %v460_v27  }
  0x29   : > { %546 = vperm.xlu1 %808, %v535_v30   ;;  %543 = vperm.xlu0 %807, %v534_v31  }
  0x2d   : > { %552 = vperm.xlu1 %808, %v537_v34   ;;  %549 = vperm.xlu0 %807, %v536_v35  }
  0x31   : > { %558 = vperm.xlu1 %808, %v539_v38   ;;  %555 = vperm.xlu0 %807, %v538_v39  }
  0x35   : > { %564 = vperm.xlu1 %808, %v541_v40   ;;  %561 = vperm.xlu0 %807, %v540_v41  }
  0x88   : > { %v419_v42 = vpop.permute.xlu1 %418  ;;  %v409_v43 = vpop.permute.xlu0 %408 }
  0x8c   : > { %v424_v44 = vpop.permute.xlu1 %423  ;;  %v414_v45 = vpop.permute.xlu0 %413 }
  0x90   : > { %v434_v46 = vpop.permute.xlu1 %433  ;;  %v429_v47 = vpop.permute.xlu0 %428 }
  0x94   : > { %v444_v48 = vpop.permute.xlu1 %443  ;;  %v439_v49 = vpop.permute.xlu0 %438 }
  0x98   : > { %v470_v50 = vpop.permute.xlu1 %469  ;;  %v465_v51 = vpop.permute.xlu0 %464 }
  0x9c   : > { %v480_v52 = vpop.permute.xlu1 %479  ;;  %v475_v53 = vpop.permute.xlu0 %474 }
  0xa0   : > { %v490_v54 = vpop.permute.xlu1 %489  ;;  %v485_v55 = vpop.permute.xlu0 %484 }
  0xa4   : > { %v500_v56 = vpop.permute.xlu1 %499  ;;  %v495_v57 = vpop.permute.xlu0 %494 }
  0xa8   : > { %v996_v58 = vpop.permute.xlu1 %546  ;;  %v544_v59 = vpop.permute.xlu0 %543 }
  0xa9   : > { %vm566_vm10 = vcmp.eq.s32.totalorder %v544_v59, 1  ;;  %vm567_vm2 = vcmp.eq.s32.totalorder %v996_v58, 1 }
  0xac   : > { %v553_v60 = vpop.permute.xlu1 %552  ;;  %v550_v61 = vpop.permute.xlu0 %549 }
  0xad   : > { %vm569_vm11 = vcmp.eq.s32.totalorder %v553_v60, 1  ;;  %vm568_vm13 = vcmp.eq.s32.totalorder %v550_v61, 1 }
  0xb0   : > { %v998_v62 = vpop.permute.xlu1 %558  ;;  %v556_v63 = vpop.permute.xlu0 %555 }
  0xb1   : > { %vm570_vm14 = vcmp.eq.s32.totalorder %v556_v63, 1  ;;  %vm571_vm3 = vcmp.eq.s32.totalorder %v998_v62, 1 }
  0xb4   : > { %v565_v0 = vpop.permute.xlu1 %564  ;;  %v562_v1 = vpop.permute.xlu0 %561 }
  0xb5   : > { %vm573_vm0 = vcmp.eq.s32.totalorder %v565_v0, 1  ;;  %vm572_vm1 = vcmp.eq.s32.totalorder %v562_v1, 1 }
  0xf5   : > { %v766_v2 = vpop.f32.mrb[0].mxu0  ;;  %v770_v3 = vpop.f32.mrb[0].mxu1 }
  0xf6   : > { %v448_v4 = vmul.f32 %v766_v2, %v419_v42  ;;  %v452_v5 = vmul.f32 %v770_v3, %v439_v49  ;;  %v367_v6 = vpop.f32.mrb[1].mxu0  ;;  %v383_v7 = vpop.f32.mrb[1].mxu1 }
  0xf7   : > { %v446_v8 = vmul.f32 %v409_v43, %v367_v6  ;;  %v450_v9 = vmul.f32 %v429_v47, %v383_v7  ;;  %v767_v10 = vpop.f32.mrb[2].mxu0  ;;  %v771_v11 = vpop.f32.mrb[2].mxu1 }
  0xf8   : > { %v504_v12 = vadd.f32 %v475_v53, %v448_v4  ;;  %v508_v13 = vadd.f32 %v495_v57, %v452_v5  ;;  %v449_v14 = vmul.f32 %v767_v10, %v424_v44  ;;  %v453_v15 = vmul.f32 %v771_v11, %v444_v48  ;;  %v370_v16 = vpop.f32.mrb[3].mxu0  ;;  %v386_v17 = vpop.f32.mrb[3].mxu1 }
  0xf9   : > { %v502_v18 = vadd.f32 %v465_v51, %v446_v8  ;;  %v506_v19 = vadd.f32 %v485_v55, %v450_v9  ;;  %v447_v20 = vmul.f32 %v414_v45, %v370_v16  ;;  %v451_v21 = vmul.f32 %v434_v46, %v386_v17 }
  0xfa   : > { %v528_v22 = vmax.f32 %v504_v12, 0.0  ;;  %v532_v23 = vmax.f32 %v508_v13, 0.0  ;;  %v505_v24 = vadd.f32 %v480_v52, %v449_v14  ;;  %v509_v25 = vadd.f32 %v500_v56, %v453_v15 }
  0xfb   : > { %v526_v26 = vmax.f32 %v502_v18, 0.0  ;;  %v530_v27 = vmax.f32 %v506_v19, 0.0  ;;  %v503_v28 = vadd.f32 %v470_v50, %v447_v20  ;;  %v507_v29 = vadd.f32 %v490_v54, %v451_v21 }
  0xfc   : > { %v576_v30 = vsel %vm568_vm13, %v528_v22, %v504_v12  ;;  %v580_v31 = vsel %vm572_vm1, %v532_v23, %v508_v13  ;;  %v529_v32 = vmax.f32 %v505_v24, 0.0  ;;  %v533_v33 = vmax.f32 %v509_v25, 0.0 }
  0xfd   : > { %v742_v34 = vpack.c.bf16 %v576_v30, %v576_v30  ;;  %v746_v35 = vpack.c.bf16 %v580_v31, %v580_v31  ;;  %v574_v36 = vsel %vm566_vm10, %v526_v26, %v502_v18  ;;  %v578_v37 = vsel %vm570_vm14, %v530_v27, %v506_v19 }
  0xfe   : > { %v740_v38 = vpack.c.bf16 %v574_v36, %v574_v36  ;;  %v744_v39 = vpack.c.bf16 %v578_v37, %v578_v37  ;;  %v577_v40 = vsel %vm569_vm11, %v529_v32, %v505_v24  ;;  %v581_v41 = vsel %vm573_vm0, %v533_v33, %v509_v25 }
  0xff   : > { %617 = vst.msk [vmem:[%s255_s23 + $0x8] sm:$0xf] %vm614_vm12, %v742_v34  ;;  %621 = vst.msk [vmem:[%s255_s23 + $0x18] sm:$0xf] %vm614_vm12, %v746_v35  ;;  %v743_v42 = vpack.c.bf16 %v577_v40, %v577_v40  ;;  %v747_v43 = vpack.c.bf16 %v581_v41, %v581_v41  ;;  %v527_v44 = vmax.f32 %v503_v28, 0.0  ;;  %v531_v45 = vmax.f32 %v507_v29, 0.0 }
 0x100   : > { %615 = vst.msk [vmem:[%s255_s23] sm:$0xf] %vm614_vm12, %v740_v38  ;;  %619 = vst.msk [vmem:[%s255_s23 + $0x10] sm:$0xf] %vm614_vm12, %v744_v39 }
 0x101   : > { %618 = vst.msk [vmem:[%s255_s23 + $0xc] sm:$0xf] %vm614_vm12, %v743_v42  ;;  %v575_v46 = vsel %vm567_vm2, %v527_v44, %v503_v28  ;;  %v579_v47 = vsel %vm571_vm3, %v531_v45, %v507_v29 }
 0x102   : > { %623 = vst.msk [vmem:[%s255_s23 + $0x1c] sm:$0x3] %vm622_vm15, %v747_v43  ;;  %v741_v48 = vpack.c.bf16 %v575_v46, %v575_v46  ;;  %v745_v49 = vpack.c.bf16 %v579_v47, %v579_v47 }
 0x104   : > { %616 = vst.msk [vmem:[%s255_s23 + $0x4] sm:$0xf] %vm614_vm12, %v741_v48  ;;  %620 = vst.msk [vmem:[%s255_s23 + $0x14] sm:$0xf] %vm614_vm12, %v745_v49 }
 0x105 PF: > { %s15_s20 = sadd.s32 1, %s839_s20   ;;  %s1036_s18 = smov %s835_s19 }
 0x106   : > { %p12_p5 = scmp.ge.s32.totalorder %s15_s20, 4   ;;  %s1037_s19 = smov %s1039_s21 }
 0x108   :  { %14 = sbr.rel (!%p12_p5) target bundleno = 2 (0x2), region = 70 }

// kernel: msg3d_forward.31
= control target key start
LH: loop header
LB: loop body
LE: loop exit
PB: predicated region body
PF: predicated region fallthrough
CT: control target
= control target key end

     0   :  { %s1509_s18 = smov 0   ;;  %s1702_s0 = inlined_call_operand.vmem [shape: bf16[2,48,80], index: 0, kind: input, shape index: {}]   ;;  %s1703_s1 = inlined_call_operand.vmem [shape: bf16[2,12,40], index: 1, kind: input, shape index: {}]   ;;  %s1704_s2 = inlined_call_operand.vmem [shape: bf16[2,60,40], index: 2, kind: input, shape index: {}]   ;;  %s1705_s3 = inlined_call_operand.vmem [shape: bf16[4,3,12,12], index: 3, kind: input, shape index: {}]   ;;  %s1706_s4 = inlined_call_operand.vmem [shape: f32[60,1], index: 4, kind: input, shape index: {}]   ;;  %s1707_s5 = inlined_call_operand.vmem [shape: bf16[2,60,40], index: 5, kind: output, shape index: {}]  }
   0x1 LB: > { %s1217_s19 = sadd.s32 4294967295, %s1468_s18   ;;  %p1221_p0 = scmp.ge.s32.totalorder %s1468_s18, 1  ;;  %s1468_s18 = sphi %s1509_s18, %s15_s18  }
   0x2   : > { %p207_p1 = scmp.lt.s32.totalorder %s1468_s18, 3 }
   0x4   : > { %p208_p2 = pnand %p1221_p0, %p207_p1 }
   0x5   : > { %p245_p3 = scmp.lt.s32.totalorder (!%p208_p2), %s1217_s19, 1  ;;  %v1470_v0 = vmov (!%p208_p2), 0.0   ;;  %vm1471_vm0 = vmmov (!%p208_p2), 0   ;;  %s1472_s24 = smov (!%p208_p2), 108   ;;  %v1008_v7 = vld [vmem:[%s1706_s4] sm:$0xff] (!%p208_p2)  ;;  %v1009_v8 = vld [vmem:[%s1706_s4 + $0x8] sm:$0xff] (!%p208_p2) }
   0x6   : > { %211 = sbr.rel (%p208_p2) target bundleno = 421 (0x1a5), region = 40  ;;  %1356 = vmatprep.subr.bf16.mxu1 (!%p208_p2), %v1470_v0  ;;  %1338 = vmatprep.subr.bf16.mxu0 (!%p208_p2), %v1470_v0  ;;  %s1473_s25 = smov (!%p208_p2), 113   ;;  %v1478_v9 = vmov (!%p208_p2), 0   ;;  %v1010_v10 = vld [vmem:[%s1706_s4 + $0x10] sm:$0xff] (!%p208_p2)  ;;  %v1012_v11 = vld [vmem:[%s1706_s4 + $0x20] sm:$0xff] (!%p208_p2)  ;;  %v1011_v12 = vld [vmem:[%s1706_s4 + $0x18] sm:$0xff] (!%p208_p2) }
   0x7   : > { %1358 = vmatprep.mubr.msk.bf16.mxu1 (!%p208_p2), %vm1471_vm0, %v1470_v0  ;;  %1340 = vmatprep.mubr.msk.bf16.mxu0 (!%p208_p2), %vm1471_vm0, %v1470_v0  ;;  %s1474_s26 = smov (!%p208_p2), 123   ;;  %s1475_s27 = smov (!%p208_p2), 103   ;;  %v1014_v13 = vld [vmem:[%s1706_s4 + $0x30] sm:$0xff] (!%p208_p2)  ;;  %v1013_v14 = vld [vmem:[%s1706_s4 + $0x28] sm:$0xff] (!%p208_p2)  ;;  %v1015_v15 = vld [vmem:[%s1706_s4 + $0x38] sm:$0xf] (!%p208_p2) }
   0x8   : > { %s1476_s28 = smov (!%p208_p2), 93   ;;  %s1477_s29 = smov (!%p208_p2), 88   ;;  %1444 = vset.pattern.permute.xlu1 (!%p208_p2), %v1478_v9  ;;  %1445 = vset.pattern.permute.xlu0 (!%p208_p2), %v1478_v9  ;;  %vm289_vm1 = vcmask (!%p208_p2), 1045504   ;;  %v1451_v19 = vld [vmem:[%s1705_s3 + $0x8] sm:$0x3f] (!%p208_p2)   ;;  %vm285_vm2 = vcmask (!%p208_p2), 97280  }
   0x9   : > { %v1450_v21 = vld [vmem:[%s1705_s3 + $0x20] sm:$0x3f] (!%p208_p2)   ;;  %v1453_v30 = vld [vmem:[%s1705_s3 + $0x18] sm:$0x3f] (!%p208_p2)   ;;  %v1454_v33 = vld [vmem:[%s1705_s3 + $0x10] sm:$0x3f] (!%p208_p2)  }
   0xa   : > { %v1452_v27 = vld [vmem:[%s1705_s3] sm:$0x3f] (!%p208_p2)   ;;  %v1456_v36 = vld [vmem:[%s1705_s3 + $0x38] sm:$0x3f] (!%p208_p2)   ;;  %v1455_v37 = vld [vmem:[%s1705_s3 + $0x28] sm:$0x3f] (!%p208_p2)  }
   0xb   : > { %v1458_v42 = vld [vmem:[%s1705_s3 + $0x30] sm:$0x3f] (!%p208_p2)   ;;  %v1459_v46 = vld [vmem:[%s1705_s3 + $0x40] sm:$0x3f] (!%p208_p2)   ;;  %v1460_v48 = vld [vmem:[%s1705_s3 + $0x48] sm:$0x3f] (!%p208_p2)  }
   0xc   : > { %v1457_v43 = vld [vmem:[%s1705_s3 + $0x50] sm:$0x3f] (!%p208_p2)   ;;  %v1461_v50 = vld [vmem:[%s1705_s3 + $0x58] sm:$0x3f] (!%p208_p2)   ;;  %vm1136_vm3 = vcmask (!%p208_p2), 320512   ;;  %vm1128_vm4 = vcmask (!%p208_p2), 322560  }
   0xd   : > { %s1709_s19 = smov (!%p245_p3, %s1217_s19), 1  ;;  %vm993_vm5 = vcmask 1043456  }
   0xe   : > { %s1426_s20 = smul.u32 24, %s1709_s19 }
  0x10   : > { %s249_s23 = scalar_lea.vmem %s1702_s0, %s1426_s20 }
  0x11   : > { %v1446_v1 = vld [vmem:[%s249_s23 + $0x4] sm:$0xfc]   ;;  %v1447_v2 = vld [vmem:[%s249_s23] sm:$0x3f]   ;;  %v1449_v4 = vld [vmem:[%s249_s23 + $0x10] sm:$0xfc]  }
  0x12   : > { %v465_v3 = vrot.slane %v1446_v1, 2  ;;  %283 = vrot.lane.b32.xlu1 %v1447_v2, %s1472_s24  ;;  %v1529_v5 = vld [vmem:[%s249_s23 + $0xc] sm:$0x3f]   ;;  %v824_v6 = vrot.slane %v1449_v4, 2 }
  0x13   : > { %v704_v38 = vsel %vm289_vm1, %v1529_v5, 0 }
  0x14   : > { %466 = vrot.lane.b32.xlu0 %v465_v3, %s1472_s24 }
  0x16   : > { %339 = vrot.lane.b32.xlu1 %v1447_v2, %s1473_s25 }
  0x18   : > { %520 = vrot.lane.b32.xlu0 %v465_v3, %s1474_s26 }
  0x1a   : > { %396 = vrot.lane.b32.xlu1 %v1447_v2, %s1475_s27 }
  0x1c   : > { %577 = vrot.lane.b32.xlu0 %v465_v3, %s1476_s28 }
  0x1e   : > { %646 = vrot.lane.b32.xlu1 %v1529_v5, %s1472_s24 }
  0x20   : > { %825 = vrot.lane.b32.xlu0 %v824_v6, %s1472_s24  ;;  %s1290_s24 = sshll.u32 %s1709_s19, 5 }
  0x21   : > { %s1662_s6 = scalar_lea.vmem %s1704_s2, %s1290_s24  ;;  %s1671_s8 = scalar_lea.vmem %s1707_s5, %s1290_s24 }
  0x22   : > { %755 = vrot.lane.b32.xlu1 %v1529_v5, %s1477_s29  ;;  %v1071_v58 = vld [vmem:[%s1662_s6 + $0x1c] sm:$0x3]  ;;  %v1070_v2 = vld [vmem:[%s1662_s6 + $0x18] sm:$0xf] }
  0x23   : > { %v1079_v60 = vunpack.c.l.bf16 %v1071_v58  ;;  %v1078_v5 = vunpack.c.l.bf16 %v1070_v2 }
  0x24   : > { %879 = vrot.lane.b32.xlu0 %v824_v6, %s1473_s25  ;;  %s1289_s25 = sshll.u32 %s1709_s19, 3 }
  0x25   : > { %s254_s28 = scalar_lea.vmem %s1703_s1, %s1289_s25 }
  0x26   : > { %1018 = vperm.xlu1 %1444, %v1008_v7   ;;  %v988_v55 = vld [vmem:[%s254_s28 + $0x4] sm:$0x3]  ;;  %v987_v1 = vld [vmem:[%s254_s28] sm:$0xf] }
  0x27   : > { %v990_v56 = vunpack.c.l.bf16 %v988_v55  ;;  %v989_v3 = vunpack.c.l.bf16 %v987_v1 }
  0x28   : > { %936 = vrot.lane.b32.xlu0 %v824_v6, %s1475_s27 }
  0x2a   : > { %1028 = vperm.xlu1 %1444, %v1010_v10  }
  0x2c   : > { %1023 = vperm.xlu0 %1445, %v1009_v8  }
  0x2e   : > { %1033 = vperm.xlu1 %1444, %v1011_v12  }
  0x30   : > { %1038 = vperm.xlu0 %1445, %v1012_v11  }
  0x32   : > { %1043 = vperm.xlu1 %1444, %v1013_v14  }
  0x34   : > { %1048 = vperm.xlu0 %1445, %v1014_v13  }
  0x36   : > { %1053 = vperm.xlu1 %1444, %v1015_v15  }
  0x84   : > { %v284_v16 = vpop.permute.xlu1 %283 }
  0x85   : > { %v291_v18 = vsel %vm289_vm1, %v284_v16, 0 }
  0x86   : > { %v467_v17 = vpop.permute.xlu0 %466  ;;  %1339 = vmatpush3.bf16.msra.mxu0 %v291_v18 }
  0x87   : > { %v472_v20 = vsel %vm289_vm1, %v467_v17, 0  ;;  %1344 = vmatprep.subr.bf16.mxu0 %v1470_v0 }
  0x88   : > { %1357 = vmatpush3.bf16.msra.mxu1 %v472_v20  ;;  %v340_v22 = vpop.permute.xlu1 %339 }
  0x89   : > { %1362 = vmatprep.subr.bf16.mxu1 %v1470_v0  ;;  %1341 = vmatmul.mubr.msk.bf16.vlgmr.msra.gmra.mrb[0].mxu0 %vm285_vm2, %v1451_v19  ;;  %v345_v24 = vsel %vm289_vm1, %v340_v22, 0 }
  0x8a   : > { %v521_v23 = vpop.permute.xlu0 %520  ;;  %1345 = vmatpush3.bf16.msra.mxu0 %v345_v24  ;;  %1346 = vmatprep.mubr.msk.bf16.mxu0 %vm1471_vm0, %v1470_v0 }
  0x8b   : > { %v526_v25 = vsel %vm289_vm1, %v521_v23, 0  ;;  %1359 = vmatmul.mubr.msk.bf16.vlgmr.msra.gmra.mrb[0].mxu1 %vm285_vm2, %v1450_v21  ;;  %1350 = vmatprep.subr.bf16.mxu0 %v1470_v0  ;;  %v1301_v21 = vld [vmem:[%s1662_s6] sm:$0xff]  }
  0x8c   : > { %1363 = vmatpush3.bf16.msra.mxu1 %v526_v25  ;;  %1364 = vmatprep.mubr.msk.bf16.mxu1 %vm1471_vm0, %v1470_v0  ;;  %v397_v26 = vpop.permute.xlu1 %396  ;;  %v1302_v25 = vunpack.c.l.bf16 %v1301_v21 }
  0x8d   : > { %1368 = vmatprep.subr.bf16.mxu1 %v1470_v0  ;;  %v402_v28 = vsel %vm289_vm1, %v397_v26, 0 }
  0x8e   : > { %v578_v29 = vpop.permute.xlu0 %577 }
  0x8f   : > { %v583_v31 = vsel %vm289_vm1, %v578_v29, 0 }
  0x90   : > { %v647_v32 = vpop.permute.xlu1 %646 }
  0x91   : > { %1347 = vmatmul.mubr.msk.bf16.vlgmr.msra.gmra.mrb[4].mxu0 %vm285_vm2, %v1452_v27  ;;  %v652_v34 = vsel %vm289_vm1, %v647_v32, 0 }
  0x92   : > { %1351 = vmatpush3.bf16.msra.mxu0 %v402_v28  ;;  %1352 = vmatprep.mubr.msk.bf16.mxu0 %vm1471_vm0, %v1470_v0  ;;  %v826_v35 = vpop.permute.xlu0 %825 }
  0x93   : > { %1374 = vmatprep.subr.bf16.mxu0 %v1470_v0  ;;  %v831_v39 = vsel %vm289_vm1, %v826_v35, 0 }
  0x94   : > { %v756_v40 = vpop.permute.xlu1 %755 }
  0x95   : > { %v761_v44 = vsel %vm289_vm1, %v756_v40, 0 }
  0x96   : > { %v880_v41 = vpop.permute.xlu0 %879 }
  0x97   : > { %1365 = vmatmul.mubr.msk.bf16.vlgmr.msra.gmra.mrb[0].mxu1 %vm285_vm2, %v1453_v30  ;;  %v885_v45 = vsel %vm289_vm1, %v880_v41, 0  ;;  %v1303_v41 = vunpack.c.h.bf16 %v1301_v21 }
  0x98   : > { %1369 = vmatpush3.bf16.msra.mxu1 %v583_v31  ;;  %1370 = vmatprep.mubr.msk.bf16.mxu1 %vm1471_vm0, %v1470_v0 }
  0x99   : > { %1392 = vmatprep.subr.bf16.mxu1 %v1470_v0  ;;  %1353 = vmatmul.mubr.msk.bf16.vlgmr.msra.gmra.mrb[8].mxu0 %vm285_vm2, %v1454_v33 }
  0x9a   : > { %1375 = vmatpush3.bf16.msra.mxu0 %v652_v34  ;;  %1376 = vmatprep.mubr.msk.bf16.mxu0 %vm1471_vm0, %v1470_v0  ;;  %v937_v47 = vpop.permute.xlu0 %936 }
  0x9b   : > { %1380 = vmatprep.subr.bf16.mxu0 %v1470_v0  ;;  %v942_v49 = vsel %vm289_vm1, %v937_v47, 0 }
  0xa1   : > { %1377 = vmatmul.mubr.msk.bf16.vlgmr.msra.gmra.mrb[12].mxu0 %vm285_vm2, %v1456_v36 }
  0xa2   : > { %1381 = vmatpush3.bf16.msra.mxu0 %v704_v38  ;;  %1382 = vmatprep.mubr.msk.bf16.mxu0 %vm1471_vm0, %v1470_v0  ;;  %v1312_v38 = vld [vmem:[%s1662_s6 + $0x8] sm:$0xff]  }
  0xa3   : > { %1371 = vmatmul.mubr.msk.bf16.vlgmr.msra.gmra.mrb[0].mxu1 %vm285_vm2, %v1455_v37  ;;  %1386 = vmatprep.subr.bf16.mxu0 %v1470_v0  ;;  %v1306_v47 = vunpack.c.l.bf16 %v1312_v38 }
  0xa4   : > { %1393 = vmatpush3.bf16.msra.mxu1 %v831_v39  ;;  %1394 = vmatprep.mubr.msk.bf16.mxu1 %vm1471_vm0, %v1470_v0 }
  0xa5   : > { %1398 = vmatprep.subr.bf16.mxu1 %v1470_v0  ;;  %v1019_v51 = vpop.permute.xlu1 %1018 }
  0xa9   : > { %1383 = vmatmul.mubr.msk.bf16.vlgmr.msra.gmra.mrb[16].mxu0 %vm285_vm2, %v1458_v42  ;;  %v1648_v52 = vpop.permute.xlu1 %1028 }
  0xaa   : > { %1387 = vmatpush3.bf16.msra.mxu0 %v761_v44  ;;  %1388 = vmatprep.mubr.msk.bf16.mxu0 %vm1471_vm0, %v1470_v0 }
  0xab   : > { %1395 = vmatmul.mubr.msk.bf16.vlgmr.msra.gmra.mrb[4].mxu1 %vm285_vm2, %v1457_v43  ;;  %v1024_v57 = vpop.permute.xlu0 %1023 }
  0xac   : > { %1399 = vmatpush3.bf16.msra.mxu1 %v885_v45  ;;  %1400 = vmatprep.mubr.msk.bf16.mxu1 %vm1471_vm0, %v1470_v0 }
  0xad   : > { %1404 = vmatprep.subr.bf16.mxu1 %v1470_v0  ;;  %v1650_v53 = vpop.permute.xlu1 %1033 }
  0xaf   : > { %v1665_v63 = vpop.permute.xlu0 %1038 }
  0xb1   : > { %1389 = vmatmul.mubr.msk.bf16.vlgmr.msra.gmra.mrb[20].mxu0 %vm285_vm2, %v1459_v46  ;;  %v1653_v54 = vpop.permute.xlu1 %1043 }
  0xb3   : > { %v1049_v6 = vpop.permute.xlu0 %1048 }
  0xb4   : > { %v1062_v7 = vadd.f32 %v1049_v6, %v989_v3 }
  0xb5   : > { %v1054_v59 = vpop.permute.xlu1 %1053 }
  0xb6   : > { %v1063_v61 = vadd.f32 %v1054_v59, %v990_v56  ;;  %v1086_v8 = vadd.f32 %v1078_v5, %v1062_v7 }
  0xb7   : > { %1401 = vmatmul.mubr.msk.bf16.vlgmr.msra.gmra.mrb[4].mxu1 %vm285_vm2, %v1460_v48 }
  0xb8   : > { %1405 = vmatpush3.bf16.msra.mxu1 %v942_v49  ;;  %1406 = vmatprep.mubr.msk.bf16.mxu1 %vm1471_vm0, %v1470_v0  ;;  %v1087_v62 = vadd.f32 %v1079_v60, %v1063_v61  ;;  %v1094_v9 = vmax.f32 %v1086_v8, 0.0 }
  0xba   : > { %v1095_v0 = vmax.f32 %v1087_v62, 0.0  ;;  %v1298_v10 = vpack.c.bf16 %v1094_v9, %v1094_v9 }
  0xbc   : > { %v1299_v4 = vpack.c.bf16 %v1095_v0, %v1095_v0  ;;  %1135 = vst.msk [vmem:[%s1671_s8 + $0x18] sm:$0xf] %vm1128_vm4, %v1298_v10 }
  0xbe   : > { %1137 = vst.msk [vmem:[%s1671_s8 + $0x1c] sm:$0x3] %vm1136_vm3, %v1299_v4 }
  0xc3   : > { %1407 = vmatmul.mubr.msk.bf16.vlgmr.msra.gmra.mrb[4].mxu1 %vm285_vm2, %v1461_v50 }
 0x15c   : > { %v327_v11 = vpop.f32.mrb[0].mxu0 }
 0x15d   : > { %v1342_v12 = vpop.f32.mrb[1].mxu0 }
 0x15e   : > { %v330_v13 = vpop.f32.mrb[2].mxu0  ;;  %v1313_v12 = vld [vmem:[%s1662_s6 + $0x10] sm:$0xff]  }
 0x15f   : > { %v1343_v14 = vpop.f32.mrb[3].mxu0  ;;  %v1311_v21 = vunpack.c.h.bf16 %v1313_v12 }
 0x164   : > { %v381_v15 = vpop.f32.mrb[4].mxu0 }
 0x165   : > { %v382_v16 = vadd.f32 %v381_v15, %v327_v11  ;;  %v1348_v17 = vpop.f32.mrb[5].mxu0 }
 0x166   : > { %v384_v18 = vpop.f32.mrb[6].mxu0 }
 0x167   : > { %v385_v19 = vadd.f32 %v384_v18, %v330_v13  ;;  %v1349_v20 = vpop.f32.mrb[7].mxu0 }
 0x16c   : > { %v438_v22 = vpop.f32.mrb[8].mxu0 }
 0x16d   : > { %v445_v23 = vadd.f32 %v438_v22, %v382_v16  ;;  %v1354_v24 = vpop.f32.mrb[9].mxu0  ;;  %v1310_v16 = vunpack.c.l.bf16 %v1313_v12 }
 0x16e   : > { %v441_v26 = vpop.f32.mrb[10].mxu0 }
 0x16f   : > { %v446_v27 = vadd.f32 %v441_v26, %v385_v19  ;;  %v1056_v28 = vadd.f32 %v1019_v51, %v445_v23  ;;  %v1355_v29 = vpop.f32.mrb[11].mxu0 }
 0x171   : > { %v1080_v30 = vadd.f32 %v1302_v25, %v1056_v28 }
 0x173   : > { %v1088_v31 = vmax.f32 %v1080_v30, 0.0 }
 0x174   : > { %v688_v32 = vpop.f32.mrb[12].mxu0 }
 0x175   : > { %v1292_v33 = vpack.c.bf16 %v1088_v31, %v1088_v31  ;;  %v1378_v35 = vpop.f32.mrb[13].mxu0 }
 0x176   : > { %v619_v34 = vpop.f32.mrb[0].mxu1  ;;  %v691_v39 = vpop.f32.mrb[14].mxu0 }
 0x177   : > { %v994_v36 = vrot.slane %v619_v34, 4  ;;  %v1372_v37 = vpop.f32.mrb[1].mxu1  ;;  %1129 = vst.msk [vmem:[%s1671_s8] sm:$0xf] %vm1128_vm4, %v1292_v33  ;;  %v1379_v42 = vpop.f32.mrb[15].mxu0 }
 0x178   : > { %v622_v40 = vpop.f32.mrb[2].mxu1 }
 0x179   : > { %v995_v43 = vrot.slane %v622_v40, 4  ;;  %v1373_v44 = vpop.f32.mrb[3].mxu1  ;;  %v1006_v45 = vsel %vm993_vm5, %v446_v27, %v994_v36 }
 0x17a   : > { %v1057_v46 = vadd.f32 %v1024_v57, %v1006_v45 }
 0x17b   : > { %v996_v48 = vsel %vm993_vm5, %v994_v36, %v995_v43 }
 0x17c   : > { %v1081_v49 = vadd.f32 %v1303_v41, %v1057_v46  ;;  %v1058_v50 = vadd.f32 %v1648_v52, %v996_v48  ;;  %v740_v51 = vpop.f32.mrb[16].mxu0  ;;  %v1307_v52 = vunpack.c.h.bf16 %v1312_v38 }
 0x17d   : > { %v741_v58 = vadd.f32 %v740_v51, %v688_v32  ;;  %v1384_v59 = vpop.f32.mrb[17].mxu0 }
 0x17e   : > { %v1089_v55 = vmax.f32 %v1081_v49, 0.0  ;;  %v1082_v56 = vadd.f32 %v1306_v47, %v1058_v50  ;;  %v743_v60 = vpop.f32.mrb[18].mxu0 }
 0x17f   : > { %v744_v0 = vadd.f32 %v743_v60, %v691_v39  ;;  %v1385_v1 = vpop.f32.mrb[19].mxu0 }
 0x180   : > { %v1293_v61 = vpack.c.bf16 %v1089_v55, %v1089_v55  ;;  %v1090_v62 = vmax.f32 %v1082_v56, 0.0 }
 0x182   : > { %1130 = vst.msk [vmem:[%s1671_s8 + $0x4] sm:$0xf] %vm1128_vm4, %v1293_v61  ;;  %v1294_v57 = vpack.c.bf16 %v1090_v62, %v1090_v62 }
 0x184   : > { %1131 = vst.msk [vmem:[%s1671_s8 + $0x8] sm:$0xf] %vm1128_vm4, %v1294_v57  ;;  %v797_v2 = vpop.f32.mrb[20].mxu0 }
 0x185   : > { %v804_v3 = vadd.f32 %v797_v2, %v741_v58  ;;  %v1390_v4 = vpop.f32.mrb[21].mxu0 }
 0x186   : > { %v800_v5 = vpop.f32.mrb[22].mxu0 }
 0x187   : > { %v1059_v6 = vadd.f32 %v1650_v53, %v804_v3  ;;  %v805_v7 = vadd.f32 %v800_v5, %v744_v0  ;;  %v1391_v8 = vpop.f32.mrb[23].mxu0 }
 0x189   : > { %v1083_v9 = vadd.f32 %v1307_v52, %v1059_v6 }
 0x18b   : > { %v1091_v10 = vmax.f32 %v1083_v9, 0.0 }
 0x18d   : > { %v1295_v11 = vpack.c.bf16 %v1091_v10, %v1091_v10 }
 0x18f   : > { %1132 = vst.msk [vmem:[%s1671_s8 + $0xc] sm:$0xf] %vm1128_vm4, %v1295_v11 }
 0x196   : > { %v978_v13 = vpop.f32.mrb[4].mxu1 }
 0x197   : > { %v1001_v14 = vrot.slane %v978_v13, 4  ;;  %v1408_v15 = vpop.f32.mrb[5].mxu1 }
 0x198   : > { %v981_v17 = vpop.f32.mrb[6].mxu1 }
 0x199   : > { %v1007_v18 = vsel %vm993_vm5, %v805_v7, %v1001_v14  ;;  %v1002_v19 = vrot.slane %v981_v17, 4  ;;  %v1409_v20 = vpop.f32.mrb[7].mxu1 }
 0x19a   : > { %v1060_v53 = vadd.f32 %v1665_v63, %v1007_v18 }
 0x19b   : > { %v1003_v22 = vsel %vm993_vm5, %v1001_v14, %v1002_v19 }
 0x19c   : > { %v1084_v23 = vadd.f32 %v1310_v16, %v1060_v53  ;;  %v1061_v24 = vadd.f32 %v1653_v54, %v1003_v22 }
 0x19e   : > { %v1092_v25 = vmax.f32 %v1084_v23, 0.0  ;;  %v1085_v26 = vadd.f32 %v1311_v21, %v1061_v24 }
 0x1a0   : > { %v1296_v27 = vpack.c.bf16 %v1092_v25, %v1092_v25  ;;  %v1093_v28 = vmax.f32 %v1085_v26, 0.0 }
 0x1a2   : > { %1133 = vst.msk [vmem:[%s1671_s8 + $0x10] sm:$0xf] %vm1128_vm4, %v1296_v27  ;;  %v1297_v29 = vpack.c.bf16 %v1093_v28, %v1093_v28 }
 0x1a4   : > { %1134 = vst.msk [vmem:[%s1671_s8 + $0x14] sm:$0xf] %vm1128_vm4, %v1297_v29 }
 0x1a5 PF: > { %s15_s18 = sadd.s32 1, %s1468_s18  }
 0x1a6   : > { %p12_p4 = scmp.ge.s32.totalorder %s15_s18, 4  }
 0x1a8   :  { %14 = sbr.rel (!%p12_p4) target bundleno = 1 (0x1), region = 87 }

// kernel: msg3d_forward.36
= control target key start
LH: loop header
LB: loop body
LE: loop exit
PB: predicated region body
PF: predicated region fallthrough
CT: control target
= control target key end

     0   :  { %s2518_s15 = smov 0   ;;  %s2520_s16 = smov 0   ;;  %s3349_s0 = inlined_call_operand.vmem [shape: bf16[2,300,8], index: 0, kind: input, shape index: {}]   ;;  %s3350_s1 = inlined_call_operand.vmem [shape: bf16[300,300], index: 1, kind: input, shape index: {}]   ;;  %s3351_s2 = inlined_call_operand.vmem [shape: f32[300,1], index: 2, kind: input, shape index: {}]   ;;  %s3352_s3 = inlined_call_operand.vmem [shape: f32[300,1], index: 3, kind: input, shape index: {}]   ;;  %s3353_s4 = inlined_call_operand.vmem [shape: bf16[2,300,8], index: 4, kind: output, shape index: {}]  }
   0x1   :  { %s2522_s17 = smov 0  }
   0x2 LB: > { %s26_s18 = sadd.s32 1, %s2484_s16  ;;  %p2023_p0 = scmp.ge.s32.totalorder %s2488_s17, 1  ;;  %s2488_s17 = sphi %s2522_s17, %s14_s17   ;;  %s2484_s16 = sphi %s2520_s16, %s3355_s16   ;;  %s2480_s15 = sphi %s2518_s15, %s3354_s15  }
   0x3   : > { %p28_p1 = scmp.ge.s32.totalorder %s26_s18, 2  ;;  %p181_p2 = scmp.lt.s32.totalorder %s2488_s17, 3 }
   0x5   : > { %s3357_s18 = smov (%p28_p1, %s26_s18), 0  ;;  %p182_p3 = pnand %p2023_p0, %p181_p2 }
   0x6   : > { %p213_p4 = scmp.lt.s32.totalorder (!%p182_p3), %s2480_s15, 1  ;;  %v1176_v0 = vld [vmem:[%s3351_s2 + $0x10] sm:$0xff] (!%p182_p3)  ;;  %v1174_v1 = vld [vmem:[%s3351_s2] sm:$0xff] (!%p182_p3)  ;;  %v2490_v2 = vmov (!%p182_p3), 0   ;;  %v1177_v3 = vld [vmem:[%s3351_s2 + $0x18] sm:$0xff] (!%p182_p3)  ;;  %v2491_v4 = vmov (!%p182_p3), 0.0  }
   0x7   : > { %185 = sbr.rel (%p182_p3) target bundleno = 451 (0x1c3), region = 36  ;;  %804 = vmatprep.subr.bf16.mxu1 (!%p182_p3), %v2490_v2  ;;  %2370 = vset.pattern.permute.xlu1 (!%p182_p3), %v2490_v2  ;;  %v1175_v5 = vld [vmem:[%s3351_s2 + $0x8] sm:$0xff] (!%p182_p3)  ;;  %vm2492_vm0 = vmmov (!%p182_p3), 0   ;;  %v1178_v8 = vld [vmem:[%s3351_s2 + $0x20] sm:$0xff] (!%p182_p3)  ;;  %v1181_v10 = vld [vmem:[%s3351_s2 + $0x38] sm:$0xff] (!%p182_p3)  ;;  %vm800_vm1 = vcmask (!%p182_p3), 1045504  }
   0x8   : > { %2369 = vset.pattern.permute.xlu0 (!%p182_p3), %v2490_v2  ;;  %1224 = vperm.xlu1 (!%p182_p3), %2370, %v1176_v0   ;;  %v1179_v6 = vld [vmem:[%s3351_s2 + $0x28] sm:$0xff] (!%p182_p3)  ;;  %v1180_v11 = vld [vmem:[%s3351_s2 + $0x30] sm:$0xff] (!%p182_p3)  ;;  %v1182_v14 = vld [vmem:[%s3351_s2 + $0x40] sm:$0xff] (!%p182_p3)  ;;  %vm742_vm2 = vcmask (!%p182_p3), 359424   ;;  %vm1896_vm3 = vcmask (!%p182_p3), 60416   ;;  %vm1934_vm4 = vcmask (!%p182_p3), 58368  }
   0x9   : > { %1214 = vperm.xlu0 (!%p182_p3), %2369, %v1174_v1   ;;  %2221 = vmatprep.subr.bf16.mxu0 (!%p182_p3), %v2491_v4  ;;  %v1183_v13 = vld [vmem:[%s3351_s2 + $0x48] sm:$0xff] (!%p182_p3)  ;;  %v1185_v16 = vld [vmem:[%s3351_s2 + $0x58] sm:$0xff] (!%p182_p3)  ;;  %v1184_v17 = vld [vmem:[%s3351_s2 + $0x50] sm:$0xff] (!%p182_p3) }
   0xa   : > { %2227 = vmatprep.mubr.msk.bf16.mxu0 (!%p182_p3), %vm2492_vm0, %v2491_v4  ;;  %v1187_v20 = vld [vmem:[%s3351_s2 + $0x68] sm:$0xff] (!%p182_p3)  ;;  %v1186_v21 = vld [vmem:[%s3351_s2 + $0x60] sm:$0xff] (!%p182_p3)  ;;  %v1189_v24 = vld [vmem:[%s3351_s2 + $0x78] sm:$0xff] (!%p182_p3) }
   0xb   : > { %v1188_v26 = vld [vmem:[%s3351_s2 + $0x70] sm:$0xff] (!%p182_p3)  ;;  %v1191_v29 = vld [vmem:[%s3351_s2 + $0x88] sm:$0xff] (!%p182_p3)  ;;  %v1190_v32 = vld [vmem:[%s3351_s2 + $0x80] sm:$0xff] (!%p182_p3) }
   0xc   : > { %1229 = vperm.xlu1 (!%p182_p3), %2370, %v1177_v3   ;;  %v2390_v30 = vld [vmem:[%s3350_s1 + $0x8] ss:$12 sps:$4 sm:$0xff] (!%p182_p3)   ;;  %v2393_v31 = vld [vmem:[%s3350_s1 + $0x4] ss:$12 sps:$4 sm:$0xff] (!%p182_p3)   ;;  %v1193_v34 = vld [vmem:[%s3351_s2 + $0x98] sm:$0xff] (!%p182_p3) }
   0xd   : > { %1219 = vperm.xlu0 (!%p182_p3), %2369, %v1175_v5   ;;  %836 = vmatprep.mubr.bf16.mxu1 (!%p182_p3), %v2393_v31  ;;  %v1192_v35 = vld [vmem:[%s3351_s2 + $0x90] sm:$0xff] (!%p182_p3)  ;;  %v1195_v37 = vld [vmem:[%s3351_s2 + $0xa8] sm:$0xff] (!%p182_p3)  ;;  %v1194_v39 = vld [vmem:[%s3351_s2 + $0xa0] sm:$0xff] (!%p182_p3) }
   0xe   : > { %s3359_s15 = smov (!%p213_p4, %s2480_s15), 1  ;;  %v2394_v38 = vld [vmem:[%s3350_s1 + $0x20] ss:$12 sps:$4 sm:$0xff]   ;;  %v1197_v41 = vld [vmem:[%s3351_s2 + $0xb8] sm:$0xff]  ;;  %v1196_v42 = vld [vmem:[%s3351_s2 + $0xb0] sm:$0xff] }
   0xf   : > { %s2341_s25 = smul.u32 152, %s3359_s15  ;;  %v1199_v44 = vld [vmem:[%s3351_s2 + $0xc8] sm:$0xff]  ;;  %v2398_v45 = vld [vmem:[%s3350_s1 + $0x38] ss:$12 sps:$4 sm:$0xff]   ;;  %v1200_v49 = vld [vmem:[%s3351_s2 + $0xd0] sm:$0xff] }
  0x10   : > { %1239 = vperm.xlu1 %2370, %v1179_v6   ;;  %v1198_v46 = vld [vmem:[%s3351_s2 + $0xc0] sm:$0xff]  ;;  %v1201_v48 = vld [vmem:[%s3351_s2 + $0xd8] sm:$0xff]  ;;  %v1203_v51 = vld [vmem:[%s3351_s2 + $0xe8] sm:$0xff] }
  0x11   : > { %s2562_s30 = scalar_lea.vmem %s3349_s0, %s2341_s25  ;;  %1234 = vperm.xlu0 %2369, %v1178_v8   ;;  %v2402_v52 = vld [vmem:[%s3350_s1 + $0x50] ss:$12 sps:$4 sm:$0xff]   ;;  %v1202_v53 = vld [vmem:[%s3351_s2 + $0xe0] sm:$0xff]  ;;  %v1207_v58 = vld [vmem:[%s3351_s2 + $0x108] sm:$0xff]  ;;  %s3141_s20 = scalar_lea.vmem %s3353_s4, %s2341_s25 }
  0x12   : > { %v2371_v7 = vld [vmem:[%s2562_s30] sm:$0xff]   ;;  %v2372_v9 = vld [vmem:[%s2562_s30 + $0x8] sm:$0xff]   ;;  %v2373_v12 = vld [vmem:[%s2562_s30 + $0x10] sm:$0xff]  }
  0x13   : > { %805 = vmatpush1.bf16.msra.mxu1 %v2371_v7  ;;  %v2374_v15 = vld [vmem:[%s2562_s30 + $0x18] sm:$0xff]   ;;  %v2375_v18 = vld [vmem:[%s2562_s30 + $0x20] sm:$0xff]   ;;  %v2376_v22 = vld [vmem:[%s2562_s30 + $0x28] sm:$0xff]  }
  0x14   : > { %806 = vmatprep.subr.bf16.mxu1 %v2490_v2  ;;  %1249 = vperm.xlu1 %2370, %v1181_v10   ;;  %v2384_v19 = vld [vmem:[%s2562_s30 + $0x80] sm:$0xff]   ;;  %v2386_v23 = vld [vmem:[%s2562_s30 + $0x88] sm:$0xff]   ;;  %v2388_v25 = vld [vmem:[%s2562_s30 + $0x90] sm:$0x3f]  }
  0x15   : > { %1244 = vperm.xlu0 %2369, %v1180_v11   ;;  %2222 = vmatpush3.bf16.msra.mxu0 %v2384_v19  ;;  %v2377_v27 = vld [vmem:[%s2562_s30 + $0x30] sm:$0xff]   ;;  %v802_v28 = vsel %vm800_vm1, %v2388_v25, 0  ;;  %v2378_v33 = vld [vmem:[%s2562_s30 + $0x38] sm:$0xff]   ;;  %v2379_v36 = vld [vmem:[%s2562_s30 + $0x40] sm:$0xff]  }
  0x16   : > { %2223 = vmatprep.subr.bf16.mxu0 %v2491_v4  ;;  %v2380_v40 = vld [vmem:[%s2562_s30 + $0x48] sm:$0xff]   ;;  %v2381_v43 = vld [vmem:[%s2562_s30 + $0x50] sm:$0xff]   ;;  %v2382_v47 = vld [vmem:[%s2562_s30 + $0x58] sm:$0xff]  }
  0x17   : > { %807 = vmatpush1.bf16.msra.mxu1 %v2372_v9  ;;  %v2383_v50 = vld [vmem:[%s2562_s30 + $0x60] sm:$0xff]   ;;  %v2385_v54 = vld [vmem:[%s2562_s30 + $0x68] sm:$0xff]   ;;  %v1205_v55 = vld [vmem:[%s3351_s2 + $0xf8] sm:$0xff] }
  0x18   : > { %808 = vmatprep.subr.bf16.mxu1 %v2490_v2  ;;  %1259 = vperm.xlu1 %2370, %v1183_v13   ;;  %v1204_v56 = vld [vmem:[%s3351_s2 + $0xf0] sm:$0xff]  ;;  %v1206_v60 = vld [vmem:[%s3351_s2 + $0x100] sm:$0xff]  ;;  %v2389_v61 = vld [vmem:[%s2562_s30 + $0x78] sm:$0xff]  }
  0x19   : > { %1254 = vperm.xlu0 %2369, %v1182_v14   ;;  %2224 = vmatpush3.bf16.msra.mxu0 %v2386_v23  ;;  %v2387_v57 = vld [vmem:[%s2562_s30 + $0x70] sm:$0xff]   ;;  %v1209_v62 = vld [vmem:[%s3351_s2 + $0x118] sm:$0xff]  ;;  %v2391_v63 = vld [vmem:[%s3350_s1] ss:$12 sps:$4 sm:$0xff]  }
  0x1a   : > { %2225 = vmatprep.subr.bf16.mxu0 %v2491_v4  ;;  %v2406_v59 = vld [vmem:[%s3350_s1 + $0x68] ss:$12 sps:$4 sm:$0xff]   ;;  %v2410_v3 = vld [vmem:[%s3350_s1 + $0x80] ss:$12 sps:$4 sm:$0xff]   ;;  %v2397_v7 = vld [vmem:[%s3350_s1 + $0x18] ss:$12 sps:$4 sm:$0xff]  }
  0x1b   : > { %809 = vmatpush1.bf16.msra.mxu1 %v2373_v12  ;;  %v1208_v0 = vld [vmem:[%s3351_s2 + $0x110] sm:$0xff]  ;;  %v2395_v1 = vld [vmem:[%s3350_s1 + $0x1c] ss:$12 sps:$4 sm:$0xff]   ;;  %v1210_v5 = vld [vmem:[%s3351_s2 + $0x120] sm:$0xff] }
  0x1c   : > { %810 = vmatprep.subr.bf16.mxu1 %v2490_v2  ;;  %1269 = vperm.xlu1 %2370, %v1185_v16   ;;  %v1441_v6 = vld [vmem:[%s3352_s3 + $0x8] sm:$0xff]  ;;  %v1440_v8 = vld [vmem:[%s3352_s3] sm:$0xff]  ;;  %v1443_v10 = vld [vmem:[%s3352_s3 + $0x18] sm:$0xff] }
  0x1d   : > { %1264 = vperm.xlu0 %2369, %v1184_v17   ;;  %2226 = vmatpush3.bf16.msra.mxu0 %v802_v28  ;;  %v2399_v9 = vld [vmem:[%s3350_s1 + $0x34] ss:$12 sps:$4 sm:$0xff]   ;;  %v2414_v11 = vld [vmem:[%s3350_s1 + $0x98] ss:$12 sps:$4 sm:$0xff]   ;;  %v2401_v13 = vld [vmem:[%s3350_s1 + $0x30] ss:$12 sps:$4 sm:$0xff]  }
  0x1e   : > { %v1442_v12 = vld [vmem:[%s3352_s3 + $0x10] sm:$0xff]  ;;  %v1445_v14 = vld [vmem:[%s3352_s3 + $0x28] sm:$0xff]  ;;  %v1447_v17 = vld [vmem:[%s3352_s3 + $0x38] sm:$0xff] }
  0x1f   : > { %811 = vmatpush1.bf16.msra.mxu1 %v2374_v15  ;;  %v1444_v15 = vld [vmem:[%s3352_s3 + $0x20] sm:$0xff]  ;;  %v2403_v16 = vld [vmem:[%s3350_s1 + $0x4c] ss:$12 sps:$4 sm:$0xff]   ;;  %v1446_v19 = vld [vmem:[%s3352_s3 + $0x30] sm:$0xff] }
  0x20   : > { %812 = vmatprep.subr.bf16.mxu1 %v2490_v2  ;;  %1279 = vperm.xlu1 %2370, %v1187_v20   ;;  %v1449_v20 = vld [vmem:[%s3352_s3 + $0x48] sm:$0xff]  ;;  %v2407_v23 = vld [vmem:[%s3350_s1 + $0x64] ss:$12 sps:$4 sm:$0xff]   ;;  %v1455_v31 = vld [vmem:[%s3352_s3 + $0x78] sm:$0xff] }
  0x21   : > { %1274 = vperm.xlu0 %2369, %v1186_v21   ;;  %2228 = vmatmul.mubr.msk.bf16.vlgmr.msra.gmra.mrb[0].mxu0 %vm742_vm2, %v2390_v30  ;;  %v2405_v21 = vld [vmem:[%s3350_s1 + $0x48] ss:$12 sps:$4 sm:$0xff]   ;;  %v2409_v28 = vld [vmem:[%s3350_s1 + $0x60] ss:$12 sps:$4 sm:$0xff]  }
  0x22   : > { %2231 = vmatprep.mubr.msk.bf16.mxu0 %vm2492_vm0, %v2491_v4  ;;  %v2422_v25 = vld [vmem:[%s3350_s1 + $0xc8] ss:$12 sps:$4 sm:$0xff]  }
  0x23   : > { %813 = vmatpush1.bf16.msra.mxu1 %v2375_v18  ;;  %v2418_v18 = vld [vmem:[%s3350_s1 + $0xb0] ss:$12 sps:$4 sm:$0xff]  }
  0x24   : > { %814 = vmatprep.subr.bf16.mxu1 %v2490_v2  ;;  %1289 = vperm.xlu1 %2370, %v1189_v24   ;;  %v1451_v24 = vld [vmem:[%s3352_s3 + $0x58] sm:$0xff] }
  0x25   : > { %1284 = vperm.xlu0 %2369, %v1188_v26   ;;  %v1450_v26 = vld [vmem:[%s3352_s3 + $0x50] sm:$0xff]  ;;  %v2411_v30 = vld [vmem:[%s3350_s1 + $0x7c] ss:$12 sps:$4 sm:$0xff]  }
  0x27   : > { %815 = vmatpush1.bf16.msra.mxu1 %v2376_v22  ;;  %v1448_v22 = vld [vmem:[%s3352_s3 + $0x40] sm:$0xff] }
  0x28   : > { %816 = vmatprep.subr.bf16.mxu1 %v2490_v2  ;;  %1299 = vperm.xlu1 %2370, %v1191_v29   ;;  %v1452_v29 = vld [vmem:[%s3352_s3 + $0x60] sm:$0xff] }
  0x29   : > { %1294 = vperm.xlu0 %2369, %v1190_v32   ;;  %2232 = vmatmul.mubr.msk.bf16.gmra.mrb[4].mxu0 %vm742_vm2, %v2394_v38  ;;  %v2426_v32 = vld [vmem:[%s3350_s1 + $0xe0] ss:$12 sps:$4 sm:$0xff]   ;;  %v1459_v38 = vld [vmem:[%s3352_s3 + $0x98] sm:$0xff] }
  0x2a   : > { %2235 = vmatprep.mubr.msk.bf16.mxu0 %vm2492_vm0, %v2491_v4 }
  0x2b   : > { %817 = vmatpush1.bf16.msra.mxu1 %v2377_v27  ;;  %v1453_v27 = vld [vmem:[%s3352_s3 + $0x68] sm:$0xff] }
  0x2c   : > { %818 = vmatprep.subr.bf16.mxu1 %v2490_v2  ;;  %1309 = vperm.xlu1 %2370, %v1193_v34   ;;  %v1457_v34 = vld [vmem:[%s3352_s3 + $0x88] sm:$0xff] }
  0x2d   : > { %1304 = vperm.xlu0 %2369, %v1192_v35   ;;  %v2413_v35 = vld [vmem:[%s3350_s1 + $0x78] ss:$12 sps:$4 sm:$0xff]  }
  0x2f   : > { %819 = vmatpush1.bf16.msra.mxu1 %v2378_v33  ;;  %v1454_v33 = vld [vmem:[%s3352_s3 + $0x70] sm:$0xff] }
  0x30   : > { %820 = vmatprep.subr.bf16.mxu1 %v2490_v2  ;;  %1319 = vperm.xlu1 %2370, %v1195_v37   ;;  %v2415_v37 = vld [vmem:[%s3350_s1 + $0x94] ss:$12 sps:$4 sm:$0xff]  }
  0x31   : > { %1314 = vperm.xlu0 %2369, %v1194_v39   ;;  %2236 = vmatmul.mubr.msk.bf16.gmra.mrb[8].mxu0 %vm742_vm2, %v2398_v45  ;;  %v2430_v39 = vld [vmem:[%s3350_s1 + $0xf8] ss:$12 sps:$4 sm:$0xff]  }
  0x32   : > { %2239 = vmatprep.mubr.msk.bf16.mxu0 %vm2492_vm0, %v2491_v4  ;;  %v1463_v45 = vld [vmem:[%s3352_s3 + $0xb8] sm:$0xff] }
  0x33   : > { %821 = vmatpush1.bf16.msra.mxu1 %v2379_v36  ;;  %v1456_v36 = vld [vmem:[%s3352_s3 + $0x80] sm:$0xff] }
  0x34   : > { %822 = vmatprep.subr.bf16.mxu1 %v2490_v2  ;;  %1329 = vperm.xlu1 %2370, %v1197_v41   ;;  %v1461_v41 = vld [vmem:[%s3352_s3 + $0xa8] sm:$0xff] }
  0x35   : > { %1324 = vperm.xlu0 %2369, %v1196_v42   ;;  %v2417_v42 = vld [vmem:[%s3350_s1 + $0x90] ss:$12 sps:$4 sm:$0xff]  }
  0x37   : > { %823 = vmatpush1.bf16.msra.mxu1 %v2380_v40  ;;  %v1458_v40 = vld [vmem:[%s3352_s3 + $0x90] sm:$0xff] }
  0x38   : > { %824 = vmatprep.subr.bf16.mxu1 %v2490_v2  ;;  %1339 = vperm.xlu1 %2370, %v1199_v44   ;;  %v2419_v44 = vld [vmem:[%s3350_s1 + $0xac] ss:$12 sps:$4 sm:$0xff]  }
  0x39   : > { %1334 = vperm.xlu0 %2369, %v1198_v46   ;;  %2240 = vmatmul.mubr.msk.bf16.gmra.mrb[12].mxu0 %vm742_vm2, %v2402_v52  ;;  %v2434_v46 = vld [vmem:[%s3350_s1 + $0x110] ss:$12 sps:$4 sm:$0xff]  }
  0x3a   : > { %2243 = vmatprep.mubr.msk.bf16.mxu0 %vm2492_vm0, %v2491_v4  ;;  %v1467_v52 = vld [vmem:[%s3352_s3 + $0xd8] sm:$0xff] }
  0x3b   : > { %825 = vmatpush1.bf16.msra.mxu1 %v2381_v43  ;;  %v1460_v43 = vld [vmem:[%s3352_s3 + $0xa0] sm:$0xff] }
  0x3c   : > { %826 = vmatprep.subr.bf16.mxu1 %v2490_v2  ;;  %1349 = vperm.xlu1 %2370, %v1201_v48   ;;  %v1465_v48 = vld [vmem:[%s3352_s3 + $0xc8] sm:$0xff] }
  0x3d   : > { %1344 = vperm.xlu0 %2369, %v1200_v49   ;;  %v2421_v49 = vld [vmem:[%s3350_s1 + $0xa8] ss:$12 sps:$4 sm:$0xff]  }
  0x3f   : > { %827 = vmatpush1.bf16.msra.mxu1 %v2382_v47  ;;  %v1462_v47 = vld [vmem:[%s3352_s3 + $0xb0] sm:$0xff] }
  0x40   : > { %828 = vmatprep.subr.bf16.mxu1 %v2490_v2  ;;  %1359 = vperm.xlu1 %2370, %v1203_v51   ;;  %v2423_v51 = vld [vmem:[%s3350_s1 + $0xc4] ss:$12 sps:$4 sm:$0xff]  }
  0x41   : > { %1354 = vperm.xlu0 %2369, %v1202_v53   ;;  %2244 = vmatmul.mubr.msk.bf16.gmra.mrb[16].mxu0 %vm742_vm2, %v2406_v59  ;;  %v2438_v53 = vld [vmem:[%s3350_s1 + $0x128] ss:$12 sps:$4 sm:$0xff]   ;;  %v1471_v59 = vld [vmem:[%s3352_s3 + $0xf8] sm:$0xff] }
  0x42   : > { %2247 = vmatprep.mubr.msk.bf16.mxu0 %vm2492_vm0, %v2491_v4 }
  0x43   : > { %829 = vmatpush1.bf16.msra.mxu1 %v2383_v50  ;;  %v1464_v50 = vld [vmem:[%s3352_s3 + $0xc0] sm:$0xff] }
  0x44   : > { %830 = vmatprep.subr.bf16.mxu1 %v2490_v2  ;;  %1369 = vperm.xlu1 %2370, %v1205_v55   ;;  %v1469_v55 = vld [vmem:[%s3352_s3 + $0xe8] sm:$0xff] }
  0x45   : > { %1364 = vperm.xlu0 %2369, %v1204_v56   ;;  %v2425_v56 = vld [vmem:[%s3350_s1 + $0xc0] ss:$12 sps:$4 sm:$0xff]  }
  0x47   : > { %831 = vmatpush1.bf16.msra.mxu1 %v2385_v54  ;;  %v1466_v54 = vld [vmem:[%s3352_s3 + $0xd0] sm:$0xff] }
  0x48   : > { %832 = vmatprep.subr.bf16.mxu1 %v2490_v2  ;;  %1379 = vperm.xlu1 %2370, %v1207_v58   ;;  %v2427_v58 = vld [vmem:[%s3350_s1 + $0xdc] ss:$12 sps:$4 sm:$0xff]  }
  0x49   : > { %1374 = vperm.xlu0 %2369, %v1206_v60   ;;  %2248 = vmatmul.mubr.msk.bf16.gmra.mrb[20].mxu0 %vm742_vm2, %v2410_v3  ;;  %v2442_v60 = vld [vmem:[%s3350_s1 + $0x140] ss:$12 sps:$4 sm:$0xff]   ;;  %v2446_v3 = vld [vmem:[%s3350_s1 + $0x158] ss:$12 sps:$4 sm:$0xff]  }
  0x4a   : > { %2251 = vmatprep.mubr.msk.bf16.mxu0 %vm2492_vm0, %v2491_v4 }
  0x4b   : > { %833 = vmatpush1.bf16.msra.mxu1 %v2387_v57  ;;  %v1468_v57 = vld [vmem:[%s3352_s3 + $0xe0] sm:$0xff] }
  0x4c   : > { %834 = vmatprep.subr.bf16.mxu1 %v2490_v2  ;;  %1389 = vperm.xlu1 %2370, %v1209_v62   ;;  %v1211_v2 = vld [vmem:[%s3351_s2 + $0x128] sm:$0xf] }
  0x4d   : > { %1384 = vperm.xlu0 %2369, %v1208_v0   ;;  %v1473_v62 = vld [vmem:[%s3352_s3 + $0x108] sm:$0xff]  ;;  %v1472_v0 = vld [vmem:[%s3352_s3 + $0x100] sm:$0xff] }
  0x4f   : > { %835 = vmatpush1.bf16.msra.mxu1 %v2389_v61  ;;  %v1470_v61 = vld [vmem:[%s3352_s3 + $0xf0] sm:$0xff] }
  0x50   : > { %1399 = vperm.xlu1 %2370, %v1211_v2   ;;  %v1475_v2 = vld [vmem:[%s3352_s3 + $0x118] sm:$0xff] }
  0x51   : > { %1394 = vperm.xlu0 %2369, %v1210_v5   ;;  %2252 = vmatmul.mubr.msk.bf16.gmra.mrb[24].mxu0 %vm742_vm2, %v2414_v11  ;;  %v1474_v5 = vld [vmem:[%s3352_s3 + $0x110] sm:$0xff] }
  0x52   : > { %837 = vmatmul.mubr.bf16.vlgmr.msra.gmra.mrb[0].mxu1 %v2391_v63  ;;  %2255 = vmatprep.mubr.msk.bf16.mxu0 %vm2492_vm0, %v2491_v4  ;;  %v2429_v63 = vld [vmem:[%s3350_s1 + $0xd8] ss:$12 sps:$4 sm:$0xff]   ;;  %v2437_v11 = vld [vmem:[%s3350_s1 + $0x108] ss:$12 sps:$4 sm:$0xff]  }
  0x53   : > { %844 = vmatprep.mubr.bf16.mxu1 %v2395_v1  ;;  %v2431_v1 = vld [vmem:[%s3350_s1 + $0xf4] ss:$12 sps:$4 sm:$0xff]  }
  0x54   : > { %1485 = vperm.xlu1 %2370, %v1441_v6   ;;  %v1477_v6 = vld [vmem:[%s3352_s3 + $0x128] sm:$0xf] }
  0x55   : > { %1480 = vperm.xlu0 %2369, %v1440_v8   ;;  %v1476_v8 = vld [vmem:[%s3352_s3 + $0x120] sm:$0xff] }
  0x58   : > { %1495 = vperm.xlu1 %2370, %v1443_v10   ;;  %v2450_v10 = vld [vmem:[%s3350_s1 + $0x170] ss:$12 sps:$4 sm:$0xff]  }
  0x59   : > { %1490 = vperm.xlu0 %2369, %v1442_v12   ;;  %2256 = vmatmul.mubr.msk.bf16.gmra.mrb[28].mxu0 %vm742_vm2, %v2418_v18  ;;  %v2439_v12 = vld [vmem:[%s3350_s1 + $0x124] ss:$12 sps:$4 sm:$0xff]  }
  0x5a   : > { %845 = vmatmul.mubr.bf16.gmra.mrb[4].mxu1 %v2397_v7  ;;  %2259 = vmatprep.mubr.msk.bf16.mxu0 %vm2492_vm0, %v2491_v4  ;;  %v2433_v7 = vld [vmem:[%s3350_s1 + $0xf0] ss:$12 sps:$4 sm:$0xff]  }
  0x5b   : > { %852 = vmatprep.mubr.bf16.mxu1 %v2399_v9  ;;  %v2435_v9 = vld [vmem:[%s3350_s1 + $0x10c] ss:$12 sps:$4 sm:$0xff]  }
  0x5c   : > { %1505 = vperm.xlu1 %2370, %v1445_v14   ;;  %v2441_v14 = vld [vmem:[%s3350_s1 + $0x120] ss:$12 sps:$4 sm:$0xff]  }
  0x5d   : > { %1500 = vperm.xlu0 %2369, %v1444_v15   ;;  %v2443_v15 = vld [vmem:[%s3350_s1 + $0x13c] ss:$12 sps:$4 sm:$0xff]  }
  0x60   : > { %1515 = vperm.xlu1 %2370, %v1447_v17   ;;  %v2445_v17 = vld [vmem:[%s3350_s1 + $0x138] ss:$12 sps:$4 sm:$0xff]  }
  0x61   : > { %1510 = vperm.xlu0 %2369, %v1446_v19   ;;  %2260 = vmatmul.mubr.msk.bf16.gmra.mrb[32].mxu0 %vm742_vm2, %v2422_v25  ;;  %v2447_v19 = vld [vmem:[%s3350_s1 + $0x154] ss:$12 sps:$4 sm:$0xff]  }
  0x62   : > { %853 = vmatmul.mubr.bf16.gmra.mrb[8].mxu1 %v2401_v13  ;;  %2263 = vmatprep.mubr.msk.bf16.mxu0 %vm2492_vm0, %v2491_v4  ;;  %v2454_v13 = vld [vmem:[%s3350_s1 + $0x188] ss:$12 sps:$4 sm:$0xff]  }
  0x63   : > { %860 = vmatprep.mubr.bf16.mxu1 %v2403_v16  ;;  %v2458_v16 = vld [vmem:[%s3350_s1 + $0x1a0] ss:$12 sps:$4 sm:$0xff]  }
  0x64   : > { %1525 = vperm.xlu1 %2370, %v1449_v20  }
  0x65   : > { %1520 = vperm.xlu0 %2369, %v1448_v22  }
  0x68   : > { %1535 = vperm.xlu1 %2370, %v1451_v24   ;;  %v2451_v24 = vld [vmem:[%s3350_s1 + $0x16c] ss:$12 sps:$4 sm:$0xff]  }
  0x69   : > { %1530 = vperm.xlu0 %2369, %v1450_v26   ;;  %2264 = vmatmul.mubr.msk.bf16.gmra.mrb[36].mxu0 %vm742_vm2, %v2426_v32 }
  0x6a   : > { %861 = vmatmul.mubr.bf16.gmra.mrb[12].mxu1 %v2405_v21  ;;  %2267 = vmatprep.mubr.msk.bf16.mxu0 %vm2492_vm0, %v2491_v4  ;;  %v2462_v21 = vld [vmem:[%s3350_s1 + $0x1b8] ss:$12 sps:$4 sm:$0x3f]  }
  0x6b   : > { %868 = vmatprep.mubr.bf16.mxu1 %v2407_v23 }
  0x6c   : > { %1545 = vperm.xlu1 %2370, %v1453_v27   ;;  %v2453_v27 = vld [vmem:[%s3350_s1 + $0x168] ss:$12 sps:$4 sm:$0xff]  }
  0x6d   : > { %1540 = vperm.xlu0 %2369, %v1452_v29  }
  0x70   : > { %1555 = vperm.xlu1 %2370, %v1455_v31   ;;  %v2457_v31 = vld [vmem:[%s3350_s1 + $0x180] ss:$12 sps:$4 sm:$0xff]  }
  0x71   : > { %1550 = vperm.xlu0 %2369, %v1454_v33   ;;  %2268 = vmatmul.mubr.msk.bf16.gmra.mrb[40].mxu0 %vm742_vm2, %v2430_v39  ;;  %v2459_v33 = vld [vmem:[%s3350_s1 + $0x19c] ss:$12 sps:$4 sm:$0xff]  }
  0x72   : > { %869 = vmatmul.mubr.bf16.gmra.mrb[16].mxu1 %v2409_v28  ;;  %2271 = vmatprep.mubr.msk.bf16.mxu0 %vm2492_vm0, %v2491_v4  ;;  %v2455_v28 = vld [vmem:[%s3350_s1 + $0x184] ss:$12 sps:$4 sm:$0xff]  }
  0x73   : > { %876 = vmatprep.mubr.bf16.mxu1 %v2411_v30 }
  0x74   : > { %1565 = vperm.xlu1 %2370, %v1457_v34  }
  0x75   : > { %1560 = vperm.xlu0 %2369, %v1456_v36   ;;  %v2461_v36 = vld [vmem:[%s3350_s1 + $0x198] ss:$12 sps:$4 sm:$0xff]  }
  0x78   : > { %1575 = vperm.xlu1 %2370, %v1459_v38   ;;  %v2463_v38 = vld [vmem:[%s3350_s1 + $0x1b4] ss:$12 sps:$4 sm:$0x3f]  }
  0x79   : > { %1570 = vperm.xlu0 %2369, %v1458_v40   ;;  %2272 = vmatmul.mubr.msk.bf16.gmra.mrb[44].mxu0 %vm742_vm2, %v2434_v46 }
  0x7a   : > { %877 = vmatmul.mubr.bf16.gmra.mrb[20].mxu1 %v2413_v35  ;;  %2275 = vmatprep.mubr.msk.bf16.mxu0 %vm2492_vm0, %v2491_v4 }
  0x7b   : > { %884 = vmatprep.mubr.bf16.mxu1 %v2415_v37 }
  0x7c   : > { %1585 = vperm.xlu1 %2370, %v1461_v41   ;;  %v2465_v41 = vld [vmem:[%s3350_s1 + $0x1b0] ss:$12 sps:$4 sm:$0x3f]  }
  0x7d   : > { %1580 = vperm.xlu0 %2369, %v1460_v43  }
  0x80   : > { %1595 = vperm.xlu1 %2370, %v1463_v45  }
  0x81   : > { %1590 = vperm.xlu0 %2369, %v1462_v47   ;;  %2276 = vmatmul.mubr.msk.bf16.gmra.mrb[48].mxu0 %vm742_vm2, %v2438_v53 }
  0x82   : > { %885 = vmatmul.mubr.bf16.gmra.mrb[24].mxu1 %v2417_v42  ;;  %2279 = vmatprep.mubr.msk.bf16.mxu0 %vm2492_vm0, %v2491_v4 }
  0x83   : > { %892 = vmatprep.mubr.bf16.mxu1 %v2419_v44 }
  0x84   : > { %1605 = vperm.xlu1 %2370, %v1465_v48  }
  0x85   : > { %1600 = vperm.xlu0 %2369, %v1464_v50  }
  0x87   : > { %v3013_v20 = vpop.permute.xlu1 %1224 }
  0x88   : > { %1615 = vperm.xlu1 %2370, %v1467_v52   ;;  %v3008_v18 = vpop.permute.xlu0 %1214 }
  0x89   : > { %1610 = vperm.xlu0 %2369, %v1466_v54   ;;  %2280 = vmatmul.mubr.msk.bf16.gmra.mrb[52].mxu0 %vm742_vm2, %v2442_v60 }
  0x8a   : > { %893 = vmatmul.mubr.bf16.gmra.mrb[28].mxu1 %v2421_v49  ;;  %2283 = vmatprep.mubr.msk.bf16.mxu0 %vm2492_vm0, %v2491_v4 }
  0x8b   : > { %900 = vmatprep.mubr.bf16.mxu1 %v2423_v51  ;;  %v3024_v23 = vpop.permute.xlu1 %1229 }
  0x8c   : > { %1625 = vperm.xlu1 %2370, %v1469_v55   ;;  %v3018_v22 = vpop.permute.xlu0 %1219 }
  0x8d   : > { %1620 = vperm.xlu0 %2369, %v1468_v57  }
  0x8f   : > { %v3031_v26 = vpop.permute.xlu1 %1239 }
  0x90   : > { %1635 = vperm.xlu1 %2370, %v1471_v59   ;;  %v3029_v25 = vpop.permute.xlu0 %1234 }
  0x91   : > { %1630 = vperm.xlu0 %2369, %v1470_v61   ;;  %2284 = vmatmul.mubr.msk.bf16.gmra.mrb[56].mxu0 %vm742_vm2, %v2446_v3 }
  0x92   : > { %901 = vmatmul.mubr.bf16.gmra.mrb[32].mxu1 %v2425_v56  ;;  %2287 = vmatprep.mubr.msk.bf16.mxu0 %vm2492_vm0, %v2491_v4 }
  0x93   : > { %908 = vmatprep.mubr.bf16.mxu1 %v2427_v58  ;;  %v3041_v30 = vpop.permute.xlu1 %1249 }
  0x94   : > { %1645 = vperm.xlu1 %2370, %v1473_v62   ;;  %v3039_v29 = vpop.permute.xlu0 %1244 }
  0x95   : > { %1640 = vperm.xlu0 %2369, %v1472_v0  }
  0x97   : > { %v3051_v34 = vpop.permute.xlu1 %1259 }
  0x98   : > { %1655 = vperm.xlu1 %2370, %v1475_v2   ;;  %v3046_v32 = vpop.permute.xlu0 %1254 }
  0x99   : > { %1650 = vperm.xlu0 %2369, %v1474_v5   ;;  %2288 = vmatmul.mubr.msk.bf16.gmra.mrb[60].mxu0 %vm742_vm2, %v2450_v10 }
  0x9a   : > { %909 = vmatmul.mubr.bf16.gmra.mrb[36].mxu1 %v2429_v63  ;;  %2291 = vmatprep.mubr.msk.bf16.mxu0 %vm2492_vm0, %v2491_v4 }
  0x9b   : > { %916 = vmatprep.mubr.bf16.mxu1 %v2431_v1  ;;  %v3058_v37 = vpop.permute.xlu1 %1269 }
  0x9c   : > { %1665 = vperm.xlu1 %2370, %v1477_v6   ;;  %v3053_v35 = vpop.permute.xlu0 %1264 }
  0x9d   : > { %1660 = vperm.xlu0 %2369, %v1476_v8  }
  0x9f   : > { %v3065_v40 = vpop.permute.xlu1 %1279 }
  0xa0   : > { %v3063_v39 = vpop.permute.xlu0 %1274 }
  0xa1   : > { %2292 = vmatmul.mubr.msk.bf16.gmra.mrb[64].mxu0 %vm742_vm2, %v2454_v13 }
  0xa2   : > { %917 = vmatmul.mubr.bf16.gmra.mrb[40].mxu1 %v2433_v7  ;;  %2295 = vmatprep.mubr.msk.bf16.mxu0 %vm2492_vm0, %v2491_v4 }
  0xa3   : > { %924 = vmatprep.mubr.bf16.mxu1 %v2435_v9  ;;  %v3072_v43 = vpop.permute.xlu1 %1289 }
  0xa4   : > { %v3070_v42 = vpop.permute.xlu0 %1284 }
  0xa7   : > { %v3076_v45 = vpop.permute.xlu1 %1299 }
  0xa8   : > { %v3074_v44 = vpop.permute.xlu0 %1294 }
  0xa9   : > { %2296 = vmatmul.mubr.msk.bf16.gmra.mrb[68].mxu0 %vm742_vm2, %v2458_v16 }
  0xaa   : > { %925 = vmatmul.mubr.bf16.gmra.mrb[44].mxu1 %v2437_v11  ;;  %2299 = vmatprep.mubr.msk.bf16.mxu0 %vm2492_vm0, %v2491_v4  ;;  %v2449_v4 = vld [vmem:[%s3350_s1 + $0x150] ss:$12 sps:$4 sm:$0xff]  }
  0xab   : > { %932 = vmatprep.mubr.bf16.mxu1 %v2439_v12  ;;  %v3080_v47 = vpop.permute.xlu1 %1309 }
  0xac   : > { %v3078_v46 = vpop.permute.xlu0 %1304 }
  0xaf   : > { %v3084_v49 = vpop.permute.xlu1 %1319 }
  0xb0   : > { %v3082_v48 = vpop.permute.xlu0 %1314 }
  0xb1   : > { %2300 = vmatmul.mubr.msk.bf16.gmra.mrb[72].mxu0 %vm742_vm2, %v2462_v21 }
  0xb2   : > { %933 = vmatmul.mubr.bf16.gmra.mrb[48].mxu1 %v2441_v14 }
  0xb3   : > { %940 = vmatprep.mubr.bf16.mxu1 %v2443_v15  ;;  %v3088_v51 = vpop.permute.xlu1 %1329 }
  0xb4   : > { %v3086_v50 = vpop.permute.xlu0 %1324 }
  0xb7   : > { %v3092_v54 = vpop.permute.xlu1 %1339 }
  0xb8   : > { %v3090_v52 = vpop.permute.xlu0 %1334 }
  0xba   : > { %941 = vmatmul.mubr.bf16.gmra.mrb[52].mxu1 %v2445_v17 }
  0xbb   : > { %948 = vmatprep.mubr.bf16.mxu1 %v2447_v19  ;;  %v3096_v59 = vpop.permute.xlu1 %1349 }
  0xbc   : > { %v3094_v58 = vpop.permute.xlu0 %1344 }
  0xbf   : > { %v3100_v1 = vpop.permute.xlu1 %1359 }
  0xc0   : > { %v3098_v63 = vpop.permute.xlu0 %1354 }
  0xc2   : > { %949 = vmatmul.mubr.bf16.gmra.mrb[56].mxu1 %v2449_v4 }
  0xc3   : > { %956 = vmatprep.mubr.bf16.mxu1 %v2451_v24  ;;  %v3108_v7 = vpop.permute.xlu1 %1369 }
  0xc4   : > { %v3104_v3 = vpop.permute.xlu0 %1364 }
  0xc7   : > { %v3114_v11 = vpop.permute.xlu1 %1379 }
  0xc8   : > { %v3110_v9 = vpop.permute.xlu0 %1374 }
  0xca   : > { %957 = vmatmul.mubr.bf16.gmra.mrb[60].mxu1 %v2453_v27 }
  0xcb   : > { %964 = vmatprep.mubr.bf16.mxu1 %v2455_v28  ;;  %v3120_v16 = vpop.permute.xlu1 %1389 }
  0xcc   : > { %v3118_v15 = vpop.permute.xlu0 %1384 }
  0xcf   : > { %v3128_v27 = vpop.permute.xlu1 %1399 }
  0xd0   : > { %v3126_v4 = vpop.permute.xlu0 %1394 }
  0xd2   : > { %965 = vmatmul.mubr.bf16.gmra.mrb[64].mxu1 %v2457_v31 }
  0xd3   : > { %972 = vmatprep.mubr.bf16.mxu1 %v2459_v33 }
  0xda   : > { %973 = vmatmul.mubr.bf16.gmra.mrb[68].mxu1 %v2461_v36 }
  0xdb   : > { %980 = vmatprep.mubr.bf16.mxu1 %v2463_v38 }
  0xe2   : > { %981 = vmatmul.mubr.bf16.gmra.mrb[72].mxu1 %v2465_v41 }
  0xf4   : > { %v1023_v53 = vpop.f32.mrb[0].mxu0 }
  0xf5   : > { %v2229_v55 = vpop.f32.mrb[1].mxu0 }
  0xf6   : > { %v1026_v56 = vpop.f32.mrb[2].mxu0 }
  0xf7   : > { %v2230_v57 = vpop.f32.mrb[3].mxu0 }
  0xfc   : > { %v1031_v60 = vpop.f32.mrb[4].mxu0 }
  0xfd   : > { %v2233_v61 = vpop.f32.mrb[5].mxu0 }
  0xfe   : > { %v1034_v62 = vpop.f32.mrb[6].mxu0  ;;  %v1481_v61 = vpop.permute.xlu0 %1480 }
  0xff   : > { %v2234_v0 = vpop.f32.mrb[7].mxu0 }
 0x104   : > { %v3102_v2 = vpop.f32.mrb[8].mxu0 }
 0x105   : > { %v2237_v5 = vpop.f32.mrb[9].mxu0 }
 0x106   : > { %v3106_v6 = vpop.f32.mrb[10].mxu0 }
 0x107   : > { %v2238_v8 = vpop.f32.mrb[11].mxu0 }
 0x10c   : > { %v3112_v10 = vpop.f32.mrb[12].mxu0 }
 0x10d   : > { %v2241_v12 = vpop.f32.mrb[13].mxu0 }
 0x10e   : > { %v3116_v13 = vpop.f32.mrb[14].mxu0 }
 0x10f   : > { %v2242_v14 = vpop.f32.mrb[15].mxu0 }
 0x110   : > { %v1486_v14 = vpop.permute.xlu1 %1485 }
 0x114   : > { %v3122_v17 = vpop.f32.mrb[16].mxu0 }
 0x115   : > { %v2245_v19 = vpop.f32.mrb[17].mxu0 }
 0x116   : > { %v3124_v21 = vpop.f32.mrb[18].mxu0 }
 0x117   : > { %v2246_v24 = vpop.f32.mrb[19].mxu0 }
 0x11c   : > { %v3131_v57 = vpop.f32.mrb[20].mxu0 }
 0x11d   : > { %v2249_v0 = vpop.f32.mrb[21].mxu0 }
 0x11e   : > { %v3134_v12 = vpop.f32.mrb[22].mxu0  ;;  %v1491_v0 = vpop.permute.xlu0 %1490 }
 0x11f   : > { %v2250_v19 = vpop.f32.mrb[23].mxu0 }
 0x120   : > { %v1496_v19 = vpop.permute.xlu1 %1495 }
 0x125   : > { %v838_v28 = vpop.f32.mrb[0].mxu1 }
 0x126   : > { %v1024_v31 = vadd.f32 %v1023_v53, %v838_v28  ;;  %v840_v33 = vpop.f32.mrb[1].mxu1 }
 0x127   : > { %v841_v36 = vpop.f32.mrb[2].mxu1 }
 0x128   : > { %v1402_v38 = vmul.f32 %v3008_v18, %v1024_v31  ;;  %v1027_v41 = vadd.f32 %v1026_v56, %v841_v36  ;;  %v843_v55 = vpop.f32.mrb[3].mxu1 }
 0x12a   : > { %v1668_v5 = vadd.f32 %v1481_v61, %v1402_v38  ;;  %v1403_v8 = vmul.f32 %v3018_v22, %v1027_v41  ;;  %v3146_v61 = vpop.f32.mrb[24].mxu0 }
 0x12c   : > { %v1706_v24 = vmax.f32 %v1668_v5, 0.0  ;;  %v1669_v53 = vadd.f32 %v1486_v14, %v1403_v8  ;;  %v2253_v5 = vpop.f32.mrb[25].mxu0 }
 0x12d   : > { %v846_v18 = vpop.f32.mrb[4].mxu1 }
 0x12e   : > { %v2161_v56 = vpack.c.bf16 %v1706_v24, %v1706_v24  ;;  %v1707_v28 = vmax.f32 %v1669_v53, 0.0  ;;  %v1032_v31 = vadd.f32 %v1031_v60, %v846_v18  ;;  %v848_v22 = vpop.f32.mrb[5].mxu1  ;;  %v3151_v60 = vpop.f32.mrb[26].mxu0 }
 0x12f   : > { %v849_v33 = vpop.f32.mrb[6].mxu1  ;;  %v2254_v24 = vpop.f32.mrb[27].mxu0 }
 0x130   : > { %1897 = vst.msk [vmem:[%s3141_s20] sm:$0xf] %vm1896_vm3, %v2161_v56  ;;  %v2162_v36 = vpack.c.bf16 %v1707_v28, %v1707_v28  ;;  %v1404_v38 = vmul.f32 %v3013_v20, %v1032_v31  ;;  %v1035_v41 = vadd.f32 %v1034_v62, %v849_v33  ;;  %v851_v55 = vpop.f32.mrb[7].mxu1 }
 0x131   : > { %v1501_v55 = vpop.permute.xlu0 %1500 }
 0x132   : > { %1898 = vst.msk [vmem:[%s3141_s20 + $0x4] sm:$0xf] %vm1896_vm3, %v2162_v36  ;;  %v1670_v8 = vadd.f32 %v1491_v0, %v1404_v38  ;;  %v1405_v14 = vmul.f32 %v3024_v23, %v1035_v41  ;;  %v3158_v41 = vpop.f32.mrb[28].mxu0 }
 0x133   : > { %v2257_v0 = vpop.f32.mrb[29].mxu0 }
 0x134   : > { %v1708_v53 = vmax.f32 %v1670_v8, 0.0  ;;  %v1671_v18 = vadd.f32 %v1496_v19, %v1405_v14  ;;  %v3163_v8 = vpop.f32.mrb[30].mxu0  ;;  %v1506_v14 = vpop.permute.xlu1 %1505 }
 0x135   : > { %v854_v20 = vpop.f32.mrb[8].mxu1  ;;  %v2258_v19 = vpop.f32.mrb[31].mxu0 }
 0x136   : > { %v2163_v62 = vpack.c.bf16 %v1708_v53, %v1708_v53  ;;  %v1709_v56 = vmax.f32 %v1671_v18, 0.0  ;;  %v1040_v28 = vadd.f32 %v3102_v2, %v854_v20  ;;  %v856_v31 = vpop.f32.mrb[9].mxu1 }
 0x137   : > { %v857_v22 = vpop.f32.mrb[10].mxu1 }
 0x138   : > { %1899 = vst.msk [vmem:[%s3141_s20 + $0x8] sm:$0xf] %vm1896_vm3, %v2163_v62  ;;  %v2164_v33 = vpack.c.bf16 %v1709_v56, %v1709_v56  ;;  %v1406_v36 = vmul.f32 %v3029_v25, %v1040_v28  ;;  %v1043_v23 = vadd.f32 %v3106_v6, %v857_v22  ;;  %v859_v38 = vpop.f32.mrb[11].mxu1  ;;  %v1516_v0 = vpop.permute.xlu1 %1515 }
 0x13a   : > { %1900 = vst.msk [vmem:[%s3141_s20 + $0xc] sm:$0xf] %vm1896_vm3, %v2164_v33  ;;  %v1672_v5 = vadd.f32 %v1501_v55, %v1406_v36  ;;  %v1407_v2 = vmul.f32 %v3031_v26, %v1043_v23  ;;  %v3170_v33 = vpop.f32.mrb[32].mxu0  ;;  %v1511_v36 = vpop.permute.xlu0 %1510 }
 0x13b   : > { %v2261_v23 = vpop.f32.mrb[33].mxu0 }
 0x13c   : > { %v1710_v24 = vmax.f32 %v1672_v5, 0.0  ;;  %v1673_v25 = vadd.f32 %v1506_v14, %v1407_v2  ;;  %v3175_v55 = vpop.f32.mrb[34].mxu0 }
 0x13d   : > { %v862_v53 = vpop.f32.mrb[12].mxu1  ;;  %v2262_v5 = vpop.f32.mrb[35].mxu0 }
 0x13e   : > { %v2165_v6 = vpack.c.bf16 %v1710_v24, %v1710_v24  ;;  %v1711_v18 = vmax.f32 %v1673_v25, 0.0  ;;  %v1048_v20 = vadd.f32 %v3112_v10, %v862_v53  ;;  %v864_v62 = vpop.f32.mrb[13].mxu1 }
 0x13f   : > { %v865_v56 = vpop.f32.mrb[14].mxu1  ;;  %v3182_v62 = vpop.f32.mrb[36].mxu0 }
 0x140   : > { %1901 = vst.msk [vmem:[%s3141_s20 + $0x10] sm:$0xf] %vm1896_vm3, %v2165_v6  ;;  %v2166_v28 = vpack.c.bf16 %v1711_v18, %v1711_v18  ;;  %v1408_v31 = vmul.f32 %v3039_v29, %v1048_v20  ;;  %v1051_v26 = vadd.f32 %v3116_v13, %v865_v56  ;;  %v867_v22 = vpop.f32.mrb[15].mxu1  ;;  %v1521_v56 = vpop.permute.xlu0 %1520 }
 0x141   : > { %v1526_v22 = vpop.permute.xlu1 %1525 }
 0x142   : > { %1902 = vst.msk [vmem:[%s3141_s20 + $0x14] sm:$0xf] %vm1896_vm3, %v2166_v28  ;;  %v1674_v38 = vadd.f32 %v1511_v36, %v1408_v31  ;;  %v1409_v10 = vmul.f32 %v3041_v30, %v1051_v26  ;;  %v2265_v28 = vpop.f32.mrb[37].mxu0 }
 0x143   : > { %v3187_v26 = vpop.f32.mrb[38].mxu0 }
 0x144   : > { %v1712_v2 = vmax.f32 %v1674_v38, 0.0  ;;  %v1675_v29 = vadd.f32 %v1516_v0, %v1409_v10  ;;  %v2266_v36 = vpop.f32.mrb[39].mxu0 }
 0x145   : > { %v870_v14 = vpop.f32.mrb[16].mxu1 }
 0x146   : > { %v2167_v13 = vpack.c.bf16 %v1712_v2, %v1712_v2  ;;  %v1713_v19 = vmax.f32 %v1675_v29, 0.0  ;;  %v1056_v24 = vadd.f32 %v3122_v17, %v870_v14  ;;  %v872_v25 = vpop.f32.mrb[17].mxu1 }
 0x147   : > { %v873_v53 = vpop.f32.mrb[18].mxu1 }
 0x148   : > { %1903 = vst.msk [vmem:[%s3141_s20 + $0x18] sm:$0xf] %vm1896_vm3, %v2167_v13  ;;  %v2168_v6 = vpack.c.bf16 %v1713_v19, %v1713_v19  ;;  %v1410_v18 = vmul.f32 %v3046_v32, %v1056_v24  ;;  %v1059_v30 = vadd.f32 %v3124_v21, %v873_v53  ;;  %v875_v20 = vpop.f32.mrb[19].mxu1  ;;  %v3194_v19 = vpop.f32.mrb[40].mxu0 }
 0x149   : > { %v1531_v24 = vpop.permute.xlu0 %1530  ;;  %v2269_v25 = vpop.f32.mrb[41].mxu0 }
 0x14a   : > { %1904 = vst.msk [vmem:[%s3141_s20 + $0x1c] sm:$0xf] %vm1896_vm3, %v2168_v6  ;;  %v1676_v31 = vadd.f32 %v1521_v56, %v1410_v18  ;;  %v1411_v17 = vmul.f32 %v3051_v34, %v1059_v30  ;;  %v3199_v6 = vpop.f32.mrb[42].mxu0  ;;  %v1536_v18 = vpop.permute.xlu1 %1535 }
 0x14b   : > { %v2270_v30 = vpop.f32.mrb[43].mxu0 }
 0x14c   : > { %v1714_v23 = vmax.f32 %v1676_v31, 0.0  ;;  %v1677_v32 = vadd.f32 %v1526_v22, %v1411_v17 }
 0x14d   : > { %v878_v38 = vpop.f32.mrb[20].mxu1 }
 0x14e   : > { %v2169_v21 = vpack.c.bf16 %v1714_v23, %v1714_v23  ;;  %v1715_v10 = vmax.f32 %v1677_v32, 0.0  ;;  %v1064_v0 = vadd.f32 %v3131_v57, %v878_v38  ;;  %v880_v5 = vpop.f32.mrb[21].mxu1  ;;  %v3206_v38 = vpop.f32.mrb[44].mxu0 }
 0x14f   : > { %v881_v2 = vpop.f32.mrb[22].mxu1 }
 0x150   : > { %1905 = vst.msk [vmem:[%s3141_s20 + $0x20] sm:$0xf] %vm1896_vm3, %v2169_v21  ;;  %v2170_v29 = vpack.c.bf16 %v1715_v10, %v1715_v10  ;;  %v1412_v14 = vmul.f32 %v3053_v35, %v1064_v0  ;;  %v1067_v34 = vadd.f32 %v3134_v12, %v881_v2  ;;  %v883_v13 = vpop.f32.mrb[23].mxu1  ;;  %v1541_v21 = vpop.permute.xlu0 %1540 }
 0x151   : > { %v2273_v10 = vpop.f32.mrb[45].mxu0  ;;  %v1546_v2 = vpop.permute.xlu1 %1545 }
 0x152   : > { %1906 = vst.msk [vmem:[%s3141_s20 + $0x24] sm:$0xf] %vm1896_vm3, %v2170_v29  ;;  %v1678_v53 = vadd.f32 %v1531_v24, %v1412_v14  ;;  %v1413_v57 = vmul.f32 %v3058_v37, %v1067_v34  ;;  %v3211_v5 = vpop.f32.mrb[46].mxu0 }
 0x153   : > { %v2274_v29 = vpop.f32.mrb[47].mxu0 }
 0x154   : > { %v1716_v20 = vmax.f32 %v1678_v53, 0.0  ;;  %v1679_v35 = vadd.f32 %v1536_v18, %v1413_v57 }
 0x155   : > { %v886_v56 = vpop.f32.mrb[24].mxu1 }
 0x156   : > { %v2171_v12 = vpack.c.bf16 %v1716_v20, %v1716_v20  ;;  %v1717_v28 = vmax.f32 %v1679_v35, 0.0  ;;  %v1072_v31 = vadd.f32 %v3146_v61, %v886_v56  ;;  %v888_v17 = vpop.f32.mrb[25].mxu1  ;;  %v3218_v20 = vpop.f32.mrb[48].mxu0 }
 0x157   : > { %v889_v22 = vpop.f32.mrb[26].mxu1  ;;  %v1551_v35 = vpop.permute.xlu0 %1550 }
 0x158   : > { %1907 = vst.msk [vmem:[%s3141_s20 + $0x28] sm:$0xf] %vm1896_vm3, %v2171_v12  ;;  %v2172_v36 = vpack.c.bf16 %v1717_v28, %v1717_v28  ;;  %v1414_v23 = vmul.f32 %v3063_v39, %v1072_v31  ;;  %v1075_v37 = vadd.f32 %v3151_v60, %v889_v22  ;;  %v891_v32 = vpop.f32.mrb[27].mxu1  ;;  %v2277_v56 = vpop.f32.mrb[49].mxu0 }
 0x159   : > { %v3223_v28 = vpop.f32.mrb[50].mxu0  ;;  %v1556_v31 = vpop.permute.xlu1 %1555 }
 0x15a   : > { %1908 = vst.msk [vmem:[%s3141_s20 + $0x2c] sm:$0xf] %vm1896_vm3, %v2172_v36  ;;  %v1680_v0 = vadd.f32 %v1541_v21, %v1414_v23  ;;  %v1415_v61 = vmul.f32 %v3065_v40, %v1075_v37  ;;  %v2278_v17 = vpop.f32.mrb[51].mxu0 }
 0x15b   : > { %v1561_v29 = vpop.permute.xlu0 %1560 }
 0x15c   : > { %v1718_v14 = vmax.f32 %v1680_v0, 0.0  ;;  %v1681_v39 = vadd.f32 %v1546_v2, %v1415_v61  ;;  %v3230_v2 = vpop.f32.mrb[52].mxu0 }
 0x15d   : > { %v894_v34 = vpop.f32.mrb[28].mxu1 }
 0x15e   : > { %v2173_v60 = vpack.c.bf16 %v1718_v14, %v1718_v14  ;;  %v1719_v13 = vmax.f32 %v1681_v39, 0.0  ;;  %v1080_v24 = vadd.f32 %v3158_v41, %v894_v34  ;;  %v896_v25 = vpop.f32.mrb[29].mxu1  ;;  %v2281_v14 = vpop.f32.mrb[53].mxu0 }
 0x15f   : > { %v897_v53 = vpop.f32.mrb[30].mxu1  ;;  %v3235_v34 = vpop.f32.mrb[54].mxu0 }
 0x160   : > { %1909 = vst.msk [vmem:[%s3141_s20 + $0x30] sm:$0xf] %vm1896_vm3, %v2173_v60  ;;  %v2174_v57 = vpack.c.bf16 %v1719_v13, %v1719_v13  ;;  %v1416_v18 = vmul.f32 %v3070_v42, %v1080_v24  ;;  %v1083_v40 = vadd.f32 %v3163_v8, %v897_v53  ;;  %v899_v30 = vpop.f32.mrb[31].mxu1  ;;  %v1566_v60 = vpop.permute.xlu1 %1565 }
 0x161   : > { %v2282_v13 = vpop.f32.mrb[55].mxu0 }
 0x162   : > { %1910 = vst.msk [vmem:[%s3141_s20 + $0x34] sm:$0xf] %vm1896_vm3, %v2174_v57  ;;  %v1682_v12 = vadd.f32 %v1551_v35, %v1416_v18  ;;  %v1417_v41 = vmul.f32 %v3072_v43, %v1083_v40 }
 0x164   : > { %v1720_v22 = vmax.f32 %v1682_v12, 0.0  ;;  %v1683_v42 = vadd.f32 %v1556_v31, %v1417_v41  ;;  %v3242_v12 = vpop.f32.mrb[56].mxu0  ;;  %v1571_v41 = vpop.permute.xlu0 %1570 }
 0x165   : > { %v902_v36 = vpop.f32.mrb[32].mxu1  ;;  %v2285_v31 = vpop.f32.mrb[57].mxu0 }
 0x166   : > { %v2175_v8 = vpack.c.bf16 %v1720_v22, %v1720_v22  ;;  %v1721_v23 = vmax.f32 %v1683_v42, 0.0  ;;  %v1088_v37 = vadd.f32 %v3170_v33, %v902_v36  ;;  %v904_v32 = vpop.f32.mrb[33].mxu1  ;;  %v3247_v22 = vpop.f32.mrb[58].mxu0 }
 0x167   : > { %v905_v21 = vpop.f32.mrb[34].mxu1  ;;  %v1576_v42 = vpop.permute.xlu1 %1575 }
 0x168   : > { %1911 = vst.msk [vmem:[%s3141_s20 + $0x38] sm:$0xf] %vm1896_vm3, %v2175_v8  ;;  %v2176_v10 = vpack.c.bf16 %v1721_v23, %v1721_v23  ;;  %v1418_v0 = vmul.f32 %v3074_v44, %v1088_v37  ;;  %v1091_v43 = vadd.f32 %v3175_v55, %v905_v21  ;;  %v907_v61 = vpop.f32.mrb[35].mxu1  ;;  %v2286_v36 = vpop.f32.mrb[59].mxu0 }
 0x169   : > { %v1581_v14 = vpop.permute.xlu0 %1580 }
 0x16a   : > { %1912 = vst.msk [vmem:[%s3141_s20 + $0x3c] sm:$0xf] %vm1896_vm3, %v2176_v10  ;;  %v1684_v39 = vadd.f32 %v1561_v29, %v1418_v0  ;;  %v1419_v33 = vmul.f32 %v3076_v45, %v1091_v43 }
 0x16b   : > { %v1586_v13 = vpop.permute.xlu1 %1585 }
 0x16c   : > { %v1722_v24 = vmax.f32 %v1684_v39, 0.0  ;;  %v1685_v44 = vadd.f32 %v1566_v60, %v1419_v33  ;;  %v3254_v29 = vpop.f32.mrb[60].mxu0 }
 0x16d   : > { %v910_v25 = vpop.f32.mrb[36].mxu1  ;;  %v2289_v39 = vpop.f32.mrb[61].mxu0 }
 0x16e   : > { %v2177_v55 = vpack.c.bf16 %v1722_v24, %v1722_v24  ;;  %v1723_v53 = vmax.f32 %v1685_v44, 0.0  ;;  %v1096_v57 = vadd.f32 %v3182_v62, %v910_v25  ;;  %v912_v18 = vpop.f32.mrb[37].mxu1  ;;  %v3259_v60 = vpop.f32.mrb[62].mxu0 }
 0x16f   : > { %v913_v40 = vpop.f32.mrb[38].mxu1  ;;  %v2290_v24 = vpop.f32.mrb[63].mxu0 }
 0x170   : > { %1913 = vst.msk [vmem:[%s3141_s20 + $0x40] sm:$0xf] %vm1896_vm3, %v2177_v55  ;;  %v2178_v30 = vpack.c.bf16 %v1723_v53, %v1723_v53  ;;  %v1420_v35 = vmul.f32 %v3078_v46, %v1096_v57  ;;  %v1099_v45 = vadd.f32 %v3187_v26, %v913_v40  ;;  %v915_v56 = vpop.f32.mrb[39].mxu1 }
 0x171   : > { %v1591_v56 = vpop.permute.xlu0 %1590 }
 0x172   : > { %1914 = vst.msk [vmem:[%s3141_s20 + $0x44] sm:$0xf] %vm1896_vm3, %v2178_v30  ;;  %v1686_v17 = vadd.f32 %v1571_v41, %v1420_v35  ;;  %v1421_v62 = vmul.f32 %v3080_v47, %v1099_v45 }
 0x174   : > { %v1724_v8 = vmax.f32 %v1686_v17, 0.0  ;;  %v1687_v46 = vadd.f32 %v1576_v42, %v1421_v62  ;;  %v3266_v45 = vpop.f32.mrb[64].mxu0  ;;  %v1596_v62 = vpop.permute.xlu1 %1595 }
 0x175   : > { %v918_v23 = vpop.f32.mrb[40].mxu1  ;;  %v2293_v41 = vpop.f32.mrb[65].mxu0 }
 0x176   : > { %v2179_v26 = vpack.c.bf16 %v1724_v8, %v1724_v8  ;;  %v1725_v37 = vmax.f32 %v1687_v46, 0.0  ;;  %v1104_v32 = vadd.f32 %v3194_v19, %v918_v23  ;;  %v920_v21 = vpop.f32.mrb[41].mxu1  ;;  %v3271_v17 = vpop.f32.mrb[66].mxu0 }
 0x177   : > { %v921_v10 = vpop.f32.mrb[42].mxu1  ;;  %v2294_v42 = vpop.f32.mrb[67].mxu0 }
 0x178   : > { %1915 = vst.msk [vmem:[%s3141_s20 + $0x48] sm:$0xf] %vm1896_vm3, %v2179_v26  ;;  %v2180_v0 = vpack.c.bf16 %v1725_v37, %v1725_v37  ;;  %v1422_v43 = vmul.f32 %v3082_v48, %v1104_v32  ;;  %v1107_v47 = vadd.f32 %v3199_v6, %v921_v10  ;;  %v923_v61 = vpop.f32.mrb[43].mxu1  ;;  %v1606_v39 = vpop.permute.xlu1 %1605 }
 0x17a   : > { %1916 = vst.msk [vmem:[%s3141_s20 + $0x4c] sm:$0xf] %vm1896_vm3, %v2180_v0  ;;  %v1688_v33 = vadd.f32 %v1581_v14, %v1422_v43  ;;  %v1423_v19 = vmul.f32 %v3084_v49, %v1107_v47  ;;  %v1601_v43 = vpop.permute.xlu0 %1600 }
 0x17c   : > { %v1726_v44 = vmax.f32 %v1688_v33, 0.0  ;;  %v1689_v48 = vadd.f32 %v1586_v13, %v1423_v19  ;;  %v3278_v0 = vpop.f32.mrb[68].mxu0 }
 0x17d   : > { %v926_v25 = vpop.f32.mrb[44].mxu1  ;;  %v2297_v47 = vpop.f32.mrb[69].mxu0 }
 0x17e   : > { %v2181_v6 = vpack.c.bf16 %v1726_v44, %v1726_v44  ;;  %v1727_v55 = vmax.f32 %v1689_v48, 0.0  ;;  %v1112_v53 = vadd.f32 %v3206_v38, %v926_v25  ;;  %v928_v57 = vpop.f32.mrb[45].mxu1  ;;  %v3283_v14 = vpop.f32.mrb[70].mxu0 }
 0x17f   : > { %v929_v18 = vpop.f32.mrb[46].mxu1  ;;  %v2298_v33 = vpop.f32.mrb[71].mxu0 }
 0x180   : > { %1917 = vst.msk [vmem:[%s3141_s20 + $0x50] sm:$0xf] %vm1896_vm3, %v2181_v6  ;;  %v2182_v40 = vpack.c.bf16 %v1727_v55, %v1727_v55  ;;  %v1424_v30 = vmul.f32 %v3086_v50, %v1112_v53  ;;  %v1115_v49 = vadd.f32 %v3211_v5, %v929_v18  ;;  %v931_v35 = vpop.f32.mrb[47].mxu1  ;;  %v1611_v18 = vpop.permute.xlu0 %1610 }
 0x181   : > { %v1616_v35 = vpop.permute.xlu1 %1615 }
 0x182   : > { %1918 = vst.msk [vmem:[%s3141_s20 + $0x54] sm:$0xf] %vm1896_vm3, %v2182_v40  ;;  %v1690_v31 = vadd.f32 %v1591_v56, %v1424_v30  ;;  %v1425_v38 = vmul.f32 %v3088_v51, %v1115_v49 }
 0x184   : > { %v1728_v36 = vmax.f32 %v1690_v31, 0.0  ;;  %v1691_v50 = vadd.f32 %v1596_v62, %v1425_v38  ;;  %v3290_v57 = vpop.f32.mrb[72].mxu0 }
 0x185   : > { %v934_v8 = vpop.f32.mrb[48].mxu1  ;;  %v2301_v40 = vpop.f32.mrb[73].mxu0 }
 0x186   : > { %v2183_v5 = vpack.c.bf16 %v1728_v36, %v1728_v36  ;;  %v1729_v46 = vmax.f32 %v1691_v50, 0.0  ;;  %v1120_v23 = vadd.f32 %v3218_v20, %v934_v8  ;;  %v936_v26 = vpop.f32.mrb[49].mxu1  ;;  %v3295_v49 = vpop.f32.mrb[74].mxu0 }
 0x187   : > { %v937_v37 = vpop.f32.mrb[50].mxu1  ;;  %v2302_v56 = vpop.f32.mrb[75].mxu0 }
 0x188   : > { %1919 = vst.msk [vmem:[%s3141_s20 + $0x58] sm:$0xf] %vm1896_vm3, %v2183_v5  ;;  %v2184_v32 = vpack.c.bf16 %v1729_v46, %v1729_v46  ;;  %v1426_v21 = vmul.f32 %v3090_v52, %v1120_v23  ;;  %v1123_v51 = vadd.f32 %v3223_v28, %v937_v37  ;;  %v939_v10 = vpop.f32.mrb[51].mxu1  ;;  %v1621_v46 = vpop.permute.xlu0 %1620 }
 0x189   : > { %v1626_v37 = vpop.permute.xlu1 %1625 }
 0x18a   : > { %1920 = vst.msk [vmem:[%s3141_s20 + $0x5c] sm:$0xf] %vm1896_vm3, %v2184_v32  ;;  %v1692_v61 = vadd.f32 %v1601_v43, %v1426_v21  ;;  %v1427_v20 = vmul.f32 %v3092_v54, %v1123_v51 }
 0x18c   : > { %v1730_v19 = vmax.f32 %v1692_v61, 0.0  ;;  %v1693_v52 = vadd.f32 %v1606_v39, %v1427_v20  ;;  %v1631_v39 = vpop.permute.xlu0 %1630 }
 0x18d   : > { %v942_v13 = vpop.f32.mrb[52].mxu1 }
 0x18e   : > { %v2185_v28 = vpack.c.bf16 %v1730_v19, %v1730_v19  ;;  %v1731_v24 = vmax.f32 %v1693_v52, 0.0  ;;  %v1128_v44 = vadd.f32 %v3230_v2, %v942_v13  ;;  %v944_v48 = vpop.f32.mrb[53].mxu1  ;;  %v1636_v52 = vpop.permute.xlu1 %1635 }
 0x18f   : > { %v945_v25 = vpop.f32.mrb[54].mxu1 }
 0x190   : > { %1921 = vst.msk [vmem:[%s3141_s20 + $0x60] sm:$0xf] %vm1896_vm3, %v2185_v28  ;;  %v2186_v6 = vpack.c.bf16 %v1731_v24, %v1731_v24  ;;  %v1428_v55 = vmul.f32 %v3094_v58, %v1128_v44  ;;  %v1131_v54 = vadd.f32 %v3235_v34, %v945_v25  ;;  %v947_v53 = vpop.f32.mrb[55].mxu1 }
 0x192   : > { %1922 = vst.msk [vmem:[%s3141_s20 + $0x64] sm:$0xf] %vm1896_vm3, %v2186_v6  ;;  %v1694_v30 = vadd.f32 %v1611_v18, %v1428_v55  ;;  %v1429_v2 = vmul.f32 %v3096_v59, %v1131_v54  ;;  %v1641_v54 = vpop.permute.xlu0 %1640  ;;  %v1646_v40 = vpop.permute.xlu1 %1645 }
 0x194   : > { %v1732_v41 = vmax.f32 %v1694_v30, 0.0  ;;  %v1695_v58 = vadd.f32 %v1616_v35, %v1429_v2 }
 0x195   : > { %v950_v31 = vpop.f32.mrb[56].mxu1 }
 0x196   : > { %v2187_v34 = vpack.c.bf16 %v1732_v41, %v1732_v41  ;;  %v1733_v38 = vmax.f32 %v1695_v58, 0.0  ;;  %v1136_v62 = vadd.f32 %v3242_v12, %v950_v31  ;;  %v952_v42 = vpop.f32.mrb[57].mxu1 }
 0x197   : > { %v953_v36 = vpop.f32.mrb[58].mxu1 }
 0x198   : > { %1923 = vst.msk [vmem:[%s3141_s20 + $0x68] sm:$0xf] %vm1896_vm3, %v2187_v34  ;;  %v2188_v50 = vpack.c.bf16 %v1733_v38, %v1733_v38  ;;  %v1430_v8 = vmul.f32 %v3098_v63, %v1136_v62  ;;  %v1139_v59 = vadd.f32 %v3247_v22, %v953_v36  ;;  %v955_v5 = vpop.f32.mrb[59].mxu1  ;;  %v1651_v38 = vpop.permute.xlu0 %1650 }
 0x199   : > { %v1656_v36 = vpop.permute.xlu1 %1655 }
 0x19a   : > { %1924 = vst.msk [vmem:[%s3141_s20 + $0x6c] sm:$0xf] %vm1896_vm3, %v2188_v50  ;;  %v1696_v23 = vadd.f32 %v1621_v46, %v1430_v8  ;;  %v1431_v26 = vmul.f32 %v3100_v1, %v1139_v59 }
 0x19c   : > { %v1734_v12 = vmax.f32 %v1696_v23, 0.0  ;;  %v1697_v32 = vadd.f32 %v1626_v37, %v1431_v26 }
 0x19d   : > { %v958_v21 = vpop.f32.mrb[60].mxu1 }
 0x19e   : > { %v2189_v51 = vpack.c.bf16 %v1734_v12, %v1734_v12  ;;  %v1735_v10 = vmax.f32 %v1697_v32, 0.0  ;;  %v1144_v43 = vadd.f32 %v3254_v29, %v958_v21  ;;  %v960_v63 = vpop.f32.mrb[61].mxu1  ;;  %v1661_v12 = vpop.permute.xlu0 %1660 }
 0x19f   : > { %v961_v47 = vpop.f32.mrb[62].mxu1 }
 0x1a0   : > { %1925 = vst.msk [vmem:[%s3141_s20 + $0x70] sm:$0xf] %vm1896_vm3, %v2189_v51  ;;  %v2190_v22 = vpack.c.bf16 %v1735_v10, %v1735_v10  ;;  %v1432_v61 = vmul.f32 %v3104_v3, %v1144_v43  ;;  %v1147_v20 = vadd.f32 %v3259_v60, %v961_v47  ;;  %v963_v1 = vpop.f32.mrb[63].mxu1  ;;  %v1666_v51 = vpop.permute.xlu1 %1665 }
 0x1a2   : > { %1926 = vst.msk [vmem:[%s3141_s20 + $0x74] sm:$0xf] %vm1896_vm3, %v2190_v22  ;;  %v1698_v33 = vadd.f32 %v1631_v39, %v1432_v61  ;;  %v1433_v19 = vmul.f32 %v3108_v7, %v1147_v20 }
 0x1a4   : > { %v1736_v29 = vmax.f32 %v1698_v33, 0.0  ;;  %v1699_v13 = vadd.f32 %v1636_v52, %v1433_v19 }
 0x1a5   : > { %v966_v28 = vpop.f32.mrb[64].mxu1 }
 0x1a6   : > { %v2191_v24 = vpack.c.bf16 %v1736_v29, %v1736_v29  ;;  %v1737_v44 = vmax.f32 %v1699_v13, 0.0  ;;  %v1152_v48 = vadd.f32 %v3266_v45, %v966_v28  ;;  %v968_v3 = vpop.f32.mrb[65].mxu1 }
 0x1a7   : > { %v969_v25 = vpop.f32.mrb[66].mxu1 }
 0x1a8   : > { %1927 = vst.msk [vmem:[%s3141_s20 + $0x78] sm:$0xf] %vm1896_vm3, %v2191_v24  ;;  %v2192_v60 = vpack.c.bf16 %v1737_v44, %v1737_v44  ;;  %v1434_v6 = vmul.f32 %v3110_v9, %v1152_v48  ;;  %v1155_v55 = vadd.f32 %v3271_v17, %v969_v25  ;;  %v971_v7 = vpop.f32.mrb[67].mxu1 }
 0x1aa   : > { %1928 = vst.msk [vmem:[%s3141_s20 + $0x7c] sm:$0xf] %vm1896_vm3, %v2192_v60  ;;  %v1700_v53 = vadd.f32 %v1641_v54, %v1434_v6  ;;  %v1435_v18 = vmul.f32 %v3114_v11, %v1155_v55 }
 0x1ac   : > { %v1738_v45 = vmax.f32 %v1700_v53, 0.0  ;;  %v1701_v30 = vadd.f32 %v1646_v40, %v1435_v18 }
 0x1ad   : > { %v974_v2 = vpop.f32.mrb[68].mxu1 }
 0x1ae   : > { %v2193_v35 = vpack.c.bf16 %v1738_v45, %v1738_v45  ;;  %v1739_v56 = vmax.f32 %v1701_v30, 0.0  ;;  %v1160_v41 = vadd.f32 %v3278_v0, %v974_v2  ;;  %v976_v9 = vpop.f32.mrb[69].mxu1 }
 0x1af   : > { %v977_v58 = vpop.f32.mrb[70].mxu1 }
 0x1b0   : > { %1929 = vst.msk [vmem:[%s3141_s20 + $0x80] sm:$0xf] %vm1896_vm3, %v2193_v35  ;;  %v2194_v17 = vpack.c.bf16 %v1739_v56, %v1739_v56  ;;  %v1436_v31 = vmul.f32 %v3118_v15, %v1160_v41  ;;  %v1163_v34 = vadd.f32 %v3283_v14, %v977_v58  ;;  %v979_v11 = vpop.f32.mrb[71].mxu1 }
 0x1b2   : > { %1930 = vst.msk [vmem:[%s3141_s20 + $0x84] sm:$0xf] %vm1896_vm3, %v2194_v17  ;;  %v1702_v62 = vadd.f32 %v1651_v38, %v1436_v31  ;;  %v1437_v42 = vmul.f32 %v3120_v16, %v1163_v34 }
 0x1b4   : > { %v1740_v0 = vmax.f32 %v1702_v62, 0.0  ;;  %v1703_v50 = vadd.f32 %v1656_v36, %v1437_v42 }
 0x1b5   : > { %v982_v8 = vpop.f32.mrb[72].mxu1 }
 0x1b6   : > { %v2195_v59 = vpack.c.bf16 %v1740_v0, %v1740_v0  ;;  %v1741_v5 = vmax.f32 %v1703_v50, 0.0  ;;  %v1168_v46 = vadd.f32 %v3290_v57, %v982_v8  ;;  %v984_v15 = vpop.f32.mrb[73].mxu1 }
 0x1b7   : > { %v985_v23 = vpop.f32.mrb[74].mxu1 }
 0x1b8   : > { %1931 = vst.msk [vmem:[%s3141_s20 + $0x88] sm:$0xf] %vm1896_vm3, %v2195_v59  ;;  %v2196_v14 = vpack.c.bf16 %v1741_v5, %v1741_v5  ;;  %v1438_v26 = vmul.f32 %v3126_v4, %v1168_v46  ;;  %v1171_v16 = vadd.f32 %v3295_v49, %v985_v23  ;;  %v987_v37 = vpop.f32.mrb[75].mxu1 }
 0x1ba   : > { %1932 = vst.msk [vmem:[%s3141_s20 + $0x8c] sm:$0xf] %vm1896_vm3, %v2196_v14  ;;  %v1704_v32 = vadd.f32 %v1661_v12, %v1438_v26  ;;  %v1439_v21 = vmul.f32 %v3128_v27, %v1171_v16 }
 0x1bc   : > { %v1742_v57 = vmax.f32 %v1704_v32, 0.0  ;;  %v1705_v10 = vadd.f32 %v1666_v51, %v1439_v21 }
 0x1be   : > { %v2197_v43 = vpack.c.bf16 %v1742_v57, %v1742_v57  ;;  %v1743_v63 = vmax.f32 %v1705_v10, 0.0 }
 0x1c0   : > { %1933 = vst.msk [vmem:[%s3141_s20 + $0x90] sm:$0xf] %vm1896_vm3, %v2197_v43  ;;  %v2198_v47 = vpack.c.bf16 %v1743_v63, %v1743_v63 }
 0x1c2   : > { %1935 = vst.msk [vmem:[%s3141_s20 + $0x94] sm:$0x3] %vm1934_vm4, %v2198_v47 }
 0x1c3 PF: > { %s14_s17 = sadd.s32 1, %s2488_s17   ;;  %s3354_s15 = smov %s2484_s16 }
 0x1c4   : > { %p11_p5 = scmp.ge.s32.totalorder %s14_s17, 4   ;;  %s3355_s16 = smov %s3357_s18 }
 0x1c6   :  { %13 = sbr.rel (!%p11_p5) target bundleno = 2 (0x2), region = 66 }

// kernel: msg3d_forward.37
= control target key start
LH: loop header
LB: loop body
LE: loop exit
PB: predicated region body
PF: predicated region fallthrough
CT: control target
= control target key end

     0   :  { %s1826_s18 = smov 0   ;;  %s1828_s19 = smov 0   ;;  %s2576_s0 = inlined_call_operand.vmem [shape: bf16[2,60,40], index: 0, kind: input, shape index: {}]   ;;  %s2577_s1 = inlined_call_operand.vmem [shape: bf16[240,60], index: 1, kind: input, shape index: {}]   ;;  %s2578_s2 = inlined_call_operand.vmem [shape: f32[240,1], index: 2, kind: input, shape index: {}]   ;;  %s2579_s3 = inlined_call_operand.vmem [shape: f32[240,1], index: 3, kind: input, shape index: {}]   ;;  %s2580_s4 = inlined_call_operand.vmem [shape: f32[240,1], index: 4, kind: input, shape index: {}]   ;;  %s2581_s5 = inlined_call_operand.vmem [shape: bf16[2,240,40], index: 5, kind: output, shape index: {}]  }
   0x1   :  { %s1830_s20 = smov 0  }
   0x2 LB: > { %s27_s21 = sadd.s32 1, %s1787_s19  ;;  %p1524_p0 = scmp.ge.s32.totalorder %s1791_s20, 1  ;;  %s1791_s20 = sphi %s1830_s20, %s15_s20   ;;  %s1787_s19 = sphi %s1828_s19, %s2611_s19   ;;  %s1783_s18 = sphi %s1826_s18, %s2610_s18  }
   0x3   : > { %p29_p1 = scmp.ge.s32.totalorder %s27_s21, 2  ;;  %p206_p2 = scmp.lt.s32.totalorder %s1791_s20, 3 }
   0x5   : > { %s2613_s21 = smov (%p29_p1, %s27_s21), 0  ;;  %p207_p3 = pnand %p1524_p0, %p206_p2 }
   0x7   : > { %210 = sbr.rel (%p207_p3) target bundleno = 327 (0x147), region = 40 }
   0xe   : > { %v598_v0 = vld [vmem:[%s2578_s2 + $0x10] sm:$0xff]  ;;  %v596_v1 = vld [vmem:[%s2578_s2] sm:$0xff]  ;;  %p240_p4 = scmp.lt.s32.totalorder %s1783_s18, 1  ;;  %v1793_v2 = vmov 0   ;;  %v599_v3 = vld [vmem:[%s2578_s2 + $0x18] sm:$0xff]  ;;  %v1794_v5 = vmov 0.0  }
   0xf   : > { %1749 = vset.pattern.permute.xlu1 %v1793_v2  ;;  %1748 = vset.pattern.permute.xlu0 %v1793_v2  ;;  %v597_v4 = vld [vmem:[%s2578_s2 + $0x8] sm:$0xff]  ;;  %vm1795_vm0 = vmmov 0   ;;  %v600_v8 = vld [vmem:[%s2578_s2 + $0x20] sm:$0xff]  ;;  %v603_v10 = vld [vmem:[%s2578_s2 + $0x38] sm:$0xff]  ;;  %vm439_vm1 = vcmask 1045504   ;;  %vm393_vm2 = vcmask 490496  }
  0x10   : > { %638 = vperm.xlu1 %1749, %v598_v0   ;;  %628 = vperm.xlu0 %1748, %v596_v1   ;;  %s2615_s18 = smov (!%p240_p4, %s1783_s18), 1  ;;  %v601_v6 = vld [vmem:[%s2578_s2 + $0x28] sm:$0xff]  ;;  %v602_v11 = vld [vmem:[%s2578_s2 + $0x30] sm:$0xff]  ;;  %v604_v15 = vld [vmem:[%s2578_s2 + $0x40] sm:$0xff] }
  0x11   : > { %1644 = vmatprep.subr.bf16.mxu0 %v1794_v5  ;;  %1712 = vmatprep.subr.bf16.mxu1 %v1794_v5  ;;  %s1594_s30 = sshll.u32 %s2615_s18, 5  ;;  %v605_v14 = vld [vmem:[%s2578_s2 + $0x48] sm:$0xff]  ;;  %v607_v17 = vld [vmem:[%s2578_s2 + $0x58] sm:$0xff]  ;;  %v606_v18 = vld [vmem:[%s2578_s2 + $0x50] sm:$0xff]  ;;  %s1720_s26 = smul.u32 120, %s2615_s18 }
  0x12   : > { %1652 = vmatprep.mubr.msk.bf16.mxu0 %vm1795_vm0, %v1794_v5  ;;  %1684 = vmatprep.mubr.msk.bf16.mxu1 %vm1795_vm0, %v1794_v5  ;;  %s247_s8 = scalar_lea.vmem %s2576_s0, %s1594_s30  ;;  %v1754_v19 = vld [vmem:[%s2577_s1] sm:$0xff]   ;;  %v609_v21 = vld [vmem:[%s2578_s2 + $0x68] sm:$0xff]  ;;  %v611_v23 = vld [vmem:[%s2578_s2 + $0x78] sm:$0xff] }
  0x13   : > { %v1750_v7 = vld [vmem:[%s247_s8] sm:$0xff]   ;;  %v1751_v9 = vld [vmem:[%s247_s8 + $0x8] sm:$0xff]   ;;  %v1752_v12 = vld [vmem:[%s247_s8 + $0x10] sm:$0xff]   ;;  %s2380_s29 = scalar_lea.vmem %s2581_s5, %s1720_s26 }
  0x14   : > { %643 = vperm.xlu1 %1749, %v599_v3   ;;  %633 = vperm.xlu0 %1748, %v597_v4   ;;  %v1753_v13 = vld [vmem:[%s247_s8 + $0x18] sm:$0x3f]   ;;  %v1755_v20 = vld [vmem:[%s2577_s1 + $0x40] sm:$0xff]   ;;  %v610_v24 = vld [vmem:[%s2578_s2 + $0x70] sm:$0xff] }
  0x15   : > { %1645 = vmatpush3.bf16.msra.mxu0 %v1750_v7  ;;  %1716 = vmatpush3.bf16.msra.mxu1 %v1750_v7  ;;  %v441_v16 = vsel %vm439_vm1, %v1753_v13, 0  ;;  %v608_v22 = vld [vmem:[%s2578_s2 + $0x60] sm:$0xff]  ;;  %v1756_v25 = vld [vmem:[%s2577_s1 + $0x8] sm:$0xff]   ;;  %v615_v29 = vld [vmem:[%s2578_s2 + $0x98] sm:$0xff] }
  0x16   : > { %1646 = vmatprep.subr.bf16.mxu0 %v1794_v5  ;;  %1713 = vmatprep.subr.bf16.mxu1 %v1794_v5  ;;  %v1757_v26 = vld [vmem:[%s2577_s1 + $0x48] sm:$0xff]   ;;  %v612_v28 = vld [vmem:[%s2578_s2 + $0x80] sm:$0xff]  ;;  %v614_v30 = vld [vmem:[%s2578_s2 + $0x90] sm:$0xff] }
  0x17   : > { %v613_v27 = vld [vmem:[%s2578_s2 + $0x88] sm:$0xff]  ;;  %v1758_v31 = vld [vmem:[%s2577_s1 + $0x10] sm:$0xff]   ;;  %v616_v34 = vld [vmem:[%s2578_s2 + $0xa0] sm:$0xff] }
  0x18   : > { %653 = vperm.xlu1 %1749, %v601_v6   ;;  %648 = vperm.xlu0 %1748, %v600_v8   ;;  %v1759_v32 = vld [vmem:[%s2577_s1 + $0x50] sm:$0xff]   ;;  %v617_v33 = vld [vmem:[%s2578_s2 + $0xa8] sm:$0xff]  ;;  %v619_v35 = vld [vmem:[%s2578_s2 + $0xb8] sm:$0xff] }
  0x19   : > { %1647 = vmatpush3.bf16.msra.mxu0 %v1751_v9  ;;  %1717 = vmatpush3.bf16.msra.mxu1 %v1751_v9  ;;  %v618_v36 = vld [vmem:[%s2578_s2 + $0xb0] sm:$0xff]  ;;  %v1760_v37 = vld [vmem:[%s2577_s1 + $0x18] sm:$0xff]   ;;  %v621_v39 = vld [vmem:[%s2578_s2 + $0xc8] sm:$0xff] }
  0x1a   : > { %1648 = vmatprep.subr.bf16.mxu0 %v1794_v5  ;;  %1714 = vmatprep.subr.bf16.mxu1 %v1794_v5  ;;  %v1761_v38 = vld [vmem:[%s2577_s1 + $0x58] sm:$0xff]   ;;  %v620_v40 = vld [vmem:[%s2578_s2 + $0xc0] sm:$0xff]  ;;  %v622_v42 = vld [vmem:[%s2578_s2 + $0xd0] sm:$0xff] }
  0x1b   : > { %v623_v41 = vld [vmem:[%s2578_s2 + $0xd8] sm:$0xff]  ;;  %v1762_v43 = vld [vmem:[%s2577_s1 + $0x20] sm:$0xff]   ;;  %v625_v45 = vld [vmem:[%s2578_s2 + $0xe8] sm:$0xff] }
  0x1c   : > { %663 = vperm.xlu1 %1749, %v603_v10   ;;  %658 = vperm.xlu0 %1748, %v602_v11   ;;  %v1763_v44 = vld [vmem:[%s2577_s1 + $0x60] sm:$0xff]   ;;  %v807_v47 = vld [vmem:[%s2579_s3 + $0x8] sm:$0xff]  ;;  %v809_v51 = vld [vmem:[%s2579_s3 + $0x18] sm:$0xff] }
  0x1d   : > { %1649 = vmatpush3.bf16.msra.mxu0 %v1752_v12  ;;  %1718 = vmatpush3.bf16.msra.mxu1 %v1752_v12  ;;  %v624_v46 = vld [vmem:[%s2578_s2 + $0xe0] sm:$0xff]  ;;  %v1764_v49 = vld [vmem:[%s2577_s1 + $0x28] sm:$0xff]   ;;  %v808_v52 = vld [vmem:[%s2579_s3 + $0x10] sm:$0xff] }
  0x1e   : > { %1650 = vmatprep.subr.bf16.mxu0 %v1794_v5  ;;  %1715 = vmatprep.subr.bf16.mxu1 %v1794_v5  ;;  %v806_v48 = vld [vmem:[%s2579_s3] sm:$0xff]  ;;  %v1765_v50 = vld [vmem:[%s2577_s1 + $0x68] sm:$0xff]   ;;  %v1766_v55 = vld [vmem:[%s2577_s1 + $0x30] sm:$0xff]  }
  0x1f   : > { %v811_v53 = vld [vmem:[%s2579_s3 + $0x28] sm:$0xff]  ;;  %v810_v54 = vld [vmem:[%s2579_s3 + $0x20] sm:$0xff]  ;;  %v1767_v56 = vld [vmem:[%s2577_s1 + $0x70] sm:$0xff]  }
  0x20   : > { %673 = vperm.xlu1 %1749, %v605_v14   ;;  %668 = vperm.xlu0 %1748, %v604_v15   ;;  %v813_v57 = vld [vmem:[%s2579_s3 + $0x38] sm:$0xff]  ;;  %v812_v58 = vld [vmem:[%s2579_s3 + $0x30] sm:$0xff]  ;;  %v815_v59 = vld [vmem:[%s2579_s3 + $0x48] sm:$0xff] }
  0x21   : > { %1651 = vmatpush3.bf16.msra.mxu0 %v441_v16  ;;  %1719 = vmatpush3.bf16.msra.mxu1 %v441_v16  ;;  %v814_v60 = vld [vmem:[%s2579_s3 + $0x40] sm:$0xff]  ;;  %v1768_v61 = vld [vmem:[%s2577_s1 + $0x38] sm:$0xff]   ;;  %v816_v63 = vld [vmem:[%s2579_s3 + $0x50] sm:$0xff] }
  0x22   : > { %v817_v62 = vld [vmem:[%s2579_s3 + $0x58] sm:$0xff]  ;;  %v819_v0 = vld [vmem:[%s2579_s3 + $0x68] sm:$0xff]  ;;  %v818_v1 = vld [vmem:[%s2579_s3 + $0x60] sm:$0xff] }
  0x23   : > { %v821_v3 = vld [vmem:[%s2579_s3 + $0x78] sm:$0xff]  ;;  %v820_v4 = vld [vmem:[%s2579_s3 + $0x70] sm:$0xff]  ;;  %v822_v6 = vld [vmem:[%s2579_s3 + $0x80] sm:$0xff] }
  0x24   : > { %683 = vperm.xlu1 %1749, %v607_v17   ;;  %678 = vperm.xlu0 %1748, %v606_v18   ;;  %v825_v7 = vld [vmem:[%s2579_s3 + $0x98] sm:$0xff]  ;;  %v824_v8 = vld [vmem:[%s2579_s3 + $0x90] sm:$0xff]  ;;  %v827_v9 = vld [vmem:[%s2579_s3 + $0xa8] sm:$0xff] }
  0x25   : > { %1653 = vmatmul.mubr.msk.bf16.vlgmr.msra.gmra.mrb[0].mxu0 %vm393_vm2, %v1754_v19  ;;  %1685 = vmatmul.mubr.msk.bf16.vlgmr.msra.gmra.mrb[0].mxu1 %vm393_vm2, %v1755_v20  ;;  %v826_v10 = vld [vmem:[%s2579_s3 + $0xa0] sm:$0xff]  ;;  %v829_v11 = vld [vmem:[%s2579_s3 + $0xb8] sm:$0xff]  ;;  %v828_v12 = vld [vmem:[%s2579_s3 + $0xb0] sm:$0xff] }
  0x26   : > { %1656 = vmatprep.mubr.msk.bf16.mxu0 %vm1795_vm0, %v1794_v5  ;;  %1688 = vmatprep.mubr.msk.bf16.mxu1 %vm1795_vm0, %v1794_v5  ;;  %v831_v13 = vld [vmem:[%s2579_s3 + $0xc8] sm:$0xff]  ;;  %v830_v14 = vld [vmem:[%s2579_s3 + $0xc0] sm:$0xff]  ;;  %v833_v15 = vld [vmem:[%s2579_s3 + $0xd8] sm:$0xff] }
  0x27   : > { %v832_v16 = vld [vmem:[%s2579_s3 + $0xd0] sm:$0xff]  ;;  %v1017_v17 = vld [vmem:[%s2580_s4 + $0x8] sm:$0xff]  ;;  %v1016_v18 = vld [vmem:[%s2580_s4] sm:$0xff] }
  0x28   : > { %693 = vperm.xlu1 %1749, %v609_v21   ;;  %688 = vperm.xlu0 %1748, %v608_v22   ;;  %v835_v19 = vld [vmem:[%s2579_s3 + $0xe8] sm:$0xff]  ;;  %v834_v20 = vld [vmem:[%s2579_s3 + $0xe0] sm:$0xff]  ;;  %vm1047_vm3 = vcmp.gt.f32.partialorder %v1017_v17, 0.0  ;;  %vm1046_vm4 = vcmp.gt.f32.partialorder %v1016_v18, 0.0  ;;  %v1019_v21 = vld [vmem:[%s2580_s4 + $0x18] sm:$0xff] }
  0x29   : > { %v1018_v22 = vld [vmem:[%s2580_s4 + $0x10] sm:$0xff]  ;;  %vm1049_vm5 = vcmp.gt.f32.partialorder %v1019_v21, 0.0  ;;  %v1040_v21 = vld [vmem:[%s2580_s4 + $0xc0] sm:$0xff] }
  0x2a   : > { %vm1048_vm6 = vcmp.gt.f32.partialorder %v1018_v22, 0.0 }
  0x2c   : > { %703 = vperm.xlu1 %1749, %v611_v23   ;;  %698 = vperm.xlu0 %1748, %v610_v24   ;;  %v1107_v23 = vsel %vm1047_vm3, 1, %v1793_v2  ;;  %v1106_v24 = vsel %vm1046_vm4, 1, %v1793_v2 }
  0x2d   : > { %1657 = vmatmul.mubr.msk.bf16.gmra.mrb[4].mxu0 %vm393_vm2, %v1756_v25  ;;  %1689 = vmatmul.mubr.msk.bf16.gmra.mrb[4].mxu1 %vm393_vm2, %v1757_v26  ;;  %v1021_v25 = vld [vmem:[%s2580_s4 + $0x28] sm:$0xff]  ;;  %v1020_v26 = vld [vmem:[%s2580_s4 + $0x20] sm:$0xff] }
  0x2e   : > { %1660 = vmatprep.mubr.msk.bf16.mxu0 %vm1795_vm0, %v1794_v5  ;;  %1692 = vmatprep.mubr.msk.bf16.mxu1 %vm1795_vm0, %v1794_v5  ;;  %vm1051_vm7 = vcmp.gt.f32.partialorder %v1021_v25, 0.0  ;;  %vm1050_vm8 = vcmp.gt.f32.partialorder %v1020_v26, 0.0  ;;  %v1043_v26 = vld [vmem:[%s2580_s4 + $0xd8] sm:$0xff] }
  0x30   : > { %713 = vperm.xlu1 %1749, %v613_v27   ;;  %708 = vperm.xlu0 %1748, %v612_v28   ;;  %v1109_v27 = vsel %vm1049_vm5, 1, %v1793_v2  ;;  %v1108_v28 = vsel %vm1048_vm6, 1, %v1793_v2 }
  0x34   : > { %723 = vperm.xlu1 %1749, %v615_v29   ;;  %718 = vperm.xlu0 %1748, %v614_v30   ;;  %v1023_v29 = vld [vmem:[%s2580_s4 + $0x38] sm:$0xff]  ;;  %v1022_v30 = vld [vmem:[%s2580_s4 + $0x30] sm:$0xff] }
  0x35   : > { %1661 = vmatmul.mubr.msk.bf16.gmra.mrb[8].mxu0 %vm393_vm2, %v1758_v31  ;;  %1693 = vmatmul.mubr.msk.bf16.gmra.mrb[8].mxu1 %vm393_vm2, %v1759_v32  ;;  %v1111_v31 = vsel %vm1051_vm7, 1, %v1793_v2  ;;  %v1110_v32 = vsel %vm1050_vm8, 1, %v1793_v2  ;;  %vm1053_vm9 = vcmp.gt.f32.partialorder %v1023_v29, 0.0  ;;  %vm1052_vm10 = vcmp.gt.f32.partialorder %v1022_v30, 0.0 }
  0x36   : > { %1664 = vmatprep.mubr.msk.bf16.mxu0 %vm1795_vm0, %v1794_v5  ;;  %1696 = vmatprep.mubr.msk.bf16.mxu1 %vm1795_vm0, %v1794_v5 }
  0x38   : > { %733 = vperm.xlu1 %1749, %v617_v33   ;;  %728 = vperm.xlu0 %1748, %v616_v34  }
  0x3c   : > { %743 = vperm.xlu1 %1749, %v619_v35   ;;  %738 = vperm.xlu0 %1748, %v618_v36   ;;  %v1025_v35 = vld [vmem:[%s2580_s4 + $0x48] sm:$0xff]  ;;  %v1024_v36 = vld [vmem:[%s2580_s4 + $0x40] sm:$0xff] }
  0x3d   : > { %1665 = vmatmul.mubr.msk.bf16.gmra.mrb[12].mxu0 %vm393_vm2, %v1760_v37  ;;  %1697 = vmatmul.mubr.msk.bf16.gmra.mrb[12].mxu1 %vm393_vm2, %v1761_v38  ;;  %v1113_v37 = vsel %vm1053_vm9, 1, %v1793_v2  ;;  %v1112_v38 = vsel %vm1052_vm10, 1, %v1793_v2  ;;  %vm1055_vm11 = vcmp.gt.f32.partialorder %v1025_v35, 0.0  ;;  %vm1054_vm12 = vcmp.gt.f32.partialorder %v1024_v36, 0.0  ;;  %v1044_v35 = vld [vmem:[%s2580_s4 + $0xe0] sm:$0xff] }
  0x3e   : > { %1668 = vmatprep.mubr.msk.bf16.mxu0 %vm1795_vm0, %v1794_v5  ;;  %1700 = vmatprep.mubr.msk.bf16.mxu1 %vm1795_vm0, %v1794_v5 }
  0x40   : > { %753 = vperm.xlu1 %1749, %v621_v39   ;;  %748 = vperm.xlu0 %1748, %v620_v40  }
  0x44   : > { %763 = vperm.xlu1 %1749, %v623_v41   ;;  %758 = vperm.xlu0 %1748, %v622_v42   ;;  %v1027_v41 = vld [vmem:[%s2580_s4 + $0x58] sm:$0xff]  ;;  %v1026_v42 = vld [vmem:[%s2580_s4 + $0x50] sm:$0xff] }
  0x45   : > { %1669 = vmatmul.mubr.msk.bf16.gmra.mrb[16].mxu0 %vm393_vm2, %v1762_v43  ;;  %1701 = vmatmul.mubr.msk.bf16.gmra.mrb[16].mxu1 %vm393_vm2, %v1763_v44  ;;  %v1115_v43 = vsel %vm1055_vm11, 1, %v1793_v2  ;;  %v1114_v44 = vsel %vm1054_vm12, 1, %v1793_v2  ;;  %vm1057_vm13 = vcmp.gt.f32.partialorder %v1027_v41, 0.0  ;;  %vm1056_vm14 = vcmp.gt.f32.partialorder %v1026_v42, 0.0 }
  0x46   : > { %1672 = vmatprep.mubr.msk.bf16.mxu0 %vm1795_vm0, %v1794_v5  ;;  %1704 = vmatprep.mubr.msk.bf16.mxu1 %vm1795_vm0, %v1794_v5  ;;  %vm1070_vm12 = vcmp.gt.f32.partialorder %v1040_v21, 0.0 }
  0x47   : > { %v1130_v29 = vsel %vm1070_vm12, 1, %v1793_v2 }
  0x48   : > { %773 = vperm.xlu1 %1749, %v625_v45   ;;  %768 = vperm.xlu0 %1748, %v624_v46  }
  0x4c   : > { %843 = vperm.xlu1 %1749, %v807_v47   ;;  %838 = vperm.xlu0 %1748, %v806_v48   ;;  %v1029_v47 = vld [vmem:[%s2580_s4 + $0x68] sm:$0xff]  ;;  %v1028_v48 = vld [vmem:[%s2580_s4 + $0x60] sm:$0xff] }
  0x4d   : > { %1673 = vmatmul.mubr.msk.bf16.gmra.mrb[20].mxu0 %vm393_vm2, %v1764_v49  ;;  %1705 = vmatmul.mubr.msk.bf16.gmra.mrb[20].mxu1 %vm393_vm2, %v1765_v50  ;;  %v1117_v49 = vsel %vm1057_vm13, 1, %v1793_v2  ;;  %v1116_v50 = vsel %vm1056_vm14, 1, %v1793_v2  ;;  %vm1059_vm15 = vcmp.gt.f32.partialorder %v1029_v47, 0.0  ;;  %vm1073_vm13 = vcmp.gt.f32.partialorder %v1043_v26, 0.0 }
  0x4e   : > { %1676 = vmatprep.mubr.msk.bf16.mxu0 %vm1795_vm0, %v1794_v5  ;;  %1708 = vmatprep.mubr.msk.bf16.mxu1 %vm1795_vm0, %v1794_v5  ;;  %v1133_v36 = vsel %vm1073_vm13, 1, %v1793_v2 }
  0x50   : > { %853 = vperm.xlu1 %1749, %v809_v51   ;;  %848 = vperm.xlu0 %1748, %v808_v52  }
  0x54   : > { %863 = vperm.xlu1 %1749, %v811_v53   ;;  %858 = vperm.xlu0 %1748, %v810_v54   ;;  %v1031_v53 = vld [vmem:[%s2580_s4 + $0x78] sm:$0xff]  ;;  %v1030_v54 = vld [vmem:[%s2580_s4 + $0x70] sm:$0xff] }
  0x55   : > { %1677 = vmatmul.mubr.msk.bf16.gmra.mrb[24].mxu0 %vm393_vm2, %v1766_v55  ;;  %1709 = vmatmul.mubr.msk.bf16.gmra.mrb[24].mxu1 %vm393_vm2, %v1767_v56  ;;  %v1119_v55 = vsel %vm1059_vm15, 1, %v1793_v2  ;;  %vm1061_vm1 = vcmp.gt.f32.partialorder %v1031_v53, 0.0 }
  0x56   : > { %1680 = vmatprep.mubr.msk.bf16.mxu0 %vm1795_vm0, %v1794_v5  ;;  %v823_v5 = vld [vmem:[%s2579_s3 + $0x88] sm:$0xff]  ;;  %vm1058_vm0 = vcmp.gt.f32.partialorder %v1028_v48, 0.0 }
  0x57   : > { %v1118_v56 = vsel %vm1058_vm0, 1, %v1793_v2  ;;  %vm1074_vm0 = vcmp.gt.f32.partialorder %v1044_v35, 0.0 }
  0x58   : > { %873 = vperm.xlu1 %1749, %v813_v57   ;;  %868 = vperm.xlu0 %1748, %v812_v58  }
  0x5c   : > { %883 = vperm.xlu1 %1749, %v815_v59   ;;  %878 = vperm.xlu0 %1748, %v814_v60   ;;  %v1033_v59 = vld [vmem:[%s2580_s4 + $0x88] sm:$0xff]  ;;  %v1032_v60 = vld [vmem:[%s2580_s4 + $0x80] sm:$0xff] }
  0x5d   : > { %1681 = vmatmul.mubr.msk.bf16.gmra.mrb[28].mxu0 %vm393_vm2, %v1768_v61  ;;  %vm1060_vm2 = vcmp.gt.f32.partialorder %v1030_v54, 0.0  ;;  %v1121_v61 = vsel %vm1061_vm1, 1, %v1793_v2  ;;  %vm1063_vm3 = vcmp.gt.f32.partialorder %v1033_v59, 0.0  ;;  %vm1062_vm4 = vcmp.gt.f32.partialorder %v1032_v60, 0.0 }
  0x60   : > { %893 = vperm.xlu1 %1749, %v817_v62   ;;  %888 = vperm.xlu0 %1748, %v816_v63   ;;  %v1120_v62 = vsel %vm1060_vm2, 1, %v1793_v2 }
  0x64   : > { %903 = vperm.xlu1 %1749, %v819_v0   ;;  %898 = vperm.xlu0 %1748, %v818_v1   ;;  %v1035_v1 = vld [vmem:[%s2580_s4 + $0x98] sm:$0xff] }
  0x65   : > { %vm1065_vm5 = vcmp.gt.f32.partialorder %v1035_v1, 0.0 }
  0x68   : > { %913 = vperm.xlu1 %1749, %v821_v3   ;;  %908 = vperm.xlu0 %1748, %v820_v4   ;;  %v1034_v3 = vld [vmem:[%s2580_s4 + $0x90] sm:$0xff]  ;;  %v1123_v4 = vsel %vm1063_vm3, 1, %v1793_v2  ;;  %vm1406_vm3 = vcmask 322560  }
  0x69   : > { %vm1064_vm6 = vcmp.gt.f32.partialorder %v1034_v3, 0.0 }
  0x6c   : > { %923 = vperm.xlu1 %1749, %v823_v5   ;;  %918 = vperm.xlu0 %1748, %v822_v6   ;;  %v1122_v5 = vsel %vm1062_vm4, 1, %v1793_v2 }
  0x70   : > { %933 = vperm.xlu1 %1749, %v825_v7   ;;  %928 = vperm.xlu0 %1748, %v824_v8   ;;  %v1037_v8 = vld [vmem:[%s2580_s4 + $0xa8] sm:$0xff] }
  0x71   : > { %vm1067_vm7 = vcmp.gt.f32.partialorder %v1037_v8, 0.0 }
  0x74   : > { %943 = vperm.xlu1 %1749, %v827_v9   ;;  %938 = vperm.xlu0 %1748, %v826_v10   ;;  %v1036_v9 = vld [vmem:[%s2580_s4 + $0xa0] sm:$0xff]  ;;  %v1125_v10 = vsel %vm1065_vm5, 1, %v1793_v2 }
  0x75   : > { %vm1066_vm8 = vcmp.gt.f32.partialorder %v1036_v9, 0.0 }
  0x76   : > { %v1126_v17 = vsel %vm1066_vm8, 1, %v1793_v2 }
  0x78   : > { %953 = vperm.xlu1 %1749, %v829_v11   ;;  %948 = vperm.xlu0 %1748, %v828_v12   ;;  %v1124_v11 = vsel %vm1064_vm6, 1, %v1793_v2 }
  0x7c   : > { %963 = vperm.xlu1 %1749, %v831_v13   ;;  %958 = vperm.xlu0 %1748, %v830_v14   ;;  %v1039_v14 = vld [vmem:[%s2580_s4 + $0xb8] sm:$0xff] }
  0x7d   : > { %vm1069_vm9 = vcmp.gt.f32.partialorder %v1039_v14, 0.0 }
  0x7e   : > { %v1129_v22 = vsel %vm1069_vm9, 1, %v1793_v2 }
  0x80   : > { %973 = vperm.xlu1 %1749, %v833_v15   ;;  %968 = vperm.xlu0 %1748, %v832_v16   ;;  %v1038_v15 = vld [vmem:[%s2580_s4 + $0xb0] sm:$0xff]  ;;  %v1127_v16 = vsel %vm1067_vm7, 1, %v1793_v2 }
  0x81   : > { %vm1068_vm10 = vcmp.gt.f32.partialorder %v1038_v15, 0.0 }
  0x84   : > { %983 = vperm.xlu1 %1749, %v835_v19   ;;  %978 = vperm.xlu0 %1748, %v834_v20   ;;  %v1041_v20 = vld [vmem:[%s2580_s4 + $0xc8] sm:$0xff] }
  0x85   : > { %vm1071_vm11 = vcmp.gt.f32.partialorder %v1041_v20, 0.0 }
  0x88   : > { %1140 = vperm.xlu1 %1749, %v1107_v23   ;;  %1137 = vperm.xlu0 %1748, %v1106_v24   ;;  %v1128_v23 = vsel %vm1068_vm10, 1, %v1793_v2 }
  0x8c   : > { %1146 = vperm.xlu1 %1749, %v1109_v27   ;;  %1143 = vperm.xlu0 %1748, %v1108_v28   ;;  %v1042_v27 = vld [vmem:[%s2580_s4 + $0xd0] sm:$0xff]  ;;  %v1131_v28 = vsel %vm1071_vm11, 1, %v1793_v2 }
  0x8d   : > { %vm1072_vm14 = vcmp.gt.f32.partialorder %v1042_v27, 0.0 }
  0x8f   : > { %v2160_v33 = vpop.permute.xlu1 %638  ;;  %v2162_v34 = vpop.permute.xlu0 %628 }
  0x90   : > { %1152 = vperm.xlu1 %1749, %v1111_v31   ;;  %1149 = vperm.xlu0 %1748, %v1110_v32   ;;  %v1045_v32 = vld [vmem:[%s2580_s4 + $0xe8] sm:$0xff] }
  0x91   : > { %vm1075_vm15 = vcmp.gt.f32.partialorder %v1045_v32, 0.0 }
  0x92   : > { %v1135_v42 = vsel %vm1075_vm15, 1, %v1793_v2 }
  0x93   : > { %v2172_v39 = vpop.permute.xlu1 %643  ;;  %v2174_v40 = vpop.permute.xlu0 %633 }
  0x94   : > { %1158 = vperm.xlu1 %1749, %v1113_v37   ;;  %1155 = vperm.xlu0 %1748, %v1112_v38   ;;  %v1132_v37 = vsel %vm1072_vm14, 1, %v1793_v2 }
  0x97   : > { %v2184_v45 = vpop.permute.xlu1 %653  ;;  %v2186_v46 = vpop.permute.xlu0 %648 }
  0x98   : > { %1164 = vperm.xlu1 %1749, %v1115_v43   ;;  %1161 = vperm.xlu0 %1748, %v1114_v44   ;;  %v1134_v43 = vsel %vm1074_vm0, 1, %v1793_v2 }
  0x9b   : > { %v2196_v51 = vpop.permute.xlu1 %663  ;;  %v2198_v52 = vpop.permute.xlu0 %658 }
  0x9c   : > { %1170 = vperm.xlu1 %1749, %v1117_v49   ;;  %1167 = vperm.xlu0 %1748, %v1116_v50  }
  0x9f   : > { %v2208_v57 = vpop.permute.xlu1 %673  ;;  %v2210_v58 = vpop.permute.xlu0 %668 }
  0xa0   : > { %1176 = vperm.xlu1 %1749, %v1119_v55   ;;  %1173 = vperm.xlu0 %1748, %v1118_v56  }
  0xa3   : > { %v2220_v63 = vpop.permute.xlu1 %683  ;;  %v2222_v0 = vpop.permute.xlu0 %678 }
  0xa4   : > { %1182 = vperm.xlu1 %1749, %v1121_v61   ;;  %1179 = vperm.xlu0 %1748, %v1120_v62  }
  0xa7   : > { %v2232_v6 = vpop.permute.xlu1 %693  ;;  %v2234_v7 = vpop.permute.xlu0 %688 }
  0xa8   : > { %1188 = vperm.xlu1 %1749, %v1123_v4   ;;  %1185 = vperm.xlu0 %1748, %v1122_v5  }
  0xab   : > { %v2244_v12 = vpop.permute.xlu1 %703  ;;  %v2246_v13 = vpop.permute.xlu0 %698 }
  0xac   : > { %2582 = vst [vmem:[#allocation2_spill] sm:$0xff] %v2244_v12  ;;  %2583 = vst [vmem:[#allocation3_spill] sm:$0xff] %v2246_v13  ;;  %1194 = vperm.xlu1 %1749, %v1125_v10   ;;  %1191 = vperm.xlu0 %1748, %v1124_v11  }
  0xaf   : > { %v2256_v18 = vpop.permute.xlu1 %713  ;;  %v2258_v19 = vpop.permute.xlu0 %708 }
  0xb0   : > { %1200 = vperm.xlu1 %1749, %v1127_v16   ;;  %1197 = vperm.xlu0 %1748, %v1126_v17  }
  0xb3   : > { %v2268_v24 = vpop.permute.xlu1 %723  ;;  %v2270_v25 = vpop.permute.xlu0 %718 }
  0xb4   : > { %1206 = vperm.xlu1 %1749, %v1129_v22   ;;  %1203 = vperm.xlu0 %1748, %v1128_v23  }
  0xb7   : > { %v2280_v30 = vpop.permute.xlu1 %733  ;;  %v2282_v31 = vpop.permute.xlu0 %728 }
  0xb8   : > { %1212 = vperm.xlu1 %1749, %v1131_v28   ;;  %1209 = vperm.xlu0 %1748, %v1130_v29  }
  0xbb   : > { %v2292_v38 = vpop.permute.xlu1 %743  ;;  %v2294_v41 = vpop.permute.xlu0 %738 }
  0xbc   : > { %1218 = vperm.xlu1 %1749, %v1133_v36   ;;  %1215 = vperm.xlu0 %1748, %v1132_v37  }
  0xbf   : > { %v2298_v44 = vpop.permute.xlu1 %753  ;;  %v2300_v47 = vpop.permute.xlu0 %748 }
  0xc0   : > { %1224 = vperm.xlu1 %1749, %v1135_v42   ;;  %1221 = vperm.xlu0 %1748, %v1134_v43  }
  0xc3   : > { %v2302_v48 = vpop.permute.xlu1 %763  ;;  %v2304_v49 = vpop.permute.xlu0 %758 }
  0xc4   : > { %2584 = vst [vmem:[#allocation4_spill] sm:$0xff] %v2302_v48  ;;  %2585 = vst [vmem:[#allocation5_spill] sm:$0xff] %v2304_v49 }
  0xc7   : > { %v2306_v50 = vpop.permute.xlu1 %773  ;;  %v2308_v53 = vpop.permute.xlu0 %768 }
  0xc8   : > { %2586 = vst [vmem:[#allocation6_spill] sm:$0xff] %v2306_v50  ;;  %2587 = vst [vmem:[#allocation7_spill] sm:$0xff] %v2308_v53 }
  0xcb   : > { %v844_v54 = vpop.permute.xlu1 %843  ;;  %v839_v55 = vpop.permute.xlu0 %838 }
  0xcf   : > { %v854_v56 = vpop.permute.xlu1 %853  ;;  %v849_v59 = vpop.permute.xlu0 %848 }
  0xd3   : > { %v2310_v60 = vpop.permute.xlu1 %863  ;;  %v2312_v2 = vpop.permute.xlu0 %858 }
  0xd7   : > { %v2314_v61 = vpop.permute.xlu1 %873  ;;  %v2316_v62 = vpop.permute.xlu0 %868 }
  0xdb   : > { %v2318_v1 = vpop.permute.xlu1 %883  ;;  %v2320_v3 = vpop.permute.xlu0 %878 }
  0xdf   : > { %v2322_v4 = vpop.permute.xlu1 %893  ;;  %v2324_v5 = vpop.permute.xlu0 %888 }
  0xe3   : > { %v2326_v8 = vpop.permute.xlu1 %903  ;;  %v2328_v9 = vpop.permute.xlu0 %898 }
  0xe4   : > { %2588 = vst [vmem:[#allocation8_spill] sm:$0xff] %v2326_v8 }
  0xe7   : > { %v2330_v10 = vpop.permute.xlu1 %913  ;;  %v2332_v11 = vpop.permute.xlu0 %908 }
  0xe8   : > { %2589 = vst [vmem:[#allocation9_spill] sm:$0xff] %v2330_v10  ;;  %2590 = vst [vmem:[#allocation10_spill] sm:$0xff] %v2332_v11 }
  0xeb   : > { %v2334_v14 = vpop.permute.xlu1 %923  ;;  %v2336_v15 = vpop.permute.xlu0 %918 }
  0xef   : > { %v2338_v16 = vpop.permute.xlu1 %933  ;;  %v2340_v17 = vpop.permute.xlu0 %928 }
  0xf3   : > { %v2342_v20 = vpop.permute.xlu1 %943  ;;  %v2344_v21 = vpop.permute.xlu0 %938 }
  0xf7   : > { %v2346_v22 = vpop.permute.xlu1 %953  ;;  %v2348_v23 = vpop.permute.xlu0 %948 }
  0xf8   : > { %2591 = vst [vmem:[#allocation11_spill] sm:$0xff] %v2346_v22  ;;  %v477_v26 = vpop.f32.mrb[0].mxu0  ;;  %v2350_v27 = vpop.f32.mrb[0].mxu1 }
  0xf9   : > { %v1654_v28 = vpop.f32.mrb[1].mxu0  ;;  %v1686_v29 = vpop.f32.mrb[1].mxu1  ;;  %v776_v50 = vmul.f32 %v2162_v34, %v477_v26 }
  0xfa   : > { %v480_v32 = vpop.f32.mrb[2].mxu0  ;;  %v2352_v35 = vpop.f32.mrb[2].mxu1 }
  0xfb   : > { %v2354_v36 = vpop.permute.xlu1 %963  ;;  %v2356_v37 = vpop.permute.xlu0 %958  ;;  %v777_v53 = vmul.f32 %v2174_v40, %v480_v32 }
  0xfc   : > { %2592 = vst [vmem:[#allocation12_spill] sm:$0xff] %v2354_v36  ;;  %2593 = vst [vmem:[#allocation13_spill] sm:$0xff] %v2356_v37  ;;  %v1655_v42 = vpop.f32.mrb[3].mxu0  ;;  %v1687_v43 = vpop.f32.mrb[3].mxu1  ;;  %v986_v36 = vadd.f32 %v839_v55, %v776_v50 }
  0xfd   : > { %v987_v42 = vadd.f32 %v844_v54, %v777_v53 }
  0xff   : > { %v2360_v10 = vpop.permute.xlu1 %973  ;;  %v2362_v12 = vpop.permute.xlu0 %968  ;;  %v1077_v37 = vmax.f32 %v987_v42, 0.0 }
 0x100   : > { %2594 = vst [vmem:[#allocation14_spill] sm:$0xff] %v2360_v10  ;;  %2595 = vst [vmem:[#allocation15_spill] sm:$0xff] %v2362_v12  ;;  %v485_v28 = vpop.f32.mrb[4].mxu0  ;;  %v2364_v29 = vpop.f32.mrb[4].mxu1  ;;  %v1076_v12 = vmax.f32 %v986_v36, 0.0 }
 0x101   : > { %v1658_v11 = vpop.f32.mrb[5].mxu0  ;;  %v1690_v48 = vpop.f32.mrb[5].mxu1  ;;  %v778_v43 = vmul.f32 %v2160_v33, %v485_v28 }
 0x102   : > { %v488_v13 = vpop.f32.mrb[6].mxu0  ;;  %v2366_v49 = vpop.f32.mrb[6].mxu1 }
 0x103   : > { %v2369_v34 = vpop.permute.xlu1 %983  ;;  %v2371_v40 = vpop.permute.xlu0 %978  ;;  %v779_v26 = vmul.f32 %v2172_v39, %v488_v13  ;;  %v988_v11 = vadd.f32 %v849_v59, %v778_v43 }
 0x104   : > { %v1659_v32 = vpop.f32.mrb[7].mxu0  ;;  %v1691_v10 = vpop.f32.mrb[7].mxu1 }
 0x105   : > { %v989_v48 = vadd.f32 %v854_v56, %v779_v26 }
 0x107   : > { %v1141_v8 = vpop.permute.xlu1 %1140  ;;  %v1138_v22 = vpop.permute.xlu0 %1137  ;;  %v1079_v28 = vmax.f32 %v989_v48, 0.0 }
 0x108   : > { %vm1227_vm1 = vcmp.eq.s32.totalorder %v1141_v8, 1  ;;  %vm1226_vm2 = vcmp.eq.s32.totalorder %v1138_v22, 1  ;;  %v493_v50 = vpop.f32.mrb[8].mxu0  ;;  %v2375_v53 = vpop.f32.mrb[8].mxu1  ;;  %v1078_v22 = vmax.f32 %v988_v11, 0.0 }
 0x109   : > { %v1257_v33 = vsel %vm1227_vm1, %v1077_v37, %v987_v42  ;;  %v1256_v39 = vsel %vm1226_vm2, %v1076_v12, %v986_v36  ;;  %v780_v13 = vmul.f32 %v2186_v46, %v493_v50  ;;  %v1662_v54 = vpop.f32.mrb[9].mxu0  ;;  %v1694_v55 = vpop.f32.mrb[9].mxu1 }
 0x10a   : > { %v1596_v56 = vpack.c.bf16 %v1257_v33, %v1257_v33  ;;  %v1595_v59 = vpack.c.bf16 %v1256_v39, %v1256_v39  ;;  %v496_v8 = vpop.f32.mrb[10].mxu0  ;;  %v2383_v10 = vpop.f32.mrb[10].mxu1 }
 0x10b   : > { %v990_v43 = vadd.f32 %v2312_v2, %v780_v13  ;;  %v1147_v26 = vpop.permute.xlu1 %1146  ;;  %v1144_v32 = vpop.permute.xlu0 %1143  ;;  %v781_v37 = vmul.f32 %v2184_v45, %v496_v8 }
 0x10c   : > { %1408 = vst.msk [vmem:[%s2380_s29 + $0x4] sm:$0xf] %vm1406_vm3, %v1596_v56  ;;  %1407 = vst.msk [vmem:[%s2380_s29] sm:$0xf] %vm1406_vm3, %v1595_v59  ;;  %vm1229_vm4 = vcmp.eq.s32.totalorder %v1147_v26, 1  ;;  %vm1228_vm5 = vcmp.eq.s32.totalorder %v1144_v32, 1 }
 0x10d   : > { %v1663_v46 = vpop.f32.mrb[11].mxu0  ;;  %v1695_v12 = vpop.f32.mrb[11].mxu1  ;;  %v1259_v36 = vsel %vm1229_vm4, %v1079_v28, %v989_v48  ;;  %v1258_v42 = vsel %vm1228_vm5, %v1078_v22, %v988_v11  ;;  %v991_v2 = vadd.f32 %v2310_v60, %v781_v37  ;;  %v1080_v39 = vmax.f32 %v990_v43, 0.0 }
 0x10e   : > { %v1598_v50 = vpack.c.bf16 %v1259_v36, %v1259_v36  ;;  %v1597_v33 = vpack.c.bf16 %v1258_v42, %v1258_v42 }
 0x10f   : > { %v1153_v13 = vpop.permute.xlu1 %1152  ;;  %v1150_v54 = vpop.permute.xlu0 %1149  ;;  %v1081_v45 = vmax.f32 %v991_v2, 0.0 }
 0x110   : > { %1410 = vst.msk [vmem:[%s2380_s29 + $0xc] sm:$0xf] %vm1406_vm3, %v1598_v50  ;;  %1409 = vst.msk [vmem:[%s2380_s29 + $0x8] sm:$0xf] %vm1406_vm3, %v1597_v33  ;;  %vm1231_vm6 = vcmp.eq.s32.totalorder %v1153_v13, 1  ;;  %vm1230_vm7 = vcmp.eq.s32.totalorder %v1150_v54, 1 }
 0x111   : > { %v501_v55 = vpop.f32.mrb[12].mxu0  ;;  %v2396_v56 = vpop.f32.mrb[12].mxu1  ;;  %v1260_v48 = vsel %vm1230_vm7, %v1080_v39, %v990_v43  ;;  %v1261_v8 = vsel %vm1231_vm6, %v1081_v45, %v991_v2 }
 0x112   : > { %v782_v11 = vmul.f32 %v2198_v52, %v501_v55  ;;  %v1666_v59 = vpop.f32.mrb[13].mxu0  ;;  %v1698_v60 = vpop.f32.mrb[13].mxu1  ;;  %v1599_v22 = vpack.c.bf16 %v1260_v48, %v1260_v48  ;;  %v1600_v32 = vpack.c.bf16 %v1261_v8, %v1261_v8 }
 0x113   : > { %v504_v28 = vpop.f32.mrb[14].mxu0  ;;  %v2399_v26 = vpop.f32.mrb[14].mxu1 }
 0x114   : > { %v992_v37 = vadd.f32 %v2316_v62, %v782_v11  ;;  %v1159_v46 = vpop.permute.xlu1 %1158  ;;  %v1156_v12 = vpop.permute.xlu0 %1155  ;;  %v783_v36 = vmul.f32 %v2196_v51, %v504_v28  ;;  %1411 = vst.msk [vmem:[%s2380_s29 + $0x10] sm:$0xf] %vm1406_vm3, %v1599_v22  ;;  %1412 = vst.msk [vmem:[%s2380_s29 + $0x14] sm:$0xf] %vm1406_vm3, %v1600_v32 }
 0x115   : > { %v1667_v43 = vpop.f32.mrb[15].mxu0  ;;  %v1699_v42 = vpop.f32.mrb[15].mxu1  ;;  %vm1232_vm8 = vcmp.eq.s32.totalorder %v1156_v12, 1  ;;  %vm1233_vm9 = vcmp.eq.s32.totalorder %v1159_v46, 1  ;;  %v793_v12 = vmul.f32 %v2256_v18, %v2352_v35 }
 0x116   : > { %v1082_v52 = vmax.f32 %v992_v37, 0.0  ;;  %v993_v50 = vadd.f32 %v2314_v61, %v783_v36  ;;  %v794_v36 = vmul.f32 %v2270_v25, %v2364_v29  ;;  %v795_v42 = vmul.f32 %v2268_v24, %v2366_v49 }
 0x117   : > { %v1003_v24 = vadd.f32 %v2334_v14, %v793_v12 }
 0x118   : > { %v1262_v33 = vsel %vm1232_vm8, %v1082_v52, %v992_v37  ;;  %v1083_v2 = vmax.f32 %v993_v50, 0.0  ;;  %v1165_v39 = vpop.permute.xlu1 %1164  ;;  %v1162_v13 = vpop.permute.xlu0 %1161  ;;  %v792_v37 = vmul.f32 %v2258_v19, %v2350_v27  ;;  %v2441_v49 = vadd.f32 %v2340_v17, %v794_v36 }
 0x119   : > { %v1601_v62 = vpack.c.bf16 %v1262_v33, %v1262_v33  ;;  %v509_v54 = vpop.f32.mrb[16].mxu0  ;;  %v2408_v51 = vpop.f32.mrb[16].mxu1  ;;  %vm1234_vm10 = vcmp.eq.s32.totalorder %v1162_v13, 1  ;;  %vm1235_vm11 = vcmp.eq.s32.totalorder %v1165_v39, 1  ;;  %v797_v39 = vmul.f32 %v2280_v30, %v2383_v10 }
 0x11a   : > { %v1263_v45 = vsel %vm1233_vm9, %v1083_v2, %v993_v50  ;;  %v784_v55 = vmul.f32 %v2210_v58, %v509_v54  ;;  %v1670_v48 = vpop.f32.mrb[17].mxu0  ;;  %v1702_v11 = vpop.f32.mrb[17].mxu1  ;;  %v1002_v18 = vadd.f32 %v2336_v15, %v792_v37  ;;  %v2445_v2 = vadd.f32 %v2338_v16, %v795_v42 }
 0x11b   : > { %1413 = vst.msk [vmem:[%s2380_s29 + $0x18] sm:$0xf] %vm1406_vm3, %v1601_v62  ;;  %v1602_v59 = vpack.c.bf16 %v1263_v45, %v1263_v45  ;;  %v512_v61 = vpop.f32.mrb[18].mxu0  ;;  %v2413_v60 = vpop.f32.mrb[18].mxu1  ;;  %v1094_v48 = vmax.f32 %v2441_v49, 0.0 }
 0x11c   : > { %v994_v8 = vadd.f32 %v2320_v3, %v784_v55  ;;  %v2416_v22 = vpop.permute.xlu1 %1170  ;;  %v1168_v28 = vpop.permute.xlu0 %1167  ;;  %v785_v32 = vmul.f32 %v2208_v57, %v512_v61  ;;  %v796_v57 = vmul.f32 %v2282_v31, %v2375_v53  ;;  %v1092_v45 = vmax.f32 %v1002_v18, 0.0 }
 0x11d   : > { %1414 = vst.msk [vmem:[%s2380_s29 + $0x1c] sm:$0xf] %vm1406_vm3, %v1602_v59  ;;  %v1671_v58 = vpop.f32.mrb[19].mxu0  ;;  %v1703_v46 = vpop.f32.mrb[19].mxu1  ;;  %v1093_v55 = vmax.f32 %v1003_v24, 0.0  ;;  %vm1236_vm12 = vcmp.eq.s32.totalorder %v1168_v28, 1  ;;  %v799_v61 = vmul.f32 %v2292_v38, %v2399_v26  ;;  %v800_v26 = vmul.f32 %v2300_v47, %v2408_v51 }
 0x11e   : > { %v1084_v43 = vmax.f32 %v994_v8, 0.0  ;;  %v995_v3 = vadd.f32 %v2318_v1, %v785_v32  ;;  %v2448_v15 = vadd.f32 %v2344_v21, %v796_v57  ;;  %vm1237_vm13 = vcmp.eq.s32.totalorder %v2416_v22, 1 }
 0x120   : > { %v1264_v19 = vsel %vm1234_vm10, %v1084_v43, %v994_v8  ;;  %v1085_v27 = vmax.f32 %v995_v3, 0.0  ;;  %v2432_v52 = vpop.permute.xlu1 %1176  ;;  %v2434_v50 = vpop.permute.xlu0 %1173 }
 0x121   : > { %v1603_v25 = vpack.c.bf16 %v1264_v19, %v1264_v19  ;;  %v517_v35 = vpop.f32.mrb[20].mxu0  ;;  %v2437_v1 = vpop.f32.mrb[20].mxu1  ;;  %vm1238_vm2 = vcmp.eq.s32.totalorder %v2434_v50, 1  ;;  %vm1239_vm4 = vcmp.eq.s32.totalorder %v2432_v52, 1 }
 0x122   : > { %v1265_v31 = vsel %vm1235_vm11, %v1085_v27, %v995_v3  ;;  %v786_v29 = vmul.f32 %v2222_v0, %v517_v35  ;;  %v1674_v53 = vpop.f32.mrb[21].mxu0  ;;  %v1706_v33 = vpop.f32.mrb[21].mxu1  ;;  %v798_v0 = vmul.f32 %v2294_v41, %v2396_v56  ;;  %v1095_v41 = vmax.f32 %v2445_v2, 0.0 }
 0x123   : > { %1415 = vst.msk [vmem:[%s2380_s29 + $0x20] sm:$0xf] %vm1406_vm3, %v1603_v25  ;;  %v1604_v14 = vpack.c.bf16 %v1265_v31, %v1265_v31  ;;  %v520_v17 = vpop.f32.mrb[22].mxu0  ;;  %v2454_v13 = vpop.f32.mrb[22].mxu1  ;;  %v2471_v56 = vadd.f32 %v2342_v20, %v797_v39  ;;  %v2597_v53 = vld [vmem:[#allocation8_spill] sm:$0xff]  ;;  %v2598_v39 = vld [vmem:[#allocation13_spill] sm:$0xff] }
 0x124   : > { %v996_v62 = vadd.f32 %v2324_v5, %v786_v29  ;;  %v2459_v54 = vpop.permute.xlu1 %1182  ;;  %v2461_v16 = vpop.permute.xlu0 %1179  ;;  %v787_v21 = vmul.f32 %v2220_v63, %v520_v17  ;;  %v1096_v5 = vmax.f32 %v2448_v15, 0.0  ;;  %v2474_v63 = vadd.f32 %v2348_v23, %v798_v0 }
 0x125   : > { %1416 = vst.msk [vmem:[%s2380_s29 + $0x24] sm:$0xf] %vm1406_vm3, %v1604_v14  ;;  %v1675_v30 = vpop.f32.mrb[23].mxu0  ;;  %v1707_v10 = vpop.f32.mrb[23].mxu1  ;;  %v1097_v27 = vmax.f32 %v2471_v56, 0.0  ;;  %v2505_v14 = vadd.f32 %v2598_v39, %v800_v26  ;;  %v2605_v26 = vld [vmem:[#allocation15_spill] sm:$0xff] }
 0x126   : > { %v1086_v11 = vmax.f32 %v996_v62, 0.0  ;;  %v997_v59 = vadd.f32 %v2322_v4, %v787_v21  ;;  %v1098_v51 = vmax.f32 %v2474_v63, 0.0  ;;  %vm1240_vm9 = vcmp.eq.s32.totalorder %v2461_v16, 1 }
 0x127   : > { %vm1241_vm10 = vcmp.eq.s32.totalorder %v2459_v54, 1 }
 0x128   : > { %v1266_v8 = vsel %vm1236_vm12, %v1086_v11, %v996_v62  ;;  %v1087_v32 = vmax.f32 %v997_v59, 0.0  ;;  %v1189_v37 = vpop.permute.xlu1 %1188  ;;  %v1186_v58 = vpop.permute.xlu0 %1185  ;;  %v2599_v62 = vld [vmem:[#allocation12_spill] sm:$0xff] }
 0x129   : > { %v1605_v4 = vpack.c.bf16 %v1266_v8, %v1266_v8  ;;  %vm1243_vm14 = vcmp.eq.s32.totalorder %v1189_v37, 1  ;;  %vm1242_vm15 = vcmp.eq.s32.totalorder %v1186_v58, 1  ;;  %v525_v46 = vpop.f32.mrb[24].mxu0  ;;  %v2479_v20 = vpop.f32.mrb[24].mxu1 }
 0x12a   : > { %v1267_v28 = vsel %vm1237_vm13, %v1087_v32, %v997_v59  ;;  %v1273_v12 = vsel %vm1243_vm14, %v1093_v55, %v1003_v24  ;;  %v1272_v23 = vsel %vm1242_vm15, %v1092_v45, %v1002_v18  ;;  %v788_v36 = vmul.f32 %v2234_v7, %v525_v46  ;;  %v1678_v43 = vpop.f32.mrb[25].mxu0  ;;  %v1710_v38 = vpop.f32.mrb[25].mxu1  ;;  %v2596_v24 = vld [vmem:[#allocation11_spill] sm:$0xff] }
 0x12b   : > { %1417 = vst.msk [vmem:[%s2380_s29 + $0x28] sm:$0xf] %vm1406_vm3, %v1605_v4  ;;  %v1606_v22 = vpack.c.bf16 %v1267_v28, %v1267_v28  ;;  %v1612_v3 = vpack.c.bf16 %v1273_v12, %v1273_v12  ;;  %v1611_v42 = vpack.c.bf16 %v1272_v23, %v1272_v23  ;;  %v528_v57 = vpop.f32.mrb[26].mxu0  ;;  %v2486_v19 = vpop.f32.mrb[26].mxu1  ;;  %v801_v7 = vmul.f32 %v2298_v44, %v2413_v60  ;;  %v2603_v12 = vld [vmem:[#allocation10_spill] sm:$0xff] }
 0x12c   : > { %v998_v18 = vadd.f32 %v2328_v9, %v788_v36  ;;  %v1195_v25 = vpop.permute.xlu1 %1194  ;;  %v1192_v35 = vpop.permute.xlu0 %1191  ;;  %v789_v47 = vmul.f32 %v2232_v6, %v528_v57  ;;  %v1009_v31 = vadd.f32 %v2596_v24, %v799_v61  ;;  %v1100_v28 = vmax.f32 %v2505_v14, 0.0  ;;  %v2604_v36 = vld [vmem:[#allocation2_spill] sm:$0xff]  ;;  %v2608_v24 = vld [vmem:[#allocation7_spill] sm:$0xff] }
 0x12d   : > { %1418 = vst.msk [vmem:[%s2380_s29 + $0x2c] sm:$0xf] %vm1406_vm3, %v1606_v22  ;;  %1424 = vst.msk [vmem:[%s2380_s29 + $0x44] sm:$0xf] %vm1406_vm3, %v1612_v3  ;;  %vm1245_vm0 = vcmp.eq.s32.totalorder %v1195_v25, 1  ;;  %vm1244_vm1 = vcmp.eq.s32.totalorder %v1192_v35, 1  ;;  %v1011_v21 = vadd.f32 %v2599_v62, %v801_v7 }
 0x12e   : > { %1423 = vst.msk [vmem:[%s2380_s29 + $0x40] sm:$0xf] %vm1406_vm3, %v1611_v42  ;;  %v1679_v29 = vpop.f32.mrb[27].mxu0  ;;  %v1711_v44 = vpop.f32.mrb[27].mxu1  ;;  %v1088_v60 = vmax.f32 %v998_v18, 0.0  ;;  %v1275_v9 = vsel %vm1245_vm0, %v1095_v41, %v2445_v2  ;;  %v1274_v6 = vsel %vm1244_vm1, %v1094_v48, %v2441_v49  ;;  %v999_v33 = vadd.f32 %v2597_v53, %v789_v47  ;;  %v2600_v49 = vld [vmem:[#allocation5_spill] sm:$0xff] }
 0x12f   : > { %v1614_v17 = vpack.c.bf16 %v1275_v9, %v1275_v9  ;;  %v1613_v0 = vpack.c.bf16 %v1274_v6, %v1274_v6  ;;  %v802_v55 = vmul.f32 %v2600_v49, %v2437_v1  ;;  %v2601_v41 = vld [vmem:[#allocation3_spill] sm:$0xff]  ;;  %v2602_v1 = vld [vmem:[#allocation4_spill] sm:$0xff]  ;;  %v1101_v38 = vmax.f32 %v1011_v21, 0.0  ;;  %v2609_v44 = vld [vmem:[#allocation6_spill] sm:$0xff] }
 0x130   : > { %v1268_v45 = vsel %vm1238_vm2, %v1088_v60, %v998_v18  ;;  %v1089_v30 = vmax.f32 %v999_v33, 0.0  ;;  %v1201_v2 = vpop.permute.xlu1 %1200  ;;  %v1198_v10 = vpop.permute.xlu0 %1197  ;;  %v803_v32 = vmul.f32 %v2602_v1, %v2454_v13  ;;  %v2607_v18 = vld [vmem:[#allocation14_spill] sm:$0xff]  ;;  %v804_v29 = vmul.f32 %v2608_v24, %v2479_v20 }
 0x131   : > { %v1607_v48 = vpack.c.bf16 %v1268_v45, %v1268_v45  ;;  %1426 = vst.msk [vmem:[%s2380_s29 + $0x4c] sm:$0xf] %vm1406_vm3, %v1614_v17  ;;  %1425 = vst.msk [vmem:[%s2380_s29 + $0x48] sm:$0xf] %vm1406_vm3, %v1613_v0  ;;  %vm1247_vm5 = vcmp.eq.s32.totalorder %v1201_v2, 1  ;;  %vm1246_vm6 = vcmp.eq.s32.totalorder %v1198_v10, 1  ;;  %v1012_v22 = vadd.f32 %v2605_v26, %v802_v55 }
 0x132   : > { %v533_v50 = vpop.f32.mrb[28].mxu0  ;;  %v1269_v11 = vsel %vm1239_vm4, %v1089_v30, %v999_v33  ;;  %v1277_v59 = vsel %vm1247_vm5, %v1097_v27, %v2471_v56  ;;  %v1276_v52 = vsel %vm1246_vm6, %v1096_v5, %v2448_v15  ;;  %v1099_v56 = vmax.f32 %v1009_v31, 0.0  ;;  %v2606_v27 = vld [vmem:[#allocation9_spill] sm:$0xff] }
 0x133   : > { %v790_v61 = vmul.f32 %v2601_v41, %v533_v50  ;;  %v1682_v8 = vpop.f32.mrb[29].mxu0  ;;  %1419 = vst.msk [vmem:[%s2380_s29 + $0x30] sm:$0xf] %vm1406_vm3, %v1607_v48  ;;  %v1608_v37 = vpack.c.bf16 %v1269_v11, %v1269_v11  ;;  %v1616_v58 = vpack.c.bf16 %v1277_v59, %v1277_v59  ;;  %v1615_v4 = vpack.c.bf16 %v1276_v52, %v1276_v52 }
 0x134   : > { %v536_v46 = vpop.f32.mrb[30].mxu0  ;;  %v1207_v5 = vpop.permute.xlu1 %1206  ;;  %v1013_v25 = vadd.f32 %v2607_v18, %v803_v32  ;;  %v805_v60 = vmul.f32 %v2609_v44, %v2486_v19  ;;  %v1102_v54 = vmax.f32 %v1012_v22, 0.0  ;;  %v1014_v0 = vadd.f32 %v2371_v40, %v804_v29 }
 0x135   : > { %v1000_v15 = vadd.f32 %v2603_v12, %v790_v61  ;;  %v1204_v23 = vpop.permute.xlu0 %1203  ;;  %v791_v43 = vmul.f32 %v2604_v36, %v536_v46  ;;  %1420 = vst.msk [vmem:[%s2380_s29 + $0x34] sm:$0xf] %vm1406_vm3, %v1608_v37  ;;  %1428 = vst.msk [vmem:[%s2380_s29 + $0x54] sm:$0xf] %vm1406_vm3, %v1616_v58  ;;  %vm1249_vm7 = vcmp.eq.s32.totalorder %v1207_v5, 1  ;;  %v1683_v13 = vpop.f32.mrb[31].mxu0 }
 0x136   : > { %1427 = vst.msk [vmem:[%s2380_s29 + $0x50] sm:$0xf] %vm1406_vm3, %v1615_v4  ;;  %vm1248_vm8 = vcmp.eq.s32.totalorder %v1204_v23, 1  ;;  %v1279_v42 = vsel %vm1249_vm7, %v1099_v56, %v1009_v31  ;;  %v1103_v17 = vmax.f32 %v1013_v25, 0.0  ;;  %v1015_v62 = vadd.f32 %v2369_v34, %v805_v60 }
 0x137   : > { %v1090_v3 = vmax.f32 %v1000_v15, 0.0  ;;  %v1278_v57 = vsel %vm1248_vm8, %v1098_v51, %v2474_v63  ;;  %v1001_v7 = vadd.f32 %v2606_v27, %v791_v43  ;;  %v1618_v35 = vpack.c.bf16 %v1279_v42, %v1279_v42 }
 0x138   : > { %v1617_v47 = vpack.c.bf16 %v1278_v57, %v1278_v57  ;;  %v1213_v6 = vpop.permute.xlu1 %1212  ;;  %v1104_v10 = vmax.f32 %v1014_v0, 0.0  ;;  %v1105_v34 = vmax.f32 %v1015_v62, 0.0 }
 0x139   : > { %v1270_v9 = vsel %vm1240_vm9, %v1090_v3, %v1000_v15  ;;  %v1091_v31 = vmax.f32 %v1001_v7, 0.0  ;;  %v1210_v53 = vpop.permute.xlu0 %1209  ;;  %1430 = vst.msk [vmem:[%s2380_s29 + $0x5c] sm:$0xf] %vm1406_vm3, %v1618_v35  ;;  %vm1251_vm11 = vcmp.eq.s32.totalorder %v1213_v6, 1 }
 0x13a   : > { %v1609_v63 = vpack.c.bf16 %v1270_v9, %v1270_v9  ;;  %1429 = vst.msk [vmem:[%s2380_s29 + $0x58] sm:$0xf] %vm1406_vm3, %v1617_v47  ;;  %vm1250_vm12 = vcmp.eq.s32.totalorder %v1210_v53, 1  ;;  %v1281_v20 = vsel %vm1251_vm11, %v1101_v38, %v1011_v21 }
 0x13b   : > { %v1271_v16 = vsel %vm1241_vm10, %v1091_v31, %v1001_v7  ;;  %v1280_v19 = vsel %vm1250_vm12, %v1100_v28, %v2505_v14  ;;  %v1620_v33 = vpack.c.bf16 %v1281_v20, %v1281_v20 }
 0x13c   : > { %1421 = vst.msk [vmem:[%s2380_s29 + $0x38] sm:$0xf] %vm1406_vm3, %v1609_v63  ;;  %v1610_v51 = vpack.c.bf16 %v1271_v16, %v1271_v16  ;;  %v1619_v39 = vpack.c.bf16 %v1280_v19, %v1280_v19  ;;  %v1219_v45 = vpop.permute.xlu1 %1218 }
 0x13d   : > { %v1216_v30 = vpop.permute.xlu0 %1215  ;;  %1432 = vst.msk [vmem:[%s2380_s29 + $0x64] sm:$0xf] %vm1406_vm3, %v1620_v33  ;;  %vm1253_vm13 = vcmp.eq.s32.totalorder %v1219_v45, 1 }
 0x13e   : > { %1422 = vst.msk [vmem:[%s2380_s29 + $0x3c] sm:$0xf] %vm1406_vm3, %v1610_v51  ;;  %1431 = vst.msk [vmem:[%s2380_s29 + $0x60] sm:$0xf] %vm1406_vm3, %v1619_v39  ;;  %vm1252_vm14 = vcmp.eq.s32.totalorder %v1216_v30, 1  ;;  %v1283_v14 = vsel %vm1253_vm13, %v1103_v17, %v1013_v25 }
 0x13f   : > { %v1282_v21 = vsel %vm1252_vm14, %v1102_v54, %v1012_v22  ;;  %v1622_v2 = vpack.c.bf16 %v1283_v14, %v1283_v14 }
 0x140   : > { %v1621_v40 = vpack.c.bf16 %v1282_v21, %v1282_v21  ;;  %v1225_v49 = vpop.permute.xlu1 %1224 }
 0x141   : > { %v1222_v55 = vpop.permute.xlu0 %1221  ;;  %1434 = vst.msk [vmem:[%s2380_s29 + $0x6c] sm:$0xf] %vm1406_vm3, %v1622_v2  ;;  %vm1255_vm15 = vcmp.eq.s32.totalorder %v1225_v49, 1 }
 0x142   : > { %1433 = vst.msk [vmem:[%s2380_s29 + $0x68] sm:$0xf] %vm1406_vm3, %v1621_v40  ;;  %vm1254_vm0 = vcmp.eq.s32.totalorder %v1222_v55, 1  ;;  %v1285_v48 = vsel %vm1255_vm15, %v1105_v34, %v1015_v62 }
 0x143   : > { %v1284_v50 = vsel %vm1254_vm0, %v1104_v10, %v1014_v0  ;;  %v1624_v11 = vpack.c.bf16 %v1285_v48, %v1285_v48 }
 0x144   : > { %v1623_v59 = vpack.c.bf16 %v1284_v50, %v1284_v50 }
 0x145   : > { %1436 = vst.msk [vmem:[%s2380_s29 + $0x74] sm:$0xf] %vm1406_vm3, %v1624_v11 }
 0x146   : > { %1435 = vst.msk [vmem:[%s2380_s29 + $0x70] sm:$0xf] %vm1406_vm3, %v1623_v59 }
 0x147 PF: > { %s15_s20 = sadd.s32 1, %s1791_s20   ;;  %s2610_s18 = smov %s1787_s19 }
 0x148   : > { %p12_p5 = scmp.ge.s32.totalorder %s15_s20, 4   ;;  %s2611_s19 = smov %s2613_s21 }
 0x14a   :  { %14 = sbr.rel (!%p12_p5) target bundleno = 2 (0x2), region = 70 }

// kernel: msg3d_forward.39
= control target key start
LH: loop header
LB: loop body
LE: loop exit
PB: predicated region body
PF: predicated region fallthrough
CT: control target
= control target key end

     0   :  { %s1228_s18 = smov 0   ;;  %s1230_s19 = smov 0   ;;  %s1582_s0 = inlined_call_operand.vmem [shape: bf16[2,120,40], index: 0, kind: input, shape index: {}]   ;;  %s1583_s1 = inlined_call_operand.vmem [shape: bf16[120,120], index: 1, kind: input, shape index: {}]   ;;  %s1584_s2 = inlined_call_operand.vmem [shape: f32[120,1], index: 2, kind: input, shape index: {}]   ;;  %s1585_s3 = inlined_call_operand.vmem [shape: f32[120,1], index: 3, kind: input, shape index: {}]   ;;  %s1586_s4 = inlined_call_operand.vmem [shape: f32[120,1], index: 4, kind: input, shape index: {}]   ;;  %s1587_s5 = inlined_call_operand.vmem [shape: bf16[2,120,40], index: 5, kind: output, shape index: {}]  }
   0x1   :  { %s1232_s20 = smov 0  }
   0x2 LB: > { %s27_s21 = sadd.s32 1, %s1191_s19  ;;  %p1004_p0 = scmp.ge.s32.totalorder %s1195_s20, 1  ;;  %s1195_s20 = sphi %s1232_s20, %s15_s20   ;;  %s1191_s19 = sphi %s1230_s19, %s1589_s19   ;;  %s1187_s18 = sphi %s1228_s18, %s1588_s18  }
   0x3   : > { %p29_p1 = scmp.ge.s32.totalorder %s27_s21, 2  ;;  %p206_p2 = scmp.lt.s32.totalorder %s1195_s20, 3 }
   0x5   : > { %s1591_s21 = smov (%p29_p1, %s27_s21), 0  ;;  %p207_p3 = pnand %p1004_p0, %p206_p2 }
   0x6   : > { %v497_v0 = vld [vmem:[%s1584_s2 + $0x10] sm:$0xff] (!%p207_p3)  ;;  %v495_v1 = vld [vmem:[%s1584_s2] sm:$0xff] (!%p207_p3)  ;;  %p240_p4 = scmp.lt.s32.totalorder (!%p207_p3), %s1187_s18, 1  ;;  %v1197_v2 = vmov (!%p207_p3), 0   ;;  %v498_v3 = vld [vmem:[%s1584_s2 + $0x18] sm:$0xff] (!%p207_p3)  ;;  %vm370_vm0 = vcmask (!%p207_p3), 982016  }
   0x7   : > { %210 = sbr.rel (%p207_p3) target bundleno = 288 (0x120), region = 40  ;;  %1156 = vset.pattern.permute.xlu1 (!%p207_p3), %v1197_v2  ;;  %1155 = vset.pattern.permute.xlu0 (!%p207_p3), %v1197_v2  ;;  %v496_v4 = vld [vmem:[%s1584_s2 + $0x8] sm:$0xff] (!%p207_p3)  ;;  %v499_v6 = vld [vmem:[%s1584_s2 + $0x20] sm:$0xff] (!%p207_p3)  ;;  %v502_v9 = vld [vmem:[%s1584_s2 + $0x38] sm:$0xff] (!%p207_p3)  ;;  %vm395_vm1 = vcmask (!%p207_p3), 1043456  }
   0x8   : > { %522 = vperm.xlu1 (!%p207_p3), %1156, %v497_v0   ;;  %512 = vperm.xlu0 (!%p207_p3), %1155, %v495_v1   ;;  %v500_v5 = vld [vmem:[%s1584_s2 + $0x28] sm:$0xff] (!%p207_p3)  ;;  %v501_v10 = vld [vmem:[%s1584_s2 + $0x30] sm:$0xff] (!%p207_p3)  ;;  %v503_v13 = vld [vmem:[%s1584_s2 + $0x40] sm:$0xff] (!%p207_p3) }
   0x9   : > { %v504_v12 = vld [vmem:[%s1584_s2 + $0x48] sm:$0xff] (!%p207_p3)  ;;  %v1165_v14 = vld [vmem:[%s1583_s1] sm:$0xff] (!%p207_p3)   ;;  %v506_v17 = vld [vmem:[%s1584_s2 + $0x58] sm:$0xff] (!%p207_p3) }
   0xa   : > { %1095 = vmatprep.mubr.msk.bf16.mxu0 (!%p207_p3), %vm370_vm0, %v1165_v14  ;;  %v1166_v16 = vld [vmem:[%s1583_s1 + $0x20] sm:$0xff] (!%p207_p3)   ;;  %v505_v18 = vld [vmem:[%s1584_s2 + $0x50] sm:$0xff] (!%p207_p3)  ;;  %v508_v20 = vld [vmem:[%s1584_s2 + $0x68] sm:$0xff] (!%p207_p3) }
   0xb   : > { %1103 = vmatprep.mubr.msk.bf16.mxu1 (!%p207_p3), %vm370_vm0, %v1166_v16  ;;  %v507_v21 = vld [vmem:[%s1584_s2 + $0x60] sm:$0xff] (!%p207_p3)  ;;  %v509_v24 = vld [vmem:[%s1584_s2 + $0x70] sm:$0xff] (!%p207_p3)  ;;  %v601_v27 = vld [vmem:[%s1585_s3 + $0x8] sm:$0xff] (!%p207_p3) }
   0xc   : > { %527 = vperm.xlu1 (!%p207_p3), %1156, %v498_v3   ;;  %517 = vperm.xlu0 (!%p207_p3), %1155, %v496_v4   ;;  %v600_v23 = vld [vmem:[%s1585_s3] sm:$0xff] (!%p207_p3)  ;;  %v602_v26 = vld [vmem:[%s1585_s3 + $0x10] sm:$0xff] (!%p207_p3)  ;;  %v603_v30 = vld [vmem:[%s1585_s3 + $0x18] sm:$0xff] (!%p207_p3) }
   0xd   : > { %v604_v29 = vld [vmem:[%s1585_s3 + $0x20] sm:$0xff] (!%p207_p3)  ;;  %v606_v32 = vld [vmem:[%s1585_s3 + $0x30] sm:$0xff] (!%p207_p3)  ;;  %v605_v33 = vld [vmem:[%s1585_s3 + $0x28] sm:$0xff] (!%p207_p3) }
   0xe   : > { %s1593_s18 = smov (!%p240_p4, %s1187_s18), 1  ;;  %v1167_v34 = vld [vmem:[%s1583_s1 + $0x8] sm:$0xff]   ;;  %v1169_v36 = vld [vmem:[%s1583_s1 + $0x10] sm:$0xff]   ;;  %v608_v38 = vld [vmem:[%s1585_s3 + $0x40] sm:$0xff] }
   0xf   : > { %s1129_s30 = smul.u32 60, %s1593_s18  ;;  %v1168_v35 = vld [vmem:[%s1583_s1 + $0x28] sm:$0xff]   ;;  %v1170_v37 = vld [vmem:[%s1583_s1 + $0x30] sm:$0xff]   ;;  %v607_v39 = vld [vmem:[%s1585_s3 + $0x38] sm:$0xff] }
  0x10   : > { %537 = vperm.xlu1 %1156, %v500_v5   ;;  %532 = vperm.xlu0 %1155, %v499_v6   ;;  %v610_v40 = vld [vmem:[%s1585_s3 + $0x50] sm:$0xff]  ;;  %v609_v41 = vld [vmem:[%s1585_s3 + $0x48] sm:$0xff]  ;;  %v1171_v42 = vld [vmem:[%s1583_s1 + $0x18] sm:$0xff]  }
  0x11   : > { %s1274_s12 = scalar_lea.vmem %s1582_s0, %s1129_s30  ;;  %v1172_v43 = vld [vmem:[%s1583_s1 + $0x38] ss:$0 sps:$4 sm:$0xff]   ;;  %v612_v44 = vld [vmem:[%s1585_s3 + $0x60] sm:$0xff]  ;;  %v706_v46 = vld [vmem:[%s1586_s4 + $0x8] sm:$0xff]  ;;  %s1503_s9 = scalar_lea.vmem %s1587_s5, %s1129_s30 }
  0x12   : > { %v1157_v7 = vld [vmem:[%s1274_s12] sm:$0xff]   ;;  %v1158_v8 = vld [vmem:[%s1274_s12 + $0x8] sm:$0xff]   ;;  %v1159_v11 = vld [vmem:[%s1274_s12 + $0x10] sm:$0xff]   ;;  %vm721_vm2 = vcmp.gt.f32.partialorder %v706_v46, 0.0 }
  0x13   : > { %1079 = vmatprep.subr.bf16.mxu0 %v1157_v7  ;;  %1111 = vmatprep.subr.bf16.mxu1 %v1157_v7  ;;  %v1160_v15 = vld [vmem:[%s1274_s12 + $0x18] sm:$0xff]   ;;  %v1161_v19 = vld [vmem:[%s1274_s12 + $0x20] sm:$0xff]   ;;  %v1162_v22 = vld [vmem:[%s1274_s12 + $0x28] sm:$0xff]   ;;  %v751_v52 = vsel %vm721_vm2, 1, %v1197_v2 }
  0x14   : > { %1080 = vmatpush3.bf16.msra.mxu0 %v1157_v7  ;;  %1119 = vmatpush3.bf16.msra.mxu1 %v1157_v7  ;;  %v1163_v25 = vld [vmem:[%s1274_s12 + $0x30] sm:$0xff]   ;;  %v1164_v28 = vld [vmem:[%s1274_s12 + $0x38] ss:$0 sps:$4 sm:$0xff]   ;;  %v705_v47 = vld [vmem:[%s1586_s4] sm:$0xff] }
  0x15   : > { %1081 = vmatprep.subr.bf16.mxu0 %v1158_v8  ;;  %1112 = vmatprep.subr.bf16.mxu1 %v1158_v8  ;;  %v397_v31 = vsel %vm395_vm1, %v1164_v28, 0  ;;  %v611_v45 = vld [vmem:[%s1585_s3 + $0x58] sm:$0xff]  ;;  %v614_v48 = vld [vmem:[%s1585_s3 + $0x70] sm:$0xff]  ;;  %v613_v49 = vld [vmem:[%s1585_s3 + $0x68] sm:$0xff]  ;;  %vm720_vm3 = vcmp.gt.f32.partialorder %v705_v47, 0.0 }
  0x16   : > { %547 = vperm.xlu1 %1156, %v502_v9   ;;  %542 = vperm.xlu0 %1155, %v501_v10   ;;  %v708_v50 = vld [vmem:[%s1586_s4 + $0x18] sm:$0xff]  ;;  %v707_v51 = vld [vmem:[%s1586_s4 + $0x10] sm:$0xff]  ;;  %v750_v53 = vsel %vm720_vm3, 1, %v1197_v2  ;;  %v710_v54 = vld [vmem:[%s1586_s4 + $0x28] sm:$0xff]  ;;  %vm901_vm3 = vcmask 322560  }
  0x17   : > { %vm723_vm4 = vcmp.gt.f32.partialorder %v708_v50, 0.0  ;;  %vm722_vm5 = vcmp.gt.f32.partialorder %v707_v51, 0.0  ;;  %v709_v55 = vld [vmem:[%s1586_s4 + $0x20] sm:$0xff]  ;;  %vm725_vm6 = vcmp.gt.f32.partialorder %v710_v54, 0.0  ;;  %v712_v58 = vld [vmem:[%s1586_s4 + $0x38] sm:$0xff]  ;;  %v711_v59 = vld [vmem:[%s1586_s4 + $0x30] sm:$0xff] }
  0x18   : > { %1082 = vmatpush3.bf16.msra.mxu0 %v1158_v8  ;;  %1120 = vmatpush3.bf16.msra.mxu1 %v1158_v8  ;;  %v753_v56 = vsel %vm723_vm4, 1, %v1197_v2  ;;  %v752_v57 = vsel %vm722_vm5, 1, %v1197_v2  ;;  %vm724_vm7 = vcmp.gt.f32.partialorder %v709_v55, 0.0  ;;  %v755_v60 = vsel %vm725_vm6, 1, %v1197_v2  ;;  %v714_v62 = vld [vmem:[%s1586_s4 + $0x48] sm:$0xff]  ;;  %v713_v63 = vld [vmem:[%s1586_s4 + $0x40] sm:$0xff] }
  0x19   : > { %1083 = vmatprep.subr.bf16.mxu0 %v1159_v11  ;;  %1113 = vmatprep.subr.bf16.mxu1 %v1159_v11  ;;  %v754_v61 = vsel %vm724_vm7, 1, %v1197_v2  ;;  %vm727_vm8 = vcmp.gt.f32.partialorder %v712_v58, 0.0  ;;  %vm726_vm9 = vcmp.gt.f32.partialorder %v711_v59, 0.0  ;;  %vm729_vm10 = vcmp.gt.f32.partialorder %v714_v62, 0.0  ;;  %v716_v3 = vld [vmem:[%s1586_s4 + $0x58] sm:$0xff]  ;;  %v715_v4 = vld [vmem:[%s1586_s4 + $0x50] sm:$0xff] }
  0x1a   : > { %557 = vperm.xlu1 %1156, %v504_v12   ;;  %552 = vperm.xlu0 %1155, %v503_v13   ;;  %v757_v0 = vsel %vm727_vm8, 1, %v1197_v2  ;;  %v756_v1 = vsel %vm726_vm9, 1, %v1197_v2  ;;  %vm728_vm11 = vcmp.gt.f32.partialorder %v713_v63, 0.0  ;;  %v759_v5 = vsel %vm729_vm10, 1, %v1197_v2  ;;  %v718_v7 = vld [vmem:[%s1586_s4 + $0x68] sm:$0xff]  ;;  %v717_v8 = vld [vmem:[%s1586_s4 + $0x60] sm:$0xff] }
  0x1b   : > { %v758_v6 = vsel %vm728_vm11, 1, %v1197_v2  ;;  %vm731_vm12 = vcmp.gt.f32.partialorder %v716_v3, 0.0  ;;  %vm730_vm13 = vcmp.gt.f32.partialorder %v715_v4, 0.0  ;;  %vm733_vm14 = vcmp.gt.f32.partialorder %v718_v7, 0.0 }
  0x1c   : > { %1084 = vmatpush3.bf16.msra.mxu0 %v1159_v11  ;;  %1121 = vmatpush3.bf16.msra.mxu1 %v1159_v11  ;;  %v761_v9 = vsel %vm731_vm12, 1, %v1197_v2  ;;  %v760_v10 = vsel %vm730_vm13, 1, %v1197_v2  ;;  %vm732_vm15 = vcmp.gt.f32.partialorder %v717_v8, 0.0  ;;  %v719_v11 = vld [vmem:[%s1586_s4 + $0x70] sm:$0xff]  ;;  %v763_v12 = vsel %vm733_vm14, 1, %v1197_v2 }
  0x1d   : > { %1085 = vmatprep.subr.bf16.mxu0 %v1160_v15  ;;  %1114 = vmatprep.subr.bf16.mxu1 %v1160_v15  ;;  %v762_v13 = vsel %vm732_vm15, 1, %v1197_v2 }
  0x1e   : > { %567 = vperm.xlu1 %1156, %v506_v17   ;;  %562 = vperm.xlu0 %1155, %v505_v18  }
  0x20   : > { %1086 = vmatpush3.bf16.msra.mxu0 %v1160_v15  ;;  %1122 = vmatpush3.bf16.msra.mxu1 %v1160_v15 }
  0x21   : > { %1087 = vmatprep.subr.bf16.mxu0 %v1161_v19  ;;  %1115 = vmatprep.subr.bf16.mxu1 %v1161_v19 }
  0x22   : > { %577 = vperm.xlu1 %1156, %v508_v20   ;;  %572 = vperm.xlu0 %1155, %v507_v21  }
  0x24   : > { %1088 = vmatpush3.bf16.msra.mxu0 %v1161_v19  ;;  %1123 = vmatpush3.bf16.msra.mxu1 %v1161_v19 }
  0x25   : > { %1089 = vmatprep.subr.bf16.mxu0 %v1162_v22  ;;  %1116 = vmatprep.subr.bf16.mxu1 %v1162_v22 }
  0x26   : > { %617 = vperm.xlu1 %1156, %v600_v23   ;;  %582 = vperm.xlu0 %1155, %v509_v24  }
  0x28   : > { %1090 = vmatpush3.bf16.msra.mxu0 %v1162_v22  ;;  %1124 = vmatpush3.bf16.msra.mxu1 %v1162_v22 }
  0x29   : > { %1091 = vmatprep.subr.bf16.mxu0 %v1163_v25  ;;  %1117 = vmatprep.subr.bf16.mxu1 %v1163_v25 }
  0x2a   : > { %627 = vperm.xlu1 %1156, %v602_v26   ;;  %622 = vperm.xlu0 %1155, %v601_v27  }
  0x2c   : > { %1092 = vmatpush3.bf16.msra.mxu0 %v1163_v25  ;;  %1125 = vmatpush3.bf16.msra.mxu1 %v1163_v25 }
  0x2d   : > { %1127 = vmatprep.subr.msk.bf16.mxu0 %vm395_vm1, %v1164_v28  ;;  %1128 = vmatprep.subr.msk.bf16.mxu1 %vm395_vm1, %v1164_v28 }
  0x2e   : > { %637 = vperm.xlu1 %1156, %v604_v29   ;;  %632 = vperm.xlu0 %1155, %v603_v30  }
  0x30   : > { %1094 = vmatpush3.bf16.msra.mxu0 %v397_v31  ;;  %1126 = vmatpush3.bf16.msra.mxu1 %v397_v31 }
  0x32   : > { %647 = vperm.xlu1 %1156, %v606_v32   ;;  %642 = vperm.xlu0 %1155, %v605_v33  }
  0x33   : > { %1096 = vmatmul.mubr.msk.bf16.vlgmr.msra.gmra.mrb[0].mxu0 %vm370_vm0, %v1167_v34  ;;  %1104 = vmatmul.mubr.msk.bf16.vlgmr.msra.gmra.mrb[0].mxu1 %vm370_vm0, %v1168_v35 }
  0x34   : > { %1099 = vmatprep.mubr.msk.bf16.mxu0 %vm370_vm0, %v1169_v36  ;;  %1107 = vmatprep.mubr.msk.bf16.mxu1 %vm370_vm0, %v1170_v37 }
  0x36   : > { %657 = vperm.xlu1 %1156, %v608_v38   ;;  %652 = vperm.xlu0 %1155, %v607_v39  }
  0x3a   : > { %667 = vperm.xlu1 %1156, %v610_v40   ;;  %662 = vperm.xlu0 %1155, %v609_v41  }
  0x3b   : > { %1100 = vmatmul.mubr.msk.bf16.gmra.mrb[4].mxu0 %vm370_vm0, %v1171_v42  ;;  %1108 = vmatmul.mubr.msk.bf16.gmra.mrb[4].mxu1 %vm370_vm0, %v1172_v43  ;;  %vm734_vm0 = vcmp.gt.f32.partialorder %v719_v11, 0.0 }
  0x3c   : > { %v764_v14 = vsel %vm734_vm0, 1, %v1197_v2 }
  0x3e   : > { %677 = vperm.xlu1 %1156, %v612_v44   ;;  %672 = vperm.xlu0 %1155, %v611_v45  }
  0x42   : > { %687 = vperm.xlu1 %1156, %v614_v48   ;;  %682 = vperm.xlu0 %1155, %v613_v49  }
  0x46   : > { %769 = vperm.xlu1 %1156, %v751_v52   ;;  %766 = vperm.xlu0 %1155, %v750_v53  }
  0x4a   : > { %775 = vperm.xlu1 %1156, %v753_v56   ;;  %772 = vperm.xlu0 %1155, %v752_v57  }
  0x4e   : > { %781 = vperm.xlu1 %1156, %v755_v60   ;;  %778 = vperm.xlu0 %1155, %v754_v61  }
  0x52   : > { %787 = vperm.xlu1 %1156, %v757_v0   ;;  %784 = vperm.xlu0 %1155, %v756_v1  }
  0x56   : > { %793 = vperm.xlu1 %1156, %v759_v5   ;;  %790 = vperm.xlu0 %1155, %v758_v6  }
  0x5a   : > { %799 = vperm.xlu1 %1156, %v761_v9   ;;  %796 = vperm.xlu0 %1155, %v760_v10  }
  0x5e   : > { %805 = vperm.xlu1 %1156, %v763_v12   ;;  %802 = vperm.xlu0 %1155, %v762_v13  }
  0x62   : > { %808 = vperm.xlu0 %1155, %v764_v14  }
  0x87   : > { %v523_v15 = vpop.permute.xlu1 %522  ;;  %v513_v16 = vpop.permute.xlu0 %512 }
  0x8b   : > { %v528_v17 = vpop.permute.xlu1 %527  ;;  %v1448_v18 = vpop.permute.xlu0 %517 }
  0x8f   : > { %v1450_v19 = vpop.permute.xlu1 %537  ;;  %v1452_v20 = vpop.permute.xlu0 %532 }
  0x95   : > { %v1454_v21 = vpop.permute.xlu1 %547  ;;  %v1456_v22 = vpop.permute.xlu0 %542 }
  0x99   : > { %v558_v23 = vpop.permute.xlu1 %557  ;;  %v553_v24 = vpop.permute.xlu0 %552 }
  0x9d   : > { %v568_v25 = vpop.permute.xlu1 %567  ;;  %v563_v26 = vpop.permute.xlu0 %562 }
  0xa1   : > { %v1458_v27 = vpop.permute.xlu1 %577  ;;  %v1460_v2 = vpop.permute.xlu0 %572 }
  0xa5   : > { %v618_v28 = vpop.permute.xlu1 %617  ;;  %v1462_v29 = vpop.permute.xlu0 %582 }
  0xa9   : > { %v628_v30 = vpop.permute.xlu1 %627  ;;  %v623_v31 = vpop.permute.xlu0 %622 }
  0xad   : > { %v1464_v32 = vpop.permute.xlu1 %637  ;;  %v633_v33 = vpop.permute.xlu0 %632 }
  0xb1   : > { %v1466_v34 = vpop.permute.xlu1 %647  ;;  %v1468_v35 = vpop.permute.xlu0 %642 }
  0xb5   : > { %v658_v36 = vpop.permute.xlu1 %657  ;;  %v1470_v37 = vpop.permute.xlu0 %652 }
  0xb9   : > { %v668_v38 = vpop.permute.xlu1 %667  ;;  %v663_v39 = vpop.permute.xlu0 %662 }
  0xbd   : > { %v1472_v40 = vpop.permute.xlu1 %677  ;;  %v673_v41 = vpop.permute.xlu0 %672 }
  0xc1   : > { %v1474_v42 = vpop.permute.xlu1 %687  ;;  %v1476_v43 = vpop.permute.xlu0 %682 }
  0xc5   : > { %v1478_v44 = vpop.permute.xlu1 %769  ;;  %v767_v45 = vpop.permute.xlu0 %766 }
  0xc6   : > { %vm810_vm1 = vcmp.eq.s32.totalorder %v767_v45, 1  ;;  %vm811_vm8 = vcmp.eq.s32.totalorder %v1478_v44, 1 }
  0xc9   : > { %v1480_v46 = vpop.permute.xlu1 %775  ;;  %v773_v47 = vpop.permute.xlu0 %772 }
  0xca   : > { %vm813_vm2 = vcmp.eq.s32.totalorder %v1480_v46, 1  ;;  %vm812_vm4 = vcmp.eq.s32.totalorder %v773_v47, 1 }
  0xcd   : > { %v1482_v48 = vpop.permute.xlu1 %781  ;;  %v1484_v49 = vpop.permute.xlu0 %778 }
  0xce   : > { %vm814_vm11 = vcmp.eq.s32.totalorder %v1484_v49, 1  ;;  %vm815_vm12 = vcmp.eq.s32.totalorder %v1482_v48, 1 }
  0xd1   : > { %v1486_v50 = vpop.permute.xlu1 %787  ;;  %v1488_v51 = vpop.permute.xlu0 %784 }
  0xd2   : > { %vm816_vm10 = vcmp.eq.s32.totalorder %v1488_v51, 1  ;;  %vm817_vm13 = vcmp.eq.s32.totalorder %v1486_v50, 1 }
  0xd5   : > { %v1490_v52 = vpop.permute.xlu1 %793  ;;  %v791_v53 = vpop.permute.xlu0 %790 }
  0xd6   : > { %vm818_vm5 = vcmp.eq.s32.totalorder %v791_v53, 1  ;;  %vm819_vm9 = vcmp.eq.s32.totalorder %v1490_v52, 1 }
  0xd9   : > { %v800_v54 = vpop.permute.xlu1 %799  ;;  %v797_v55 = vpop.permute.xlu0 %796 }
  0xda   : > { %vm821_vm6 = vcmp.eq.s32.totalorder %v800_v54, 1  ;;  %vm820_vm7 = vcmp.eq.s32.totalorder %v797_v55, 1 }
 0x106   : > { %v1097_v56 = vpop.f32.mrb[0].mxu0  ;;  %v1105_v57 = vpop.f32.mrb[0].mxu1 }
 0x107   : > { %v587_v58 = vmul.f32 %v1097_v56, %v523_v15  ;;  %v595_v59 = vmul.f32 %v1105_v57, %v563_v26  ;;  %v433_v60 = vpop.f32.mrb[1].mxu0  ;;  %v465_v61 = vpop.f32.mrb[1].mxu1 }
 0x108   : > { %v585_v62 = vmul.f32 %v513_v16, %v433_v60  ;;  %v593_v63 = vmul.f32 %v553_v24, %v465_v61  ;;  %v1098_v0 = vpop.f32.mrb[2].mxu0  ;;  %v1106_v1 = vpop.f32.mrb[2].mxu1 }
 0x109   : > { %v692_v3 = vadd.f32 %v628_v30, %v587_v58  ;;  %v700_v4 = vadd.f32 %v668_v38, %v595_v59  ;;  %v588_v5 = vmul.f32 %v1098_v0, %v528_v17  ;;  %v596_v6 = vmul.f32 %v1106_v1, %v568_v25  ;;  %v436_v7 = vpop.f32.mrb[3].mxu0  ;;  %v468_v8 = vpop.f32.mrb[3].mxu1 }
 0x10a   : > { %v690_v9 = vadd.f32 %v618_v28, %v585_v62  ;;  %v698_v10 = vadd.f32 %v658_v36, %v593_v63  ;;  %v586_v11 = vmul.f32 %v1448_v18, %v436_v7  ;;  %v594_v12 = vmul.f32 %v558_v23, %v468_v8  ;;  %v1496_v24 = vpop.permute.xlu0 %802 }
 0x10b   : > { %v737_v13 = vmax.f32 %v692_v3, 0.0  ;;  %v745_v14 = vmax.f32 %v700_v4, 0.0  ;;  %v693_v15 = vadd.f32 %v633_v33, %v588_v5  ;;  %v701_v16 = vadd.f32 %v673_v41, %v596_v6 }
 0x10c   : > { %v735_v26 = vmax.f32 %v690_v9, 0.0  ;;  %v743_v56 = vmax.f32 %v698_v10, 0.0  ;;  %v691_v30 = vadd.f32 %v623_v31, %v586_v11  ;;  %v699_v38 = vadd.f32 %v663_v39, %v594_v12 }
 0x10d   : > { %v827_v17 = vsel %vm812_vm4, %v737_v13, %v692_v3  ;;  %v835_v18 = vsel %vm820_vm7, %v745_v14, %v700_v4  ;;  %v738_v23 = vmax.f32 %v693_v15, 0.0  ;;  %v746_v25 = vmax.f32 %v701_v16, 0.0 }
 0x10e   : > { %v1050_v28 = vpack.c.bf16 %v827_v17, %v827_v17  ;;  %v1058_v33 = vpack.c.bf16 %v835_v18, %v835_v18  ;;  %v825_v31 = vsel %vm810_vm1, %v735_v26, %v690_v9  ;;  %v833_v36 = vsel %vm818_vm5, %v743_v56, %v698_v10  ;;  %v1101_v39 = vpop.f32.mrb[4].mxu0  ;;  %v1109_v41 = vpop.f32.mrb[4].mxu1 }
 0x10f   : > { %v1048_v47 = vpack.c.bf16 %v825_v31, %v825_v31  ;;  %v1056_v55 = vpack.c.bf16 %v833_v36, %v833_v36  ;;  %v828_v57 = vsel %vm813_vm2, %v738_v23, %v693_v15  ;;  %v836_v58 = vsel %vm821_vm6, %v746_v25, %v701_v16  ;;  %v449_v59 = vpop.f32.mrb[5].mxu0  ;;  %v481_v60 = vpop.f32.mrb[5].mxu1 }
 0x110   : > { %904 = vst.msk [vmem:[%s1503_s9 + $0x8] sm:$0xf] %vm901_vm3, %v1050_v28  ;;  %912 = vst.msk [vmem:[%s1503_s9 + $0x28] sm:$0xf] %vm901_vm3, %v1058_v33  ;;  %v1051_v45 = vpack.c.bf16 %v828_v57, %v828_v57  ;;  %v1059_v53 = vpack.c.bf16 %v836_v58, %v836_v58  ;;  %v736_v61 = vmax.f32 %v691_v30, 0.0  ;;  %v744_v46 = vmax.f32 %v699_v38, 0.0  ;;  %v809_v6 = vpop.permute.xlu0 %808  ;;  %v806_v15 = vpop.permute.xlu1 %805 }
 0x111   : > { %v1102_v62 = vpop.f32.mrb[6].mxu0  ;;  %v1110_v63 = vpop.f32.mrb[6].mxu1  ;;  %902 = vst.msk [vmem:[%s1503_s9] sm:$0xf] %vm901_vm3, %v1048_v47  ;;  %910 = vst.msk [vmem:[%s1503_s9 + $0x20] sm:$0xf] %vm901_vm3, %v1056_v55  ;;  %v591_v54 = vmul.f32 %v1101_v39, %v1456_v22  ;;  %v599_v0 = vmul.f32 %v1109_v41, %v1462_v29  ;;  %v589_v1 = vmul.f32 %v1452_v20, %v449_v59 }
 0x112   : > { %v597_v3 = vmul.f32 %v1460_v2, %v481_v60  ;;  %v452_v4 = vpop.f32.mrb[7].mxu0  ;;  %v484_v5 = vpop.f32.mrb[7].mxu1  ;;  %905 = vst.msk [vmem:[%s1503_s9 + $0xc] sm:$0xf] %vm901_vm3, %v1051_v45  ;;  %913 = vst.msk [vmem:[%s1503_s9 + $0x2c] sm:$0xf] %vm901_vm3, %v1059_v53  ;;  %v826_v7 = vsel %vm811_vm8, %v736_v61, %v691_v30  ;;  %v834_v22 = vsel %vm819_vm9, %v744_v46, %v699_v38 }
 0x113   : > { %v592_v29 = vmul.f32 %v1102_v62, %v1454_v21  ;;  %v590_v20 = vmul.f32 %v1450_v19, %v452_v4  ;;  %v1049_v2 = vpack.c.bf16 %v826_v7, %v826_v7  ;;  %v1057_v8 = vpack.c.bf16 %v834_v22, %v834_v22 }
 0x114   : > { %v696_v9 = vadd.f32 %v1466_v34, %v591_v54  ;;  %v704_v10 = vadd.f32 %v1474_v42, %v599_v0  ;;  %v694_v11 = vadd.f32 %v1464_v32, %v589_v1  ;;  %v702_v12 = vadd.f32 %v1472_v40, %v597_v3 }
 0x115   : > { %v697_v44 = vadd.f32 %v1470_v37, %v592_v29  ;;  %v695_v13 = vadd.f32 %v1468_v35, %v590_v20  ;;  %vm824_vm14 = vcmp.eq.s32.totalorder %v809_v6, 1  ;;  %903 = vst.msk [vmem:[%s1503_s9 + $0x4] sm:$0xf] %vm901_vm3, %v1049_v2  ;;  %911 = vst.msk [vmem:[%s1503_s9 + $0x24] sm:$0xf] %vm901_vm3, %v1057_v8  ;;  %v598_v52 = vmul.f32 %v1458_v27, %v484_v5 }
 0x116   : > { %v741_v19 = vmax.f32 %v696_v9, 0.0  ;;  %v749_v21 = vmax.f32 %v704_v10, 0.0  ;;  %v739_v34 = vmax.f32 %v694_v11, 0.0  ;;  %v747_v14 = vmax.f32 %v702_v12, 0.0 }
 0x117   : > { %v742_v42 = vmax.f32 %v697_v44, 0.0  ;;  %v740_v32 = vmax.f32 %v695_v13, 0.0  ;;  %vm822_vm15 = vcmp.eq.s32.totalorder %v1496_v24, 1  ;;  %v703_v40 = vadd.f32 %v1476_v43, %v598_v52 }
 0x118   : > { %v831_v35 = vsel %vm816_vm10, %v741_v19, %v696_v9  ;;  %v839_v37 = vsel %vm824_vm14, %v749_v21, %v704_v10  ;;  %v829_v26 = vsel %vm814_vm11, %v739_v34, %v694_v11  ;;  %v837_v56 = vsel %vm822_vm15, %v747_v14, %v702_v12 }
 0x119   : > { %v1054_v16 = vpack.c.bf16 %v831_v35, %v831_v35  ;;  %v1062_v27 = vpack.c.bf16 %v839_v37, %v839_v37  ;;  %v1052_v30 = vpack.c.bf16 %v829_v26, %v829_v26  ;;  %v1060_v24 = vpack.c.bf16 %v837_v56, %v837_v56 }
 0x11a   : > { %v832_v51 = vsel %vm817_vm13, %v742_v42, %v697_v44  ;;  %v830_v43 = vsel %vm815_vm12, %v740_v32, %v695_v13  ;;  %v748_v18 = vmax.f32 %v703_v40, 0.0  ;;  %vm823_vm0 = vcmp.eq.s32.totalorder %v806_v15, 1 }
 0x11b   : > { %908 = vst.msk [vmem:[%s1503_s9 + $0x18] sm:$0xf] %vm901_vm3, %v1054_v16  ;;  %916 = vst.msk [vmem:[%s1503_s9 + $0x38] sm:$0xf] %vm901_vm3, %v1062_v27  ;;  %v1055_v38 = vpack.c.bf16 %v832_v51, %v832_v51  ;;  %v1053_v17 = vpack.c.bf16 %v830_v43, %v830_v43 }
 0x11c   : > { %906 = vst.msk [vmem:[%s1503_s9 + $0x10] sm:$0xf] %vm901_vm3, %v1052_v30  ;;  %914 = vst.msk [vmem:[%s1503_s9 + $0x30] sm:$0xf] %vm901_vm3, %v1060_v24  ;;  %v838_v49 = vsel %vm823_vm0, %v748_v18, %v703_v40 }
 0x11d   : > { %909 = vst.msk [vmem:[%s1503_s9 + $0x1c] sm:$0xf] %vm901_vm3, %v1055_v38  ;;  %907 = vst.msk [vmem:[%s1503_s9 + $0x14] sm:$0xf] %vm901_vm3, %v1053_v17  ;;  %v1061_v50 = vpack.c.bf16 %v838_v49, %v838_v49 }
 0x11f   : > { %915 = vst.msk [vmem:[%s1503_s9 + $0x34] sm:$0xf] %vm901_vm3, %v1061_v50 }
 0x120 PF: > { %s15_s20 = sadd.s32 1, %s1195_s20   ;;  %s1588_s18 = smov %s1191_s19 }
 0x121   : > { %p12_p5 = scmp.ge.s32.totalorder %s15_s20, 4   ;;  %s1589_s19 = smov %s1591_s21 }
 0x123   :  { %14 = sbr.rel (!%p12_p5) target bundleno = 2 (0x2), region = 70 }

// kernel: msg3d_forward.38
= control target key start
LH: loop header
LB: loop body
LE: loop exit
PB: predicated region body
PF: predicated region fallthrough
CT: control target
= control target key end

     0   :  { %s1955_s18 = smov 0   ;;  %s2248_s0 = inlined_call_operand.vmem [shape: bf16[2,96,80], index: 0, kind: input, shape index: {}]   ;;  %s2249_s1 = inlined_call_operand.vmem [shape: bf16[2,24,40], index: 1, kind: input, shape index: {}]   ;;  %s2250_s2 = inlined_call_operand.vmem [shape: bf16[2,120,40], index: 2, kind: input, shape index: {}]   ;;  %s2251_s3 = inlined_call_operand.vmem [shape: bf16[4,3,24,24], index: 3, kind: input, shape index: {}]   ;;  %s2252_s4 = inlined_call_operand.vmem [shape: f32[120,1], index: 4, kind: input, shape index: {}]   ;;  %s2253_s5 = inlined_call_operand.vmem [shape: bf16[2,120,40], index: 5, kind: output, shape index: {}]  }
   0x1 LB: > { %s1534_s19 = sadd.s32 4294967295, %s1916_s18   ;;  %p1538_p0 = scmp.ge.s32.totalorder %s1916_s18, 1  ;;  %s1916_s18 = sphi %s1955_s18, %s15_s18  }
   0x2   : > { %p207_p1 = scmp.lt.s32.totalorder %s1916_s18, 3 }
   0x4   : > { %p208_p2 = pnand %p1538_p0, %p207_p1 }
   0x5   : > { %p245_p3 = scmp.lt.s32.totalorder (!%p208_p2), %s1534_s19, 1  ;;  %v1886_v0 = vld [vmem:[%s2251_s3 + $0xc] sm:$0xff] (!%p208_p2)   ;;  %vm297_vm0 = vcmask (!%p208_p2), 195584   ;;  %v1888_v1 = vld [vmem:[%s2251_s3] sm:$0xff] (!%p208_p2)   ;;  %s1918_s28 = smov (!%p208_p2), 108   ;;  %v1924_v10 = vmov (!%p208_p2), 0  }
   0x6   : > { %211 = sbr.rel (%p208_p2) target bundleno = 411 (0x19b), region = 40  ;;  %1754 = vmatprep.mubr.msk.bf16.mxu0 (!%p208_p2), %vm297_vm0, %v1886_v0  ;;  %1762 = vmatprep.mubr.msk.bf16.mxu1 (!%p208_p2), %vm297_vm0, %v1888_v1  ;;  %s1919_s29 = smov (!%p208_p2), 113   ;;  %v1213_v11 = vld [vmem:[%s2252_s4] sm:$0xff] (!%p208_p2)  ;;  %v1214_v12 = vld [vmem:[%s2252_s4 + $0x8] sm:$0xff] (!%p208_p2)  ;;  %v1216_v13 = vld [vmem:[%s2252_s4 + $0x18] sm:$0xff] (!%p208_p2)  ;;  %vm304_vm1 = vcmask (!%p208_p2), 1043456  }
   0x7   : > { %s1920_s30 = smov (!%p208_p2), 103   ;;  %s1921_s6 = smov (!%p208_p2), 123   ;;  %1877 = vset.pattern.permute.xlu1 (!%p208_p2), %v1924_v10  ;;  %1876 = vset.pattern.permute.xlu0 (!%p208_p2), %v1924_v10  ;;  %v1215_v14 = vld [vmem:[%s2252_s4 + $0x10] sm:$0xff] (!%p208_p2)  ;;  %v1218_v15 = vld [vmem:[%s2252_s4 + $0x28] sm:$0xff] (!%p208_p2)  ;;  %v1217_v16 = vld [vmem:[%s2252_s4 + $0x20] sm:$0xff] (!%p208_p2)  ;;  %vm1439_vm2 = vcmask (!%p208_p2), 322560  }
   0x8   : > { %s1922_s7 = smov (!%p208_p2), 93   ;;  %s1923_s8 = smov (!%p208_p2), 88   ;;  %v1220_v17 = vld [vmem:[%s2252_s4 + $0x38] sm:$0xff] (!%p208_p2)  ;;  %v1219_v18 = vld [vmem:[%s2252_s4 + $0x30] sm:$0xff] (!%p208_p2)  ;;  %v1222_v19 = vld [vmem:[%s2252_s4 + $0x48] sm:$0xff] (!%p208_p2) }
   0x9   : > { %v1221_v20 = vld [vmem:[%s2252_s4 + $0x40] sm:$0xff] (!%p208_p2)  ;;  %v1224_v21 = vld [vmem:[%s2252_s4 + $0x58] sm:$0xff] (!%p208_p2)  ;;  %v1223_v22 = vld [vmem:[%s2252_s4 + $0x50] sm:$0xff] (!%p208_p2) }
   0xa   : > { %v1226_v23 = vld [vmem:[%s2252_s4 + $0x68] sm:$0xff] (!%p208_p2)  ;;  %v1225_v24 = vld [vmem:[%s2252_s4 + $0x60] sm:$0xff] (!%p208_p2)  ;;  %v1227_v25 = vld [vmem:[%s2252_s4 + $0x70] sm:$0xff] (!%p208_p2) }
   0xb   : > { %v1887_v31 = vld [vmem:[%s2251_s3 + $0x14] ss:$0 sps:$4 sm:$0xff] (!%p208_p2)   ;;  %v1890_v33 = vld [vmem:[%s2251_s3 + $0x18] sm:$0xff] (!%p208_p2)   ;;  %v1889_v36 = vld [vmem:[%s2251_s3 + $0x8] ss:$0 sps:$4 sm:$0xff] (!%p208_p2)  }
   0xc   : > { %v1892_v37 = vld [vmem:[%s2251_s3 + $0x30] sm:$0xff] (!%p208_p2)   ;;  %v1891_v41 = vld [vmem:[%s2251_s3 + $0x20] ss:$0 sps:$4 sm:$0xff] (!%p208_p2)   ;;  %v1894_v43 = vld [vmem:[%s2251_s3 + $0x24] sm:$0xff] (!%p208_p2)  }
   0xd   : > { %s2255_s19 = smov (!%p245_p3, %s1534_s19), 1  ;;  %v1893_v46 = vld [vmem:[%s2251_s3 + $0x38] ss:$0 sps:$4 sm:$0xff]   ;;  %v1896_v47 = vld [vmem:[%s2251_s3 + $0x3c] sm:$0xff]   ;;  %v1895_v51 = vld [vmem:[%s2251_s3 + $0x2c] ss:$0 sps:$4 sm:$0xff]  }
   0xe   : > { %s1858_s22 = smul.u32 48, %s2255_s19  ;;  %v1898_v54 = vld [vmem:[%s2251_s3 + $0x54] sm:$0xff]   ;;  %v1897_v56 = vld [vmem:[%s2251_s3 + $0x44] ss:$0 sps:$4 sm:$0xff]   ;;  %v1900_v59 = vld [vmem:[%s2251_s3 + $0x48] sm:$0xff]  }
   0xf   : > { %v1899_v60 = vld [vmem:[%s2251_s3 + $0x5c] ss:$0 sps:$4 sm:$0xff]   ;;  %v1902_v0 = vld [vmem:[%s2251_s3 + $0x60] sm:$0xff]   ;;  %v1901_v1 = vld [vmem:[%s2251_s3 + $0x50] ss:$0 sps:$4 sm:$0xff]   ;;  %s1860_s14 = smul.u32 60, %s2255_s19 }
  0x10   : > { %s1976_s27 = scalar_lea.vmem %s2248_s0, %s1858_s22  ;;  %v1906_v10 = vld [vmem:[%s2251_s3 + $0x6c] sm:$0xff]   ;;  %s1859_s15 = smul.u32 12, %s2255_s19 }
  0x11   : > { %v1878_v2 = vld [vmem:[%s1976_s27] sm:$0xff]   ;;  %v1879_v3 = vld [vmem:[%s1976_s27 + $0x8] ss:$0 sps:$4 sm:$0xff]   ;;  %v1880_v4 = vld [vmem:[%s1976_s27 + $0xc] sm:$0xff]   ;;  %s2186_s23 = scalar_lea.vmem %s2250_s2, %s1860_s14  ;;  %s2195_s25 = scalar_lea.vmem %s2253_s5, %s1860_s14 }
  0x12   : > { %292 = vrot.lane.b32.xlu0 %v1878_v2, %s1918_s28  ;;  %294 = vrot.lane.b32.xlu1 %v1879_v3, %s1918_s28  ;;  %v1881_v5 = vld [vmem:[%s1976_s27 + $0x14] ss:$0 sps:$4 sm:$0xff]   ;;  %v1984_v6 = vld [vmem:[%s1976_s27 + $0x18] sm:$0xff]   ;;  %s254_s20 = scalar_lea.vmem %s2249_s1, %s1859_s15 }
  0x13   : > { %v1987_v7 = vld [vmem:[%s1976_s27 + $0x20] ss:$0 sps:$4 sm:$0xff]   ;;  %v1884_v8 = vld [vmem:[%s1976_s27 + $0x24] sm:$0xff]   ;;  %v1885_v9 = vld [vmem:[%s1976_s27 + $0x2c] ss:$0 sps:$4 sm:$0xff]  }
  0x14   : > { %v844_v62 = vsel %vm304_vm1, %v1987_v7, 0 }
  0x16   : > { %364 = vrot.lane.b32.xlu0 %v1878_v2, %s1919_s29  ;;  %366 = vrot.lane.b32.xlu1 %v1879_v3, %s1919_s29 }
  0x1a   : > { %438 = vrot.lane.b32.xlu0 %v1878_v2, %s1920_s30  ;;  %530 = vrot.lane.b32.xlu1 %v1880_v4, %s1918_s28 }
  0x1e   : > { %440 = vrot.lane.b32.xlu0 %v1879_v3, %s1920_s30  ;;  %532 = vrot.lane.b32.xlu1 %v1881_v5, %s1918_s28 }
  0x22   : > { %600 = vrot.lane.b32.xlu0 %v1880_v4, %s1921_s6  ;;  %674 = vrot.lane.b32.xlu1 %v1880_v4, %s1922_s7 }
  0x26   : > { %602 = vrot.lane.b32.xlu0 %v1881_v5, %s1921_s6  ;;  %676 = vrot.lane.b32.xlu1 %v1881_v5, %s1922_s7  ;;  %v1904_v5 = vld [vmem:[%s2251_s3 + $0x78] sm:$0xff]  }
  0x2a   : > { %766 = vrot.lane.b32.xlu0 %v1984_v6, %s1918_s28  ;;  %768 = vrot.lane.b32.xlu1 %v1987_v7, %s1918_s28 }
  0x2e   : > { %906 = vrot.lane.b32.xlu0 %v1984_v6, %s1923_s8  ;;  %998 = vrot.lane.b32.xlu1 %v1884_v8, %s1918_s28 }
  0x32   : > { %908 = vrot.lane.b32.xlu0 %v1987_v7, %s1923_s8  ;;  %1000 = vrot.lane.b32.xlu1 %v1885_v9, %s1918_s28 }
  0x36   : > { %1068 = vrot.lane.b32.xlu0 %v1884_v8, %s1919_s29  ;;  %1142 = vrot.lane.b32.xlu1 %v1884_v8, %s1920_s30 }
  0x3a   : > { %1070 = vrot.lane.b32.xlu0 %v1885_v9, %s1919_s29  ;;  %1144 = vrot.lane.b32.xlu1 %v1885_v9, %s1920_s30 }
  0x3e   : > { %1230 = vperm.xlu0 %1876, %v1213_v11   ;;  %1235 = vperm.xlu1 %1877, %v1214_v12   ;;  %v1905_v11 = vld [vmem:[%s2251_s3 + $0x80] ss:$0 sps:$4 sm:$0xff]  }
  0x42   : > { %1245 = vperm.xlu0 %1876, %v1216_v13   ;;  %1240 = vperm.xlu1 %1877, %v1215_v14   ;;  %v1908_v13 = vld [vmem:[%s2251_s3 + $0x84] sm:$0xff]  }
  0x46   : > { %1255 = vperm.xlu0 %1876, %v1218_v15   ;;  %1250 = vperm.xlu1 %1877, %v1217_v16   ;;  %v1907_v15 = vld [vmem:[%s2251_s3 + $0x74] ss:$0 sps:$4 sm:$0xff]  }
  0x4a   : > { %1265 = vperm.xlu0 %1876, %v1220_v17   ;;  %1260 = vperm.xlu1 %1877, %v1219_v18   ;;  %v1909_v17 = vld [vmem:[%s2251_s3 + $0x8c] ss:$0 sps:$4 sm:$0xff]  }
  0x4e   : > { %1275 = vperm.xlu0 %1876, %v1222_v19   ;;  %1270 = vperm.xlu1 %1877, %v1221_v20  }
  0x52   : > { %1285 = vperm.xlu0 %1876, %v1224_v21   ;;  %1280 = vperm.xlu1 %1877, %v1223_v22  }
  0x56   : > { %1295 = vperm.xlu0 %1876, %v1226_v23   ;;  %1290 = vperm.xlu1 %1877, %v1225_v24  }
  0x5a   : > { %1300 = vperm.xlu1 %1877, %v1227_v25  }
  0x84   : > { %v293_v26 = vpop.permute.xlu0 %292  ;;  %v295_v27 = vpop.permute.xlu1 %294 }
  0x85   : > { %1750 = vmatprep.subr.bf16.mxu0 %v293_v26  ;;  %v306_v28 = vsel %vm304_vm1, %v295_v27, 0 }
  0x86   : > { %1751 = vmatpush3.bf16.msra.mxu0 %v293_v26 }
  0x87   : > { %1846 = vmatprep.subr.msk.bf16.mxu0 %vm304_vm1, %v295_v27 }
  0x88   : > { %v365_v29 = vpop.permute.xlu0 %364  ;;  %v367_v30 = vpop.permute.xlu1 %366 }
  0x89   : > { %1758 = vmatprep.subr.bf16.mxu1 %v365_v29  ;;  %v376_v32 = vsel %vm304_vm1, %v367_v30, 0 }
  0x8a   : > { %1753 = vmatpush3.bf16.msra.mxu0 %v306_v28  ;;  %1759 = vmatpush3.bf16.msra.mxu1 %v365_v29 }
  0x8b   : > { %1847 = vmatprep.subr.msk.bf16.mxu1 %vm304_vm1, %v367_v30  ;;  %v1665_v30 = vld [vmem:[%s254_s20] sm:$0xff]  }
  0x8c   : > { %v439_v34 = vpop.permute.xlu0 %438  ;;  %v531_v35 = vpop.permute.xlu1 %530 }
  0x8d   : > { %1755 = vmatmul.mubr.msk.bf16.vlgmr.msra.gmra.mrb[0].mxu0 %vm297_vm0, %v1887_v31  ;;  %1766 = vmatprep.subr.bf16.mxu0 %v439_v34  ;;  %v1209_v31 = vld [vmem:[%s254_s20 + $0x8] sm:$0xf] }
  0x8e   : > { %1761 = vmatpush3.bf16.msra.mxu1 %v376_v32  ;;  %1767 = vmatpush3.bf16.msra.mxu0 %v439_v34  ;;  %v1666_v32 = vunpack.c.l.bf16 %v1665_v30  ;;  %v1701_v34 = vld [vmem:[%s2186_s23 + $0x30] sm:$0xff]  }
  0x8f   : > { %1774 = vmatprep.subr.bf16.mxu1 %v531_v35  ;;  %1770 = vmatprep.mubr.msk.bf16.mxu0 %vm297_vm0, %v1890_v33  ;;  %v1212_v33 = vunpack.c.l.bf16 %v1209_v31 }
  0x90   : > { %v441_v38 = vpop.permute.xlu0 %440  ;;  %v533_v40 = vpop.permute.xlu1 %532 }
  0x91   : > { %v450_v39 = vsel %vm304_vm1, %v441_v38, 0  ;;  %1763 = vmatmul.mubr.msk.bf16.vlgmr.msra.gmra.mrb[0].mxu1 %vm297_vm0, %v1889_v36  ;;  %1848 = vmatprep.subr.msk.bf16.mxu0 %vm304_vm1, %v441_v38  ;;  %v542_v42 = vsel %vm304_vm1, %v533_v40, 0  ;;  %v1694_v38 = vunpack.c.l.bf16 %v1701_v34 }
  0x92   : > { %1769 = vmatpush3.bf16.msra.mxu0 %v450_v39  ;;  %1775 = vmatpush3.bf16.msra.mxu1 %v531_v35  ;;  %v1332_v35 = vld [vmem:[%s2186_s23 + $0x38] sm:$0xf] }
  0x93   : > { %1849 = vmatprep.subr.msk.bf16.mxu1 %vm304_vm1, %v533_v40  ;;  %1778 = vmatprep.mubr.msk.bf16.mxu1 %vm297_vm0, %v1892_v37  ;;  %v1347_v40 = vunpack.c.l.bf16 %v1332_v35 }
  0x94   : > { %v601_v44 = vpop.permute.xlu0 %600  ;;  %v675_v45 = vpop.permute.xlu1 %674 }
  0x95   : > { %1771 = vmatmul.mubr.msk.bf16.vlgmr.msra.gmra.mrb[4].mxu0 %vm297_vm0, %v1891_v41  ;;  %1782 = vmatprep.subr.bf16.mxu0 %v601_v44 }
  0x96   : > { %1777 = vmatpush3.bf16.msra.mxu1 %v542_v42  ;;  %1783 = vmatpush3.bf16.msra.mxu0 %v601_v44  ;;  %v1667_v44 = vunpack.c.h.bf16 %v1665_v30 }
  0x97   : > { %1790 = vmatprep.subr.bf16.mxu1 %v675_v45  ;;  %1786 = vmatprep.mubr.msk.bf16.mxu0 %vm297_vm0, %v1894_v43 }
  0x98   : > { %v603_v48 = vpop.permute.xlu0 %602  ;;  %v677_v50 = vpop.permute.xlu1 %676 }
  0x99   : > { %v612_v49 = vsel %vm304_vm1, %v603_v48, 0  ;;  %1779 = vmatmul.mubr.msk.bf16.vlgmr.msra.gmra.mrb[4].mxu1 %vm297_vm0, %v1893_v46  ;;  %1850 = vmatprep.subr.msk.bf16.mxu0 %vm304_vm1, %v603_v48  ;;  %v686_v52 = vsel %vm304_vm1, %v677_v50, 0  ;;  %v1695_v48 = vunpack.c.h.bf16 %v1701_v34 }
  0x9a   : > { %1785 = vmatpush3.bf16.msra.mxu0 %v612_v49  ;;  %1791 = vmatpush3.bf16.msra.mxu1 %v675_v45 }
  0x9b   : > { %1851 = vmatprep.subr.msk.bf16.mxu1 %vm304_vm1, %v677_v50  ;;  %1794 = vmatprep.mubr.msk.bf16.mxu1 %vm297_vm0, %v1896_v47 }
  0x9c   : > { %v767_v53 = vpop.permute.xlu0 %766  ;;  %v769_v55 = vpop.permute.xlu1 %768 }
  0x9d   : > { %1787 = vmatmul.mubr.msk.bf16.vlgmr.msra.gmra.mrb[8].mxu0 %vm297_vm0, %v1895_v51  ;;  %1798 = vmatprep.subr.bf16.mxu0 %v767_v53  ;;  %v778_v57 = vsel %vm304_vm1, %v769_v55, 0 }
  0x9e   : > { %1793 = vmatpush3.bf16.msra.mxu1 %v686_v52  ;;  %1799 = vmatpush3.bf16.msra.mxu0 %v767_v53 }
  0x9f   : > { %1852 = vmatprep.subr.msk.bf16.mxu0 %vm304_vm1, %v769_v55  ;;  %1806 = vmatprep.subr.bf16.mxu1 %v1984_v6 }
  0xa0   : > { %1802 = vmatprep.mubr.msk.bf16.mxu0 %vm297_vm0, %v1898_v54  ;;  %v907_v58 = vpop.permute.xlu0 %906  ;;  %v999_v61 = vpop.permute.xlu1 %998 }
  0xa1   : > { %1795 = vmatmul.mubr.msk.bf16.vlgmr.msra.gmra.mrb[8].mxu1 %vm297_vm0, %v1897_v56 }
  0xa2   : > { %1801 = vmatpush3.bf16.msra.mxu0 %v778_v57  ;;  %1807 = vmatpush3.bf16.msra.mxu1 %v1984_v6  ;;  %v1903_v6 = vld [vmem:[%s2251_s3 + $0x68] ss:$0 sps:$4 sm:$0xff]  }
  0xa3   : > { %1853 = vmatprep.subr.msk.bf16.mxu1 %vm304_vm1, %v1987_v7  ;;  %1814 = vmatprep.subr.bf16.mxu0 %v907_v58 }
  0xa4   : > { %1810 = vmatprep.mubr.msk.bf16.mxu1 %vm297_vm0, %v1900_v59  ;;  %v909_v63 = vpop.permute.xlu0 %908  ;;  %v1001_v2 = vpop.permute.xlu1 %1000 }
  0xa5   : > { %1803 = vmatmul.mubr.msk.bf16.vlgmr.msra.gmra.mrb[12].mxu0 %vm297_vm0, %v1899_v60  ;;  %v918_v3 = vsel %vm304_vm1, %v909_v63, 0  ;;  %v1010_v8 = vsel %vm304_vm1, %v1001_v2, 0 }
  0xa6   : > { %1809 = vmatpush3.bf16.msra.mxu1 %v844_v62  ;;  %1815 = vmatpush3.bf16.msra.mxu0 %v907_v58 }
  0xa7   : > { %1854 = vmatprep.subr.msk.bf16.mxu0 %vm304_vm1, %v909_v63  ;;  %1822 = vmatprep.subr.bf16.mxu1 %v999_v61 }
  0xa8   : > { %1818 = vmatprep.mubr.msk.bf16.mxu0 %vm297_vm0, %v1902_v0  ;;  %v1069_v4 = vpop.permute.xlu0 %1068  ;;  %v1143_v7 = vpop.permute.xlu1 %1142  ;;  %v1696_v0 = vld [vmem:[%s2186_s23 + $0x8] sm:$0xff]  }
  0xa9   : > { %1811 = vmatmul.mubr.msk.bf16.vlgmr.msra.gmra.mrb[12].mxu1 %vm297_vm0, %v1901_v1 }
  0xaa   : > { %1817 = vmatpush3.bf16.msra.mxu0 %v918_v3  ;;  %1823 = vmatpush3.bf16.msra.mxu1 %v999_v61 }
  0xab   : > { %1855 = vmatprep.subr.msk.bf16.mxu1 %vm304_vm1, %v1001_v2  ;;  %1830 = vmatprep.subr.bf16.mxu0 %v1069_v4  ;;  %v1669_v2 = vld [vmem:[%s2186_s23] sm:$0xff]  }
  0xac   : > { %1826 = vmatprep.mubr.msk.bf16.mxu1 %vm297_vm0, %v1904_v5  ;;  %v1071_v9 = vpop.permute.xlu0 %1070  ;;  %v1145_v14 = vpop.permute.xlu1 %1144 }
  0xad   : > { %1819 = vmatmul.mubr.msk.bf16.vlgmr.msra.gmra.mrb[16].mxu0 %vm297_vm0, %v1903_v6  ;;  %v1080_v12 = vsel %vm304_vm1, %v1071_v9, 0  ;;  %v1154_v16 = vsel %vm304_vm1, %v1145_v14, 0  ;;  %v1674_v6 = vunpack.c.l.bf16 %v1696_v0 }
  0xae   : > { %1825 = vmatpush3.bf16.msra.mxu1 %v1010_v8  ;;  %1831 = vmatpush3.bf16.msra.mxu0 %v1069_v4 }
  0xaf   : > { %1856 = vmatprep.subr.msk.bf16.mxu0 %vm304_vm1, %v1071_v9  ;;  %1838 = vmatprep.subr.bf16.mxu1 %v1143_v7  ;;  %v1670_v9 = vunpack.c.l.bf16 %v1669_v2 }
  0xb0   : > { %1834 = vmatprep.mubr.msk.bf16.mxu0 %vm297_vm0, %v1906_v10 }
  0xb1   : > { %1827 = vmatmul.mubr.msk.bf16.vlgmr.msra.gmra.mrb[16].mxu1 %vm297_vm0, %v1905_v11 }
  0xb2   : > { %1833 = vmatpush3.bf16.msra.mxu0 %v1080_v12  ;;  %1839 = vmatpush3.bf16.msra.mxu1 %v1143_v7 }
  0xb3   : > { %1857 = vmatprep.subr.msk.bf16.mxu1 %vm304_vm1, %v1145_v14  ;;  %1842 = vmatprep.mubr.msk.bf16.mxu1 %vm297_vm0, %v1908_v13 }
  0xb5   : > { %1835 = vmatmul.mubr.msk.bf16.vlgmr.msra.gmra.mrb[20].mxu0 %vm297_vm0, %v1907_v15  ;;  %v1671_v15 = vunpack.c.h.bf16 %v1669_v2 }
  0xb6   : > { %1841 = vmatpush3.bf16.msra.mxu1 %v1154_v16 }
  0xb9   : > { %1843 = vmatmul.mubr.msk.bf16.vlgmr.msra.gmra.mrb[20].mxu1 %vm297_vm0, %v1909_v17 }
  0xbd   : > { %v2156_v18 = vpop.permute.xlu1 %1235  ;;  %v2162_v21 = vpop.permute.xlu0 %1230 }
  0xc1   : > { %v2158_v19 = vpop.permute.xlu1 %1240  ;;  %v2166_v23 = vpop.permute.xlu0 %1245 }
  0xc5   : > { %v2160_v20 = vpop.permute.xlu1 %1250  ;;  %v2170_v25 = vpop.permute.xlu0 %1255 }
  0xc9   : > { %v2164_v22 = vpop.permute.xlu1 %1260  ;;  %v2174_v27 = vpop.permute.xlu0 %1265 }
  0xcd   : > { %v2168_v24 = vpop.permute.xlu1 %1270  ;;  %v2178_v29 = vpop.permute.xlu0 %1275 }
  0xd1   : > { %v2172_v26 = vpop.permute.xlu1 %1280  ;;  %v2190_v37 = vpop.permute.xlu0 %1285 }
  0xd5   : > { %v1291_v28 = vpop.permute.xlu1 %1290  ;;  %v1296_v45 = vpop.permute.xlu0 %1295 }
  0xd6   : > { %v1315_v39 = vadd.f32 %v1666_v32, %v1291_v28  ;;  %v1316_v49 = vadd.f32 %v1667_v44, %v1296_v45  ;;  %v1697_v44 = vld [vmem:[%s2186_s23 + $0x10] sm:$0xff]  }
  0xd8   : > { %v1360_v42 = vadd.f32 %v1694_v38, %v1315_v39  ;;  %v1361_v52 = vadd.f32 %v1695_v48, %v1316_v49  ;;  %v1679_v49 = vunpack.c.h.bf16 %v1697_v44 }
  0xd9   : > { %v1301_v36 = vpop.permute.xlu1 %1300 }
  0xda   : > { %v1317_v41 = vadd.f32 %v1301_v36, %v1212_v33  ;;  %v1375_v46 = vmax.f32 %v1360_v42, 0.0  ;;  %v1376_v53 = vmax.f32 %v1361_v52, 0.0  ;;  %v1675_v52 = vunpack.c.h.bf16 %v1696_v0 }
  0xdc   : > { %v1362_v43 = vadd.f32 %v1347_v40, %v1317_v41  ;;  %v1661_v50 = vpack.c.bf16 %v1375_v46, %v1375_v46  ;;  %v1662_v54 = vpack.c.bf16 %v1376_v53, %v1376_v53 }
  0xde   : > { %v1377_v47 = vmax.f32 %v1362_v43, 0.0  ;;  %1452 = vst.msk [vmem:[%s2195_s25 + $0x30] sm:$0xf] %vm1439_vm2, %v1661_v50  ;;  %1453 = vst.msk [vmem:[%s2195_s25 + $0x34] sm:$0xf] %vm1439_vm2, %v1662_v54 }
  0xe0   : > { %v1663_v51 = vpack.c.bf16 %v1377_v47, %v1377_v47 }
  0xe2   : > { %1454 = vst.msk [vmem:[%s2195_s25 + $0x38] sm:$0xf] %vm1439_vm2, %v1663_v51 }
 0x160   : > { %v1756_v55 = vpop.f32.mrb[0].mxu0 }
 0x161   : > { %v342_v56 = vpop.f32.mrb[1].mxu0 }
 0x162   : > { %v1757_v57 = vpop.f32.mrb[2].mxu0 }
 0x163   : > { %v345_v58 = vpop.f32.mrb[3].mxu0 }
 0x164   : > { %v1764_v59 = vpop.f32.mrb[0].mxu1 }
 0x165   : > { %v421_v60 = vadd.f32 %v1764_v59, %v1756_v55  ;;  %v412_v61 = vpop.f32.mrb[1].mxu1 }
 0x166   : > { %v413_v62 = vadd.f32 %v412_v61, %v342_v56  ;;  %v1765_v63 = vpop.f32.mrb[2].mxu1 }
 0x167   : > { %v415_v1 = vpop.f32.mrb[3].mxu1 }
 0x168   : > { %v416_v3 = vadd.f32 %v415_v1, %v345_v58  ;;  %v1772_v4 = vpop.f32.mrb[4].mxu0  ;;  %v1678_v58 = vunpack.c.l.bf16 %v1697_v44 }
 0x169   : > { %v502_v5 = vadd.f32 %v1772_v4, %v421_v60  ;;  %v486_v7 = vpop.f32.mrb[5].mxu0 }
 0x16a   : > { %v500_v8 = vadd.f32 %v486_v7, %v413_v62  ;;  %v1773_v10 = vpop.f32.mrb[6].mxu0 }
 0x16b   : > { %v1305_v11 = vadd.f32 %v2158_v19, %v502_v5  ;;  %v489_v12 = vpop.f32.mrb[7].mxu0 }
 0x16c   : > { %v1303_v13 = vadd.f32 %v2162_v21, %v500_v8  ;;  %v501_v14 = vadd.f32 %v489_v12, %v416_v3  ;;  %v1780_v16 = vpop.f32.mrb[4].mxu1  ;;  %v1698_v12 = vld [vmem:[%s2186_s23 + $0x18] sm:$0xff]  }
 0x16d   : > { %v1350_v17 = vadd.f32 %v1674_v6, %v1305_v11  ;;  %v578_v28 = vpop.f32.mrb[5].mxu1  ;;  %v1699_v11 = vld [vmem:[%s2186_s23 + $0x20] sm:$0xff]  }
 0x16e   : > { %v1348_v30 = vadd.f32 %v1670_v9, %v1303_v13  ;;  %v1304_v31 = vadd.f32 %v2156_v18, %v501_v14  ;;  %v1781_v32 = vpop.f32.mrb[6].mxu1 }
 0x16f   : > { %v1365_v33 = vmax.f32 %v1350_v17, 0.0  ;;  %v581_v34 = vpop.f32.mrb[7].mxu1  ;;  %v1686_v17 = vunpack.c.l.bf16 %v1699_v11 }
 0x170   : > { %v1363_v35 = vmax.f32 %v1348_v30, 0.0  ;;  %v1349_v36 = vadd.f32 %v1671_v15, %v1304_v31  ;;  %v1788_v19 = vpop.f32.mrb[8].mxu0  ;;  %v1682_v31 = vunpack.c.l.bf16 %v1698_v12 }
 0x171   : > { %v1651_v38 = vpack.c.bf16 %v1365_v33, %v1365_v33  ;;  %v657_v39 = vadd.f32 %v1788_v19, %v1780_v16  ;;  %v648_v21 = vpop.f32.mrb[9].mxu0  ;;  %v1683_v19 = vunpack.c.h.bf16 %v1698_v12 }
 0x172   : > { %v1649_v40 = vpack.c.bf16 %v1363_v35, %v1363_v35  ;;  %v1364_v41 = vmax.f32 %v1349_v36, 0.0  ;;  %v649_v42 = vadd.f32 %v648_v21, %v578_v28  ;;  %v1789_v43 = vpop.f32.mrb[10].mxu0 }
 0x173   : > { %1442 = vst.msk [vmem:[%s2195_s25 + $0x8] sm:$0xf] %vm1439_vm2, %v1651_v38  ;;  %v651_v45 = vpop.f32.mrb[11].mxu0 }
 0x174   : > { %1440 = vst.msk [vmem:[%s2195_s25] sm:$0xf] %vm1439_vm2, %v1649_v40  ;;  %v1650_v18 = vpack.c.bf16 %v1364_v41, %v1364_v41  ;;  %v652_v46 = vadd.f32 %v651_v45, %v581_v34  ;;  %v1796_v47 = vpop.f32.mrb[8].mxu1 }
 0x175   : > { %v738_v48 = vadd.f32 %v1796_v47, %v657_v39  ;;  %v722_v50 = vpop.f32.mrb[9].mxu1 }
 0x176   : > { %1441 = vst.msk [vmem:[%s2195_s25 + $0x4] sm:$0xf] %vm1439_vm2, %v1650_v18  ;;  %v736_v51 = vadd.f32 %v722_v50, %v649_v42  ;;  %v1797_v53 = vpop.f32.mrb[10].mxu1 }
 0x177   : > { %v1308_v54 = vadd.f32 %v2170_v25, %v738_v48  ;;  %v725_v55 = vpop.f32.mrb[11].mxu1 }
 0x178   : > { %v1306_v56 = vadd.f32 %v2166_v23, %v736_v51  ;;  %v737_v57 = vadd.f32 %v725_v55, %v652_v46  ;;  %v1804_v59 = vpop.f32.mrb[12].mxu0 }
 0x179   : > { %v1353_v60 = vadd.f32 %v1679_v49, %v1308_v54  ;;  %v814_v61 = vpop.f32.mrb[13].mxu0 }
 0x17a   : > { %v1351_v62 = vadd.f32 %v1675_v52, %v1306_v56  ;;  %v1307_v63 = vadd.f32 %v2160_v20, %v737_v57  ;;  %v1805_v1 = vpop.f32.mrb[14].mxu0  ;;  %v1700_v52 = vld [vmem:[%s2186_s23 + $0x28] sm:$0xff]  }
 0x17b   : > { %v1368_v2 = vmax.f32 %v1353_v60, 0.0  ;;  %v817_v0 = vpop.f32.mrb[15].mxu0  ;;  %v1691_v57 = vunpack.c.h.bf16 %v1700_v52  ;;  %v1687_v60 = vunpack.c.h.bf16 %v1699_v11 }
 0x17c   : > { %v1366_v3 = vmax.f32 %v1351_v62, 0.0  ;;  %v1352_v25 = vadd.f32 %v1678_v58, %v1307_v63  ;;  %v1812_v4 = vpop.f32.mrb[12].mxu1 }
 0x17d   : > { %v1654_v5 = vpack.c.bf16 %v1368_v2, %v1368_v2  ;;  %v889_v23 = vadd.f32 %v1812_v4, %v1804_v59  ;;  %v880_v6 = vpop.f32.mrb[13].mxu1 }
 0x17e   : > { %v1652_v7 = vpack.c.bf16 %v1366_v3, %v1366_v3  ;;  %v1367_v8 = vmax.f32 %v1352_v25, 0.0  ;;  %v881_v9 = vadd.f32 %v880_v6, %v814_v61  ;;  %v1813_v10 = vpop.f32.mrb[14].mxu1 }
 0x17f   : > { %1445 = vst.msk [vmem:[%s2195_s25 + $0x14] sm:$0xf] %vm1439_vm2, %v1654_v5  ;;  %v883_v20 = vpop.f32.mrb[15].mxu1 }
 0x180   : > { %1443 = vst.msk [vmem:[%s2195_s25 + $0xc] sm:$0xf] %vm1439_vm2, %v1652_v7  ;;  %v1653_v13 = vpack.c.bf16 %v1367_v8, %v1367_v8  ;;  %v884_v14 = vadd.f32 %v883_v20, %v817_v0  ;;  %v1820_v15 = vpop.f32.mrb[16].mxu0  ;;  %v1690_v0 = vunpack.c.l.bf16 %v1700_v52 }
 0x181   : > { %v970_v16 = vadd.f32 %v1820_v15, %v889_v23  ;;  %v954_v28 = vpop.f32.mrb[17].mxu0 }
 0x182   : > { %1444 = vst.msk [vmem:[%s2195_s25 + $0x10] sm:$0xf] %vm1439_vm2, %v1653_v13  ;;  %v968_v30 = vadd.f32 %v954_v28, %v881_v9  ;;  %v1821_v32 = vpop.f32.mrb[18].mxu0 }
 0x183   : > { %v1311_v33 = vadd.f32 %v2168_v24, %v970_v16  ;;  %v957_v34 = vpop.f32.mrb[19].mxu0 }
 0x184   : > { %v1309_v35 = vadd.f32 %v2164_v22, %v968_v30  ;;  %v969_v36 = vadd.f32 %v957_v34, %v884_v14  ;;  %v1828_v38 = vpop.f32.mrb[16].mxu1 }
 0x185   : > { %v1356_v39 = vadd.f32 %v1686_v17, %v1311_v33  ;;  %v1046_v21 = vpop.f32.mrb[17].mxu1 }
 0x186   : > { %v1354_v40 = vadd.f32 %v1682_v31, %v1309_v35  ;;  %v1310_v41 = vadd.f32 %v2174_v27, %v969_v36  ;;  %v1829_v42 = vpop.f32.mrb[18].mxu1 }
 0x187   : > { %v1371_v43 = vmax.f32 %v1356_v39, 0.0  ;;  %v1049_v44 = vpop.f32.mrb[19].mxu1 }
 0x188   : > { %v1369_v45 = vmax.f32 %v1354_v40, 0.0  ;;  %v1355_v18 = vadd.f32 %v1683_v19, %v1310_v41  ;;  %v1836_v24 = vpop.f32.mrb[20].mxu0 }
 0x189   : > { %v1657_v46 = vpack.c.bf16 %v1371_v43, %v1371_v43  ;;  %v1125_v47 = vadd.f32 %v1836_v24, %v1828_v38  ;;  %v1116_v22 = vpop.f32.mrb[21].mxu0 }
 0x18a   : > { %v1655_v48 = vpack.c.bf16 %v1369_v45, %v1369_v45  ;;  %v1370_v49 = vmax.f32 %v1355_v18, 0.0  ;;  %v1117_v50 = vadd.f32 %v1116_v22, %v1046_v21  ;;  %v1837_v51 = vpop.f32.mrb[22].mxu0 }
 0x18b   : > { %1448 = vst.msk [vmem:[%s2195_s25 + $0x20] sm:$0xf] %vm1439_vm2, %v1657_v46  ;;  %v1119_v53 = vpop.f32.mrb[23].mxu0 }
 0x18c   : > { %1446 = vst.msk [vmem:[%s2195_s25 + $0x18] sm:$0xf] %vm1439_vm2, %v1655_v48  ;;  %v1656_v27 = vpack.c.bf16 %v1370_v49, %v1370_v49  ;;  %v1120_v54 = vadd.f32 %v1119_v53, %v1049_v44  ;;  %v1844_v55 = vpop.f32.mrb[20].mxu1 }
 0x18d   : > { %v1206_v56 = vadd.f32 %v1844_v55, %v1125_v47  ;;  %v1190_v58 = vpop.f32.mrb[21].mxu1 }
 0x18e   : > { %1447 = vst.msk [vmem:[%s2195_s25 + $0x1c] sm:$0xf] %vm1439_vm2, %v1656_v27  ;;  %v1204_v59 = vadd.f32 %v1190_v58, %v1117_v50  ;;  %v1845_v61 = vpop.f32.mrb[22].mxu1 }
 0x18f   : > { %v1314_v62 = vadd.f32 %v2190_v37, %v1206_v56  ;;  %v1193_v63 = vpop.f32.mrb[23].mxu1 }
 0x190   : > { %v1312_v1 = vadd.f32 %v2178_v29, %v1204_v59  ;;  %v1205_v2 = vadd.f32 %v1193_v63, %v1120_v54 }
 0x191   : > { %v1359_v3 = vadd.f32 %v1691_v57, %v1314_v62 }
 0x192   : > { %v1357_v25 = vadd.f32 %v1687_v60, %v1312_v1  ;;  %v1313_v4 = vadd.f32 %v2172_v26, %v1205_v2 }
 0x193   : > { %v1374_v5 = vmax.f32 %v1359_v3, 0.0 }
 0x194   : > { %v1372_v23 = vmax.f32 %v1357_v25, 0.0  ;;  %v1358_v6 = vadd.f32 %v1690_v0, %v1313_v4 }
 0x195   : > { %v1660_v7 = vpack.c.bf16 %v1374_v5, %v1374_v5 }
 0x196   : > { %v1658_v8 = vpack.c.bf16 %v1372_v23, %v1372_v23  ;;  %v1373_v9 = vmax.f32 %v1358_v6, 0.0 }
 0x197   : > { %1451 = vst.msk [vmem:[%s2195_s25 + $0x2c] sm:$0xf] %vm1439_vm2, %v1660_v7 }
 0x198   : > { %1449 = vst.msk [vmem:[%s2195_s25 + $0x24] sm:$0xf] %vm1439_vm2, %v1658_v8  ;;  %v1659_v37 = vpack.c.bf16 %v1373_v9, %v1373_v9 }
 0x19a   : > { %1450 = vst.msk [vmem:[%s2195_s25 + $0x28] sm:$0xf] %vm1439_vm2, %v1659_v37 }
 0x19b PF: > { %s15_s18 = sadd.s32 1, %s1916_s18  }
 0x19c   : > { %p12_p4 = scmp.ge.s32.totalorder %s15_s18, 4  }
 0x19e   :  { %14 = sbr.rel (!%p12_p4) target bundleno = 1 (0x1), region = 87 }

// kernel: msg3d_forward.43
= control target key start
LH: loop header
LB: loop body
LE: loop exit
PB: predicated region body
PF: predicated region fallthrough
CT: control target
= control target key end

     0   :  { %s1102_s12 = smov 0   ;;  %s1104_s13 = smov 0   ;;  %s1223_s0 = inlined_call_operand.vmem [shape: bf16[2,600,8], index: 0, kind: input, shape index: {}]   ;;  %s1224_s1 = inlined_call_operand.vmem [shape: bf16[32,600], index: 1, kind: input, shape index: {}]   ;;  %s1225_s2 = inlined_call_operand.vmem [shape: f32[32,1], index: 2, kind: input, shape index: {}]   ;;  %s1226_s3 = inlined_call_operand.vmem [shape: f32[2,32,8], index: 3, kind: output, shape index: {}]  }
   0x1   :  { %s1106_s14 = smov 0  }
   0x2 LB: > { %s25_s15 = sadd.s32 1, %s1075_s13  ;;  %p839_p0 = scmp.ge.s32.totalorder %s1079_s14, 1  ;;  %s1079_s14 = sphi %s1106_s14, %s13_s14   ;;  %s1075_s13 = sphi %s1104_s13, %s1228_s13   ;;  %s1071_s12 = sphi %s1102_s12, %s1227_s12  }
   0x3   : > { %p27_p1 = scmp.ge.s32.totalorder %s25_s15, 2  ;;  %p156_p2 = scmp.lt.s32.totalorder %s1079_s14, 3 }
   0x5   : > { %s1230_s15 = smov (%p27_p1, %s25_s15), 0  ;;  %p157_p3 = pnand %p839_p0, %p156_p2 }
   0x6   : > { %p186_p4 = scmp.lt.s32.totalorder (!%p157_p3), %s1071_s12, 1  ;;  %v1038_v0 = vld [vmem:[%s1224_s1 + $0x4] ss:$20 sps:$4 sm:$0xff] (!%p157_p3)   ;;  %v1043_v1 = vld [vmem:[%s1224_s1 + $0xc] ss:$20 sps:$4 sm:$0xff] (!%p157_p3)   ;;  %v1081_v2 = vmov (!%p157_p3), 0  }
   0x7   : > { %160 = sbr.rel (%p157_p3) target bundleno = 293 (0x125), region = 32  ;;  %1003 = vset.pattern.permute.xlu0 (!%p157_p3), %v1081_v2  ;;  %1004 = vset.pattern.permute.xlu1 (!%p157_p3), %v1081_v2  ;;  %v1036_v32 = vld [vmem:[%s1224_s1] ss:$20 sps:$4 sm:$0xff] (!%p157_p3)   ;;  %v1041_v36 = vld [vmem:[%s1224_s1 + $0x8] ss:$20 sps:$4 sm:$0xff] (!%p157_p3)   ;;  %vm589_vm0 = vcmask (!%p157_p3), 719872  }
   0x8   : > { %632 = vmatprep.mubr.bf16.mxu0 (!%p157_p3), %v1038_v0  ;;  %681 = vmatprep.mubr.bf16.mxu1 (!%p157_p3), %v1043_v1  ;;  %v1046_v34 = vld [vmem:[%s1224_s1 + $0x2c] ss:$20 sps:$4 sm:$0xff] (!%p157_p3)   ;;  %v1050_v38 = vld [vmem:[%s1224_s1 + $0x34] ss:$20 sps:$4 sm:$0xff] (!%p157_p3)   ;;  %v1055_v45 = vld [vmem:[%s1224_s1 + $0x10] ss:$20 sps:$4 sm:$0xff] (!%p157_p3)  }
   0x9   : > { %v1049_v42 = vld [vmem:[%s1224_s1 + $0x28] ss:$20 sps:$4 sm:$0xff] (!%p157_p3)   ;;  %v290_v43 = vld [vmem:[%s1225_s2] sm:$0xff] (!%p157_p3)  ;;  %v292_v44 = vld [vmem:[%s1225_s2 + $0x10] sm:$0xff] (!%p157_p3)  ;;  %vm596_vm1 = vcmask (!%p157_p3), 1043456   ;;  %vm747_vm2 = vcmask (!%p157_p3), 64512  }
   0xa   : > { %296 = vperm.xlu0 (!%p157_p3), %1003, %v290_v43   ;;  %v1052_v47 = vld [vmem:[%s1224_s1 + $0x30] ss:$20 sps:$4 sm:$0xff] (!%p157_p3)   ;;  %306 = vperm.xlu1 (!%p157_p3), %1004, %v292_v44   ;;  %v291_v48 = vld [vmem:[%s1225_s2 + $0x8] sm:$0xff] (!%p157_p3)  ;;  %v293_v49 = vld [vmem:[%s1225_s2 + $0x18] sm:$0xff] (!%p157_p3) }
   0xb   : > { %v1056_v53 = vld [vmem:[%s1224_s1 + $0x38] ss:$20 sps:$4 sm:$0xff] (!%p157_p3)  }
   0xe   : > { %s1232_s12 = smov (!%p186_p4, %s1071_s12), 1  ;;  %301 = vperm.xlu0 %1003, %v291_v48   ;;  %311 = vperm.xlu1 %1004, %v293_v49  }
   0xf   : > { %s977_s20 = smul.u32 300, %s1232_s12 }
  0x11   : > { %s1132_s23 = scalar_lea.vmem %s1223_s0, %s977_s20 }
  0x12   : > { %v1005_v3 = vld [vmem:[%s1132_s23 + $0x40] sm:$0xff]   ;;  %v1009_v7 = vld [vmem:[%s1132_s23 + $0x48] sm:$0xff]   ;;  %v1013_v11 = vld [vmem:[%s1132_s23 + $0x50] sm:$0xff]  }
  0x13   : > { %v1006_v4 = vld [vmem:[%s1132_s23] sm:$0xff]   ;;  %896 = vmatprep.subr.bf16.mxu0 %v1005_v3  ;;  %v1010_v8 = vld [vmem:[%s1132_s23 + $0x8] sm:$0xff]   ;;  %v1014_v12 = vld [vmem:[%s1132_s23 + $0x10] sm:$0xff]  }
  0x14   : > { %v1007_v5 = vld [vmem:[%s1132_s23 + $0xc0] sm:$0xff]   ;;  %897 = vmatpush3.bf16.msra.mxu0 %v1006_v4  ;;  %v1011_v9 = vld [vmem:[%s1132_s23 + $0xc8] sm:$0xff]   ;;  %v1015_v13 = vld [vmem:[%s1132_s23 + $0xd0] sm:$0xff]  }
  0x15   : > { %v1008_v6 = vld [vmem:[%s1132_s23 + $0x80] sm:$0xff]   ;;  %924 = vmatprep.subr.bf16.mxu1 %v1007_v5  ;;  %898 = vmatprep.subr.bf16.mxu0 %v1009_v7  ;;  %v1012_v10 = vld [vmem:[%s1132_s23 + $0x88] sm:$0xff]   ;;  %v1016_v14 = vld [vmem:[%s1132_s23 + $0x90] sm:$0xff]  }
  0x16   : > { %925 = vmatpush3.bf16.msra.mxu1 %v1008_v6  ;;  %v1017_v15 = vld [vmem:[%s1132_s23 + $0x58] sm:$0xff]   ;;  %v1021_v19 = vld [vmem:[%s1132_s23 + $0x60] sm:$0xff]   ;;  %v1025_v23 = vld [vmem:[%s1132_s23 + $0x68] sm:$0xff]  }
  0x17   : > { %926 = vmatprep.subr.bf16.mxu1 %v1011_v9  ;;  %v1018_v16 = vld [vmem:[%s1132_s23 + $0x18] sm:$0xff]   ;;  %v1022_v20 = vld [vmem:[%s1132_s23 + $0x20] sm:$0xff]   ;;  %v1026_v24 = vld [vmem:[%s1132_s23 + $0x28] sm:$0xff]  }
  0x18   : > { %899 = vmatpush3.bf16.msra.mxu0 %v1010_v8  ;;  %v1019_v17 = vld [vmem:[%s1132_s23 + $0xd8] sm:$0xff]   ;;  %v1023_v21 = vld [vmem:[%s1132_s23 + $0xe0] sm:$0xff]   ;;  %v1027_v25 = vld [vmem:[%s1132_s23 + $0xe8] sm:$0xff]  }
  0x19   : > { %900 = vmatprep.subr.bf16.mxu0 %v1013_v11  ;;  %v1020_v18 = vld [vmem:[%s1132_s23 + $0x98] sm:$0xff]   ;;  %v1024_v22 = vld [vmem:[%s1132_s23 + $0xa0] sm:$0xff]   ;;  %v1028_v26 = vld [vmem:[%s1132_s23 + $0xa8] sm:$0xff]  }
  0x1a   : > { %927 = vmatpush3.bf16.msra.mxu1 %v1012_v10  ;;  %v1029_v27 = vld [vmem:[%s1132_s23 + $0x70] sm:$0xff]   ;;  %v1033_v31 = vld [vmem:[%s1132_s23 + $0x78] sm:$0xff]   ;;  %v1040_v39 = vld [vmem:[%s1132_s23 + $0x100] sm:$0xff]  }
  0x1b   : > { %928 = vmatprep.subr.bf16.mxu1 %v1015_v13  ;;  %v1030_v28 = vld [vmem:[%s1132_s23 + $0x30] sm:$0xff]   ;;  %v1034_v33 = vld [vmem:[%s1132_s23 + $0x38] sm:$0xff]   ;;  %v1044_v40 = vld [vmem:[%s1132_s23 + $0x108] sm:$0xff]  }
  0x1c   : > { %901 = vmatpush3.bf16.msra.mxu0 %v1014_v12  ;;  %v1031_v29 = vld [vmem:[%s1132_s23 + $0xf0] sm:$0xff]   ;;  %v1035_v35 = vld [vmem:[%s1132_s23 + $0xf8] sm:$0xff]   ;;  %v1053_v50 = vld [vmem:[%s1132_s23 + $0x120] sm:$0xff]  }
  0x1d   : > { %902 = vmatprep.subr.bf16.mxu0 %v1017_v15  ;;  %v1032_v30 = vld [vmem:[%s1132_s23 + $0xb0] sm:$0xff]   ;;  %v1039_v37 = vld [vmem:[%s1132_s23 + $0xb8] sm:$0xff]   ;;  %v1054_v51 = vld [vmem:[%s1132_s23 + $0x128] ss:$0 sps:$4 sm:$0xff]  }
  0x1e   : > { %929 = vmatpush3.bf16.msra.mxu1 %v1016_v14  ;;  %v1045_v41 = vld [vmem:[%s1132_s23 + $0x110] sm:$0xff]   ;;  %v1048_v46 = vld [vmem:[%s1132_s23 + $0x118] sm:$0xff]   ;;  %v598_v52 = vsel %vm596_vm1, %v1054_v51, 0  ;;  %s895_s23 = sshll.u32 %s1232_s12, 5 }
  0x1f   : > { %930 = vmatprep.subr.bf16.mxu1 %v1019_v17  ;;  %s201_s28 = scalar_lea.vmem %s1226_s3, %s895_s23 }
  0x20   : > { %903 = vmatpush3.bf16.msra.mxu0 %v1018_v16 }
  0x21   : > { %904 = vmatprep.subr.bf16.mxu0 %v1021_v19 }
  0x22   : > { %931 = vmatpush3.bf16.msra.mxu1 %v1020_v18 }
  0x23   : > { %932 = vmatprep.subr.bf16.mxu1 %v1023_v21 }
  0x24   : > { %905 = vmatpush3.bf16.msra.mxu0 %v1022_v20 }
  0x25   : > { %906 = vmatprep.subr.bf16.mxu0 %v1025_v23 }
  0x26   : > { %933 = vmatpush3.bf16.msra.mxu1 %v1024_v22 }
  0x27   : > { %934 = vmatprep.subr.bf16.mxu1 %v1027_v25 }
  0x28   : > { %907 = vmatpush3.bf16.msra.mxu0 %v1026_v24 }
  0x29   : > { %908 = vmatprep.subr.bf16.mxu0 %v1029_v27 }
  0x2a   : > { %935 = vmatpush3.bf16.msra.mxu1 %v1028_v26 }
  0x2b   : > { %936 = vmatprep.subr.bf16.mxu1 %v1031_v29 }
  0x2c   : > { %909 = vmatpush3.bf16.msra.mxu0 %v1030_v28 }
  0x2d   : > { %910 = vmatprep.subr.bf16.mxu0 %v1033_v31 }
  0x2e   : > { %937 = vmatpush3.bf16.msra.mxu1 %v1032_v30 }
  0x2f   : > { %938 = vmatprep.subr.bf16.mxu1 %v1035_v35 }
  0x30   : > { %911 = vmatpush3.bf16.msra.mxu0 %v1034_v33 }
  0x31   : > { %960 = vmatprep.subr.bf16.mxu0 %v1040_v39 }
  0x32   : > { %939 = vmatpush3.bf16.msra.mxu1 %v1039_v37 }
  0x33   : > { %633 = vmatmul.mubr.bf16.vlgmr.msra.gmra.mrb[0].mxu0 %v1036_v32 }
  0x34   : > { %961 = vmatpush3.bf16.msra.mxu0 %v1040_v39  ;;  %640 = vmatprep.mubr.bf16.mxu0 %v1046_v34 }
  0x35   : > { %682 = vmatmul.mubr.bf16.vlgmr.msra.gmra.mrb[0].mxu1 %v1041_v36  ;;  %962 = vmatprep.subr.bf16.mxu0 %v1044_v40 }
  0x36   : > { %689 = vmatprep.mubr.bf16.mxu1 %v1050_v38 }
  0x38   : > { %963 = vmatpush3.bf16.msra.mxu0 %v1044_v40 }
  0x39   : > { %964 = vmatprep.subr.bf16.mxu0 %v1045_v41 }
  0x3b   : > { %641 = vmatmul.mubr.bf16.gmra.mrb[4].mxu0 %v1049_v42 }
  0x3c   : > { %965 = vmatpush3.bf16.msra.mxu0 %v1045_v41  ;;  %972 = vmatprep.mubr.msk.bf16.mxu0 %vm589_vm0, %v1055_v45 }
  0x3d   : > { %966 = vmatprep.subr.bf16.mxu0 %v1048_v46  ;;  %690 = vmatmul.mubr.bf16.gmra.mrb[4].mxu1 %v1052_v47 }
  0x40   : > { %967 = vmatpush3.bf16.msra.mxu0 %v1048_v46 }
  0x41   : > { %968 = vmatprep.subr.bf16.mxu0 %v1053_v50 }
  0x44   : > { %969 = vmatpush3.bf16.msra.mxu0 %v1053_v50 }
  0x45   : > { %976 = vmatprep.subr.msk.bf16.mxu0 %vm596_vm1, %v1054_v51 }
  0x48   : > { %971 = vmatpush3.bf16.msra.mxu0 %v598_v52 }
  0x4b   : > { %973 = vmatmul.mubr.msk.bf16.vlgmr.msra.gmra.mrb[8].mxu0 %vm589_vm0, %v1056_v53 }
  0x89   : > { %v297_v54 = vpop.permute.xlu0 %296  ;;  %v307_v56 = vpop.permute.xlu1 %306 }
  0x8d   : > { %v302_v58 = vpop.permute.xlu0 %301  ;;  %v312_v11 = vpop.permute.xlu1 %311 }
 0x106   : > { %v912_v55 = vpop.f32.mrb[0].mxu0 }
 0x107   : > { %v913_v57 = vpop.f32.mrb[1].mxu0 }
 0x108   : > { %v914_v59 = vadd.f32 %v913_v57, %v912_v55  ;;  %v915_v60 = vpop.f32.mrb[2].mxu0  ;;  %v940_v61 = vpop.f32.mrb[0].mxu1 }
 0x109   : > { %v916_v62 = vpop.f32.mrb[3].mxu0  ;;  %v941_v63 = vpop.f32.mrb[1].mxu1 }
 0x10a   : > { %v635_v0 = vadd.f32 %v914_v59, %v297_v54  ;;  %v917_v1 = vadd.f32 %v916_v62, %v915_v60  ;;  %v942_v2 = vadd.f32 %v941_v63, %v940_v61  ;;  %v943_v3 = vpop.f32.mrb[2].mxu1 }
 0x10b   : > { %v944_v4 = vpop.f32.mrb[3].mxu1 }
 0x10c   : > { %v638_v5 = vadd.f32 %v917_v1, %v302_v58  ;;  %v945_v6 = vadd.f32 %v944_v4, %v943_v3  ;;  %v684_v7 = vadd.f32 %v942_v2, %v635_v0 }
 0x10e   : > { %v918_v8 = vpop.f32.mrb[4].mxu0  ;;  %v687_v9 = vadd.f32 %v945_v6, %v638_v5 }
 0x10f   : > { %v919_v10 = vpop.f32.mrb[5].mxu0 }
 0x110   : > { %v920_v12 = vadd.f32 %v919_v10, %v918_v8  ;;  %v921_v13 = vpop.f32.mrb[6].mxu0  ;;  %v946_v14 = vpop.f32.mrb[4].mxu1 }
 0x111   : > { %v922_v15 = vpop.f32.mrb[7].mxu0  ;;  %v947_v16 = vpop.f32.mrb[5].mxu1 }
 0x112   : > { %v643_v17 = vadd.f32 %v920_v12, %v307_v56  ;;  %v923_v18 = vadd.f32 %v922_v15, %v921_v13  ;;  %v948_v19 = vadd.f32 %v947_v16, %v946_v14  ;;  %v949_v20 = vpop.f32.mrb[6].mxu1 }
 0x113   : > { %v950_v21 = vpop.f32.mrb[7].mxu1 }
 0x114   : > { %v646_v22 = vadd.f32 %v923_v18, %v312_v11  ;;  %v951_v23 = vadd.f32 %v950_v21, %v949_v20  ;;  %v692_v24 = vadd.f32 %v948_v19, %v643_v17 }
 0x116   : > { %v695_v25 = vadd.f32 %v951_v23, %v646_v22 }
 0x11e   : > { %v974_v26 = vpop.f32.mrb[8].mxu0 }
 0x11f   : > { %v741_v27 = vadd.f32 %v974_v26, %v692_v24  ;;  %v732_v28 = vpop.f32.mrb[9].mxu0 }
 0x120   : > { %v733_v29 = vadd.f32 %v732_v28, %v684_v7  ;;  %v975_v30 = vpop.f32.mrb[10].mxu0 }
 0x121   : > { %750 = vst.msk [vmem:[%s201_s28 + $0x10] sm:$0xff] %vm747_vm2, %v741_v27  ;;  %v744_v31 = vadd.f32 %v975_v30, %v695_v25  ;;  %v735_v32 = vpop.f32.mrb[11].mxu0 }
 0x122   : > { %748 = vst.msk [vmem:[%s201_s28] sm:$0xff] %vm747_vm2, %v733_v29  ;;  %v736_v33 = vadd.f32 %v735_v32, %v687_v9 }
 0x123   : > { %751 = vst.msk [vmem:[%s201_s28 + $0x18] sm:$0xff] %vm747_vm2, %v744_v31 }
 0x124   : > { %749 = vst.msk [vmem:[%s201_s28 + $0x8] sm:$0xff] %vm747_vm2, %v736_v33 }
 0x125 PF: > { %s13_s14 = sadd.s32 1, %s1079_s14   ;;  %s1227_s12 = smov %s1075_s13 }
 0x126   : > { %p10_p5 = scmp.ge.s32.totalorder %s13_s14, 4   ;;  %s1228_s13 = smov %s1230_s15 }
 0x128   :  { %12 = sbr.rel (!%p10_p5) target bundleno = 2 (0x2), region = 62 }

</bundles_post_ra>
